<compile_context>
chip_gen: v5e
topology: v5e:2x2
jax: 0.10.0
libtpu: 0.0.40
codegen_flags: <defaults>
</compile_context>

<pallas_src>
import math

import jax
import jax.numpy as jnp
from jax.experimental import pallas as pl
from jax.experimental.pallas import tpu as pltpu

# ---- model hyper-parameters (small shapes consistent with the module) ----
N_LAYERS = 2                 # Encoder depth N
H = 4                        # attention heads
D_MODEL = 32                 # layer.size / d_model
D_K = D_MODEL // H           # per-head width
D_FF = 128                   # position-wise FFN hidden width (4*d_model), lane-dense
D_PAD = 128                  # lane padding for (.., d_model) activations / outputs
LN_EPS = 1e-6
NEG_INF = -1e9               # matches masked_fill value in the reference attention


def encoder_kernel(x_ref, bias_ref, wqkv_ref, bqkv_ref, wo_ref, bo_ref,
                   lna_ref, lnb_ref, w1_ref, b1_ref, w2_ref, b2_ref, out_ref):
    """One grid step == one batch element; the whole N-layer Encoder is fused."""
    S = x_ref.shape[1]
    x = x_ref[0]                         # (S, 128); lanes >= D_MODEL are zero
    mask_bias = bias_ref[0]              # (S, S) additive f32 bias (0 / -1e9)

    # Lane mask so LayerNorm statistics only see the real D_MODEL features.
    lane = jax.lax.broadcasted_iota(jnp.int32, (1, D_PAD), 1)
    lane_mask = (lane < D_MODEL).astype(jnp.float32)

    def layer_norm(t, idx):
        # Matches the PyTorch LayerNorm: unbiased std (ddof=1), eps added to var.
        mean = jnp.sum(t, axis=-1, keepdims=True) * (1.0 / D_MODEL)
        c = (t - mean) * lane_mask
        var = jnp.sum(c * c, axis=-1, keepdims=True) * (1.0 / (D_MODEL - 1))
        return lna_ref[idx] * (c * jax.lax.rsqrt(var + LN_EPS)) + lnb_ref[idx]

    scale = 1.0 / math.sqrt(D_K)

    for l in range(N_LAYERS):            # static unroll over N tiny layers
        # -------- self-attention sublayer: x = x + Attn(LN(x), mask) --------
        xn = layer_norm(x, 2 * l)
        # Head-batched fused QKV projection: the head split lives entirely in the
        # wrapper-side weight layout -> no lane slicing of activations in-kernel.
        xb = jnp.broadcast_to(xn[None], (3 * H, S, D_PAD))
        p = jnp.einsum("gsd,gdk->gsk", xb, wqkv_ref[l],
                       preferred_element_type=jnp.float32) + bqkv_ref[l]
        qh = p[0:H]                       # (H, S, D_K)  leading-axis slices (free)
        kh = p[H:2 * H]
        vh = p[2 * H:3 * H]

        sc = jnp.einsum("hqd,hkd->hqk", qh, kh,
                        preferred_element_type=jnp.float32) * scale
        sc = sc + mask_bias[None]         # additive mask, broadcast over heads
        sc = sc - jnp.max(sc, axis=-1, keepdims=True)
        e = jnp.exp(sc)
        p_attn = e / jnp.sum(e, axis=-1, keepdims=True)   # exact softmax denom
        # TODO(synk): nn.Dropout(p_attn) is identity in eval mode; not applied.

        ctx = jnp.einsum("hqk,hkd->hqd", p_attn, vh,
                         preferred_element_type=jnp.float32)            # (H, S, D_K)
        # Head-batched output projection; head reduction = leading-axis VPU adds
        # (no cross-lane concat relayout).
        outs = jnp.einsum("hqd,hdo->hqo", ctx, wo_ref[l],
                          preferred_element_type=jnp.float32)           # (H, S, 128)
        x = x + (jnp.sum(outs, axis=0) + bo_ref[l])

        # -------- position-wise FFN sublayer: x = x + FFN(LN(x)) --------
        xn = layer_norm(x, 2 * l + 1)
        h1 = jnp.maximum(
            jnp.dot(xn, w1_ref[l], preferred_element_type=jnp.float32) + b1_ref[l],
            0.0)
        x = x + (jnp.dot(h1, w2_ref[l], preferred_element_type=jnp.float32)
                 + b2_ref[l])

    # Final Encoder LayerNorm; single lane-dense (S, 128) store.
    out_ref[0] = layer_norm(x, 2 * N_LAYERS).astype(out_ref.dtype)


def _head_split_T(w):
    # torch-style (out, in) weight -> (H, D_MODEL, D_K) so that
    # einsum('sd,hdk->hsk', x, w_h) == split_heads(x @ w.T)
    return w.reshape(H, D_K, D_MODEL).transpose(0, 2, 1)


def _pack_params(params):
    """Wrapper-side layout plumbing: head-batched, lane-padded weight tensors."""
    pad_d = D_PAD - D_MODEL
    wqkv, bqkv, wo, bo, w1, b1, w2, b2 = [], [], [], [], [], [], [], []
    ln_a, ln_b = [], []

    for lp in params["layers"]:
        wh = jnp.concatenate([_head_split_T(lp["wq"]),
                              _head_split_T(lp["wk"]),
                              _head_split_T(lp["wv"])], axis=0)        # (3H, D, D_K)
        wqkv.append(jnp.pad(wh, ((0, 0), (0, pad_d), (0, 0))))         # (3H, 128, D_K)
        bqkv.append(jnp.concatenate([lp["bq"], lp["bk"], lp["bv"]])
                    .reshape(3 * H, 1, D_K))
        wo.append(jnp.pad(lp["wo"].T.reshape(H, D_K, D_MODEL),
                          ((0, 0), (0, 0), (0, pad_d))))               # (H, D_K, 128)
        bo.append(jnp.pad(lp["bo"], (0, pad_d)).reshape(1, D_PAD))
        w1.append(jnp.pad(lp["w1"].T, ((0, pad_d), (0, 0))))           # (128, D_FF)
        b1.append(lp["b1"].reshape(1, D_FF))
        w2.append(jnp.pad(lp["w2"].T, ((0, 0), (0, pad_d))))           # (D_FF, 128)
        b2.append(jnp.pad(lp["b2"], (0, pad_d)).reshape(1, D_PAD))
        ln_a += [lp["ln0_a"], lp["ln1_a"]]
        ln_b += [lp["ln0_b"], lp["ln1_b"]]

    ln_a.append(params["norm_a"])
    ln_b.append(params["norm_b"])
    ln_a = jnp.stack([jnp.pad(a, (0, pad_d)).reshape(1, D_PAD) for a in ln_a])
    ln_b = jnp.stack([jnp.pad(b, (0, pad_d)).reshape(1, D_PAD) for b in ln_b])

    return (jnp.stack(wqkv), jnp.stack(bqkv), jnp.stack(wo), jnp.stack(bo),
            ln_a, ln_b, jnp.stack(w1), jnp.stack(b1), jnp.stack(w2), jnp.stack(b2))


def encoder_forward(x, mask, params):
    """Encoder.forward(x, mask) in eval mode; x: (B, S, D_MODEL), mask: (B, S, S)."""
    B, S, D = x.shape
    assert D == D_MODEL and D_MODEL % H == 0
    wqkv, bqkv, wo, bo, ln_a, ln_b, w1, b1, w2, b2 = _pack_params(params)

    x_pad = jnp.pad(x, ((0, 0), (0, 0), (0, D_PAD - D)))               # (B, S, 128)
    if mask is None:
        mask_bias = jnp.zeros((B, S, S), jnp.float32)
    else:
        mask_bias = jnp.where(mask == 0, NEG_INF, 0.0).astype(jnp.float32)

    def full(a):   # whole-array block, constant index map (weights)
        return pl.BlockSpec(a.shape, lambda b, _nd=a.ndim: (0,) * _nd)

    out = pl.pallas_call(
        encoder_kernel,
        out_shape=jax.ShapeDtypeStruct((B, S, D_PAD), x.dtype),
        grid_spec=pltpu.PrefetchScalarGridSpec(
            num_scalar_prefetch=0,
            grid=(B,),                      # one batch element per step ("parallel"
            in_specs=[                      #  -> both v7x TensorCores busy)
                pl.BlockSpec((1, S, D_PAD), lambda b: (b, 0, 0)),      # x
                pl.BlockSpec((1, S, S), lambda b: (b, 0, 0)),          # mask bias
                full(wqkv), full(bqkv), full(wo), full(bo),
                full(ln_a), full(ln_b), full(w1), full(b1), full(w2), full(b2),
            ],
            out_specs=pl.BlockSpec((1, S, D_PAD), lambda b: (b, 0, 0)),
        ),
        compiler_params=pltpu.CompilerParams(
            dimension_semantics=("parallel",)),
    )(x_pad, mask_bias, wqkv, bqkv, wo, bo, ln_a, ln_b, w1, b1, w2, b2)

    return out[..., :D]                    # strip lane padding


# ------------------------- pure-JAX reference -------------------------
def reference_encoder(x, mask, params):
    B, S, D = x.shape

    def ln(t, a, b):
        mean = t.mean(-1, keepdims=True)
        std = jnp.std(t, axis=-1, keepdims=True, ddof=1)   # torch.std is unbiased
        return a * (t - mean) / jnp.sqrt(std ** 2 + LN_EPS) + b

    def lin(t, w, b):
        return t @ w.T + b

    def attn(xn, lp):
        q = lin(xn, lp["wq"], lp["bq"]).reshape(B, S, H, D_K).transpose(0, 2, 1, 3)
        k = lin(xn, lp["wk"], lp["bk"]).reshape(B, S, H, D_K).transpose(0, 2, 1, 3)
        v = lin(xn, lp["wv"], lp["bv"]).reshape(B, S, H, D_K).transpose(0, 2, 1, 3)
        sc = jnp.einsum("bhqd,bhkd->bhqk", q, k) / math.sqrt(D_K)
        if mask is not None:
            sc = jnp.where(mask[:, None] == 0, NEG_INF, sc)
        p = jax.nn.softmax(sc, axis=-1)
        ctx = jnp.einsum("bhqk,bhkd->bhqd", p, v).transpose(0, 2, 1, 3).reshape(B, S, D)
        return lin(ctx, lp["wo"], lp["bo"])

    for lp in params["layers"]:
        x = x + attn(ln(x, lp["ln0_a"], lp["ln0_b"]), lp)
        xn = ln(x, lp["ln1_a"], lp["ln1_b"])
        x = x + lin(jax.nn.relu(lin(xn, lp["w1"], lp["b1"])), lp["w2"], lp["b2"])
    return ln(x, params["norm_a"], params["norm_b"])


def init_params(key):
    """Deterministic torch-style init: Linear ~ U(-1/sqrt(fan_in), 1/sqrt(fan_in))."""
    def linear(k, out_f, in_f):
        kw, kb = jax.random.split(k)
        bound = 1.0 / math.sqrt(in_f)
        return (jax.random.uniform(kw, (out_f, in_f), jnp.float32, -bound, bound),
                jax.random.uniform(kb, (out_f,), jnp.float32, -bound, bound))

    keys = jax.random.split(key, N_LAYERS + 1)
    layers = []
    for l in range(N_LAYERS):
        ks = jax.random.split(keys[l], 10)
        wq, bq = linear(ks[0], D_MODEL, D_MODEL)
        wk, bk = linear(ks[1], D_MODEL, D_MODEL)
        wv, bv = linear(ks[2], D_MODEL, D_MODEL)
        wo, bo = linear(ks[3], D_MODEL, D_MODEL)
        w1, b1 = linear(ks[4], D_FF, D_MODEL)
        w2, b2 = linear(ks[5], D_MODEL, D_FF)
        layers.append(dict(
            wq=wq, bq=bq, wk=wk, bk=bk, wv=wv, bv=bv, wo=wo, bo=bo,
            w1=w1, b1=b1, w2=w2, b2=b2,
            ln0_a=1.0 + 0.1 * jax.random.normal(ks[6], (D_MODEL,), jnp.float32),
            ln0_b=0.1 * jax.random.normal(ks[7], (D_MODEL,), jnp.float32),
            ln1_a=1.0 + 0.1 * jax.random.normal(ks[8], (D_MODEL,), jnp.float32),
            ln1_b=0.1 * jax.random.normal(ks[9], (D_MODEL,), jnp.float32)))
    kf = jax.random.split(keys[-1], 2)
    return dict(layers=layers,
                norm_a=1.0 + 0.1 * jax.random.normal(kf[0], (D_MODEL,), jnp.float32),
                norm_b=0.1 * jax.random.normal(kf[1], (D_MODEL,), jnp.float32))


if __name__ == "__main__":
    jax.config.update("jax_default_matmul_precision", "highest")   # f32 reference dots
    B, S = 2, 8
    root = jax.random.PRNGKey(0)
    kx, kp = jax.random.split(root)

    x = jax.random.normal(kx, (B, S, D_MODEL), jnp.float32)
    mask = jnp.tril(jnp.ones((S, S), jnp.int32))[None].repeat(B, axis=0)  # causal
    params = init_params(kp)

    out = encoder_forward(x, mask, params)
    out = jax.block_until_ready(out)

    ref = reference_encoder(x, mask, params)
    assert out.shape == (B, S, D_MODEL)
    assert jnp.allclose(out, ref, atol=1e-4, rtol=1e-4), "mismatch vs reference"

    print("KERNEL_OK")
</pallas_src>

<mosaic_0001>
module attributes {stable_mosaic.version = 11 : i64} {
  func.func @encoder_kernel(%arg0: i32, %arg1: memref<1x8x128xf32, #tpu.memory_space<vmem>>, %arg2: memref<1x8x8xf32, #tpu.memory_space<vmem>>, %arg3: memref<2x12x128x8xf32, #tpu.memory_space<vmem>>, %arg4: memref<2x12x1x8xf32, #tpu.memory_space<vmem>>, %arg5: memref<2x4x8x128xf32, #tpu.memory_space<vmem>>, %arg6: memref<2x1x128xf32, #tpu.memory_space<vmem>>, %arg7: memref<5x1x128xf32, #tpu.memory_space<vmem>>, %arg8: memref<5x1x128xf32, #tpu.memory_space<vmem>>, %arg9: memref<2x128x128xf32, #tpu.memory_space<vmem>>, %arg10: memref<2x1x128xf32, #tpu.memory_space<vmem>>, %arg11: memref<2x128x128xf32, #tpu.memory_space<vmem>>, %arg12: memref<2x1x128xf32, #tpu.memory_space<vmem>>, %arg13: memref<1x8x128xf32, #tpu.memory_space<vmem>>) attributes {dimension_semantics = [#tpu.dimension_semantics<parallel>], iteration_bounds = array<i64: 2>, scalar_prefetch = 0 : i64, scratch_operands = 0 : i64, tpu.core_type = #tpu.core_type<tc>, window_params = [{transform_indices = @transform_0, window_bounds = array<i64: 1, 8, 128>}, {transform_indices = @transform_1, window_bounds = array<i64: 1, 8, 8>}, {pipeline_mode = #tpu.pipeline_mode<synchronous>, transform_indices = @transform_2, window_bounds = array<i64: 2, 12, 128, 8>}, {pipeline_mode = #tpu.pipeline_mode<synchronous>, transform_indices = @transform_3, window_bounds = array<i64: 2, 12, 1, 8>}, {pipeline_mode = #tpu.pipeline_mode<synchronous>, transform_indices = @transform_4, window_bounds = array<i64: 2, 4, 8, 128>}, {pipeline_mode = #tpu.pipeline_mode<synchronous>, transform_indices = @transform_5, window_bounds = array<i64: 2, 1, 128>}, {pipeline_mode = #tpu.pipeline_mode<synchronous>, transform_indices = @transform_6, window_bounds = array<i64: 5, 1, 128>}, {pipeline_mode = #tpu.pipeline_mode<synchronous>, transform_indices = @transform_7, window_bounds = array<i64: 5, 1, 128>}, {pipeline_mode = #tpu.pipeline_mode<synchronous>, transform_indices = @transform_8, window_bounds = array<i64: 2, 128, 128>}, {pipeline_mode = #tpu.pipeline_mode<synchronous>, transform_indices = @transform_9, window_bounds = array<i64: 2, 1, 128>}, {pipeline_mode = #tpu.pipeline_mode<synchronous>, transform_indices = @transform_10, window_bounds = array<i64: 2, 128, 128>}, {pipeline_mode = #tpu.pipeline_mode<synchronous>, transform_indices = @transform_11, window_bounds = array<i64: 2, 1, 128>}, {transform_indices = @transform_12, window_bounds = array<i64: 1, 8, 128>}]} {
    %c0 = arith.constant 0 : index
    %c0_0 = arith.constant 0 : index
    %c0_1 = arith.constant 0 : index
    %0 = vector.load %arg1[%c0, %c0_0, %c0_1] : memref<1x8x128xf32, #tpu.memory_space<vmem>>, vector<1x8x128xf32>
    %1 = vector.shape_cast %0 : vector<1x8x128xf32> to vector<8x128xf32>
    %c0_2 = arith.constant 0 : index
    %c0_3 = arith.constant 0 : index
    %c0_4 = arith.constant 0 : index
    %2 = vector.load %arg2[%c0_2, %c0_3, %c0_4] : memref<1x8x8xf32, #tpu.memory_space<vmem>>, vector<1x8x8xf32>
    %3 = vector.shape_cast %2 : vector<1x8x8xf32> to vector<8x8xf32>
    %4 = tpu.iota {dimensions = array<i32: 1>} : vector<1x128xi32>
    %c32_i32 = arith.constant 32 : i32
    %5 = vector.broadcast %c32_i32 : i32 to vector<1x128xi32>
    %6 = arith.cmpi slt, %4, %5 : vector<1x128xi32>
    %7 = arith.extui %6 : vector<1x128xi1> to vector<1x128xi32>
    %8 = arith.sitofp %7 : vector<1x128xi32> to vector<1x128xf32>
    %cst = arith.constant dense<0.000000e+00> : vector<8xf32>
    %9 = vector.multi_reduction <add>, %1, %cst [1] : vector<8x128xf32> to vector<8xf32>
    %10 = vector.shape_cast %9 : vector<8xf32> to vector<8x1xf32>
    %cst_5 = arith.constant 3.125000e-02 : f32
    %11 = vector.broadcast %cst_5 : f32 to vector<8x1xf32>
    %12 = arith.mulf %10, %11 : vector<8x1xf32>
    %13 = vector.broadcast %12 : vector<8x1xf32> to vector<8x128xf32>
    %14 = arith.subf %1, %13 : vector<8x128xf32>
    %15 = vector.broadcast %8 : vector<1x128xf32> to vector<8x128xf32>
    %16 = arith.mulf %14, %15 : vector<8x128xf32>
    %17 = arith.mulf %16, %16 : vector<8x128xf32>
    %cst_6 = arith.constant dense<0.000000e+00> : vector<8xf32>
    %18 = vector.multi_reduction <add>, %17, %cst_6 [1] : vector<8x128xf32> to vector<8xf32>
    %19 = vector.shape_cast %18 : vector<8xf32> to vector<8x1xf32>
    %cst_7 = arith.constant 0.0322580636 : f32
    %20 = vector.broadcast %cst_7 : f32 to vector<8x1xf32>
    %21 = arith.mulf %19, %20 : vector<8x1xf32>
    %c0_8 = arith.constant 0 : index
    %c0_9 = arith.constant 0 : index
    %c0_10 = arith.constant 0 : index
    %22 = vector.load %arg7[%c0_8, %c0_9, %c0_10] : memref<5x1x128xf32, #tpu.memory_space<vmem>>, vector<1x1x128xf32>
    %23 = vector.shape_cast %22 : vector<1x1x128xf32> to vector<1x128xf32>
    %cst_11 = arith.constant 9.99999997E-7 : f32
    %24 = vector.broadcast %cst_11 : f32 to vector<8x1xf32>
    %25 = arith.addf %21, %24 : vector<8x1xf32>
    %26 = math.rsqrt %25 : vector<8x1xf32>
    %27 = vector.broadcast %26 : vector<8x1xf32> to vector<8x128xf32>
    %28 = arith.mulf %16, %27 : vector<8x128xf32>
    %29 = vector.broadcast %23 : vector<1x128xf32> to vector<8x128xf32>
    %30 = arith.mulf %29, %28 : vector<8x128xf32>
    %c0_12 = arith.constant 0 : index
    %c0_13 = arith.constant 0 : index
    %c0_14 = arith.constant 0 : index
    %31 = vector.load %arg8[%c0_12, %c0_13, %c0_14] : memref<5x1x128xf32, #tpu.memory_space<vmem>>, vector<1x1x128xf32>
    %32 = vector.shape_cast %31 : vector<1x1x128xf32> to vector<1x128xf32>
    %33 = vector.broadcast %32 : vector<1x128xf32> to vector<8x128xf32>
    %34 = arith.addf %30, %33 : vector<8x128xf32>
    %35 = vector.shape_cast %34 : vector<8x128xf32> to vector<1x8x128xf32>
    %36 = vector.shape_cast %35 : vector<1x8x128xf32> to vector<1x8x128xf32>
    %37 = vector.broadcast %36 : vector<1x8x128xf32> to vector<12x8x128xf32>
    %c0_15 = arith.constant 0 : index
    %c0_16 = arith.constant 0 : index
    %c0_17 = arith.constant 0 : index
    %c0_18 = arith.constant 0 : index
    %38 = vector.load %arg3[%c0_15, %c0_16, %c0_17, %c0_18] : memref<2x12x128x8xf32, #tpu.memory_space<vmem>>, vector<1x12x128x8xf32>
    %39 = vector.shape_cast %38 : vector<1x12x128x8xf32> to vector<12x128x8xf32>
    "tpu.trace_start"() <{level = 10 : i32, message = "gsd,gdk->gsk"}> : () -> ()
    %cst_19 = arith.constant dense<0.000000e+00> : vector<12x8x8xf32>
    %40 = tpu.matmul %37, %39, %cst_19 {dimension_numbers = #tpu.dot_dimension_numbers<[2], [1], [1], [2], [0, 0, 0, 1, 1, 2], [0], [0]>, precision = #tpu.contract_precision<fp32>} : vector<12x8x128xf32>, vector<12x128x8xf32>, vector<12x8x8xf32> -> vector<12x8x8xf32>
    "tpu.trace_stop"() : () -> ()
    %c0_20 = arith.constant 0 : index
    %c0_21 = arith.constant 0 : index
    %c0_22 = arith.constant 0 : index
    %c0_23 = arith.constant 0 : index
    %41 = vector.load %arg4[%c0_20, %c0_21, %c0_22, %c0_23] : memref<2x12x1x8xf32, #tpu.memory_space<vmem>>, vector<1x12x1x8xf32>
    %42 = vector.shape_cast %41 : vector<1x12x1x8xf32> to vector<12x1x8xf32>
    %43 = vector.broadcast %42 : vector<12x1x8xf32> to vector<12x8x8xf32>
    %44 = arith.addf %40, %43 : vector<12x8x8xf32>
    %45 = vector.extract_strided_slice %44 {offsets = [0, 0, 0], sizes = [4, 8, 8], strides = [1, 1, 1]} : vector<12x8x8xf32> to vector<4x8x8xf32>
    %46 = vector.extract_strided_slice %44 {offsets = [4, 0, 0], sizes = [4, 8, 8], strides = [1, 1, 1]} : vector<12x8x8xf32> to vector<4x8x8xf32>
    %47 = vector.extract_strided_slice %44 {offsets = [8, 0, 0], sizes = [4, 8, 8], strides = [1, 1, 1]} : vector<12x8x8xf32> to vector<4x8x8xf32>
    "tpu.trace_start"() <{level = 10 : i32, message = "hqd,hkd->hqk"}> : () -> ()
    %cst_24 = arith.constant dense<0.000000e+00> : vector<4x8x8xf32>
    %48 = tpu.matmul %45, %46, %cst_24 {dimension_numbers = #tpu.dot_dimension_numbers<[2], [2], [1], [1], [0, 0, 0, 1, 1, 1], [0], [0]>, precision = #tpu.contract_precision<fp32>} : vector<4x8x8xf32>, vector<4x8x8xf32>, vector<4x8x8xf32> -> vector<4x8x8xf32>
    "tpu.trace_stop"() : () -> ()
    %cst_25 = arith.constant 0.353553385 : f32
    %49 = vector.broadcast %cst_25 : f32 to vector<4x8x8xf32>
    %50 = arith.mulf %48, %49 : vector<4x8x8xf32>
    %51 = vector.shape_cast %3 : vector<8x8xf32> to vector<1x8x8xf32>
    %52 = vector.broadcast %51 : vector<1x8x8xf32> to vector<4x8x8xf32>
    %53 = arith.addf %50, %52 : vector<4x8x8xf32>
    %cst_26 = arith.constant dense<0xFF800000> : vector<4x8xf32>
    %54 = vector.multi_reduction <maximumf>, %53, %cst_26 [2] : vector<4x8x8xf32> to vector<4x8xf32>
    %55 = vector.shape_cast %54 : vector<4x8xf32> to vector<4x8x1xf32>
    %56 = vector.broadcast %55 : vector<4x8x1xf32> to vector<4x8x8xf32>
    %57 = arith.subf %53, %56 : vector<4x8x8xf32>
    %58 = math.exp %57 : vector<4x8x8xf32>
    %cst_27 = arith.constant dense<0.000000e+00> : vector<4x8xf32>
    %59 = vector.multi_reduction <add>, %58, %cst_27 [2] : vector<4x8x8xf32> to vector<4x8xf32>
    %60 = vector.shape_cast %59 : vector<4x8xf32> to vector<4x8x1xf32>
    %61 = vector.broadcast %60 : vector<4x8x1xf32> to vector<4x8x8xf32>
    %62 = arith.divf %58, %61 : vector<4x8x8xf32>
    "tpu.trace_start"() <{level = 10 : i32, message = "hqk,hkd->hqd"}> : () -> ()
    %cst_28 = arith.constant dense<0.000000e+00> : vector<4x8x8xf32>
    %63 = tpu.matmul %62, %47, %cst_28 {dimension_numbers = #tpu.dot_dimension_numbers<[2], [1], [1], [2], [0, 0, 0, 1, 1, 2], [0], [0]>, precision = #tpu.contract_precision<fp32>} : vector<4x8x8xf32>, vector<4x8x8xf32>, vector<4x8x8xf32> -> vector<4x8x8xf32>
    "tpu.trace_stop"() : () -> ()
    %c0_29 = arith.constant 0 : index
    %c0_30 = arith.constant 0 : index
    %c0_31 = arith.constant 0 : index
    %c0_32 = arith.constant 0 : index
    %64 = vector.load %arg5[%c0_29, %c0_30, %c0_31, %c0_32] : memref<2x4x8x128xf32, #tpu.memory_space<vmem>>, vector<1x4x8x128xf32>
    %65 = vector.shape_cast %64 : vector<1x4x8x128xf32> to vector<4x8x128xf32>
    "tpu.trace_start"() <{level = 10 : i32, message = "hqd,hdo->hqo"}> : () -> ()
    %cst_33 = arith.constant dense<0.000000e+00> : vector<4x8x128xf32>
    %66 = tpu.matmul %63, %65, %cst_33 {dimension_numbers = #tpu.dot_dimension_numbers<[2], [1], [1], [2], [0, 0, 0, 1, 1, 2], [0], [0]>, precision = #tpu.contract_precision<fp32>} : vector<4x8x8xf32>, vector<4x8x128xf32>, vector<4x8x128xf32> -> vector<4x8x128xf32>
    "tpu.trace_stop"() : () -> ()
    %cst_34 = arith.constant dense<0.000000e+00> : vector<8x128xf32>
    %67 = vector.multi_reduction <add>, %66, %cst_34 [0] : vector<4x8x128xf32> to vector<8x128xf32>
    %c0_35 = arith.constant 0 : index
    %c0_36 = arith.constant 0 : index
    %c0_37 = arith.constant 0 : index
    %68 = vector.load %arg6[%c0_35, %c0_36, %c0_37] : memref<2x1x128xf32, #tpu.memory_space<vmem>>, vector<1x1x128xf32>
    %69 = vector.shape_cast %68 : vector<1x1x128xf32> to vector<1x128xf32>
    %70 = vector.broadcast %69 : vector<1x128xf32> to vector<8x128xf32>
    %71 = arith.addf %67, %70 : vector<8x128xf32>
    %72 = arith.addf %1, %71 : vector<8x128xf32>
    %cst_38 = arith.constant dense<0.000000e+00> : vector<8xf32>
    %73 = vector.multi_reduction <add>, %72, %cst_38 [1] : vector<8x128xf32> to vector<8xf32>
    %74 = vector.shape_cast %73 : vector<8xf32> to vector<8x1xf32>
    %cst_39 = arith.constant 3.125000e-02 : f32
    %75 = vector.broadcast %cst_39 : f32 to vector<8x1xf32>
    %76 = arith.mulf %74, %75 : vector<8x1xf32>
    %77 = vector.broadcast %76 : vector<8x1xf32> to vector<8x128xf32>
    %78 = arith.subf %72, %77 : vector<8x128xf32>
    %79 = vector.broadcast %8 : vector<1x128xf32> to vector<8x128xf32>
    %80 = arith.mulf %78, %79 : vector<8x128xf32>
    %81 = arith.mulf %80, %80 : vector<8x128xf32>
    %cst_40 = arith.constant dense<0.000000e+00> : vector<8xf32>
    %82 = vector.multi_reduction <add>, %81, %cst_40 [1] : vector<8x128xf32> to vector<8xf32>
    %83 = vector.shape_cast %82 : vector<8xf32> to vector<8x1xf32>
    %cst_41 = arith.constant 0.0322580636 : f32
    %84 = vector.broadcast %cst_41 : f32 to vector<8x1xf32>
    %85 = arith.mulf %83, %84 : vector<8x1xf32>
    %c1 = arith.constant 1 : index
    %c0_42 = arith.constant 0 : index
    %c0_43 = arith.constant 0 : index
    %86 = vector.load %arg7[%c1, %c0_42, %c0_43] : memref<5x1x128xf32, #tpu.memory_space<vmem>>, vector<1x1x128xf32>
    %87 = vector.shape_cast %86 : vector<1x1x128xf32> to vector<1x128xf32>
    %cst_44 = arith.constant 9.99999997E-7 : f32
    %88 = vector.broadcast %cst_44 : f32 to vector<8x1xf32>
    %89 = arith.addf %85, %88 : vector<8x1xf32>
    %90 = math.rsqrt %89 : vector<8x1xf32>
    %91 = vector.broadcast %90 : vector<8x1xf32> to vector<8x128xf32>
    %92 = arith.mulf %80, %91 : vector<8x128xf32>
    %93 = vector.broadcast %87 : vector<1x128xf32> to vector<8x128xf32>
    %94 = arith.mulf %93, %92 : vector<8x128xf32>
    %c1_45 = arith.constant 1 : index
    %c0_46 = arith.constant 0 : index
    %c0_47 = arith.constant 0 : index
    %95 = vector.load %arg8[%c1_45, %c0_46, %c0_47] : memref<5x1x128xf32, #tpu.memory_space<vmem>>, vector<1x1x128xf32>
    %96 = vector.shape_cast %95 : vector<1x1x128xf32> to vector<1x128xf32>
    %97 = vector.broadcast %96 : vector<1x128xf32> to vector<8x128xf32>
    %98 = arith.addf %94, %97 : vector<8x128xf32>
    %c0_48 = arith.constant 0 : index
    %c0_49 = arith.constant 0 : index
    %c0_50 = arith.constant 0 : index
    %99 = vector.load %arg9[%c0_48, %c0_49, %c0_50] : memref<2x128x128xf32, #tpu.memory_space<vmem>>, vector<1x128x128xf32>
    %100 = vector.shape_cast %99 : vector<1x128x128xf32> to vector<128x128xf32>
    %cst_51 = arith.constant dense<0.000000e+00> : vector<8x128xf32>
    %101 = tpu.matmul %98, %100, %cst_51 {dimension_numbers = #tpu.dot_dimension_numbers<[1], [0], [0], [1], [0, 0, 1, 1], [], []>, precision = #tpu.contract_precision<fp32>} : vector<8x128xf32>, vector<128x128xf32>, vector<8x128xf32> -> vector<8x128xf32>
    %c0_52 = arith.constant 0 : index
    %c0_53 = arith.constant 0 : index
    %c0_54 = arith.constant 0 : index
    %102 = vector.load %arg10[%c0_52, %c0_53, %c0_54] : memref<2x1x128xf32, #tpu.memory_space<vmem>>, vector<1x1x128xf32>
    %103 = vector.shape_cast %102 : vector<1x1x128xf32> to vector<1x128xf32>
    %104 = vector.broadcast %103 : vector<1x128xf32> to vector<8x128xf32>
    %105 = arith.addf %101, %104 : vector<8x128xf32>
    %cst_55 = arith.constant 0.000000e+00 : f32
    %106 = vector.broadcast %cst_55 : f32 to vector<8x128xf32>
    %107 = arith.maximumf %105, %106 : vector<8x128xf32>
    %c0_56 = arith.constant 0 : index
    %c0_57 = arith.constant 0 : index
    %c0_58 = arith.constant 0 : index
    %108 = vector.load %arg11[%c0_56, %c0_57, %c0_58] : memref<2x128x128xf32, #tpu.memory_space<vmem>>, vector<1x128x128xf32>
    %109 = vector.shape_cast %108 : vector<1x128x128xf32> to vector<128x128xf32>
    %cst_59 = arith.constant dense<0.000000e+00> : vector<8x128xf32>
    %110 = tpu.matmul %107, %109, %cst_59 {dimension_numbers = #tpu.dot_dimension_numbers<[1], [0], [0], [1], [0, 0, 1, 1], [], []>, precision = #tpu.contract_precision<fp32>} : vector<8x128xf32>, vector<128x128xf32>, vector<8x128xf32> -> vector<8x128xf32>
    %c0_60 = arith.constant 0 : index
    %c0_61 = arith.constant 0 : index
    %c0_62 = arith.constant 0 : index
    %111 = vector.load %arg12[%c0_60, %c0_61, %c0_62] : memref<2x1x128xf32, #tpu.memory_space<vmem>>, vector<1x1x128xf32>
    %112 = vector.shape_cast %111 : vector<1x1x128xf32> to vector<1x128xf32>
    %113 = vector.broadcast %112 : vector<1x128xf32> to vector<8x128xf32>
    %114 = arith.addf %110, %113 : vector<8x128xf32>
    %115 = arith.addf %72, %114 : vector<8x128xf32>
    %cst_63 = arith.constant dense<0.000000e+00> : vector<8xf32>
    %116 = vector.multi_reduction <add>, %115, %cst_63 [1] : vector<8x128xf32> to vector<8xf32>
    %117 = vector.shape_cast %116 : vector<8xf32> to vector<8x1xf32>
    %cst_64 = arith.constant 3.125000e-02 : f32
    %118 = vector.broadcast %cst_64 : f32 to vector<8x1xf32>
    %119 = arith.mulf %117, %118 : vector<8x1xf32>
    %120 = vector.broadcast %119 : vector<8x1xf32> to vector<8x128xf32>
    %121 = arith.subf %115, %120 : vector<8x128xf32>
    %122 = vector.broadcast %8 : vector<1x128xf32> to vector<8x128xf32>
    %123 = arith.mulf %121, %122 : vector<8x128xf32>
    %124 = arith.mulf %123, %123 : vector<8x128xf32>
    %cst_65 = arith.constant dense<0.000000e+00> : vector<8xf32>
    %125 = vector.multi_reduction <add>, %124, %cst_65 [1] : vector<8x128xf32> to vector<8xf32>
    %126 = vector.shape_cast %125 : vector<8xf32> to vector<8x1xf32>
    %cst_66 = arith.constant 0.0322580636 : f32
    %127 = vector.broadcast %cst_66 : f32 to vector<8x1xf32>
    %128 = arith.mulf %126, %127 : vector<8x1xf32>
    %c2 = arith.constant 2 : index
    %c0_67 = arith.constant 0 : index
    %c0_68 = arith.constant 0 : index
    %129 = vector.load %arg7[%c2, %c0_67, %c0_68] : memref<5x1x128xf32, #tpu.memory_space<vmem>>, vector<1x1x128xf32>
    %130 = vector.shape_cast %129 : vector<1x1x128xf32> to vector<1x128xf32>
    %cst_69 = arith.constant 9.99999997E-7 : f32
    %131 = vector.broadcast %cst_69 : f32 to vector<8x1xf32>
    %132 = arith.addf %128, %131 : vector<8x1xf32>
    %133 = math.rsqrt %132 : vector<8x1xf32>
    %134 = vector.broadcast %133 : vector<8x1xf32> to vector<8x128xf32>
    %135 = arith.mulf %123, %134 : vector<8x128xf32>
    %136 = vector.broadcast %130 : vector<1x128xf32> to vector<8x128xf32>
    %137 = arith.mulf %136, %135 : vector<8x128xf32>
    %c2_70 = arith.constant 2 : index
    %c0_71 = arith.constant 0 : index
    %c0_72 = arith.constant 0 : index
    %138 = vector.load %arg8[%c2_70, %c0_71, %c0_72] : memref<5x1x128xf32, #tpu.memory_space<vmem>>, vector<1x1x128xf32>
    %139 = vector.shape_cast %138 : vector<1x1x128xf32> to vector<1x128xf32>
    %140 = vector.broadcast %139 : vector<1x128xf32> to vector<8x128xf32>
    %141 = arith.addf %137, %140 : vector<8x128xf32>
    %142 = vector.shape_cast %141 : vector<8x128xf32> to vector<1x8x128xf32>
    %143 = vector.shape_cast %142 : vector<1x8x128xf32> to vector<1x8x128xf32>
    %144 = vector.broadcast %143 : vector<1x8x128xf32> to vector<12x8x128xf32>
    %c1_73 = arith.constant 1 : index
    %c0_74 = arith.constant 0 : index
    %c0_75 = arith.constant 0 : index
    %c0_76 = arith.constant 0 : index
    %145 = vector.load %arg3[%c1_73, %c0_74, %c0_75, %c0_76] : memref<2x12x128x8xf32, #tpu.memory_space<vmem>>, vector<1x12x128x8xf32>
    %146 = vector.shape_cast %145 : vector<1x12x128x8xf32> to vector<12x128x8xf32>
    "tpu.trace_start"() <{level = 10 : i32, message = "gsd,gdk->gsk"}> : () -> ()
    %cst_77 = arith.constant dense<0.000000e+00> : vector<12x8x8xf32>
    %147 = tpu.matmul %144, %146, %cst_77 {dimension_numbers = #tpu.dot_dimension_numbers<[2], [1], [1], [2], [0, 0, 0, 1, 1, 2], [0], [0]>, precision = #tpu.contract_precision<fp32>} : vector<12x8x128xf32>, vector<12x128x8xf32>, vector<12x8x8xf32> -> vector<12x8x8xf32>
    "tpu.trace_stop"() : () -> ()
    %c1_78 = arith.constant 1 : index
    %c0_79 = arith.constant 0 : index
    %c0_80 = arith.constant 0 : index
    %c0_81 = arith.constant 0 : index
    %148 = vector.load %arg4[%c1_78, %c0_79, %c0_80, %c0_81] : memref<2x12x1x8xf32, #tpu.memory_space<vmem>>, vector<1x12x1x8xf32>
    %149 = vector.shape_cast %148 : vector<1x12x1x8xf32> to vector<12x1x8xf32>
    %150 = vector.broadcast %149 : vector<12x1x8xf32> to vector<12x8x8xf32>
    %151 = arith.addf %147, %150 : vector<12x8x8xf32>
    %152 = vector.extract_strided_slice %151 {offsets = [0, 0, 0], sizes = [4, 8, 8], strides = [1, 1, 1]} : vector<12x8x8xf32> to vector<4x8x8xf32>
    %153 = vector.extract_strided_slice %151 {offsets = [4, 0, 0], sizes = [4, 8, 8], strides = [1, 1, 1]} : vector<12x8x8xf32> to vector<4x8x8xf32>
    %154 = vector.extract_strided_slice %151 {offsets = [8, 0, 0], sizes = [4, 8, 8], strides = [1, 1, 1]} : vector<12x8x8xf32> to vector<4x8x8xf32>
    "tpu.trace_start"() <{level = 10 : i32, message = "hqd,hkd->hqk"}> : () -> ()
    %cst_82 = arith.constant dense<0.000000e+00> : vector<4x8x8xf32>
    %155 = tpu.matmul %152, %153, %cst_82 {dimension_numbers = #tpu.dot_dimension_numbers<[2], [2], [1], [1], [0, 0, 0, 1, 1, 1], [0], [0]>, precision = #tpu.contract_precision<fp32>} : vector<4x8x8xf32>, vector<4x8x8xf32>, vector<4x8x8xf32> -> vector<4x8x8xf32>
    "tpu.trace_stop"() : () -> ()
    %cst_83 = arith.constant 0.353553385 : f32
    %156 = vector.broadcast %cst_83 : f32 to vector<4x8x8xf32>
    %157 = arith.mulf %155, %156 : vector<4x8x8xf32>
    %158 = vector.shape_cast %3 : vector<8x8xf32> to vector<1x8x8xf32>
    %159 = vector.broadcast %158 : vector<1x8x8xf32> to vector<4x8x8xf32>
    %160 = arith.addf %157, %159 : vector<4x8x8xf32>
    %cst_84 = arith.constant dense<0xFF800000> : vector<4x8xf32>
    %161 = vector.multi_reduction <maximumf>, %160, %cst_84 [2] : vector<4x8x8xf32> to vector<4x8xf32>
    %162 = vector.shape_cast %161 : vector<4x8xf32> to vector<4x8x1xf32>
    %163 = vector.broadcast %162 : vector<4x8x1xf32> to vector<4x8x8xf32>
    %164 = arith.subf %160, %163 : vector<4x8x8xf32>
    %165 = math.exp %164 : vector<4x8x8xf32>
    %cst_85 = arith.constant dense<0.000000e+00> : vector<4x8xf32>
    %166 = vector.multi_reduction <add>, %165, %cst_85 [2] : vector<4x8x8xf32> to vector<4x8xf32>
    %167 = vector.shape_cast %166 : vector<4x8xf32> to vector<4x8x1xf32>
    %168 = vector.broadcast %167 : vector<4x8x1xf32> to vector<4x8x8xf32>
    %169 = arith.divf %165, %168 : vector<4x8x8xf32>
    "tpu.trace_start"() <{level = 10 : i32, message = "hqk,hkd->hqd"}> : () -> ()
    %cst_86 = arith.constant dense<0.000000e+00> : vector<4x8x8xf32>
    %170 = tpu.matmul %169, %154, %cst_86 {dimension_numbers = #tpu.dot_dimension_numbers<[2], [1], [1], [2], [0, 0, 0, 1, 1, 2], [0], [0]>, precision = #tpu.contract_precision<fp32>} : vector<4x8x8xf32>, vector<4x8x8xf32>, vector<4x8x8xf32> -> vector<4x8x8xf32>
    "tpu.trace_stop"() : () -> ()
    %c1_87 = arith.constant 1 : index
    %c0_88 = arith.constant 0 : index
    %c0_89 = arith.constant 0 : index
    %c0_90 = arith.constant 0 : index
    %171 = vector.load %arg5[%c1_87, %c0_88, %c0_89, %c0_90] : memref<2x4x8x128xf32, #tpu.memory_space<vmem>>, vector<1x4x8x128xf32>
    %172 = vector.shape_cast %171 : vector<1x4x8x128xf32> to vector<4x8x128xf32>
    "tpu.trace_start"() <{level = 10 : i32, message = "hqd,hdo->hqo"}> : () -> ()
    %cst_91 = arith.constant dense<0.000000e+00> : vector<4x8x128xf32>
    %173 = tpu.matmul %170, %172, %cst_91 {dimension_numbers = #tpu.dot_dimension_numbers<[2], [1], [1], [2], [0, 0, 0, 1, 1, 2], [0], [0]>, precision = #tpu.contract_precision<fp32>} : vector<4x8x8xf32>, vector<4x8x128xf32>, vector<4x8x128xf32> -> vector<4x8x128xf32>
    "tpu.trace_stop"() : () -> ()
    %cst_92 = arith.constant dense<0.000000e+00> : vector<8x128xf32>
    %174 = vector.multi_reduction <add>, %173, %cst_92 [0] : vector<4x8x128xf32> to vector<8x128xf32>
    %c1_93 = arith.constant 1 : index
    %c0_94 = arith.constant 0 : index
    %c0_95 = arith.constant 0 : index
    %175 = vector.load %arg6[%c1_93, %c0_94, %c0_95] : memref<2x1x128xf32, #tpu.memory_space<vmem>>, vector<1x1x128xf32>
    %176 = vector.shape_cast %175 : vector<1x1x128xf32> to vector<1x128xf32>
    %177 = vector.broadcast %176 : vector<1x128xf32> to vector<8x128xf32>
    %178 = arith.addf %174, %177 : vector<8x128xf32>
    %179 = arith.addf %115, %178 : vector<8x128xf32>
    %cst_96 = arith.constant dense<0.000000e+00> : vector<8xf32>
    %180 = vector.multi_reduction <add>, %179, %cst_96 [1] : vector<8x128xf32> to vector<8xf32>
    %181 = vector.shape_cast %180 : vector<8xf32> to vector<8x1xf32>
    %cst_97 = arith.constant 3.125000e-02 : f32
    %182 = vector.broadcast %cst_97 : f32 to vector<8x1xf32>
    %183 = arith.mulf %181, %182 : vector<8x1xf32>
    %184 = vector.broadcast %183 : vector<8x1xf32> to vector<8x128xf32>
    %185 = arith.subf %179, %184 : vector<8x128xf32>
    %186 = vector.broadcast %8 : vector<1x128xf32> to vector<8x128xf32>
    %187 = arith.mulf %185, %186 : vector<8x128xf32>
    %188 = arith.mulf %187, %187 : vector<8x128xf32>
    %cst_98 = arith.constant dense<0.000000e+00> : vector<8xf32>
    %189 = vector.multi_reduction <add>, %188, %cst_98 [1] : vector<8x128xf32> to vector<8xf32>
    %190 = vector.shape_cast %189 : vector<8xf32> to vector<8x1xf32>
    %cst_99 = arith.constant 0.0322580636 : f32
    %191 = vector.broadcast %cst_99 : f32 to vector<8x1xf32>
    %192 = arith.mulf %190, %191 : vector<8x1xf32>
    %c3 = arith.constant 3 : index
    %c0_100 = arith.constant 0 : index
    %c0_101 = arith.constant 0 : index
    %193 = vector.load %arg7[%c3, %c0_100, %c0_101] : memref<5x1x128xf32, #tpu.memory_space<vmem>>, vector<1x1x128xf32>
    %194 = vector.shape_cast %193 : vector<1x1x128xf32> to vector<1x128xf32>
    %cst_102 = arith.constant 9.99999997E-7 : f32
    %195 = vector.broadcast %cst_102 : f32 to vector<8x1xf32>
    %196 = arith.addf %192, %195 : vector<8x1xf32>
    %197 = math.rsqrt %196 : vector<8x1xf32>
    %198 = vector.broadcast %197 : vector<8x1xf32> to vector<8x128xf32>
    %199 = arith.mulf %187, %198 : vector<8x128xf32>
    %200 = vector.broadcast %194 : vector<1x128xf32> to vector<8x128xf32>
    %201 = arith.mulf %200, %199 : vector<8x128xf32>
    %c3_103 = arith.constant 3 : index
    %c0_104 = arith.constant 0 : index
    %c0_105 = arith.constant 0 : index
    %202 = vector.load %arg8[%c3_103, %c0_104, %c0_105] : memref<5x1x128xf32, #tpu.memory_space<vmem>>, vector<1x1x128xf32>
    %203 = vector.shape_cast %202 : vector<1x1x128xf32> to vector<1x128xf32>
    %204 = vector.broadcast %203 : vector<1x128xf32> to vector<8x128xf32>
    %205 = arith.addf %201, %204 : vector<8x128xf32>
    %c1_106 = arith.constant 1 : index
    %c0_107 = arith.constant 0 : index
    %c0_108 = arith.constant 0 : index
    %206 = vector.load %arg9[%c1_106, %c0_107, %c0_108] : memref<2x128x128xf32, #tpu.memory_space<vmem>>, vector<1x128x128xf32>
    %207 = vector.shape_cast %206 : vector<1x128x128xf32> to vector<128x128xf32>
    %cst_109 = arith.constant dense<0.000000e+00> : vector<8x128xf32>
    %208 = tpu.matmul %205, %207, %cst_109 {dimension_numbers = #tpu.dot_dimension_numbers<[1], [0], [0], [1], [0, 0, 1, 1], [], []>, precision = #tpu.contract_precision<fp32>} : vector<8x128xf32>, vector<128x128xf32>, vector<8x128xf32> -> vector<8x128xf32>
    %c1_110 = arith.constant 1 : index
    %c0_111 = arith.constant 0 : index
    %c0_112 = arith.constant 0 : index
    %209 = vector.load %arg10[%c1_110, %c0_111, %c0_112] : memref<2x1x128xf32, #tpu.memory_space<vmem>>, vector<1x1x128xf32>
    %210 = vector.shape_cast %209 : vector<1x1x128xf32> to vector<1x128xf32>
    %211 = vector.broadcast %210 : vector<1x128xf32> to vector<8x128xf32>
    %212 = arith.addf %208, %211 : vector<8x128xf32>
    %cst_113 = arith.constant 0.000000e+00 : f32
    %213 = vector.broadcast %cst_113 : f32 to vector<8x128xf32>
    %214 = arith.maximumf %212, %213 : vector<8x128xf32>
    %c1_114 = arith.constant 1 : index
    %c0_115 = arith.constant 0 : index
    %c0_116 = arith.constant 0 : index
    %215 = vector.load %arg11[%c1_114, %c0_115, %c0_116] : memref<2x128x128xf32, #tpu.memory_space<vmem>>, vector<1x128x128xf32>
    %216 = vector.shape_cast %215 : vector<1x128x128xf32> to vector<128x128xf32>
    %cst_117 = arith.constant dense<0.000000e+00> : vector<8x128xf32>
    %217 = tpu.matmul %214, %216, %cst_117 {dimension_numbers = #tpu.dot_dimension_numbers<[1], [0], [0], [1], [0, 0, 1, 1], [], []>, precision = #tpu.contract_precision<fp32>} : vector<8x128xf32>, vector<128x128xf32>, vector<8x128xf32> -> vector<8x128xf32>
    %c1_118 = arith.constant 1 : index
    %c0_119 = arith.constant 0 : index
    %c0_120 = arith.constant 0 : index
    %218 = vector.load %arg12[%c1_118, %c0_119, %c0_120] : memref<2x1x128xf32, #tpu.memory_space<vmem>>, vector<1x1x128xf32>
    %219 = vector.shape_cast %218 : vector<1x1x128xf32> to vector<1x128xf32>
    %220 = vector.broadcast %219 : vector<1x128xf32> to vector<8x128xf32>
    %221 = arith.addf %217, %220 : vector<8x128xf32>
    %222 = arith.addf %179, %221 : vector<8x128xf32>
    %cst_121 = arith.constant dense<0.000000e+00> : vector<8xf32>
    %223 = vector.multi_reduction <add>, %222, %cst_121 [1] : vector<8x128xf32> to vector<8xf32>
    %224 = vector.shape_cast %223 : vector<8xf32> to vector<8x1xf32>
    %cst_122 = arith.constant 3.125000e-02 : f32
    %225 = vector.broadcast %cst_122 : f32 to vector<8x1xf32>
    %226 = arith.mulf %224, %225 : vector<8x1xf32>
    %227 = vector.broadcast %226 : vector<8x1xf32> to vector<8x128xf32>
    %228 = arith.subf %222, %227 : vector<8x128xf32>
    %229 = vector.broadcast %8 : vector<1x128xf32> to vector<8x128xf32>
    %230 = arith.mulf %228, %229 : vector<8x128xf32>
    %231 = arith.mulf %230, %230 : vector<8x128xf32>
    %cst_123 = arith.constant dense<0.000000e+00> : vector<8xf32>
    %232 = vector.multi_reduction <add>, %231, %cst_123 [1] : vector<8x128xf32> to vector<8xf32>
    %233 = vector.shape_cast %232 : vector<8xf32> to vector<8x1xf32>
    %cst_124 = arith.constant 0.0322580636 : f32
    %234 = vector.broadcast %cst_124 : f32 to vector<8x1xf32>
    %235 = arith.mulf %233, %234 : vector<8x1xf32>
    %c4 = arith.constant 4 : index
    %c0_125 = arith.constant 0 : index
    %c0_126 = arith.constant 0 : index
    %236 = vector.load %arg7[%c4, %c0_125, %c0_126] : memref<5x1x128xf32, #tpu.memory_space<vmem>>, vector<1x1x128xf32>
    %237 = vector.shape_cast %236 : vector<1x1x128xf32> to vector<1x128xf32>
    %cst_127 = arith.constant 9.99999997E-7 : f32
    %238 = vector.broadcast %cst_127 : f32 to vector<8x1xf32>
    %239 = arith.addf %235, %238 : vector<8x1xf32>
    %240 = math.rsqrt %239 : vector<8x1xf32>
    %241 = vector.broadcast %240 : vector<8x1xf32> to vector<8x128xf32>
    %242 = arith.mulf %230, %241 : vector<8x128xf32>
    %243 = vector.broadcast %237 : vector<1x128xf32> to vector<8x128xf32>
    %244 = arith.mulf %243, %242 : vector<8x128xf32>
    %c4_128 = arith.constant 4 : index
    %c0_129 = arith.constant 0 : index
    %c0_130 = arith.constant 0 : index
    %245 = vector.load %arg8[%c4_128, %c0_129, %c0_130] : memref<5x1x128xf32, #tpu.memory_space<vmem>>, vector<1x1x128xf32>
    %246 = vector.shape_cast %245 : vector<1x1x128xf32> to vector<1x128xf32>
    %247 = vector.broadcast %246 : vector<1x128xf32> to vector<8x128xf32>
    %248 = arith.addf %244, %247 : vector<8x128xf32>
    %c0_131 = arith.constant 0 : index
    %c0_132 = arith.constant 0 : index
    %c0_133 = arith.constant 0 : index
    %249 = vector.load %arg13[%c0_131, %c0_132, %c0_133] : memref<1x8x128xf32, #tpu.memory_space<vmem>>, vector<1x8x128xf32>
    %250 = vector.shape_cast %249 : vector<1x8x128xf32> to vector<8x128xf32>
    %251 = vector.shape_cast %248 : vector<8x128xf32> to vector<1x8x128xf32>
    tpu.vector_store %arg13[%c0_131, %c0_132, %c0_133], %251 {strides = array<i32>} : memref<1x8x128xf32, #tpu.memory_space<vmem>>, vector<1x8x128xf32>,
    return
  }
  func.func @transform_0(%arg0: i32) -> (i32, i32, i32) {
    %c0_i32 = arith.constant 0 : i32
    %c0_i32_0 = arith.constant 0 : i32
    %c0_i32_1 = arith.constant 0 : i32
    return %arg0, %c0_i32, %c0_i32_0 : i32, i32, i32
  }
  func.func @transform_1(%arg0: i32) -> (i32, i32, i32) {
    %c0_i32 = arith.constant 0 : i32
    %c0_i32_0 = arith.constant 0 : i32
    %c0_i32_1 = arith.constant 0 : i32
    return %arg0, %c0_i32, %c0_i32_0 : i32, i32, i32
  }
  func.func @transform_2(%arg0: i32) -> (i32, i32, i32, i32) {
    %c0_i32 = arith.constant 0 : i32
    %c0_i32_0 = arith.constant 0 : i32
    %c0_i32_1 = arith.constant 0 : i32
    %c0_i32_2 = arith.constant 0 : i32
    %c0_i32_3 = arith.constant 0 : i32
    return %c0_i32, %c0_i32_0, %c0_i32_1, %c0_i32_2 : i32, i32, i32, i32
  }
  func.func @transform_3(%arg0: i32) -> (i32, i32, i32, i32) {
    %c0_i32 = arith.constant 0 : i32
    %c0_i32_0 = arith.constant 0 : i32
    %c0_i32_1 = arith.constant 0 : i32
    %c0_i32_2 = arith.constant 0 : i32
    %c0_i32_3 = arith.constant 0 : i32
    return %c0_i32, %c0_i32_0, %c0_i32_1, %c0_i32_2 : i32, i32, i32, i32
  }
  func.func @transform_4(%arg0: i32) -> (i32, i32, i32, i32) {
    %c0_i32 = arith.constant 0 : i32
    %c0_i32_0 = arith.constant 0 : i32
    %c0_i32_1 = arith.constant 0 : i32
    %c0_i32_2 = arith.constant 0 : i32
    %c0_i32_3 = arith.constant 0 : i32
    return %c0_i32, %c0_i32_0, %c0_i32_1, %c0_i32_2 : i32, i32, i32, i32
  }
  func.func @transform_5(%arg0: i32) -> (i32, i32, i32) {
    %c0_i32 = arith.constant 0 : i32
    %c0_i32_0 = arith.constant 0 : i32
    %c0_i32_1 = arith.constant 0 : i32
    %c0_i32_2 = arith.constant 0 : i32
    return %c0_i32, %c0_i32_0, %c0_i32_1 : i32, i32, i32
  }
  func.func @transform_6(%arg0: i32) -> (i32, i32, i32) {
    %c0_i32 = arith.constant 0 : i32
    %c0_i32_0 = arith.constant 0 : i32
    %c0_i32_1 = arith.constant 0 : i32
    %c0_i32_2 = arith.constant 0 : i32
    return %c0_i32, %c0_i32_0, %c0_i32_1 : i32, i32, i32
  }
  func.func @transform_7(%arg0: i32) -> (i32, i32, i32) {
    %c0_i32 = arith.constant 0 : i32
    %c0_i32_0 = arith.constant 0 : i32
    %c0_i32_1 = arith.constant 0 : i32
    %c0_i32_2 = arith.constant 0 : i32
    return %c0_i32, %c0_i32_0, %c0_i32_1 : i32, i32, i32
  }
  func.func @transform_8(%arg0: i32) -> (i32, i32, i32) {
    %c0_i32 = arith.constant 0 : i32
    %c0_i32_0 = arith.constant 0 : i32
    %c0_i32_1 = arith.constant 0 : i32
    %c0_i32_2 = arith.constant 0 : i32
    return %c0_i32, %c0_i32_0, %c0_i32_1 : i32, i32, i32
  }
  func.func @transform_9(%arg0: i32) -> (i32, i32, i32) {
    %c0_i32 = arith.constant 0 : i32
    %c0_i32_0 = arith.constant 0 : i32
    %c0_i32_1 = arith.constant 0 : i32
    %c0_i32_2 = arith.constant 0 : i32
    return %c0_i32, %c0_i32_0, %c0_i32_1 : i32, i32, i32
  }
  func.func @transform_10(%arg0: i32) -> (i32, i32, i32) {
    %c0_i32 = arith.constant 0 : i32
    %c0_i32_0 = arith.constant 0 : i32
    %c0_i32_1 = arith.constant 0 : i32
    %c0_i32_2 = arith.constant 0 : i32
    return %c0_i32, %c0_i32_0, %c0_i32_1 : i32, i32, i32
  }
  func.func @transform_11(%arg0: i32) -> (i32, i32, i32) {
    %c0_i32 = arith.constant 0 : i32
    %c0_i32_0 = arith.constant 0 : i32
    %c0_i32_1 = arith.constant 0 : i32
    %c0_i32_2 = arith.constant 0 : i32
    return %c0_i32, %c0_i32_0, %c0_i32_1 : i32, i32, i32
  }
  func.func @transform_12(%arg0: i32) -> (i32, i32, i32) {
    %c0_i32 = arith.constant 0 : i32
    %c0_i32_0 = arith.constant 0 : i32
    %c0_i32_1 = arith.constant 0 : i32
    return %arg0, %c0_i32, %c0_i32_0 : i32, i32, i32
  }
}

</mosaic_0001>

<bundles_post_ra>
// kernel: tpu_custom_call.1
= control target key start
LH: loop header
LB: loop body
LE: loop exit
PB: predicated region body
PF: predicated region fallthrough
CT: control target
= control target key end

     0   :  { %s24090_s0 = inlined_call_operand.vmem [shape: f32[2,8,128], index: 0, kind: input, shape index: {}]   ;;  %s24091_s1 = inlined_call_operand.vmem [shape: f32[2,8,8], index: 1, kind: input, shape index: {}]   ;;  %s24092_s2 = inlined_call_operand.vmem [shape: f32[2,12,128,8], index: 2, kind: input, shape index: {}]   ;;  %s24093_s3 = inlined_call_operand.vmem [shape: f32[2,12,1,8], index: 3, kind: input, shape index: {}]   ;;  %s24094_s4 = inlined_call_operand.vmem [shape: f32[2,4,8,128], index: 4, kind: input, shape index: {}]   ;;  %s24095_s5 = inlined_call_operand.vmem [shape: f32[2,1,128], index: 5, kind: input, shape index: {}]   ;;  %s24096_s6 = inlined_call_operand.vmem [shape: f32[5,1,128], index: 6, kind: input, shape index: {}]   ;;  %s24097_s7 = inlined_call_operand.vmem [shape: f32[5,1,128], index: 7, kind: input, shape index: {}]   ;;  %s24098_s8 = inlined_call_operand.vmem [shape: f32[2,128,128], index: 8, kind: input, shape index: {}]   ;;  %s24099_s9 = inlined_call_operand.vmem [shape: f32[2,1,128], index: 9, kind: input, shape index: {}]   ;;  %s24100_s10 = inlined_call_operand.vmem [shape: f32[2,128,128], index: 10, kind: input, shape index: {}]   ;;  %s24101_s11 = inlined_call_operand.vmem [shape: f32[2,1,128], index: 11, kind: input, shape index: {}]   ;;  %s24102_s12 = inlined_call_operand.hbm [shape: f32[2,8,128], index: 12, kind: output, shape index: {}]  }
   0x1   :  { %24381 = sst [smem:[#allocation37_spill]] %s24090_s0 }
   0x2   :  { %17 = vsyncpa [#allocation3], 0 }
   0x3   :  { %19 = vsyncpa [#allocation3 + $0x1], 0  ;;  %s15156_s21 = smov 0   ;;  %s15158_s22 = smov 0  }
   0x4   :  { %s15160_s23 = smov 0   ;;  %s15162_s24 = smov 0  }
   0x5 LB: > { %24382 = sst [smem:[#allocation5_spill]] %s15084_s23  ;;  %s15177_s25 = sadd.s32 4294967295, %s15088_s24   ;;  %s15088_s24 = sphi %s15162_s24, %s24877_s24   ;;  %s15084_s23 = sphi %s15160_s23, %s24874_s23   ;;  %s15080_s22 = sphi %s15158_s22, %s24876_s22   ;;  %s15076_s21 = sphi %s15156_s21, %s24875_s21  }
   0x6   : > { %s14639_s26 = sadd.s32 4294967294, %s15088_s24   ;;  %s15181_s27 = sadd.s32 1, %s15088_s24  }
   0x7   : > { %s294_s28 = sadd.s32 1, %s15084_s23  ;;  %s291_s29 = ssub.s32 %s15088_s24, %s15181_s27 }
   0x8   : > { %p304_p0 = scmp.ne.s32.totalorder %s15084_s23, %s15080_s22  ;;  %p292_p1 = scmp.eq.s32.totalorder %s291_s29, 0 }
   0x9   : > { %p305_p2 = scmp.eq.s32.totalorder %s15177_s25, 1  ;;  %p310_p3 = scmp.ne.s32.totalorder %s15080_s22, %s15076_s21 }
   0xa   : > { %p311_p4 = scmp.eq.s32.totalorder %s14639_s26, 1  ;;  %p14642_p7 = scmp.ge.s32.totalorder %s15088_s24, 1 }
   0xb   : > { %s15192_s30 = scalar_select %p292_p1, %s15084_s23, %s294_s28  }
   0xc   : > { %p15194_p5 = por %p305_p2, %p304_p0  ;;  %p15198_p6 = por %p311_p4, %p310_p3 }
   0xd   : > { %24383 = sst [smem:[#allocation6_spill]] %s15192_s30  ;;  %p373_p8 = scmp.lt.s32.totalorder %s15088_s24, 3 }
   0xf   : > { %p374_p9 = pnand %p14642_p7, %p373_p8 }
  0x11   : > { %377 = sbr.rel (%p374_p9) target bundleno = 4629 (0x1215), region = 68 }
  0x16   : > { %p418_p10 = scmp.lt.s32.totalorder %s15177_s25, 1  ;;  %s24386_s0 = sld [smem:[#allocation37_spill]]  ;;  %v479_v1 = vld [vmem:[%s24092_s2 + $0x78] sm:$0xff]  ;;  %v478_v2 = vld [vmem:[%s24092_s2 + $0x70] sm:$0xff]  ;;  %v477_v3 = vld [vmem:[%s24092_s2 + $0x68] sm:$0xff]  ;;  %v428_v47 = vlaneseq  ;;  %vm4796_vm4 = vcmask 64512  }
  0x17   : > { %v15229_v4 = vand.u32 4294901760, %v479_v1  ;;  %v15231_v5 = vand.u32 4294901760, %v478_v2  ;;  %v15233_v6 = vand.u32 4294901760, %v477_v3  ;;  %v476_v7 = vld [vmem:[%s24092_s2 + $0x60] sm:$0xff]  ;;  %v475_v8 = vld [vmem:[%s24092_s2 + $0x58] sm:$0xff]  ;;  %v474_v9 = vld [vmem:[%s24092_s2 + $0x50] sm:$0xff] }
  0x18   : > { %s15206_s15 = scalar_select %p418_p10, %s15177_s25, 1  ;;  %v15244_v10 = vand.u32 4294901760, %v476_v7  ;;  %v15246_v11 = vand.u32 4294901760, %v475_v8  ;;  %v15248_v12 = vand.u32 4294901760, %v474_v9  ;;  %v473_v13 = vld [vmem:[%s24092_s2 + $0x48] sm:$0xff]  ;;  %v472_v14 = vld [vmem:[%s24092_s2 + $0x40] sm:$0xff] }
  0x19   : > { %v15257_v15 = vsub.f32 %v479_v1, %v15229_v4  ;;  %v15260_v16 = vsub.f32 %v478_v2, %v15231_v5  ;;  %v15263_v17 = vsub.f32 %v477_v3, %v15233_v6  ;;  %901 = vmatpush.msra.mxu3 %v15229_v4  ;;  %705 = vmatpush.msra.mxu0 %v15229_v4  ;;  %v15267_v18 = vand.u32 4294901760, %v473_v13  ;;  %v471_v34 = vld [vmem:[%s24092_s2 + $0x38] sm:$0xff]  ;;  %v470_v35 = vld [vmem:[%s24092_s2 + $0x30] sm:$0xff]  ;;  %v469_v36 = vld [vmem:[%s24092_s2 + $0x28] sm:$0xff]  ;;  %s415_s23 = sand.u32 1, %s15080_s22   ;;  %s14899_s17 = sshll.u32 %s15177_s25, 3 }
  0x1a   : > { %s14644_s16 = sshll.u32 %s15206_s15, 3  ;;  %v15270_v19 = vsub.f32 %v476_v7, %v15244_v10  ;;  %v15273_v20 = vsub.f32 %v475_v8, %v15246_v11  ;;  %v15276_v21 = vsub.f32 %v474_v9, %v15248_v12  ;;  %v15278_v22 = vand.u32 4294901760, %v472_v14  ;;  %v468_v42 = vld [vmem:[%s24092_s2 + $0x20] sm:$0xff]  ;;  %v467_v50 = vld [vmem:[%s24092_s2 + $0x18] sm:$0xff]  ;;  %v466_v56 = vld [vmem:[%s24092_s2 + $0x10] sm:$0xff]  ;;  %s14643_s30 = sshll.u32 %s415_s23, 3 }
  0x1b   : > { %v747_v23 = vand.u32 4294901760, %v15257_v15  ;;  %v753_v24 = vand.u32 4294901760, %v15260_v16  ;;  %848 = vmatpush.msra.mxu2 %v15257_v15  ;;  %v759_v25 = vand.u32 4294901760, %v15263_v17  ;;  %903 = vmatpush.msra.mxu3 %v15231_v5  ;;  %v15289_v28 = vsub.f32 %v473_v13, %v15267_v18  ;;  %v465_v63 = vld [vmem:[%s24092_s2 + $0x8] sm:$0xff]  ;;  %v464_v9 = vld [vmem:[%s24092_s2] sm:$0xff]  ;;  %s18993_s28 = scalar_lea.vmem %s24091_s1, %s14644_s16  ;;  %s14563_s15 = scalar_lea.hbm %s24102_s12, %s14899_s17 }
  0x1c   : > { %s15214_s19 = scalar_lea.vmem %s24386_s0, %s14644_s16  ;;  %v765_v26 = vand.u32 4294901760, %v15270_v19  ;;  %v771_v27 = vand.u32 4294901760, %v15273_v20  ;;  %707 = vmatpush.msra.mxu0 %v15231_v5  ;;  %v777_v32 = vand.u32 4294901760, %v15276_v21  ;;  %v15305_v33 = vsub.f32 %v472_v14, %v15278_v22  ;;  %s417_s29 = scalar_lea.vmem [#allocation2], %s14643_s30 }
  0x1d   : > { %v15217_v0 = vld [vmem:[%s15214_s19] sm:$0xff]  ;;  %v748_v29 = vsub.f32 %v15257_v15, %v747_v23  ;;  %v754_v30 = vsub.f32 %v15260_v16, %v753_v24  ;;  %v760_v31 = vsub.f32 %v15263_v17, %v759_v25  ;;  %851 = vmatpush.msra.mxu2 %v15260_v16  ;;  %905 = vmatpush.msra.mxu3 %v15233_v6  ;;  %v783_v41 = vand.u32 4294901760, %v15289_v28  ;;  %s14565_s25 = sshll.u32 %s417_s29, 4  ;;  %s14567_s0 = sshll.u32 %s14563_s15, 4  ;;  %s14566_s25 = int_to_ptr.vmem [resolvable:$true] %s14565_s25  ;;  %s14568_s0 = int_to_ptr.hbm [resolvable:$true] %s14567_s0 }
  0x1e   : > { %433 = vadd.xlane.f32.xlu0 %v15217_v0  ;;  %709 = vmatpush.msra.mxu0 %v15233_v6  ;;  %v766_v39 = vsub.f32 %v15270_v19, %v765_v26  ;;  %v772_v40 = vsub.f32 %v15273_v20, %v771_v27  ;;  %v15330_v44 = vand.u32 4294901760, %v471_v34  ;;  %v15332_v45 = vand.u32 4294901760, %v470_v35  ;;  %s14553_s18 = scalar_lea.sflag [#allocation3], %s415_s23  ;;  %s15040_s20 = sshra.s32 %s14568_s0, 4  ;;  %s15041_s20 = int_to_ptr.hbm [resolvable:$true] %s15040_s20 }
  0x1f   : > { %v749_v37 = vand.u32 4294901760, %v748_v29  ;;  %v755_v38 = vand.u32 4294901760, %v754_v30  ;;  %854 = vmatpush.msra.mxu2 %v15263_v17  ;;  %907 = vmatpush.msra.mxu3 %v15244_v10  ;;  %v761_v43 = vand.u32 4294901760, %v760_v31  ;;  %v15334_v46 = vand.u32 4294901760, %v469_v36  ;;  %s15042_s26 = scalar_lea.hbm %s15041_s20, 8  ;;  %s15046_s16 = scalar_lea.hbm %s24102_s12, 16 }
  0x20   : > { %711 = vmatpush.msra.mxu0 %v15244_v10  ;;  %v778_v48 = vsub.f32 %v15276_v21, %v777_v32  ;;  %v789_v49 = vand.u32 4294901760, %v15305_v33  ;;  %v767_v51 = vand.u32 4294901760, %v766_v39  ;;  %v15347_v52 = vsub.f32 %v471_v34, %v15330_v44  ;;  %p15043_p11 = scmp.ne.s32.totalorder %s15041_s20, %s15042_s26  ;;  %p15047_p0 = scmp.lt.s32.totalorder %s15041_s20, %s24102_s12 }
  0x21   : > { %750 = vmatpush.msra.mxu1 %v749_v37  ;;  %857 = vmatpush.msra.mxu2 %v15270_v19  ;;  %v15350_v53 = vsub.f32 %v470_v35, %v15332_v45  ;;  %v15352_v54 = vand.u32 4294901760, %v468_v42  ;;  %v784_v55 = vsub.f32 %v15289_v28, %v783_v41  ;;  %v773_v57 = vand.u32 4294901760, %v772_v40  ;;  %p15048_p1 = scmp.lt.s32.totalorder %s15046_s16, %s15042_s26 }
  0x22   : > { %909 = vmatpush.msra.mxu3 %v15246_v11  ;;  %713 = vmatpush.msra.mxu0 %v15246_v11  ;;  %v795_v58 = vand.u32 4294901760, %v15347_v52  ;;  %v15365_v59 = vsub.f32 %v469_v36, %v15334_v46  ;;  %v15367_v60 = vand.u32 4294901760, %v467_v50  ;;  %v429_v61 = vand.u32 127, %v428_v47  ;;  %p15044_p12 = pnand %p15043_p11, %p15194_p5 }
  0x23   : > { %756 = vmatpush.msra.mxu1 %v755_v38  ;;  %860 = vmatpush.msra.mxu2 %v15273_v20  ;;  %v790_v62 = vsub.f32 %v15305_v33, %v789_v49  ;;  %v779_v1 = vand.u32 4294901760, %v778_v48  ;;  %v801_v2 = vand.u32 4294901760, %v15350_v53  ;;  %v15380_v3 = vsub.f32 %v468_v42, %v15352_v54  ;;  %p15049_p2 = por %p15048_p1, %p15047_p0 }
  0x24   : > { %911 = vmatpush.msra.mxu3 %v15248_v12  ;;  %715 = vmatpush.msra.mxu0 %v15248_v12  ;;  %v15382_v7 = vand.u32 4294901760, %v466_v56  ;;  %v785_v8 = vand.u32 4294901760, %v784_v55  ;;  %v796_v13 = vsub.f32 %v15347_v52, %v795_v58  ;;  %v807_v14 = vand.u32 4294901760, %v15365_v59  ;;  %p15045_p13 = pneg %p15044_p12 }
  0x25   : > { %762 = vmatpush.msra.mxu1 %v761_v43  ;;  %863 = vmatpush.msra.mxu2 %v15276_v21  ;;  %v15395_v29 = vsub.f32 %v467_v50, %v15367_v60  ;;  %v15397_v30 = vand.u32 4294901760, %v465_v63  ;;  %vm430_vm0 = vcmp.lt.s32.totalorder %v429_v61, 32  ;;  %v791_v31 = vand.u32 4294901760, %v790_v62 }
  0x26   : > { %913 = vmatpush.msra.mxu3 %v15267_v18  ;;  %717 = vmatpush.msra.mxu0 %v15267_v18  ;;  %v802_v34 = vsub.f32 %v15350_v53, %v801_v2  ;;  %v813_v35 = vand.u32 4294901760, %v15380_v3  ;;  %v15407_v36 = vsub.f32 %v466_v56, %v15382_v7  ;;  %v15409_v37 = vand.u32 4294901760, %v464_v9  ;;  %p15050_p3 = pnand %p15049_p2, %p15045_p13 }
  0x27   : > { %768 = vmatpush.msra.mxu1 %v767_v51  ;;  %866 = vmatpush.msra.mxu2 %v15289_v28  ;;  %v797_v39 = vand.u32 4294901760, %v796_v13  ;;  %v808_v40 = vsub.f32 %v15365_v59, %v807_v14  ;;  %v819_v42 = vand.u32 4294901760, %v15395_v29  ;;  %v15419_v43 = vsub.f32 %v465_v63, %v15397_v30 }
  0x28   : > { %915 = vmatpush.msra.mxu3 %v15278_v22  ;;  %719 = vmatpush.msra.mxu0 %v15278_v22  ;;  %v15090_v48 = vmov 0.0   ;;  %v803_v51 = vand.u32 4294901760, %v802_v34  ;;  %v814_v55 = vsub.f32 %v15380_v3, %v813_v35  ;;  %v825_v56 = vand.u32 4294901760, %v15407_v36 }
  0x29   : > { %774 = vmatpush.msra.mxu1 %v773_v57  ;;  %869 = vmatpush.msra.mxu2 %v15305_v33  ;;  %v15422_v50 = vsel %vm430_vm0, 1.0, %v15090_v48  ;;  %v15432_v57 = vsub.f32 %v464_v9, %v15409_v37  ;;  %v809_v62 = vand.u32 4294901760, %v808_v40  ;;  %v820_v63 = vsub.f32 %v15395_v29, %v819_v42 }
  0x2a   : > { %917 = vmatpush.msra.mxu3 %v15330_v44  ;;  %721 = vmatpush.msra.mxu0 %v15330_v44  ;;  %24387 = vst [vmem:[#allocation7_spill] sm:$0xff] %v15422_v50  ;;  %v826_v9 = vsub.f32 %v15407_v36, %v825_v56 }
  0x2b   : > { %780 = vmatpush.msra.mxu1 %v779_v1  ;;  %872 = vmatpush.msra.mxu2 %v15347_v52  ;;  %v831_v1 = vand.u32 4294901760, %v15419_v43  ;;  %v837_v13 = vand.u32 4294901760, %v15432_v57  ;;  %v821_v34 = vand.u32 4294901760, %v820_v63  ;;  %v485_v63 = vld [vmem:[%s24092_s2 + $0xa8] sm:$0xff] }
  0x2c   : > { %919 = vmatpush.msra.mxu3 %v15332_v45  ;;  %723 = vmatpush.msra.mxu0 %v15332_v45 }
  0x2d   : > { %786 = vmatpush.msra.mxu1 %v785_v8  ;;  %875 = vmatpush.msra.mxu2 %v15350_v53  ;;  %v838_v40 = vsub.f32 %v15432_v57, %v837_v13 }
  0x2e   : > { %921 = vmatpush.msra.mxu3 %v15334_v46  ;;  %725 = vmatpush.msra.mxu0 %v15334_v46 }
  0x2f   : > { %792 = vmatpush.msra.mxu1 %v791_v31  ;;  %878 = vmatpush.msra.mxu2 %v15365_v59  ;;  %v839_v48 = vand.u32 4294901760, %v838_v40 }
  0x30   : > { %923 = vmatpush.msra.mxu3 %v15352_v54  ;;  %727 = vmatpush.msra.mxu0 %v15352_v54 }
  0x31   : > { %798 = vmatpush.msra.mxu1 %v797_v39  ;;  %881 = vmatpush.msra.mxu2 %v15380_v3  ;;  %v827_v39 = vand.u32 4294901760, %v826_v9  ;;  %v15629_v9 = vand.u32 4294901760, %v485_v63 }
  0x32   : > { %925 = vmatpush.msra.mxu3 %v15367_v60  ;;  %729 = vmatpush.msra.mxu0 %v15367_v60 }
  0x33   : > { %804 = vmatpush.msra.mxu1 %v803_v51  ;;  %884 = vmatpush.msra.mxu2 %v15395_v29  ;;  %v486_v51 = vld [vmem:[%s24092_s2 + $0xb0] sm:$0xff] }
  0x34   : > { %927 = vmatpush.msra.mxu3 %v15382_v7  ;;  %731 = vmatpush.msra.mxu0 %v15382_v7 }
  0x35   : > { %810 = vmatpush.msra.mxu1 %v809_v62  ;;  %887 = vmatpush.msra.mxu2 %v15407_v36 }
  0x36   : > { %929 = vmatpush.msra.mxu3 %v15397_v30  ;;  %733 = vmatpush.msra.mxu0 %v15397_v30 }
  0x37   : > { %890 = vmatpush.msra.mxu2 %v15419_v43 }
  0x38   : > { %931 = vmatpush.msra.mxu3 %v15409_v37  ;;  %735 = vmatpush.msra.mxu0 %v15409_v37 }
  0x39   : > { %893 = vmatpush.msra.mxu2 %v15432_v57  ;;  %v15618_v57 = vand.u32 4294901760, %v486_v51 }
  0x3a   : > { %942 = vmatpush.msrb.mxu0 %v747_v23  ;;  %v491_v23 = vld [vmem:[%s24092_s2 + $0xd8] sm:$0xff] }
  0x3c   : > { %946 = vmatpush.msrb.mxu0 %v753_v24 }
  0x3e   : > { %950 = vmatpush.msrb.mxu0 %v759_v25 }
  0x40   : > { %954 = vmatpush.msrb.mxu0 %v765_v26 }
  0x42   : > { %958 = vmatpush.msrb.mxu0 %v771_v27  ;;  %v15554_v27 = vand.u32 4294901760, %v491_v23 }
  0x44   : > { %962 = vmatpush.msrb.mxu0 %v777_v32  ;;  %v490_v32 = vld [vmem:[%s24092_s2 + $0xd0] sm:$0xff] }
  0x46   : > { %966 = vmatpush.msrb.mxu0 %v783_v41 }
  0x48   : > { %970 = vmatpush.msrb.mxu0 %v789_v49  ;;  %v489_v49 = vld [vmem:[%s24092_s2 + $0xc8] sm:$0xff] }
  0x4a   : > { %974 = vmatpush.msrb.mxu0 %v795_v58 }
  0x4c   : > { %978 = vmatpush.msrb.mxu0 %v801_v2 }
  0x4e   : > { %982 = vmatpush.msrb.mxu0 %v807_v14 }
  0x50   : > { %986 = vmatpush.msrb.mxu0 %v813_v35 }
  0x52   : > { %990 = vmatpush.msrb.mxu0 %v819_v42 }
  0x54   : > { %994 = vmatpush.msrb.mxu0 %v825_v56 }
  0x56   : > { %998 = vmatpush.msrb.mxu0 %v831_v1 }
  0x58   : > { %1002 = vmatpush.msrb.mxu0 %v837_v13  ;;  %v15632_v13 = vsub.f32 %v486_v51, %v15618_v57  ;;  %v480_v51 = vld [vmem:[%s24092_s2 + $0x80] sm:$0xff] }
  0x91   : > { %v434_v38 = vpop.xlane.xlu0 %433 }
  0x92   : > { %v435_v47 = vmul.f32 0.03125, %v434_v38  ;;  %v832_v38 = vsub.f32 %v15419_v43, %v831_v1 }
  0x94   : > { %v436_v61 = vsub.f32 %v15217_v0, %v435_v47  ;;  %v815_v0 = vand.u32 4294901760, %v814_v55  ;;  %v833_v47 = vand.u32 4294901760, %v832_v38 }
  0x96   : > { %v15443_v8 = vmul.f32 %v15422_v50, %v436_v61  ;;  %816 = vmatpush.msra.mxu1 %v815_v0 }
  0x98   : > { %v438_v31 = vmul.f32 %v15443_v8, %v15443_v8  ;;  %822 = vmatpush.msra.mxu1 %v821_v34  ;;  %v484_v34 = vld [vmem:[%s24092_s2 + $0xa0] sm:$0xff] }
  0x99   : > { %v15645_v40 = vand.u32 4294901760, %v484_v34 }
  0x9a   : > { %439 = vadd.xlane.f32.xlu0 %v438_v31  ;;  %828 = vmatpush.msra.mxu1 %v827_v39  ;;  %v1142_v39 = vand.u32 4294901760, %v15632_v13 }
  0x9c   : > { %834 = vmatpush.msra.mxu1 %v833_v47  ;;  %v15648_v47 = vsub.f32 %v485_v63, %v15629_v9 }
  0x9e   : > { %840 = vmatpush.msra.mxu1 %v839_v48 }
  0xa0   : > { %1009 = vmatpush.msrb.mxu1 %v15229_v4  ;;  %v495_v4 = vld [vmem:[%s24092_s2 + $0xf8] sm:$0xff] }
  0xa2   : > { %1011 = vmatpush.msrb.mxu1 %v15231_v5  ;;  %v15512_v5 = vand.u32 4294901760, %v495_v4 }
  0xa4   : > { %1013 = vmatpush.msrb.mxu1 %v15233_v6  ;;  %v494_v6 = vld [vmem:[%s24092_s2 + $0xf0] sm:$0xff]  ;;  %1046 = vmatpush.msrb.mxu2 %v15512_v5 }
  0xa6   : > { %1015 = vmatpush.msrb.mxu1 %v15244_v10  ;;  %v15518_v10 = vand.u32 4294901760, %v494_v6 }
  0xa8   : > { %1017 = vmatpush.msrb.mxu1 %v15246_v11  ;;  %v15521_v11 = vsub.f32 %v495_v4, %v15512_v5  ;;  %1048 = vmatpush.msrb.mxu2 %v15518_v10  ;;  %v15531_v17 = vsub.f32 %v494_v6, %v15518_v10  ;;  %v483_v4 = vld [vmem:[%s24092_s2 + $0x98] sm:$0xff] }
  0xaa   : > { %1019 = vmatpush.msrb.mxu1 %v15248_v12  ;;  %v493_v12 = vld [vmem:[%s24092_s2 + $0xe8] sm:$0xff]  ;;  %v1088_v15 = vand.u32 4294901760, %v15521_v11  ;;  %v1094_v20 = vand.u32 4294901760, %v15531_v17 }
  0xab   : > { %v15528_v16 = vand.u32 4294901760, %v493_v12 }
  0xac   : > { %1021 = vmatpush.msrb.mxu1 %v15267_v18  ;;  %v492_v18 = vld [vmem:[%s24092_s2 + $0xe0] sm:$0xff]  ;;  %v1089_v19 = vsub.f32 %v15521_v11, %v1088_v15  ;;  %v1095_v25 = vsub.f32 %v15531_v17, %v1094_v20 }
  0xad   : > { %1050 = vmatpush.msrb.mxu2 %v15528_v16  ;;  %v15541_v21 = vand.u32 4294901760, %v492_v18 }
  0xae   : > { %1023 = vmatpush.msrb.mxu1 %v15278_v22  ;;  %v15544_v22 = vsub.f32 %v493_v12, %v15528_v16  ;;  %v1090_v24 = vand.u32 4294901760, %v1089_v19  ;;  %v1096_v33 = vand.u32 4294901760, %v1095_v25  ;;  %v1143_v12 = vsub.f32 %v15632_v13, %v1142_v39 }
  0xaf   : > { %1052 = vmatpush.msrb.mxu2 %v15541_v21  ;;  %v15557_v28 = vsub.f32 %v492_v18, %v15541_v21  ;;  %v1148_v18 = vand.u32 4294901760, %v15648_v47  ;;  %v15658_v19 = vand.u32 4294901760, %v483_v4 }
  0xb0   : > { %1025 = vmatpush.msrb.mxu1 %v15330_v44  ;;  %v1100_v26 = vand.u32 4294901760, %v15544_v22  ;;  %1091 = vmatpush.msrb.mxu3 %v1090_v24  ;;  %v15566_v44 = vand.u32 4294901760, %v490_v32  ;;  %v482_v24 = vld [vmem:[%s24092_s2 + $0x90] sm:$0xff]  ;;  %v1144_v25 = vand.u32 4294901760, %v1143_v12 }
  0xb1   : > { %1054 = vmatpush.msrb.mxu2 %v15554_v27 }
  0xb2   : > { %1027 = vmatpush.msrb.mxu1 %v15332_v45  ;;  %v1101_v41 = vsub.f32 %v15544_v22, %v1100_v26  ;;  %v15569_v45 = vsub.f32 %v491_v23, %v15554_v27  ;;  %1097 = vmatpush.msrb.mxu3 %v1096_v33  ;;  %v15580_v58 = vsub.f32 %v490_v32, %v15566_v44  ;;  %v15670_v33 = vand.u32 4294901760, %v482_v24 }
  0xb3   : > { %1056 = vmatpush.msrb.mxu2 %v15566_v44  ;;  %v15661_v23 = vsub.f32 %v484_v34, %v15645_v40  ;;  %v1149_v32 = vsub.f32 %v15648_v47, %v1148_v18 }
  0xb4   : > { %1029 = vmatpush.msrb.mxu1 %v15334_v46  ;;  %v1106_v46 = vand.u32 4294901760, %v15557_v28  ;;  %v1102_v52 = vand.u32 4294901760, %v1101_v41  ;;  %v1112_v53 = vand.u32 4294901760, %v15569_v45  ;;  %v1118_v3 = vand.u32 4294901760, %v15580_v58 }
  0xb5   : > { %v15673_v41 = vsub.f32 %v483_v4, %v15658_v19 }
  0xb6   : > { %1031 = vmatpush.msrb.mxu1 %v15352_v54  ;;  %v15577_v54 = vand.u32 4294901760, %v489_v49  ;;  %v1107_v59 = vsub.f32 %v15557_v28, %v1106_v46  ;;  %1103 = vmatpush.msrb.mxu3 %v1102_v52  ;;  %v1113_v2 = vsub.f32 %v15569_v45, %v1112_v53  ;;  %v1119_v36 = vsub.f32 %v15580_v58, %v1118_v3  ;;  %v481_v52 = vld [vmem:[%s24092_s2 + $0x88] sm:$0xff] }
  0xb8   : > { %1033 = vmatpush.msrb.mxu1 %v15367_v60  ;;  %v488_v60 = vld [vmem:[%s24092_s2 + $0xc0] sm:$0xff]  ;;  %1058 = vmatpush.msrb.mxu2 %v15577_v54  ;;  %v15596_v14 = vsub.f32 %v489_v49, %v15577_v54  ;;  %v1108_v29 = vand.u32 4294901760, %v1107_v59  ;;  %v1114_v35 = vand.u32 4294901760, %v1113_v2  ;;  %v1120_v55 = vand.u32 4294901760, %v1119_v36 }
  0xb9   : > { %v1154_v49 = vand.u32 4294901760, %v15661_v23  ;;  %v1150_v59 = vand.u32 4294901760, %v1149_v32  ;;  %v15681_v2 = vand.u32 4294901760, %v481_v52 }
  0xba   : > { %1035 = vmatpush.msrb.mxu1 %v15382_v7  ;;  %v15593_v7 = vand.u32 4294901760, %v488_v60  ;;  %1109 = vmatpush.msrb.mxu3 %v1108_v29  ;;  %v15684_v29 = vsub.f32 %v482_v24, %v15670_v33 }
  0xbb   : > { %v15700_v63 = vsub.f32 %v481_v52, %v15681_v2 }
  0xbc   : > { %1037 = vmatpush.msrb.mxu1 %v15397_v30  ;;  %v487_v30 = vld [vmem:[%s24092_s2 + $0xb8] sm:$0xff]  ;;  %1060 = vmatpush.msrb.mxu2 %v15593_v7  ;;  %v15609_v43 = vsub.f32 %v488_v60, %v15593_v7  ;;  %v1160_v60 = vand.u32 4294901760, %v15673_v41  ;;  %v1166_v36 = vand.u32 4294901760, %v15684_v29 }
  0xbd   : > { %v15606_v42 = vand.u32 4294901760, %v487_v30  ;;  %1115 = vmatpush.msrb.mxu3 %v1114_v35  ;;  %v1172_v34 = vand.u32 4294901760, %v15700_v63 }
  0xbe   : > { %1039 = vmatpush.msrb.mxu1 %v15409_v37  ;;  %v1124_v37 = vand.u32 4294901760, %v15596_v14  ;;  %v1130_v62 = vand.u32 4294901760, %v15609_v43  ;;  %v1161_v35 = vsub.f32 %v15673_v41, %v1160_v60 }
  0xbf   : > { %1062 = vmatpush.msrb.mxu2 %v15606_v42  ;;  %v15621_v61 = vsub.f32 %v487_v30, %v15606_v42  ;;  %1121 = vmatpush.msrb.mxu3 %v1120_v55  ;;  %v1155_v30 = vsub.f32 %v15661_v23, %v1154_v49  ;;  %v1173_v4 = vsub.f32 %v15700_v63, %v1172_v34 }
  0xc0   : > { %v1125_v56 = vsub.f32 %v15596_v14, %v1124_v37  ;;  %v1131_v31 = vsub.f32 %v15609_v43, %v1130_v62 }
  0xc1   : > { %1064 = vmatpush.msrb.mxu2 %v15618_v57  ;;  %v1136_v0 = vand.u32 4294901760, %v15621_v61  ;;  %v1156_v55 = vand.u32 4294901760, %v1155_v30  ;;  %v1174_v12 = vand.u32 4294901760, %v1173_v4 }
  0xc2   : > { %v1126_v1 = vand.u32 4294901760, %v1125_v56  ;;  %v1132_v48 = vand.u32 4294901760, %v1131_v31  ;;  %v15697_v56 = vand.u32 4294901760, %v480_v51  ;;  %v1167_v31 = vsub.f32 %v15684_v29, %v1166_v36 }
  0xc3   : > { %v1137_v38 = vsub.f32 %v15621_v61, %v1136_v0  ;;  %1066 = vmatpush.msrb.mxu2 %v15629_v9 }
  0xc4   : > { %1127 = vmatpush.msrb.mxu3 %v1126_v1  ;;  %v1162_v1 = vand.u32 4294901760, %v1161_v35 }
  0xc5   : > { %v1138_v6 = vand.u32 4294901760, %v1137_v38  ;;  %1068 = vmatpush.msrb.mxu2 %v15645_v40  ;;  %v15708_v38 = vsub.f32 %v480_v51, %v15697_v56 }
  0xc6   : > { %1133 = vmatpush.msrb.mxu3 %v1132_v48  ;;  %v1168_v48 = vand.u32 4294901760, %v1167_v31 }
  0xc7   : > { %1070 = vmatpush.msrb.mxu2 %v15658_v19 }
  0xc8   : > { %1139 = vmatpush.msrb.mxu3 %v1138_v6  ;;  %v1178_v6 = vand.u32 4294901760, %v15708_v38 }
  0xc9   : > { %1072 = vmatpush.msrb.mxu2 %v15670_v33 }
  0xca   : > { %1145 = vmatpush.msrb.mxu3 %v1144_v25  ;;  %v1179_v24 = vsub.f32 %v15708_v38, %v1178_v6 }
  0xcb   : > { %1074 = vmatpush.msrb.mxu2 %v15681_v2 }
  0xcc   : > { %1151 = vmatpush.msrb.mxu3 %v1150_v59  ;;  %v1180_v52 = vand.u32 4294901760, %v1179_v24 }
  0xcd   : > { %1076 = vmatpush.msrb.mxu2 %v15697_v56 }
  0xce   : > { %1157 = vmatpush.msrb.mxu3 %v1156_v55 }
  0xd0   : > { %1163 = vmatpush.msrb.mxu3 %v1162_v1 }
  0xd2   : > { %1169 = vmatpush.msrb.mxu3 %v1168_v48  ;;  %v14942_v48 = vld [vmem:[%s24096_s6] ss:$0 sm:$0xff] }
  0xd4   : > { %1175 = vmatpush.msrb.mxu3 %v1174_v12  ;;  %v14943_v12 = vld [vmem:[%s24097_s7] ss:$0 sm:$0xff] }
  0xd6   : > { %1181 = vmatpush.msrb.mxu3 %v1180_v52 }
 0x10d   : > { %v440_v25 = vpop.xlane.xlu0 %439 }
 0x10e   : > { %v441_v32 = vmul.f32 0.032258064, %v440_v25 }
 0x110   : > { %v443_v59 = vadd.f32 1e-06, %v441_v32 }
 0x112   : > { %14982 = vrsqrt.f32 %v443_v59  ;;  %vm450_vm2 = vweird.f32 %v443_v59 }
 0x118   : > { %v14983_v30 = vpop.eup %14982 }
 0x119   : > { %v445_v35 = vmul.f32 %v14983_v30, %v443_v59  ;;  %vm451_vm1 = vweird.f32 %v14983_v30 }
 0x11a   : > { %vm452_vm3 = vmor %vm450_vm2, %vm451_vm1 }
 0x11b   : > { %v446_v51 = vmul.f32 %v14983_v30, %v445_v35 }
 0x11d   : > { %v447_v55 = vmul.f32 0.5, %v446_v51 }
 0x11f   : > { %v448_v1 = vsub.f32 1.5, %v447_v55 }
 0x121   : > { %v449_v31 = vmul.f32 %v14983_v30, %v448_v1 }
 0x123   : > { %v453_v4 = vsel %vm452_vm3, %v14983_v30, %v449_v31  ;;  %v500_v31 = vld [vmem:[%s24092_s2 + $0x120] sm:$0xff] }
 0x124   : > { %v454_v24 = vmul.f32 %v453_v4, %v15443_v8 }
 0x126   : > { %v458_v25 = vmul.f32 %v14942_v48, %v454_v24 }
 0x128   : > { %v463_v32 = vadd.f32 %v14943_v12, %v458_v25  ;;  %v499_v12 = vld [vmem:[%s24092_s2 + $0x118] sm:$0xff]  ;;  %v15942_v25 = vand.u32 4294901760, %v500_v31 }
 0x12a   : > { %v15724_v52 = vand.u32 4294901760, %v463_v32 }
 0x12c   : > { %v15727_v35 = vsub.f32 %v463_v32, %v15724_v52  ;;  %842 = vmatmul.f32.vlgmr.msra.gmra.mxu1 %v15724_v52 }
 0x12d   : > { %1242 = vmatpush.msra.mxu1 %v15512_v5 }
 0x12e   : > { %24388 = vst [vmem:[#allocation8_spill] sm:$0xff] %v15727_v35  ;;  %896 = vmatmul.f32.vlgmr.msra.gmra.mxu2 %v15727_v35  ;;  %v15733_v59 = vand.u32 4294901760, %v15727_v35 }
 0x12f   : > { %1244 = vmatpush.msra.mxu1 %v15518_v10  ;;  %1283 = vmatpush.msra.mxu2 %v1088_v15  ;;  %v509_v15 = vld [vmem:[%s24092_s2 + $0x168] sm:$0xff] }
 0x130   : > { %24389 = vst [vmem:[#allocation9_spill] sm:$0xff] %v15733_v59  ;;  %935 = vmatmul.f32.vlgmr.msra.gmra.mxu3 %v15733_v59  ;;  %v739_v8 = vsub.f32 %v15727_v35, %v15733_v59 }
 0x131   : > { %1246 = vmatpush.msra.mxu1 %v15528_v16  ;;  %1287 = vmatpush.msra.mxu2 %v1094_v20 }
 0x132   : > { %1350 = vmatpush.msra.mxu3 %v15512_v5  ;;  %v15745_v30 = vand.u32 4294901760, %v739_v8  ;;  %v511_v5 = vld [vmem:[%s24092_s2 + $0x178] sm:$0xff] }
 0x133   : > { %1248 = vmatpush.msra.mxu1 %v15541_v21  ;;  %1291 = vmatpush.msra.mxu2 %v1100_v26 }
 0x134   : > { %1352 = vmatpush.msra.mxu3 %v15518_v10  ;;  %741 = vmatmul.f32.vlgmr.msra.gmra.mxu0 %v15745_v30  ;;  %v510_v10 = vld [vmem:[%s24092_s2 + $0x170] sm:$0xff] }
 0x135   : > { %1041 = vmatmul.f32.vlgmr.msrb.gmra.mxu1 %v15724_v52  ;;  %1189 = vmatpush.msra.mxu0 %v15521_v11  ;;  %v15777_v11 = vand.u32 4294901760, %v511_v5 }
 0x136   : > { %1250 = vmatpush.msra.mxu1 %v15554_v27  ;;  %1295 = vmatpush.msra.mxu2 %v1106_v46  ;;  %v506_v46 = vld [vmem:[%s24092_s2 + $0x150] sm:$0xff] }
 0x137   : > { %1354 = vmatpush.msra.mxu3 %v15528_v16  ;;  %1082 = vmatmul.f32.vlgmr.msrb.gmra.mxu2 %v15745_v30  ;;  %v15787_v16 = vand.u32 4294901760, %v510_v10  ;;  %v15798_v20 = vsub.f32 %v511_v5, %v15777_v11 }
 0x138   : > { %1192 = vmatpush.msra.mxu0 %v15531_v17  ;;  %1252 = vmatpush.msra.mxu1 %v15566_v44  ;;  %v508_v17 = vld [vmem:[%s24092_s2 + $0x160] sm:$0xff] }
 0x139   : > { %1299 = vmatpush.msra.mxu2 %v1112_v53  ;;  %1356 = vmatpush.msra.mxu3 %v15541_v21  ;;  %v15800_v21 = vand.u32 4294901760, %v509_v15  ;;  %v15811_v26 = vsub.f32 %v510_v10, %v15787_v16  ;;  %v505_v53 = vld [vmem:[%s24092_s2 + $0x148] sm:$0xff]  ;;  %v15957_v10 = vand.u32 4294901760, %v499_v12 }
 0x13a   : > { %1183 = vmatmul.f32.vlgmr.msrb.gmra.mxu3 %v15724_v52  ;;  %1195 = vmatpush.msra.mxu0 %v15544_v22  ;;  %v507_v22 = vld [vmem:[%s24092_s2 + $0x158] sm:$0xff] }
 0x13b   : > { %1254 = vmatpush.msra.mxu1 %v15577_v54  ;;  %1303 = vmatpush.msra.mxu2 %v1118_v3  ;;  %v15843_v3 = vand.u32 4294901760, %v506_v46 }
 0x13c   : > { %1358 = vmatpush.msra.mxu3 %v15554_v27  ;;  %1198 = vmatpush.msra.mxu0 %v15557_v28  ;;  %v15813_v27 = vand.u32 4294901760, %v508_v17  ;;  %v24121_v28 = vand.u32 4294901760, %v15798_v20 }
 0x13d   : > { %1256 = vmatpush.msra.mxu1 %v15593_v7  ;;  %1307 = vmatpush.msra.mxu2 %v1124_v37 }
 0x13e   : > { %1360 = vmatpush.msra.mxu3 %v15566_v44  ;;  %1004 = vmatmul.f32.vlgmr.msrb.gmra.mxu0 %v15724_v52  ;;  %v15822_v44 = vsub.f32 %v509_v15, %v15800_v21 }
 0x13f   : > { %1201 = vmatpush.msra.mxu0 %v15569_v45  ;;  %1258 = vmatpush.msra.mxu1 %v15606_v42  ;;  %v15824_v45 = vand.u32 4294901760, %v507_v22 }
 0x140   : > { %1311 = vmatpush.msra.mxu2 %v1130_v62  ;;  %1362 = vmatpush.msra.mxu3 %v15577_v54  ;;  %v24120_v54 = vand.u32 4294901760, %v15811_v26  ;;  %v24119_v37 = vand.u32 4294901760, %v15822_v44 }
 0x141   : > { %1204 = vmatpush.msra.mxu0 %v15580_v58  ;;  %1260 = vmatpush.msra.mxu1 %v15618_v57  ;;  %v15839_v58 = vsub.f32 %v508_v17, %v15813_v27  ;;  %v497_v17 = vld [vmem:[%s24092_s2 + $0x108] sm:$0xff] }
 0x142   : > { %1315 = vmatpush.msra.mxu2 %v1136_v0  ;;  %1364 = vmatpush.msra.mxu3 %v15593_v7  ;;  %v504_v7 = vld [vmem:[%s24092_s2 + $0x140] sm:$0xff]  ;;  %v503_v0 = vld [vmem:[%s24092_s2 + $0x138] sm:$0xff] }
 0x143   : > { %1207 = vmatpush.msra.mxu0 %v15596_v14  ;;  %1262 = vmatpush.msra.mxu1 %v15629_v9  ;;  %v1430_v14 = vsub.f32 %v15798_v20, %v24121_v28  ;;  %v15869_v62 = vand.u32 4294901760, %v504_v7 }
 0x144   : > { %1319 = vmatpush.msra.mxu2 %v1142_v39  ;;  %1366 = vmatpush.msra.mxu3 %v15606_v42  ;;  %v15856_v42 = vsub.f32 %v507_v22, %v15824_v45  ;;  %v1442_v39 = vsub.f32 %v15822_v44, %v24119_v37 }
 0x145   : > { %1210 = vmatpush.msra.mxu0 %v15609_v43  ;;  %1264 = vmatpush.msra.mxu1 %v15645_v40  ;;  %v15858_v43 = vand.u32 4294901760, %v505_v53 }
 0x146   : > { %1323 = vmatpush.msra.mxu2 %v1148_v18  ;;  %1368 = vmatpush.msra.mxu3 %v15618_v57  ;;  %v1436_v57 = vsub.f32 %v15811_v26, %v24120_v54 }
 0x147   : > { %1213 = vmatpush.msra.mxu0 %v15621_v61  ;;  %1266 = vmatpush.msra.mxu1 %v15658_v19  ;;  %v24118_v61 = vand.u32 4294901760, %v15839_v58  ;;  %v15887_v18 = vsub.f32 %v505_v53, %v15858_v43  ;;  %v15970_v53 = vsub.f32 %v500_v31, %v15942_v25 }
 0x148   : > { %1327 = vmatpush.msra.mxu2 %v1154_v49  ;;  %1370 = vmatpush.msra.mxu3 %v15629_v9  ;;  %v15877_v9 = vsub.f32 %v506_v46, %v15843_v3  ;;  %v15894_v49 = vand.u32 4294901760, %v503_v0 }
 0x149   : > { %1216 = vmatpush.msra.mxu0 %v15632_v13  ;;  %1268 = vmatpush.msra.mxu1 %v15670_v33  ;;  %v1431_v13 = vand.u32 4294901760, %v1430_v14  ;;  %v24114_v1 = vand.u32 4294901760, %v15887_v18  ;;  %v496_v14 = vld [vmem:[%s24092_s2 + $0x100] sm:$0xff] }
 0x14a   : > { %1331 = vmatpush.msra.mxu2 %v1160_v60  ;;  %1372 = vmatpush.msra.mxu3 %v15645_v40  ;;  %v24116_v40 = vand.u32 4294901760, %v15856_v42  ;;  %v1448_v60 = vsub.f32 %v15839_v58, %v24118_v61  ;;  %v518_v61 = vld [vmem:[%s24092_s2 + $0x1b0] sm:$0xff] }
 0x14b   : > { %1219 = vmatpush.msra.mxu0 %v15648_v47  ;;  %1270 = vmatpush.msra.mxu1 %v15681_v2  ;;  %v502_v47 = vld [vmem:[%s24092_s2 + $0x130] sm:$0xff]  ;;  %v1466_v8 = vsub.f32 %v15887_v18, %v24114_v1  ;;  %v519_v1 = vld [vmem:[%s24092_s2 + $0x1b8] sm:$0xff] }
 0x14c   : > { %1335 = vmatpush.msra.mxu2 %v1166_v36  ;;  %1374 = vmatpush.msra.mxu3 %v15658_v19  ;;  %v1437_v19 = vand.u32 4294901760, %v1436_v57  ;;  %v15903_v36 = vsub.f32 %v504_v7, %v15869_v62  ;;  %v15911_v51 = vand.u32 4294901760, %v502_v47  ;;  %v1454_v55 = vsub.f32 %v15856_v42, %v24116_v40 }
 0x14d   : > { %1222 = vmatpush.msra.mxu0 %v15661_v23  ;;  %1272 = vmatpush.msra.mxu1 %v15697_v56  ;;  %v501_v23 = vld [vmem:[%s24092_s2 + $0x128] sm:$0xff]  ;;  %v1467_v7 = vand.u32 4294901760, %v1466_v8  ;;  %v16150_v54 = vand.u32 4294901760, %v519_v1 }
 0x14e   : > { %1339 = vmatpush.msra.mxu2 %v1172_v34  ;;  %1376 = vmatpush.msra.mxu3 %v15670_v33  ;;  %v24115_v34 = vand.u32 4294901760, %v15877_v9  ;;  %v1443_v33 = vand.u32 4294901760, %v1442_v39  ;;  %v15927_v48 = vand.u32 4294901760, %v501_v23  ;;  %v24112_v4 = vand.u32 4294901760, %v15903_v36 }
 0x14f   : > { %1276 = vmatmul.f32.vlgmr.msra.gmra.mxu1 %v15733_v59  ;;  %1225 = vmatpush.msra.mxu0 %v15673_v41  ;;  %v15925_v41 = vsub.f32 %v503_v0, %v15894_v49  ;;  %v15940_v24 = vsub.f32 %v502_v47, %v15911_v51  ;;  %v1455_v32 = vand.u32 4294901760, %v1454_v55  ;;  %v16179_v50 = vsub.f32 %v519_v1, %v16150_v54 }
 0x150   : > { %1432 = vmatpush.msrb.mxu1 %v1431_v13  ;;  %1343 = vmatpush.msra.mxu2 %v1178_v6  ;;  %v1449_v6 = vand.u32 4294901760, %v1448_v60  ;;  %v15955_v5 = vsub.f32 %v501_v23, %v15927_v48  ;;  %v1472_v15 = vsub.f32 %v15903_v36, %v24112_v4  ;;  %v15985_v13 = vsub.f32 %v499_v12, %v15957_v10  ;;  %v520_v4 = vld [vmem:[%s24092_s2 + $0x1c0] sm:$0xff] }
 0x151   : > { %1378 = vmatpush.msra.mxu3 %v15681_v2  ;;  %1345 = vmatmul.f32.vlgmr.msra.gmra.mxu2 %v15724_v52  ;;  %v1460_v2 = vsub.f32 %v15877_v9, %v24115_v34  ;;  %v24110_v46 = vand.u32 4294901760, %v15940_v24  ;;  %v15999_v23 = vand.u32 4294901760, %v496_v14  ;;  %v16134_v40 = vand.u32 4294901760, %v520_v4 }
 0x152   : > { %1438 = vmatpush.msrb.mxu1 %v1437_v19  ;;  %1530 = vmatpush.msrb.mxu2 %v15798_v20  ;;  %v24109_v0 = vand.u32 4294901760, %v15955_v5  ;;  %v1473_v39 = vand.u32 4294901760, %v1472_v15  ;;  %v24108_v19 = vand.u32 4294901760, %v15970_v53  ;;  %v24106_v31 = vand.u32 4294901760, %v15985_v13 }
 0x153   : > { %1228 = vmatpush.msra.mxu0 %v15684_v29  ;;  %1380 = vmatpush.msra.mxu3 %v15697_v56  ;;  %v498_v29 = vld [vmem:[%s24092_s2 + $0x110] sm:$0xff]  ;;  %v24111_v56 = vand.u32 4294901760, %v15925_v41  ;;  %v1461_v22 = vand.u32 4294901760, %v1460_v2  ;;  %v1484_v47 = vsub.f32 %v15940_v24, %v24110_v46  ;;  %v16019_v8 = vsub.f32 %v496_v14, %v15999_v23 }
 0x154   : > { %1382 = vmatmul.f32.vlgmr.msra.gmra.mxu3 %v15724_v52  ;;  %1444 = vmatpush.msrb.mxu1 %v1443_v33  ;;  %v1490_v55 = vsub.f32 %v15955_v5, %v24109_v0  ;;  %v1496_v2 = vsub.f32 %v15970_v53, %v24108_v19  ;;  %v522_v19 = vld [vmem:[%s24092_s2 + $0x1d0] sm:$0xff] }
 0x155   : > { %1533 = vmatpush.msrb.mxu2 %v15811_v26  ;;  %1583 = vmatpush.msrb.mxu3 %v15777_v11  ;;  %v1478_v57 = vsub.f32 %v15925_v41, %v24111_v56  ;;  %v1485_v12 = vand.u32 4294901760, %v1484_v47 }
 0x156   : > { %1231 = vmatpush.msra.mxu0 %v15700_v63  ;;  %1450 = vmatpush.msrb.mxu1 %v1449_v6  ;;  %v15972_v63 = vand.u32 4294901760, %v498_v29  ;;  %v1491_v15 = vand.u32 4294901760, %v1490_v55  ;;  %v1497_v14 = vand.u32 4294901760, %v1496_v2  ;;  %v525_v2 = vld [vmem:[%s24092_s2 + $0x1e8] sm:$0xff] }
 0x157   : > { %1536 = vmatpush.msrb.mxu2 %v15822_v44  ;;  %1585 = vmatpush.msrb.mxu3 %v15787_v16  ;;  %v1479_v33 = vand.u32 4294901760, %v1478_v57 }
 0x158   : > { %1234 = vmatpush.msra.mxu0 %v15708_v38  ;;  %1456 = vmatpush.msrb.mxu1 %v1455_v32  ;;  %v15987_v38 = vand.u32 4294901760, %v497_v17  ;;  %v15997_v60 = vsub.f32 %v498_v29, %v15972_v63  ;;  %v527_v29 = vld [vmem:[%s24092_s2 + $0x1f8] sm:$0xff] }
 0x159   : > { %1237 = vmatmul.f32.vlgmr.msra.gmra.mxu0 %v15727_v35  ;;  %1539 = vmatpush.msrb.mxu2 %v15839_v58  ;;  %v16041_v47 = vand.u32 4294901760, %v527_v29 }
 0x15a   : > { %1387 = vmatpush.msrb.mxu0 %v15777_v11  ;;  %1587 = vmatpush.msrb.mxu3 %v15800_v21  ;;  %v16009_v6 = vsub.f32 %v497_v17, %v15987_v38  ;;  %v24105_v32 = vand.u32 4294901760, %v15997_v60  ;;  %v1502_v17 = vsub.f32 %v15985_v13, %v24106_v31  ;;  %v16068_v31 = vand.u32 4294901760, %v525_v2 }
 0x15b   : > { %1462 = vmatpush.msrb.mxu1 %v1461_v22  ;;  %1542 = vmatpush.msrb.mxu2 %v15856_v42 }
 0x15c   : > { %1389 = vmatpush.msrb.mxu0 %v15787_v16  ;;  %1589 = vmatpush.msrb.mxu3 %v15813_v27  ;;  %v24104_v22 = vand.u32 4294901760, %v16009_v6  ;;  %v1508_v57 = vsub.f32 %v15997_v60, %v24105_v32  ;;  %v524_v32 = vld [vmem:[%s24092_s2 + $0x1e0] sm:$0xff] }
 0x15d   : > { %1468 = vmatpush.msrb.mxu1 %v1467_v7  ;;  %1545 = vmatpush.msrb.mxu2 %v15877_v9  ;;  %v526_v7 = vld [vmem:[%s24092_s2 + $0x1f0] sm:$0xff] }
 0x15e   : > { %1391 = vmatpush.msrb.mxu0 %v15800_v21  ;;  %1591 = vmatpush.msrb.mxu3 %v15824_v45  ;;  %v1514_v55 = vsub.f32 %v16009_v6, %v24104_v22  ;;  %v16061_v22 = vsub.f32 %v527_v29, %v16041_v47 }
 0x15f   : > { %1474 = vmatpush.msrb.mxu1 %v1473_v39  ;;  %1548 = vmatpush.msrb.mxu2 %v15887_v18  ;;  %v24107_v39 = vand.u32 4294901760, %v16019_v8 }
 0x160   : > { %1393 = vmatpush.msrb.mxu0 %v15813_v27  ;;  %1593 = vmatpush.msrb.mxu3 %v15843_v3  ;;  %v24113_v0 = vand.u32 4294901760, %v16061_v22 }
 0x161   : > { %1480 = vmatpush.msrb.mxu1 %v1479_v33  ;;  %1551 = vmatpush.msrb.mxu2 %v15903_v36  ;;  %v1503_v33 = vand.u32 4294901760, %v1502_v17  ;;  %v1520_v17 = vsub.f32 %v16019_v8, %v24107_v39  ;;  %v16079_v39 = vand.u32 4294901760, %v524_v32 }
 0x162   : > { %1395 = vmatpush.msrb.mxu0 %v15824_v45  ;;  %1595 = vmatpush.msrb.mxu3 %v15858_v43 }
 0x163   : > { %1486 = vmatpush.msrb.mxu1 %v1485_v12  ;;  %1554 = vmatpush.msrb.mxu2 %v15925_v41  ;;  %v16049_v12 = vand.u32 4294901760, %v526_v7  ;;  %v16103_v56 = vsub.f32 %v524_v32, %v16079_v39 }
 0x164   : > { %1397 = vmatpush.msrb.mxu0 %v15843_v3  ;;  %1597 = vmatpush.msrb.mxu3 %v15869_v62 }
 0x165   : > { %1492 = vmatpush.msrb.mxu1 %v1491_v15  ;;  %1557 = vmatpush.msrb.mxu2 %v15940_v24  ;;  %v1509_v15 = vand.u32 4294901760, %v1508_v57  ;;  %v1515_v57 = vand.u32 4294901760, %v1514_v55  ;;  %v16075_v29 = vsub.f32 %v526_v7, %v16049_v12  ;;  %v16091_v7 = vsub.f32 %v525_v2, %v16068_v31 }
 0x166   : > { %1399 = vmatpush.msrb.mxu0 %v15858_v43  ;;  %1599 = vmatpush.msrb.mxu3 %v15894_v49  ;;  %v1771_v2 = vsub.f32 %v16061_v22, %v24113_v0  ;;  %v24123_v34 = vand.u32 4294901760, %v16103_v56 }
 0x167   : > { %1498 = vmatpush.msrb.mxu1 %v1497_v14  ;;  %1560 = vmatpush.msrb.mxu2 %v15955_v5  ;;  %v523_v14 = vld [vmem:[%s24092_s2 + $0x1d8] sm:$0xff]  ;;  %v24117_v46 = vand.u32 4294901760, %v16075_v29  ;;  %v24122_v32 = vand.u32 4294901760, %v16091_v7 }
 0x168   : > { %1401 = vmatpush.msrb.mxu0 %v15869_v62  ;;  %1601 = vmatpush.msrb.mxu3 %v15911_v51  ;;  %v16086_v55 = vand.u32 4294901760, %v523_v14 }
 0x169   : > { %1504 = vmatpush.msrb.mxu1 %v1503_v33  ;;  %1563 = vmatpush.msrb.mxu2 %v15970_v53  ;;  %v1521_v33 = vand.u32 4294901760, %v1520_v17  ;;  %v521_v17 = vld [vmem:[%s24092_s2 + $0x1c8] sm:$0xff] }
 0x16a   : > { %1403 = vmatpush.msrb.mxu0 %v15894_v49  ;;  %1603 = vmatpush.msrb.mxu3 %v15927_v48 }
 0x16b   : > { %1510 = vmatpush.msrb.mxu1 %v1509_v15  ;;  %1566 = vmatpush.msrb.mxu2 %v15985_v13  ;;  %v16095_v15 = vand.u32 4294901760, %v522_v19 }
 0x16c   : > { %1405 = vmatpush.msrb.mxu0 %v15911_v51  ;;  %1605 = vmatpush.msrb.mxu3 %v15942_v25 }
 0x16d   : > { %1516 = vmatpush.msrb.mxu1 %v1515_v57  ;;  %1569 = vmatpush.msrb.mxu2 %v15997_v60  ;;  %v16110_v57 = vsub.f32 %v523_v14, %v16086_v55  ;;  %v1777_v14 = vsub.f32 %v16075_v29, %v24117_v46  ;;  %v16126_v0 = vsub.f32 %v522_v19, %v16095_v15  ;;  %v1772_v46 = vand.u32 4294901760, %v1771_v2 }
 0x16e   : > { %1407 = vmatpush.msrb.mxu0 %v15927_v48  ;;  %1607 = vmatpush.msrb.mxu3 %v15957_v10  ;;  %v16166_v19 = vand.u32 4294901760, %v518_v61 }
 0x16f   : > { %1522 = vmatpush.msrb.mxu1 %v1521_v33  ;;  %1572 = vmatpush.msrb.mxu2 %v16009_v6  ;;  %24390 = vst [vmem:[#allocation10_spill] sm:$0xff] %v16110_v57  ;;  %v16118_v33 = vand.u32 4294901760, %v521_v17  ;;  %v1778_v2 = vand.u32 4294901760, %v1777_v14  ;;  %v24392_v14 = vand.u32 4294901760, %v16110_v57 }
 0x170   : > { %1409 = vmatpush.msrb.mxu0 %v15942_v25  ;;  %1609 = vmatpush.msrb.mxu3 %v15972_v63  ;;  %24391 = vst [vmem:[#allocation11_spill] sm:$0xff] %v16126_v0 }
 0x171   : > { %1524 = vmatmul.f32.vlgmr.msrb.gmra.mxu1 %v15724_v52  ;;  %1575 = vmatpush.msrb.mxu2 %v16019_v8  ;;  %v16148_v37 = vsub.f32 %v521_v17, %v16118_v33  ;;  %v1789_v17 = vsub.f32 %v16103_v56, %v24123_v34  ;;  %v1795_v28 = vsub.f32 %v16110_v57, %v24392_v14 }
 0x172   : > { %1691 = vmatpush.msra.mxu1 %v15777_v11  ;;  %1411 = vmatpush.msrb.mxu0 %v15957_v10  ;;  %v1783_v11 = vsub.f32 %v16091_v7, %v24122_v32  ;;  %v16164_v32 = vsub.f32 %v520_v4, %v16134_v40 }
 0x173   : > { %1611 = vmatpush.msrb.mxu3 %v15987_v38  ;;  %1578 = vmatmul.f32.vlgmr.msrb.gmra.mxu2 %v15727_v35 }
 0x174   : > { %1693 = vmatpush.msra.mxu1 %v15787_v16  ;;  %1728 = vmatpush.msra.mxu2 %v16041_v47  ;;  %v517_v16 = vld [vmem:[%s24092_s2 + $0x1a8] sm:$0xff]  ;;  %v1784_v34 = vand.u32 4294901760, %v1783_v11  ;;  %v16194_v11 = vsub.f32 %v518_v61, %v16166_v19 }
 0x175   : > { %1413 = vmatpush.msrb.mxu0 %v15972_v63  ;;  %1613 = vmatpush.msrb.mxu3 %v15999_v23  ;;  %v16181_v35 = vand.u32 4294901760, %v517_v16 }
 0x176   : > { %1617 = vmatmul.f32.vlgmr.msrb.gmra.mxu3 %v15733_v59  ;;  %1695 = vmatpush.msra.mxu1 %v15800_v21  ;;  %v516_v21 = vld [vmem:[%s24092_s2 + $0x1a0] sm:$0xff]  ;;  %v515_v59 = vld [vmem:[%s24092_s2 + $0x198] sm:$0xff] }
 0x177   : > { %1730 = vmatpush.msra.mxu2 %v16049_v12  ;;  %1773 = vmatpush.msra.mxu3 %v1772_v46  ;;  %v24393_v46 = vand.u32 4294901760, %v16126_v0  ;;  %v16196_v4 = vand.u32 4294901760, %v516_v21  ;;  %v16210_v1 = vsub.f32 %v517_v16, %v16181_v35  ;;  %v16212_v57 = vand.u32 4294901760, %v515_v59 }
 0x178   : > { %1415 = vmatpush.msrb.mxu0 %v15987_v38  ;;  %1697 = vmatpush.msra.mxu1 %v15813_v27  ;;  %v1790_v27 = vand.u32 4294901760, %v1789_v17 }
 0x179   : > { %1732 = vmatpush.msra.mxu2 %v16068_v31  ;;  %1779 = vmatpush.msra.mxu3 %v1778_v2  ;;  %v1801_v14 = vsub.f32 %v16126_v0, %v24393_v46  ;;  %v1796_v2 = vand.u32 4294901760, %v1795_v28  ;;  %v514_v46 = vld [vmem:[%s24092_s2 + $0x190] sm:$0xff]  ;;  %v24394_v0 = vand.u32 4294901760, %v15798_v20  ;;  %v24396_v20 = vand.u32 4294901760, %v15811_v26 }
 0x17a   : > { %1417 = vmatpush.msrb.mxu0 %v15999_v23  ;;  %1699 = vmatpush.msra.mxu1 %v15824_v45  ;;  %v24395_v45 = vand.u32 4294901760, %v16148_v37  ;;  %v16223_v16 = vsub.f32 %v516_v21, %v16196_v4  ;;  %v16225_v17 = vand.u32 4294901760, %v514_v46  ;;  %v24398_v26 = vand.u32 4294901760, %v15822_v44 }
 0x17b   : > { %1423 = vmatmul.f32.vlgmr.msrb.gmra.mxu0 %v15745_v30  ;;  %1734 = vmatpush.msra.mxu2 %v16079_v39  ;;  %v1802_v28 = vand.u32 4294901760, %v1801_v14 }
 0x17c   : > { %1624 = vmatpush.msra.mxu0 %v24394_v0  ;;  %1785 = vmatpush.msra.mxu3 %v1784_v34  ;;  %v1807_v61 = vsub.f32 %v16148_v37, %v24395_v45  ;;  %v24397_v34 = vand.u32 4294901760, %v16164_v32  ;;  %v1824_v45 = vand.u32 4294901760, %v16194_v11 }
 0x17d   : > { %1701 = vmatpush.msra.mxu1 %v15843_v3  ;;  %1736 = vmatpush.msra.mxu2 %v16086_v55  ;;  %v513_v3 = vld [vmem:[%s24092_s2 + $0x188] sm:$0xff] }
 0x17e   : > { %1628 = vmatpush.msra.mxu0 %v24396_v20  ;;  %1791 = vmatpush.msra.mxu3 %v1790_v27  ;;  %v1813_v0 = vsub.f32 %v16164_v32, %v24397_v34  ;;  %v1808_v14 = vand.u32 4294901760, %v1807_v61  ;;  %v24399_v27 = vand.u32 4294901760, %v16179_v50  ;;  %v1830_v20 = vand.u32 4294901760, %v16210_v1 }
 0x17f   : > { %1703 = vmatpush.msra.mxu1 %v15858_v43  ;;  %1738 = vmatpush.msra.mxu2 %v16095_v15  ;;  %v16239_v34 = vsub.f32 %v515_v59, %v16212_v57  ;;  %v512_v43 = vld [vmem:[%s24092_s2 + $0x180] sm:$0xff]  ;;  %v16246_v44 = vand.u32 4294901760, %v513_v3  ;;  %v1825_v59 = vsub.f32 %v16194_v11, %v1824_v45 }
 0x180   : > { %1632 = vmatpush.msra.mxu0 %v24398_v26  ;;  %1797 = vmatpush.msra.mxu3 %v1796_v2  ;;  %v1819_v21 = vsub.f32 %v16179_v50, %v24399_v27  ;;  %v24400_v2 = vand.u32 4294901760, %v15839_v58  ;;  %v1814_v61 = vand.u32 4294901760, %v1813_v0  ;;  %v1836_v26 = vand.u32 4294901760, %v16223_v16 }
 0x181   : > { %1705 = vmatpush.msra.mxu1 %v15869_v62  ;;  %1740 = vmatpush.msra.mxu2 %v16118_v33  ;;  %v16255_v27 = vsub.f32 %v514_v46, %v16225_v17  ;;  %v16259_v62 = vand.u32 4294901760, %v512_v43  ;;  %v24401_v58 = vand.u32 4294901760, %v15856_v42  ;;  %v1831_v0 = vsub.f32 %v16210_v1, %v1830_v20 }
 0x182   : > { %1636 = vmatpush.msra.mxu0 %v24400_v2  ;;  %1803 = vmatpush.msra.mxu3 %v1802_v28  ;;  %v1820_v28 = vand.u32 4294901760, %v1819_v21  ;;  %v1842_v2 = vand.u32 4294901760, %v16239_v34  ;;  %v24402_v46 = vand.u32 4294901760, %v15877_v9  ;;  %v1826_v42 = vand.u32 4294901760, %v1825_v59 }
 0x183   : > { %1707 = vmatpush.msra.mxu1 %v15894_v49  ;;  %1742 = vmatpush.msra.mxu2 %v16134_v40  ;;  %v16270_v49 = vsub.f32 %v513_v3, %v16246_v44  ;;  %v1848_v21 = vand.u32 4294901760, %v16255_v27  ;;  %v24403_v3 = vand.u32 4294901760, %v15887_v18  ;;  %v1832_v9 = vand.u32 4294901760, %v1831_v0 }
 0x184   : > { %1640 = vmatpush.msra.mxu0 %v24401_v58  ;;  %1809 = vmatpush.msra.mxu3 %v1808_v14  ;;  %v1837_v14 = vsub.f32 %v16223_v16, %v1836_v26  ;;  %v24404_v59 = vand.u32 4294901760, %v15903_v36  ;;  %v24406_v0 = vand.u32 4294901760, %v15940_v24 }
 0x185   : > { %1709 = vmatpush.msra.mxu1 %v15911_v51  ;;  %1744 = vmatpush.msra.mxu2 %v16150_v54  ;;  %v16281_v51 = vsub.f32 %v512_v43, %v16259_v62  ;;  %v1849_v18 = vsub.f32 %v16255_v27, %v1848_v21 }
 0x186   : > { %1644 = vmatpush.msra.mxu0 %v24402_v46  ;;  %1815 = vmatpush.msra.mxu3 %v1814_v61  ;;  %v1843_v61 = vsub.f32 %v16239_v34, %v1842_v2  ;;  %v1838_v43 = vand.u32 4294901760, %v1837_v14  ;;  %v24408_v46 = vand.u32 4294901760, %v15970_v53  ;;  %v24411_v53 = vand.u32 4294901760, %v15997_v60 }
 0x187   : > { %1711 = vmatpush.msra.mxu1 %v15927_v48  ;;  %1746 = vmatpush.msra.mxu2 %v16166_v19  ;;  %v1854_v48 = vand.u32 4294901760, %v16270_v49  ;;  %v1860_v58 = vand.u32 4294901760, %v16281_v51  ;;  %v24414_v14 = vand.u32 4294901760, %v16091_v7  ;;  %v24415_v60 = vand.u32 4294901760, %v16019_v8  ;;  %v543_v8 = vld [vmem:[%s24092_s2 + $0x278] sm:$0xff] }
 0x188   : > { %1648 = vmatpush.msra.mxu0 %v24403_v3  ;;  %1821 = vmatpush.msra.mxu3 %v1820_v28  ;;  %v1844_v28 = vand.u32 4294901760, %v1843_v61  ;;  %v24416_v3 = vand.u32 4294901760, %v16103_v56 }
 0x189   : > { %1713 = vmatpush.msra.mxu1 %v15942_v25  ;;  %1748 = vmatpush.msra.mxu2 %v16181_v35  ;;  %v24405_v25 = vand.u32 4294901760, %v15925_v41  ;;  %v1855_v36 = vsub.f32 %v16270_v49, %v1854_v48  ;;  %v1861_v41 = vsub.f32 %v16281_v51, %v1860_v58 }
 0x18a   : > { %1652 = vmatpush.msra.mxu0 %v24404_v59  ;;  %1827 = vmatpush.msra.mxu3 %v1826_v42  ;;  %v24412_v42 = vand.u32 4294901760, %v16075_v29 }
 0x18b   : > { %1715 = vmatpush.msra.mxu1 %v15957_v10  ;;  %1750 = vmatpush.msra.mxu2 %v16196_v4  ;;  %v1850_v10 = vand.u32 4294901760, %v1849_v18  ;;  %v1856_v24 = vand.u32 4294901760, %v1855_v36  ;;  %v538_v36 = vld [vmem:[%s24092_s2 + $0x250] sm:$0xff] }
 0x18c   : > { %1656 = vmatpush.msra.mxu0 %v24405_v25  ;;  %1833 = vmatpush.msra.mxu3 %v1832_v9 }
 0x18d   : > { %1717 = vmatpush.msra.mxu1 %v15972_v63  ;;  %1752 = vmatpush.msra.mxu2 %v16212_v57  ;;  %v24407_v63 = vand.u32 4294901760, %v15955_v5  ;;  %v24409_v5 = vand.u32 4294901760, %v15985_v13  ;;  %v24413_v13 = vand.u32 4294901760, %v16009_v6  ;;  %v24417_v6 = vld [vmem:[#allocation10_spill] sm:$0xff] }
 0x18e   : > { %1660 = vmatpush.msra.mxu0 %v24406_v0  ;;  %1839 = vmatpush.msra.mxu3 %v1838_v43  ;;  %v539_v43 = vld [vmem:[%s24092_s2 + $0x258] sm:$0xff]  ;;  %v16432_v0 = vand.u32 4294901760, %v538_v36 }
 0x18f   : > { %1719 = vmatpush.msra.mxu1 %v15987_v38  ;;  %1754 = vmatpush.msra.mxu2 %v16225_v17  ;;  %v1862_v38 = vand.u32 4294901760, %v1861_v41 }
 0x190   : > { %1664 = vmatpush.msra.mxu0 %v24407_v63  ;;  %1845 = vmatpush.msra.mxu3 %v1844_v28  ;;  %v535_v63 = vld [vmem:[%s24092_s2 + $0x238] sm:$0xff] }
 0x191   : > { %1721 = vmatpush.msra.mxu1 %v15999_v23  ;;  %1756 = vmatpush.msra.mxu2 %v16246_v44  ;;  %v24410_v23 = vand.u32 4294901760, %v16061_v22 }
 0x192   : > { %1668 = vmatpush.msra.mxu0 %v24408_v46  ;;  %1851 = vmatpush.msra.mxu3 %v1850_v10 }
 0x193   : > { %1723 = vmatmul.f32.vlgmr.msra.gmra.mxu1 %v15724_v52  ;;  %1758 = vmatpush.msra.mxu2 %v16259_v62 }
 0x194   : > { %1924 = vmatpush.msrb.mxu1 %v16041_v47  ;;  %1672 = vmatpush.msra.mxu0 %v24409_v5 }
 0x195   : > { %1857 = vmatpush.msra.mxu3 %v1856_v24  ;;  %1764 = vmatmul.f32.vlgmr.msra.gmra.mxu2 %v15745_v30 }
 0x196   : > { %1926 = vmatpush.msrb.mxu1 %v16049_v12  ;;  %1965 = vmatpush.msrb.mxu2 %v24410_v23  ;;  %v533_v23 = vld [vmem:[%s24092_s2 + $0x228] sm:$0xff] }
 0x197   : > { %1676 = vmatpush.msra.mxu0 %v24411_v53  ;;  %1863 = vmatpush.msra.mxu3 %v1862_v38  ;;  %v24424_v53 = vld [vmem:[#allocation9_spill] sm:$0xff] }
 0x198   : > { %1865 = vmatmul.f32.vlgmr.msra.gmra.mxu3 %v15724_v52  ;;  %1928 = vmatpush.msrb.mxu1 %v16068_v31 }
 0x199   : > { %1969 = vmatpush.msrb.mxu2 %v24412_v42  ;;  %2032 = vmatpush.msrb.mxu3 %v16041_v47  ;;  %v24418_v47 = vand.u32 4294901760, %v24417_v6 }
 0x19a   : > { %1680 = vmatpush.msra.mxu0 %v24413_v13  ;;  %1930 = vmatpush.msrb.mxu1 %v16079_v39 }
 0x19b   : > { %1973 = vmatpush.msrb.mxu2 %v24414_v14  ;;  %2034 = vmatpush.msrb.mxu3 %v16049_v12  ;;  %v24419_v12 = vld [vmem:[#allocation11_spill] sm:$0xff]  ;;  %v532_v14 = vld [vmem:[%s24092_s2 + $0x220] sm:$0xff] }
 0x19c   : > { %1684 = vmatpush.msra.mxu0 %v24415_v60  ;;  %1932 = vmatpush.msrb.mxu1 %v16086_v55  ;;  %v24420_v9 = vand.u32 4294901760, %v24419_v12  ;;  %v16515_v60 = vand.u32 4294901760, %v533_v23 }
 0x19d   : > { %1686 = vmatmul.f32.vlgmr.msra.gmra.mxu0 %v15724_v52  ;;  %1977 = vmatpush.msrb.mxu2 %v24416_v3 }
 0x19e   : > { %1871 = vmatpush.msrb.mxu0 %v16061_v22  ;;  %2036 = vmatpush.msrb.mxu3 %v16068_v31  ;;  %v542_v31 = vld [vmem:[%s24092_s2 + $0x270] sm:$0xff]  ;;  %v16365_v22 = vand.u32 4294901760, %v543_v8 }
 0x19f   : > { %1934 = vmatpush.msrb.mxu1 %v16095_v15  ;;  %1981 = vmatpush.msrb.mxu2 %v24418_v47  ;;  %v16375_v61 = vand.u32 4294901760, %v542_v31 }
 0x1a0   : > { %1874 = vmatpush.msrb.mxu0 %v16075_v29  ;;  %2038 = vmatpush.msrb.mxu3 %v16079_v39  ;;  %v24421_v29 = vand.u32 4294901760, %v16148_v37  ;;  %v541_v39 = vld [vmem:[%s24092_s2 + $0x268] sm:$0xff]  ;;  %v16386_v59 = vsub.f32 %v543_v8, %v16365_v22  ;;  %v16530_v8 = vand.u32 4294901760, %v532_v14 }
 0x1a1   : > { %1936 = vmatpush.msrb.mxu1 %v16118_v33  ;;  %1985 = vmatpush.msrb.mxu2 %v24420_v9 }
 0x1a2   : > { %1877 = vmatpush.msrb.mxu0 %v16091_v7  ;;  %2040 = vmatpush.msrb.mxu3 %v16086_v55  ;;  %v24422_v55 = vand.u32 4294901760, %v16164_v32  ;;  %v540_v7 = vld [vmem:[%s24092_s2 + $0x260] sm:$0xff]  ;;  %v24152_v25 = vand.u32 4294901760, %v16386_v59 }
 0x1a3   : > { %1938 = vmatpush.msrb.mxu1 %v16134_v40  ;;  %1989 = vmatpush.msrb.mxu2 %v24421_v29  ;;  %v16401_v18 = vand.u32 4294901760, %v540_v7 }
 0x1a4   : > { %1880 = vmatpush.msrb.mxu0 %v16103_v56  ;;  %2042 = vmatpush.msrb.mxu3 %v16095_v15  ;;  %v16388_v56 = vand.u32 4294901760, %v541_v39  ;;  %v24423_v15 = vand.u32 4294901760, %v16179_v50 }
 0x1a5   : > { %1940 = vmatpush.msrb.mxu1 %v16150_v54  ;;  %1993 = vmatpush.msrb.mxu2 %v24422_v55  ;;  %v529_v55 = vld [vmem:[%s24092_s2 + $0x208] sm:$0xff] }
 0x1a6   : > { %1883 = vmatpush.msrb.mxu0 %v24417_v6  ;;  %2044 = vmatpush.msrb.mxu3 %v16118_v33  ;;  %v16399_v33 = vsub.f32 %v542_v31, %v16375_v61  ;;  %v16410_v28 = vsub.f32 %v541_v39, %v16388_v56  ;;  %v531_v6 = vld [vmem:[%s24092_s2 + $0x218] sm:$0xff]  ;;  %v16543_v31 = vsub.f32 %v533_v23, %v16515_v60 }
 0x1a7   : > { %1942 = vmatpush.msrb.mxu1 %v16166_v19  ;;  %1997 = vmatpush.msrb.mxu2 %v24423_v15  ;;  %v16545_v29 = vand.u32 4294901760, %v531_v6 }
 0x1a8   : > { %1886 = vmatpush.msrb.mxu0 %v24419_v12  ;;  %2046 = vmatpush.msrb.mxu3 %v16134_v40  ;;  %v16412_v40 = vand.u32 4294901760, %v539_v43 }
 0x1a9   : > { %1944 = vmatpush.msrb.mxu1 %v16181_v35  ;;  %2001 = vmatpush.msrb.mxu2 %v1824_v45  ;;  %v16427_v45 = vsub.f32 %v540_v7, %v16401_v18 }
 0x1aa   : > { %1889 = vmatpush.msrb.mxu0 %v16148_v37  ;;  %2048 = vmatpush.msrb.mxu3 %v16150_v54  ;;  %v537_v54 = vld [vmem:[%s24092_s2 + $0x248] sm:$0xff]  ;;  %v24150_v37 = vand.u32 4294901760, %v16399_v33  ;;  %v16444_v10 = vsub.f32 %v539_v43, %v16412_v40  ;;  %v16558_v43 = vsub.f32 %v532_v14, %v16530_v8 }
 0x1ab   : > { %1946 = vmatpush.msrb.mxu1 %v16196_v4  ;;  %2005 = vmatpush.msrb.mxu2 %v1830_v20  ;;  %v536_v20 = vld [vmem:[%s24092_s2 + $0x240] sm:$0xff] }
 0x1ac   : > { %1892 = vmatpush.msrb.mxu0 %v16164_v32  ;;  %2050 = vmatpush.msrb.mxu3 %v16166_v19  ;;  %v2112_v32 = vsub.f32 %v16386_v59, %v24152_v25  ;;  %v24149_v19 = vand.u32 4294901760, %v16410_v28  ;;  %v16457_v41 = vand.u32 4294901760, %v536_v20  ;;  %v24147_v24 = vand.u32 4294901760, %v16444_v10 }
 0x1ad   : > { %1948 = vmatpush.msrb.mxu1 %v16212_v57  ;;  %2009 = vmatpush.msrb.mxu2 %v1836_v26  ;;  %v16446_v26 = vand.u32 4294901760, %v537_v54 }
 0x1ae   : > { %1895 = vmatpush.msrb.mxu0 %v16179_v50  ;;  %2052 = vmatpush.msrb.mxu3 %v16181_v35  ;;  %v2118_v50 = vsub.f32 %v16399_v33, %v24150_v37  ;;  %v24148_v35 = vand.u32 4294901760, %v16427_v45  ;;  %v16491_v5 = vsub.f32 %v536_v20, %v16457_v41  ;;  %v2136_v42 = vsub.f32 %v16444_v10, %v24147_v24  ;;  %v24425_v20 = vld [vmem:[#allocation8_spill] sm:$0xff]  ;;  %v550_v24 = vld [vmem:[%s24092_s2 + $0x2b0] sm:$0xff] }
 0x1af   : > { %1950 = vmatpush.msrb.mxu1 %v16225_v17  ;;  %2013 = vmatpush.msrb.mxu2 %v1842_v2  ;;  %v2124_v2 = vsub.f32 %v16410_v28, %v24149_v19  ;;  %v16475_v46 = vsub.f32 %v537_v54, %v16446_v26  ;;  %v528_v54 = vld [vmem:[%s24092_s2 + $0x200] sm:$0xff]  ;;  %v16754_v25 = vand.u32 4294901760, %v550_v24 }
 0x1b0   : > { %1898 = vmatpush.msrb.mxu0 %v16194_v11  ;;  %2054 = vmatpush.msrb.mxu3 %v16196_v4  ;;  %v16466_v11 = vsub.f32 %v538_v36, %v16432_v0  ;;  %v2113_v4 = vand.u32 4294901760, %v2112_v32  ;;  %v2130_v38 = vsub.f32 %v16427_v45, %v24148_v35  ;;  %v24143_v3 = vand.u32 4294901760, %v16491_v5 }
 0x1b1   : > { %1952 = vmatpush.msrb.mxu1 %v16246_v44  ;;  %2017 = vmatpush.msrb.mxu2 %v1848_v21  ;;  %v534_v21 = vld [vmem:[%s24092_s2 + $0x230] sm:$0xff]  ;;  %v24144_v13 = vand.u32 4294901760, %v16475_v46  ;;  %v2137_v12 = vand.u32 4294901760, %v2136_v42 }
 0x1b2   : > { %1901 = vmatpush.msrb.mxu0 %v16210_v1  ;;  %2056 = vmatpush.msrb.mxu3 %v16212_v57  ;;  %v16483_v57 = vand.u32 4294901760, %v535_v63  ;;  %v2119_v1 = vand.u32 4294901760, %v2118_v50  ;;  %v2154_v39 = vsub.f32 %v16491_v5, %v24143_v3  ;;  %v24139_v50 = vand.u32 4294901760, %v16543_v31  ;;  %v551_v3 = vld [vmem:[%s24092_s2 + $0x2b8] sm:$0xff] }
 0x1b3   : > { %1954 = vmatpush.msrb.mxu1 %v16259_v62  ;;  %2021 = vmatpush.msrb.mxu2 %v1854_v48  ;;  %v2125_v48 = vand.u32 4294901760, %v2124_v2  ;;  %v2148_v9 = vsub.f32 %v16475_v46, %v24144_v13  ;;  %v16738_v19 = vand.u32 4294901760, %v551_v3 }
 0x1b4   : > { %1904 = vmatpush.msrb.mxu0 %v16223_v16  ;;  %2058 = vmatpush.msrb.mxu3 %v16225_v17  ;;  %v24145_v16 = vand.u32 4294901760, %v16466_v11  ;;  %v16500_v17 = vand.u32 4294901760, %v534_v21 }
 0x1b5   : > { %1958 = vmatmul.f32.vlgmr.msrb.gmra.mxu1 %v24424_v53  ;;  %2025 = vmatpush.msrb.mxu2 %v1860_v58  ;;  %v16513_v58 = vsub.f32 %v535_v63, %v16483_v57  ;;  %v2149_v36 = vand.u32 4294901760, %v2148_v9  ;;  %v16573_v63 = vsub.f32 %v531_v6, %v16545_v29  ;;  %v559_v9 = vld [vmem:[%s24092_s2 + $0x2f8] sm:$0xff]  ;;  %v16767_v37 = vsub.f32 %v551_v3, %v16738_v19 }
 0x1b6   : > { %2114 = vmatpush.msra.mxu1 %v2113_v4  ;;  %1907 = vmatpush.msrb.mxu0 %v16239_v34  ;;  %v2131_v34 = vand.u32 4294901760, %v2130_v38  ;;  %v16528_v47 = vsub.f32 %v534_v21, %v16500_v17  ;;  %v2155_v4 = vand.u32 4294901760, %v2154_v39  ;;  %v24138_v21 = vand.u32 4294901760, %v16558_v43 }
 0x1b7   : > { %2060 = vmatpush.msrb.mxu3 %v16246_v44  ;;  %2027 = vmatmul.f32.vlgmr.msrb.gmra.mxu2 %v15724_v52  ;;  %v2142_v44 = vsub.f32 %v16466_v11, %v24145_v16  ;;  %v16587_v38 = vand.u32 4294901760, %v528_v54  ;;  %v24137_v42 = vand.u32 4294901760, %v16573_v63 }
 0x1b8   : > { %2120 = vmatpush.msra.mxu1 %v2119_v1  ;;  %2212 = vmatpush.msra.mxu2 %v16386_v59  ;;  %v24140_v15 = vand.u32 4294901760, %v16528_v47  ;;  %v2178_v6 = vsub.f32 %v16558_v43, %v24138_v21 }
 0x1b9   : > { %1910 = vmatpush.msrb.mxu0 %v16255_v27  ;;  %2062 = vmatpush.msrb.mxu3 %v16259_v62  ;;  %v530_v27 = vld [vmem:[%s24092_s2 + $0x210] sm:$0xff]  ;;  %v24141_v62 = vand.u32 4294901760, %v16513_v58  ;;  %v2143_v7 = vand.u32 4294901760, %v2142_v44  ;;  %v2184_v39 = vsub.f32 %v16573_v63, %v24137_v42 }
 0x1ba   : > { %2064 = vmatmul.f32.vlgmr.msrb.gmra.mxu3 %v15724_v52  ;;  %2126 = vmatpush.msra.mxu1 %v2125_v48  ;;  %v2166_v2 = vsub.f32 %v16528_v47, %v24140_v15  ;;  %v2172_v48 = vsub.f32 %v16543_v31, %v24139_v50  ;;  %v554_v42 = vld [vmem:[%s24092_s2 + $0x2d0] sm:$0xff] }
 0x1bb   : > { %2215 = vmatpush.msra.mxu2 %v16399_v33  ;;  %2265 = vmatpush.msra.mxu3 %v16365_v22  ;;  %v2160_v32 = vsub.f32 %v16513_v58, %v24141_v62  ;;  %v552_v62 = vld [vmem:[%s24092_s2 + $0x2c0] sm:$0xff] }
 0x1bc   : > { %1913 = vmatpush.msrb.mxu0 %v16270_v49  ;;  %2132 = vmatpush.msra.mxu1 %v2131_v34  ;;  %v16560_v49 = vand.u32 4294901760, %v530_v27  ;;  %v2167_v34 = vand.u32 4294901760, %v2166_v2  ;;  %v2185_v2 = vand.u32 4294901760, %v2184_v39  ;;  %v16722_v16 = vand.u32 4294901760, %v552_v62 }
 0x1bd   : > { %2218 = vmatpush.msra.mxu2 %v16410_v28  ;;  %2267 = vmatpush.msra.mxu3 %v16375_v61  ;;  %v2161_v23 = vand.u32 4294901760, %v2160_v32 }
 0x1be   : > { %1916 = vmatpush.msrb.mxu0 %v16281_v51  ;;  %2138 = vmatpush.msra.mxu1 %v2137_v12  ;;  %v16575_v51 = vand.u32 4294901760, %v529_v55  ;;  %v16585_v1 = vsub.f32 %v530_v27, %v16560_v49  ;;  %v16607_v12 = vsub.f32 %v528_v54, %v16587_v38  ;;  %v2173_v27 = vand.u32 4294901760, %v2172_v48 }
 0x1bf   : > { %1919 = vmatmul.f32.vlgmr.msrb.gmra.mxu0 %v24425_v20  ;;  %2221 = vmatpush.msra.mxu2 %v16427_v45 }
 0x1c0   : > { %2069 = vmatpush.msra.mxu0 %v16365_v22  ;;  %2269 = vmatpush.msra.mxu3 %v16388_v56  ;;  %v16597_v14 = vsub.f32 %v529_v55, %v16575_v51  ;;  %v24135_v44 = vand.u32 4294901760, %v16585_v1  ;;  %v24136_v32 = vand.u32 4294901760, %v16607_v12 }
 0x1c1   : > { %2144 = vmatpush.msra.mxu1 %v2143_v7  ;;  %2224 = vmatpush.msra.mxu2 %v16444_v10  ;;  %v558_v7 = vld [vmem:[%s24092_s2 + $0x2f0] sm:$0xff] }
 0x1c2   : > { %2071 = vmatpush.msra.mxu0 %v16375_v61  ;;  %2271 = vmatpush.msra.mxu3 %v16401_v18  ;;  %v24134_v55 = vand.u32 4294901760, %v16597_v14  ;;  %v2190_v54 = vsub.f32 %v16585_v1, %v24135_v44  ;;  %v16637_v48 = vand.u32 4294901760, %v558_v7 }
 0x1c3   : > { %2150 = vmatpush.msra.mxu1 %v2149_v36  ;;  %2227 = vmatpush.msra.mxu2 %v16466_v11  ;;  %v2179_v36 = vand.u32 4294901760, %v2178_v6 }
 0x1c4   : > { %2073 = vmatpush.msra.mxu0 %v16388_v56  ;;  %2273 = vmatpush.msra.mxu3 %v16412_v40  ;;  %v2191_v6 = vand.u32 4294901760, %v2190_v54 }
 0x1c5   : > { %2156 = vmatpush.msra.mxu1 %v2155_v4  ;;  %2230 = vmatpush.msra.mxu2 %v16475_v46  ;;  %v16629_v4 = vand.u32 4294901760, %v559_v9 }
 0x1c6   : > { %2075 = vmatpush.msra.mxu0 %v16401_v18  ;;  %2275 = vmatpush.msra.mxu3 %v16432_v0 }
 0x1c7   : > { %2162 = vmatpush.msra.mxu1 %v2161_v23  ;;  %2233 = vmatpush.msra.mxu2 %v16491_v5  ;;  %v2196_v23 = vsub.f32 %v16597_v14, %v24134_v55  ;;  %v16649_v39 = vsub.f32 %v559_v9, %v16629_v4  ;;  %v556_v55 = vld [vmem:[%s24092_s2 + $0x2e0] sm:$0xff]  ;;  %v16663_v9 = vsub.f32 %v558_v7, %v16637_v48 }
 0x1c8   : > { %2077 = vmatpush.msra.mxu0 %v16412_v40  ;;  %2277 = vmatpush.msra.mxu3 %v16446_v26 }
 0x1c9   : > { %2168 = vmatpush.msra.mxu1 %v2167_v34  ;;  %2236 = vmatpush.msra.mxu2 %v16513_v58  ;;  %v557_v34 = vld [vmem:[%s24092_s2 + $0x2e8] sm:$0xff]  ;;  %v2197_v54 = vand.u32 4294901760, %v2196_v23  ;;  %v24142_v21 = vand.u32 4294901760, %v16649_v39  ;;  %v24146_v50 = vand.u32 4294901760, %v16663_v9 }
 0x1ca   : > { %2079 = vmatpush.msra.mxu0 %v16432_v0  ;;  %2279 = vmatpush.msra.mxu3 %v16457_v41  ;;  %v16656_v44 = vand.u32 4294901760, %v557_v34 }
 0x1cb   : > { %2174 = vmatpush.msra.mxu1 %v2173_v27  ;;  %2239 = vmatpush.msra.mxu2 %v16528_v47  ;;  %v2202_v27 = vsub.f32 %v16607_v12, %v24136_v32  ;;  %v16667_v32 = vand.u32 4294901760, %v556_v55 }
 0x1cc   : > { %2081 = vmatpush.msra.mxu0 %v16446_v26  ;;  %2281 = vmatpush.msra.mxu3 %v16483_v57  ;;  %v16679_v7 = vsub.f32 %v557_v34, %v16656_v44  ;;  %v2453_v34 = vsub.f32 %v16649_v39, %v24142_v21 }
 0x1cd   : > { %2180 = vmatpush.msra.mxu1 %v2179_v36  ;;  %2242 = vmatpush.msra.mxu2 %v16543_v31  ;;  %v555_v36 = vld [vmem:[%s24092_s2 + $0x2d8] sm:$0xff]  ;;  %v16691_v15 = vsub.f32 %v556_v55, %v16667_v32 }
 0x1ce   : > { %2083 = vmatpush.msra.mxu0 %v16457_v41  ;;  %2283 = vmatpush.msra.mxu3 %v16500_v17  ;;  %v16674_v23 = vand.u32 4294901760, %v555_v36  ;;  %v24151_v55 = vand.u32 4294901760, %v16679_v7 }
 0x1cf   : > { %2186 = vmatpush.msra.mxu1 %v2185_v2  ;;  %2245 = vmatpush.msra.mxu2 %v16558_v43  ;;  %v2203_v2 = vand.u32 4294901760, %v2202_v27  ;;  %v553_v27 = vld [vmem:[%s24092_s2 + $0x2c8] sm:$0xff]  ;;  %v24153_v13 = vand.u32 4294901760, %v16691_v15 }
 0x1d0   : > { %2085 = vmatpush.msra.mxu0 %v16483_v57  ;;  %2285 = vmatpush.msra.mxu3 %v16515_v60 }
 0x1d1   : > { %2192 = vmatpush.msra.mxu1 %v2191_v6  ;;  %2248 = vmatpush.msra.mxu2 %v16573_v63  ;;  %v16683_v6 = vand.u32 4294901760, %v554_v42 }
 0x1d2   : > { %2087 = vmatpush.msra.mxu0 %v16500_v17  ;;  %2287 = vmatpush.msra.mxu3 %v16530_v8 }
 0x1d3   : > { %2198 = vmatpush.msra.mxu1 %v2197_v54  ;;  %2251 = vmatpush.msra.mxu2 %v16585_v1  ;;  %v16698_v54 = vsub.f32 %v555_v36, %v16674_v23  ;;  %v2459_v36 = vsub.f32 %v16663_v9, %v24146_v50  ;;  %v16714_v21 = vsub.f32 %v554_v42, %v16683_v6  ;;  %v2454_v50 = vand.u32 4294901760, %v2453_v34 }
 0x1d4   : > { %2089 = vmatpush.msra.mxu0 %v16515_v60  ;;  %2289 = vmatpush.msra.mxu3 %v16545_v29 }
 0x1d5   : > { %2204 = vmatpush.msra.mxu1 %v2203_v2  ;;  %2254 = vmatpush.msra.mxu2 %v16597_v14  ;;  %24426 = vst [vmem:[#allocation10_spill] sm:$0xff] %v16698_v54  ;;  %v16706_v2 = vand.u32 4294901760, %v553_v27  ;;  %v24155_v42 = vand.u32 4294901760, %v16698_v54  ;;  %v2460_v34 = vand.u32 4294901760, %v2459_v36 }
 0x1d6   : > { %2091 = vmatpush.msra.mxu0 %v16530_v8  ;;  %2291 = vmatpush.msra.mxu3 %v16560_v49  ;;  %24427 = vst [vmem:[#allocation11_spill] sm:$0xff] %v16714_v21 }
 0x1d7   : > { %2206 = vmatmul.f32.vlgmr.msra.gmra.mxu1 %v15724_v52  ;;  %2257 = vmatpush.msra.mxu2 %v16607_v12  ;;  %v16736_v35 = vsub.f32 %v553_v27, %v16706_v2  ;;  %v2471_v27 = vsub.f32 %v16691_v15, %v24153_v13  ;;  %v2477_v36 = vsub.f32 %v16698_v54, %v24155_v42 }
 0x1d8   : > { %2373 = vmatpush.msrb.mxu1 %v16365_v22  ;;  %2093 = vmatpush.msra.mxu0 %v16545_v29  ;;  %v2465_v22 = vsub.f32 %v16679_v7, %v24151_v55  ;;  %v16752_v55 = vsub.f32 %v552_v62, %v16722_v16 }
 0x1d9   : > { %2293 = vmatpush.msra.mxu3 %v16575_v51  ;;  %2260 = vmatmul.f32.vlgmr.msra.gmra.mxu2 %v24425_v20 }
 0x1da   : > { %2375 = vmatpush.msrb.mxu1 %v16375_v61  ;;  %2410 = vmatpush.msrb.mxu2 %v16629_v4  ;;  %v549_v61 = vld [vmem:[%s24092_s2 + $0x2a8] sm:$0xff]  ;;  %v2466_v13 = vand.u32 4294901760, %v2465_v22  ;;  %v16782_v22 = vsub.f32 %v550_v24, %v16754_v25 }
 0x1db   : > { %2095 = vmatpush.msra.mxu0 %v16560_v49  ;;  %2295 = vmatpush.msra.mxu3 %v16587_v38  ;;  %v16769_v20 = vand.u32 4294901760, %v549_v61 }
 0x1dc   : > { %2299 = vmatmul.f32.vlgmr.msra.gmra.mxu3 %v24424_v53  ;;  %2377 = vmatpush.msrb.mxu1 %v16388_v56  ;;  %v548_v56 = vld [vmem:[%s24092_s2 + $0x2a0] sm:$0xff]  ;;  %v547_v53 = vld [vmem:[%s24092_s2 + $0x298] sm:$0xff] }
 0x1dd   : > { %2412 = vmatpush.msrb.mxu2 %v16637_v48  ;;  %2455 = vmatpush.msrb.mxu3 %v2454_v50  ;;  %v24428_v50 = vand.u32 4294901760, %v16714_v21  ;;  %v16784_v62 = vand.u32 4294901760, %v548_v56  ;;  %v16798_v3 = vsub.f32 %v549_v61, %v16769_v20  ;;  %v16800_v54 = vand.u32 4294901760, %v547_v53 }
 0x1de   : > { %2097 = vmatpush.msra.mxu0 %v16575_v51  ;;  %2379 = vmatpush.msrb.mxu1 %v16401_v18  ;;  %v2472_v18 = vand.u32 4294901760, %v2471_v27 }
 0x1df   : > { %2414 = vmatpush.msrb.mxu2 %v16656_v44  ;;  %2461 = vmatpush.msrb.mxu3 %v2460_v34  ;;  %v2483_v42 = vsub.f32 %v16714_v21, %v24428_v50  ;;  %v2478_v34 = vand.u32 4294901760, %v2477_v36  ;;  %v546_v50 = vld [vmem:[%s24092_s2 + $0x290] sm:$0xff]  ;;  %v24429_v21 = vand.u32 4294901760, %v16386_v59  ;;  %v24431_v59 = vand.u32 4294901760, %v16399_v33 }
 0x1e0   : > { %2099 = vmatpush.msra.mxu0 %v16587_v38  ;;  %2381 = vmatpush.msrb.mxu1 %v16412_v40  ;;  %v24430_v40 = vand.u32 4294901760, %v16736_v35  ;;  %v16811_v61 = vsub.f32 %v548_v56, %v16784_v62  ;;  %v16813_v27 = vand.u32 4294901760, %v546_v50  ;;  %v24433_v33 = vand.u32 4294901760, %v16410_v28 }
 0x1e1   : > { %2105 = vmatmul.f32.vlgmr.msra.gmra.mxu0 %v15745_v30  ;;  %2416 = vmatpush.msrb.mxu2 %v16667_v32  ;;  %v2484_v36 = vand.u32 4294901760, %v2483_v42 }
 0x1e2   : > { %2306 = vmatpush.msrb.mxu0 %v24429_v21  ;;  %2467 = vmatpush.msrb.mxu3 %v2466_v13  ;;  %v2489_v24 = vsub.f32 %v16736_v35, %v24430_v40  ;;  %v24432_v13 = vand.u32 4294901760, %v16752_v55  ;;  %v2506_v40 = vand.u32 4294901760, %v16782_v22 }
 0x1e3   : > { %2383 = vmatpush.msrb.mxu1 %v16432_v0  ;;  %2418 = vmatpush.msrb.mxu2 %v16674_v23  ;;  %v545_v0 = vld [vmem:[%s24092_s2 + $0x288] sm:$0xff] }
 0x1e4   : > { %2310 = vmatpush.msrb.mxu0 %v24431_v59  ;;  %2473 = vmatpush.msrb.mxu3 %v2472_v18  ;;  %v2495_v21 = vsub.f32 %v16752_v55, %v24432_v13  ;;  %v2490_v42 = vand.u32 4294901760, %v2489_v24  ;;  %v24434_v18 = vand.u32 4294901760, %v16767_v37  ;;  %v2512_v59 = vand.u32 4294901760, %v16798_v3 }
 0x1e5   : > { %2385 = vmatpush.msrb.mxu1 %v16446_v26  ;;  %2420 = vmatpush.msrb.mxu2 %v16683_v6  ;;  %v16827_v13 = vsub.f32 %v547_v53, %v16800_v54  ;;  %v544_v26 = vld [vmem:[%s24092_s2 + $0x280] sm:$0xff]  ;;  %v16834_v28 = vand.u32 4294901760, %v545_v0  ;;  %v2507_v53 = vsub.f32 %v16782_v22, %v2506_v40 }
 0x1e6   : > { %2314 = vmatpush.msrb.mxu0 %v24433_v33  ;;  %2479 = vmatpush.msrb.mxu3 %v2478_v34  ;;  %v2501_v56 = vsub.f32 %v16767_v37, %v24434_v18  ;;  %v24435_v34 = vand.u32 4294901760, %v16427_v45  ;;  %v2496_v24 = vand.u32 4294901760, %v2495_v21  ;;  %v2518_v33 = vand.u32 4294901760, %v16811_v61 }
 0x1e7   : > { %2387 = vmatpush.msrb.mxu1 %v16457_v41  ;;  %2422 = vmatpush.msrb.mxu2 %v16706_v2  ;;  %v16843_v18 = vsub.f32 %v546_v50, %v16813_v27  ;;  %v16847_v41 = vand.u32 4294901760, %v544_v26  ;;  %v24436_v45 = vand.u32 4294901760, %v16444_v10  ;;  %v2513_v21 = vsub.f32 %v16798_v3, %v2512_v59 }
 0x1e8   : > { %2318 = vmatpush.msrb.mxu0 %v24435_v34  ;;  %2485 = vmatpush.msrb.mxu3 %v2484_v36  ;;  %v2502_v36 = vand.u32 4294901760, %v2501_v56  ;;  %v2524_v34 = vand.u32 4294901760, %v16827_v13  ;;  %v24437_v50 = vand.u32 4294901760, %v16466_v11  ;;  %v2508_v10 = vand.u32 4294901760, %v2507_v53 }
 0x1e9   : > { %2389 = vmatpush.msrb.mxu1 %v16483_v57  ;;  %2424 = vmatpush.msrb.mxu2 %v16722_v16  ;;  %v16858_v57 = vsub.f32 %v545_v0, %v16834_v28  ;;  %v2530_v56 = vand.u32 4294901760, %v16843_v18  ;;  %v24438_v0 = vand.u32 4294901760, %v16475_v46  ;;  %v2514_v11 = vand.u32 4294901760, %v2513_v21 }
 0x1ea   : > { %2322 = vmatpush.msrb.mxu0 %v24436_v45  ;;  %2491 = vmatpush.msrb.mxu3 %v2490_v42  ;;  %v2519_v42 = vsub.f32 %v16811_v61, %v2518_v33  ;;  %v24439_v53 = vand.u32 4294901760, %v16491_v5  ;;  %v24441_v21 = vand.u32 4294901760, %v16528_v47 }
 0x1eb   : > { %2391 = vmatpush.msrb.mxu1 %v16500_v17  ;;  %2426 = vmatpush.msrb.mxu2 %v16738_v19  ;;  %v16869_v17 = vsub.f32 %v544_v26, %v16847_v41  ;;  %v2531_v46 = vsub.f32 %v16843_v18, %v2530_v56 }
 0x1ec   : > { %2326 = vmatpush.msrb.mxu0 %v24437_v50  ;;  %2497 = vmatpush.msrb.mxu3 %v2496_v24  ;;  %v2525_v24 = vsub.f32 %v16827_v13, %v2524_v34  ;;  %v2520_v26 = vand.u32 4294901760, %v2519_v42  ;;  %v24443_v50 = vand.u32 4294901760, %v16558_v43  ;;  %v24446_v43 = vand.u32 4294901760, %v16585_v1 }
 0x1ed   : > { %2393 = vmatpush.msrb.mxu1 %v16515_v60  ;;  %2428 = vmatpush.msrb.mxu2 %v16754_v25  ;;  %v2536_v60 = vand.u32 4294901760, %v16858_v57  ;;  %v2542_v45 = vand.u32 4294901760, %v16869_v17  ;;  %v24449_v42 = vand.u32 4294901760, %v16679_v7  ;;  %v24450_v1 = vand.u32 4294901760, %v16607_v12  ;;  %v575_v12 = vld [vmem:[%s24092_s2 + $0x378] sm:$0xff] }
 0x1ee   : > { %2330 = vmatpush.msrb.mxu0 %v24438_v0  ;;  %2503 = vmatpush.msrb.mxu3 %v2502_v36  ;;  %v2526_v36 = vand.u32 4294901760, %v2525_v24  ;;  %v24451_v0 = vand.u32 4294901760, %v16691_v15 }
 0x1ef   : > { %2395 = vmatpush.msrb.mxu1 %v16530_v8  ;;  %2430 = vmatpush.msrb.mxu2 %v16769_v20  ;;  %v24440_v8 = vand.u32 4294901760, %v16513_v58  ;;  %v2537_v5 = vsub.f32 %v16858_v57, %v2536_v60  ;;  %v2543_v58 = vsub.f32 %v16869_v17, %v2542_v45 }
 0x1f0   : > { %2334 = vmatpush.msrb.mxu0 %v24439_v53  ;;  %2509 = vmatpush.msrb.mxu3 %v2508_v10  ;;  %v24447_v10 = vand.u32 4294901760, %v16663_v9 }
 0x1f1   : > { %2397 = vmatpush.msrb.mxu1 %v16545_v29  ;;  %2432 = vmatpush.msrb.mxu2 %v16784_v62  ;;  %v2532_v29 = vand.u32 4294901760, %v2531_v46  ;;  %v2538_v47 = vand.u32 4294901760, %v2537_v5  ;;  %v570_v5 = vld [vmem:[%s24092_s2 + $0x350] sm:$0xff] }
 0x1f2   : > { %2338 = vmatpush.msrb.mxu0 %v24440_v8  ;;  %2515 = vmatpush.msrb.mxu3 %v2514_v11 }
 0x1f3   : > { %2399 = vmatpush.msrb.mxu1 %v16560_v49  ;;  %2434 = vmatpush.msrb.mxu2 %v16800_v54  ;;  %v24442_v49 = vand.u32 4294901760, %v16543_v31  ;;  %v24444_v31 = vand.u32 4294901760, %v16573_v63  ;;  %v24448_v63 = vand.u32 4294901760, %v16597_v14  ;;  %v24452_v14 = vld [vmem:[#allocation10_spill] sm:$0xff] }
 0x1f4   : > { %2342 = vmatpush.msrb.mxu0 %v24441_v21  ;;  %2521 = vmatpush.msrb.mxu3 %v2520_v26  ;;  %v571_v26 = vld [vmem:[%s24092_s2 + $0x358] sm:$0xff]  ;;  %v17020_v21 = vand.u32 4294901760, %v570_v5 }
 0x1f5   : > { %2401 = vmatpush.msrb.mxu1 %v16575_v51  ;;  %2436 = vmatpush.msrb.mxu2 %v16813_v27  ;;  %v2544_v51 = vand.u32 4294901760, %v2543_v58 }
 0x1f6   : > { %2346 = vmatpush.msrb.mxu0 %v24442_v49  ;;  %2527 = vmatpush.msrb.mxu3 %v2526_v36  ;;  %v567_v49 = vld [vmem:[%s24092_s2 + $0x338] sm:$0xff] }
 0x1f7   : > { %2403 = vmatpush.msrb.mxu1 %v16587_v38  ;;  %2438 = vmatpush.msrb.mxu2 %v16834_v28  ;;  %v24445_v38 = vand.u32 4294901760, %v16649_v39 }
 0x1f8   : > { %2350 = vmatpush.msrb.mxu0 %v24443_v50  ;;  %2533 = vmatpush.msrb.mxu3 %v2532_v29 }
 0x1f9   : > { %2405 = vmatmul.f32.vlgmr.msrb.gmra.mxu1 %v15724_v52  ;;  %2440 = vmatpush.msrb.mxu2 %v16847_v41 }
 0x1fa   : > { %2606 = vmatpush.msra.mxu1 %v16629_v4  ;;  %2354 = vmatpush.msrb.mxu0 %v24444_v31 }
 0x1fb   : > { %2539 = vmatpush.msrb.mxu3 %v2538_v47  ;;  %2446 = vmatmul.f32.vlgmr.msrb.gmra.mxu2 %v15745_v30 }
 0x1fc   : > { %2608 = vmatpush.msra.mxu1 %v16637_v48  ;;  %2647 = vmatpush.msra.mxu2 %v24445_v38  ;;  %v565_v38 = vld [vmem:[%s24092_s2 + $0x328] sm:$0xff] }
 0x1fd   : > { %2358 = vmatpush.msrb.mxu0 %v24446_v43  ;;  %2545 = vmatpush.msrb.mxu3 %v2544_v51  ;;  %v24459_v43 = vld [vmem:[#allocation9_spill] sm:$0xff] }
 0x1fe   : > { %2547 = vmatmul.f32.vlgmr.msrb.gmra.mxu3 %v15724_v52  ;;  %2610 = vmatpush.msra.mxu1 %v16656_v44 }
 0x1ff   : > { %2651 = vmatpush.msra.mxu2 %v24447_v10  ;;  %2714 = vmatpush.msra.mxu3 %v16629_v4  ;;  %v24453_v4 = vand.u32 4294901760, %v24452_v14 }
 0x200   : > { %2362 = vmatpush.msrb.mxu0 %v24448_v63  ;;  %2612 = vmatpush.msra.mxu1 %v16667_v32 }
 0x201   : > { %2655 = vmatpush.msra.mxu2 %v24449_v42  ;;  %2716 = vmatpush.msra.mxu3 %v16637_v48  ;;  %v24454_v48 = vld [vmem:[#allocation11_spill] sm:$0xff]  ;;  %v564_v42 = vld [vmem:[%s24092_s2 + $0x320] sm:$0xff] }
 0x202   : > { %2366 = vmatpush.msrb.mxu0 %v24450_v1  ;;  %2614 = vmatpush.msra.mxu1 %v16674_v23  ;;  %v24455_v11 = vand.u32 4294901760, %v24454_v48  ;;  %v17103_v1 = vand.u32 4294901760, %v565_v38 }
 0x203   : > { %2368 = vmatmul.f32.vlgmr.msrb.gmra.mxu0 %v15724_v52  ;;  %2659 = vmatpush.msra.mxu2 %v24451_v0 }
 0x204   : > { %2553 = vmatpush.msra.mxu0 %v16649_v39  ;;  %2718 = vmatpush.msra.mxu3 %v16656_v44  ;;  %v574_v44 = vld [vmem:[%s24092_s2 + $0x370] sm:$0xff]  ;;  %v16953_v39 = vand.u32 4294901760, %v575_v12 }
 0x205   : > { %2616 = vmatpush.msra.mxu1 %v16683_v6  ;;  %2663 = vmatpush.msra.mxu2 %v24453_v4  ;;  %v16963_v24 = vand.u32 4294901760, %v574_v44 }
 0x206   : > { %2556 = vmatpush.msra.mxu0 %v16663_v9  ;;  %2720 = vmatpush.msra.mxu3 %v16667_v32  ;;  %v24456_v9 = vand.u32 4294901760, %v16736_v35  ;;  %v573_v32 = vld [vmem:[%s24092_s2 + $0x368] sm:$0xff]  ;;  %v16974_v53 = vsub.f32 %v575_v12, %v16953_v39  ;;  %v17118_v12 = vand.u32 4294901760, %v564_v42 }
 0x207   : > { %2618 = vmatpush.msra.mxu1 %v16706_v2  ;;  %2667 = vmatpush.msra.mxu2 %v24455_v11 }
 0x208   : > { %2559 = vmatpush.msra.mxu0 %v16679_v7  ;;  %2722 = vmatpush.msra.mxu3 %v16674_v23  ;;  %v24457_v23 = vand.u32 4294901760, %v16752_v55  ;;  %v572_v7 = vld [vmem:[%s24092_s2 + $0x360] sm:$0xff]  ;;  %v24179_v8 = vand.u32 4294901760, %v16974_v53 }
 0x209   : > { %2620 = vmatpush.msra.mxu1 %v16722_v16  ;;  %2671 = vmatpush.msra.mxu2 %v24456_v9  ;;  %v16989_v46 = vand.u32 4294901760, %v572_v7 }
 0x20a   : > { %2562 = vmatpush.msra.mxu0 %v16691_v15  ;;  %2724 = vmatpush.msra.mxu3 %v16683_v6  ;;  %v16976_v15 = vand.u32 4294901760, %v573_v32  ;;  %v24458_v6 = vand.u32 4294901760, %v16767_v37 }
 0x20b   : > { %2622 = vmatpush.msra.mxu1 %v16738_v19  ;;  %2675 = vmatpush.msra.mxu2 %v24457_v23  ;;  %v561_v23 = vld [vmem:[%s24092_s2 + $0x308] sm:$0xff] }
 0x20c   : > { %2565 = vmatpush.msra.mxu0 %v24452_v14  ;;  %2726 = vmatpush.msra.mxu3 %v16706_v2  ;;  %v16987_v2 = vsub.f32 %v574_v44, %v16963_v24  ;;  %v16998_v36 = vsub.f32 %v573_v32, %v16976_v15  ;;  %v563_v14 = vld [vmem:[%s24092_s2 + $0x318] sm:$0xff]  ;;  %v17131_v44 = vsub.f32 %v565_v38, %v17103_v1 }
 0x20d   : > { %2624 = vmatpush.msra.mxu1 %v16754_v25  ;;  %2679 = vmatpush.msra.mxu2 %v24458_v6  ;;  %v17133_v9 = vand.u32 4294901760, %v563_v14 }
 0x20e   : > { %2568 = vmatpush.msra.mxu0 %v24454_v48  ;;  %2728 = vmatpush.msra.mxu3 %v16722_v16  ;;  %v17000_v16 = vand.u32 4294901760, %v571_v26 }
 0x20f   : > { %2626 = vmatpush.msra.mxu1 %v16769_v20  ;;  %2683 = vmatpush.msra.mxu2 %v2506_v40  ;;  %v17015_v40 = vsub.f32 %v572_v7, %v16989_v46 }
 0x210   : > { %2571 = vmatpush.msra.mxu0 %v16736_v35  ;;  %2730 = vmatpush.msra.mxu3 %v16738_v19  ;;  %v569_v19 = vld [vmem:[%s24092_s2 + $0x348] sm:$0xff]  ;;  %v24177_v35 = vand.u32 4294901760, %v16987_v2  ;;  %v17032_v29 = vsub.f32 %v571_v26, %v17000_v16  ;;  %v17146_v26 = vsub.f32 %v564_v42, %v17118_v12 }
 0x211   : > { %2628 = vmatpush.msra.mxu1 %v16784_v62  ;;  %2687 = vmatpush.msra.mxu2 %v2512_v59  ;;  %v568_v59 = vld [vmem:[%s24092_s2 + $0x340] sm:$0xff] }
 0x212   : > { %2574 = vmatpush.msra.mxu0 %v16752_v55  ;;  %2732 = vmatpush.msra.mxu3 %v16754_v25  ;;  %v2794_v25 = vsub.f32 %v16974_v53, %v24179_v8  ;;  %v24176_v55 = vand.u32 4294901760, %v16998_v36  ;;  %v17045_v58 = vand.u32 4294901760, %v568_v59  ;;  %v24174_v47 = vand.u32 4294901760, %v17032_v29 }
 0x213   : > { %2630 = vmatpush.msra.mxu1 %v16800_v54  ;;  %2691 = vmatpush.msra.mxu2 %v2518_v33  ;;  %v17034_v33 = vand.u32 4294901760, %v569_v19 }
 0x214   : > { %2577 = vmatpush.msra.mxu0 %v16767_v37  ;;  %2734 = vmatpush.msra.mxu3 %v16769_v20  ;;  %v2800_v37 = vsub.f32 %v16987_v2, %v24177_v35  ;;  %v24175_v20 = vand.u32 4294901760, %v17015_v40  ;;  %v17079_v31 = vsub.f32 %v568_v59, %v17045_v58  ;;  %v2818_v10 = vsub.f32 %v17032_v29, %v24174_v47  ;;  %v24460_v59 = vld [vmem:[#allocation8_spill] sm:$0xff]  ;;  %v582_v47 = vld [vmem:[%s24092_s2 + $0x3b0] sm:$0xff] }
 0x215   : > { %2632 = vmatpush.msra.mxu1 %v16813_v27  ;;  %2695 = vmatpush.msra.mxu2 %v2524_v34  ;;  %v2806_v34 = vsub.f32 %v16998_v36, %v24176_v55  ;;  %v17063_v50 = vsub.f32 %v569_v19, %v17034_v33  ;;  %v560_v19 = vld [vmem:[%s24092_s2 + $0x300] sm:$0xff]  ;;  %v17342_v8 = vand.u32 4294901760, %v582_v47 }
 0x216   : > { %2580 = vmatpush.msra.mxu0 %v16782_v22  ;;  %2736 = vmatpush.msra.mxu3 %v16784_v62  ;;  %v17054_v22 = vsub.f32 %v570_v5, %v17020_v21  ;;  %v2795_v62 = vand.u32 4294901760, %v2794_v25  ;;  %v2812_v51 = vsub.f32 %v17015_v40, %v24175_v20  ;;  %v24170_v0 = vand.u32 4294901760, %v17079_v31 }
 0x217   : > { %2634 = vmatpush.msra.mxu1 %v16834_v28  ;;  %2699 = vmatpush.msra.mxu2 %v2530_v56  ;;  %v566_v56 = vld [vmem:[%s24092_s2 + $0x330] sm:$0xff]  ;;  %v24171_v63 = vand.u32 4294901760, %v17063_v50  ;;  %v2819_v48 = vand.u32 4294901760, %v2818_v10 }
 0x218   : > { %2583 = vmatpush.msra.mxu0 %v16798_v3  ;;  %2738 = vmatpush.msra.mxu3 %v16800_v54  ;;  %v17071_v54 = vand.u32 4294901760, %v567_v49  ;;  %v2801_v3 = vand.u32 4294901760, %v2800_v37  ;;  %v2836_v32 = vsub.f32 %v17079_v31, %v24170_v0  ;;  %v24166_v37 = vand.u32 4294901760, %v17131_v44  ;;  %v583_v0 = vld [vmem:[%s24092_s2 + $0x3b8] sm:$0xff] }
 0x219   : > { %2636 = vmatpush.msra.mxu1 %v16847_v41  ;;  %2703 = vmatpush.msra.mxu2 %v2536_v60  ;;  %v2807_v60 = vand.u32 4294901760, %v2806_v34  ;;  %v2830_v11 = vsub.f32 %v17063_v50, %v24171_v63  ;;  %v17326_v55 = vand.u32 4294901760, %v583_v0 }
 0x21a   : > { %2586 = vmatpush.msra.mxu0 %v16811_v61  ;;  %2740 = vmatpush.msra.mxu3 %v16813_v27  ;;  %v24172_v61 = vand.u32 4294901760, %v17054_v22  ;;  %v17088_v27 = vand.u32 4294901760, %v566_v56 }
 0x21b   : > { %2640 = vmatmul.f32.vlgmr.msra.gmra.mxu1 %v24459_v43  ;;  %2707 = vmatpush.msra.mxu2 %v2542_v45  ;;  %v17101_v45 = vsub.f32 %v567_v49, %v17071_v54  ;;  %v2831_v5 = vand.u32 4294901760, %v2830_v11  ;;  %v17161_v49 = vsub.f32 %v563_v14, %v17133_v9  ;;  %v591_v11 = vld [vmem:[%s24092_s2 + $0x3f8] sm:$0xff]  ;;  %v17355_v35 = vsub.f32 %v583_v0, %v17326_v55 }
 0x21c   : > { %2796 = vmatpush.msrb.mxu1 %v2795_v62  ;;  %2589 = vmatpush.msra.mxu0 %v16827_v13  ;;  %v2813_v13 = vand.u32 4294901760, %v2812_v51  ;;  %v17116_v4 = vsub.f32 %v566_v56, %v17088_v27  ;;  %v2837_v62 = vand.u32 4294901760, %v2836_v32  ;;  %v24165_v56 = vand.u32 4294901760, %v17146_v26 }
 0x21d   : > { %2742 = vmatpush.msra.mxu3 %v16834_v28  ;;  %2709 = vmatmul.f32.vlgmr.msra.gmra.mxu2 %v15724_v52  ;;  %v2824_v28 = vsub.f32 %v17054_v22, %v24172_v61  ;;  %v17175_v51 = vand.u32 4294901760, %v560_v19  ;;  %v24164_v10 = vand.u32 4294901760, %v17161_v49 }
 0x21e   : > { %2802 = vmatpush.msrb.mxu1 %v2801_v3  ;;  %2894 = vmatpush.msrb.mxu2 %v16974_v53  ;;  %v24167_v6 = vand.u32 4294901760, %v17116_v4  ;;  %v2860_v14 = vsub.f32 %v17146_v26, %v24165_v56 }
 0x21f   : > { %2592 = vmatpush.msra.mxu0 %v16843_v18  ;;  %2744 = vmatpush.msra.mxu3 %v16847_v41  ;;  %v562_v18 = vld [vmem:[%s24092_s2 + $0x310] sm:$0xff]  ;;  %v24168_v41 = vand.u32 4294901760, %v17101_v45  ;;  %v2825_v7 = vand.u32 4294901760, %v2824_v28  ;;  %v2866_v32 = vsub.f32 %v17161_v49, %v24164_v10 }
 0x220   : > { %2746 = vmatmul.f32.vlgmr.msra.gmra.mxu3 %v15724_v52  ;;  %2808 = vmatpush.msrb.mxu1 %v2807_v60  ;;  %v2848_v34 = vsub.f32 %v17116_v4, %v24167_v6  ;;  %v2854_v60 = vsub.f32 %v17131_v44, %v24166_v37  ;;  %v586_v10 = vld [vmem:[%s24092_s2 + $0x3d0] sm:$0xff] }
 0x221   : > { %2897 = vmatpush.msrb.mxu2 %v16987_v2  ;;  %2947 = vmatpush.msrb.mxu3 %v16953_v39  ;;  %v2842_v25 = vsub.f32 %v17101_v45, %v24168_v41  ;;  %v584_v41 = vld [vmem:[%s24092_s2 + $0x3c0] sm:$0xff] }
 0x222   : > { %2595 = vmatpush.msra.mxu0 %v16858_v57  ;;  %2814 = vmatpush.msrb.mxu1 %v2813_v13  ;;  %v17148_v57 = vand.u32 4294901760, %v562_v18  ;;  %v2849_v13 = vand.u32 4294901760, %v2848_v34  ;;  %v2867_v34 = vand.u32 4294901760, %v2866_v32  ;;  %v17310_v61 = vand.u32 4294901760, %v584_v41 }
 0x223   : > { %2900 = vmatpush.msrb.mxu2 %v16998_v36  ;;  %2949 = vmatpush.msrb.mxu3 %v16963_v24  ;;  %v2843_v38 = vand.u32 4294901760, %v2842_v25 }
 0x224   : > { %2598 = vmatpush.msra.mxu0 %v16869_v17  ;;  %2820 = vmatpush.msrb.mxu1 %v2819_v48  ;;  %v17163_v17 = vand.u32 4294901760, %v561_v23  ;;  %v17173_v3 = vsub.f32 %v562_v18, %v17148_v57  ;;  %v17195_v48 = vsub.f32 %v560_v19, %v17175_v51  ;;  %v2855_v18 = vand.u32 4294901760, %v2854_v60 }
 0x225   : > { %2601 = vmatmul.f32.vlgmr.msra.gmra.mxu0 %v24460_v59  ;;  %2903 = vmatpush.msrb.mxu2 %v17015_v40 }
 0x226   : > { %2751 = vmatpush.msrb.mxu0 %v16953_v39  ;;  %2951 = vmatpush.msrb.mxu3 %v16976_v15  ;;  %v17185_v42 = vsub.f32 %v561_v23, %v17163_v17  ;;  %v24162_v28 = vand.u32 4294901760, %v17173_v3  ;;  %v24163_v25 = vand.u32 4294901760, %v17195_v48 }
 0x227   : > { %2826 = vmatpush.msrb.mxu1 %v2825_v7  ;;  %2906 = vmatpush.msrb.mxu2 %v17032_v29  ;;  %v590_v7 = vld [vmem:[%s24092_s2 + $0x3f0] sm:$0xff] }
 0x228   : > { %2753 = vmatpush.msrb.mxu0 %v16963_v24  ;;  %2953 = vmatpush.msrb.mxu3 %v16989_v46  ;;  %v24161_v23 = vand.u32 4294901760, %v17185_v42  ;;  %v2872_v19 = vsub.f32 %v17173_v3, %v24162_v28  ;;  %v17225_v60 = vand.u32 4294901760, %v590_v7 }
 0x229   : > { %2832 = vmatpush.msrb.mxu1 %v2831_v5  ;;  %2909 = vmatpush.msrb.mxu2 %v17054_v22  ;;  %v2861_v5 = vand.u32 4294901760, %v2860_v14 }
 0x22a   : > { %2755 = vmatpush.msrb.mxu0 %v16976_v15  ;;  %2955 = vmatpush.msrb.mxu3 %v17000_v16  ;;  %v2873_v14 = vand.u32 4294901760, %v2872_v19 }
 0x22b   : > { %2838 = vmatpush.msrb.mxu1 %v2837_v62  ;;  %2912 = vmatpush.msrb.mxu2 %v17063_v50  ;;  %v17217_v62 = vand.u32 4294901760, %v591_v11 }
 0x22c   : > { %2757 = vmatpush.msrb.mxu0 %v16989_v46  ;;  %2957 = vmatpush.msrb.mxu3 %v17020_v21 }
 0x22d   : > { %2844 = vmatpush.msrb.mxu1 %v2843_v38  ;;  %2915 = vmatpush.msrb.mxu2 %v17079_v31  ;;  %v2878_v38 = vsub.f32 %v17185_v42, %v24161_v23  ;;  %v17237_v32 = vsub.f32 %v591_v11, %v17217_v62  ;;  %v588_v23 = vld [vmem:[%s24092_s2 + $0x3e0] sm:$0xff]  ;;  %v17251_v11 = vsub.f32 %v590_v7, %v17225_v60 }
 0x22e   : > { %2759 = vmatpush.msrb.mxu0 %v17000_v16  ;;  %2959 = vmatpush.msrb.mxu3 %v17034_v33 }
 0x22f   : > { %2850 = vmatpush.msrb.mxu1 %v2849_v13  ;;  %2918 = vmatpush.msrb.mxu2 %v17101_v45  ;;  %v589_v13 = vld [vmem:[%s24092_s2 + $0x3e8] sm:$0xff]  ;;  %v2879_v19 = vand.u32 4294901760, %v2878_v38  ;;  %v24169_v56 = vand.u32 4294901760, %v17237_v32  ;;  %v24173_v37 = vand.u32 4294901760, %v17251_v11 }
 0x230   : > { %2761 = vmatpush.msrb.mxu0 %v17020_v21  ;;  %2961 = vmatpush.msrb.mxu3 %v17045_v58  ;;  %v17244_v28 = vand.u32 4294901760, %v589_v13 }
 0x231   : > { %2856 = vmatpush.msrb.mxu1 %v2855_v18  ;;  %2921 = vmatpush.msrb.mxu2 %v17116_v4  ;;  %v2884_v18 = vsub.f32 %v17195_v48, %v24163_v25  ;;  %v17255_v25 = vand.u32 4294901760, %v588_v23 }
 0x232   : > { %2763 = vmatpush.msrb.mxu0 %v17034_v33  ;;  %2963 = vmatpush.msrb.mxu3 %v17071_v54  ;;  %v17267_v7 = vsub.f32 %v589_v13, %v17244_v28  ;;  %v3135_v13 = vsub.f32 %v17237_v32, %v24169_v56 }
 0x233   : > { %2862 = vmatpush.msrb.mxu1 %v2861_v5  ;;  %2924 = vmatpush.msrb.mxu2 %v17131_v44  ;;  %v587_v5 = vld [vmem:[%s24092_s2 + $0x3d8] sm:$0xff]  ;;  %v17279_v6 = vsub.f32 %v588_v23, %v17255_v25 }
 0x234   : > { %2765 = vmatpush.msrb.mxu0 %v17045_v58  ;;  %2965 = vmatpush.msrb.mxu3 %v17088_v27  ;;  %v17262_v38 = vand.u32 4294901760, %v587_v5  ;;  %v24178_v23 = vand.u32 4294901760, %v17267_v7 }
 0x235   : > { %2868 = vmatpush.msrb.mxu1 %v2867_v34  ;;  %2927 = vmatpush.msrb.mxu2 %v17146_v26  ;;  %v2885_v34 = vand.u32 4294901760, %v2884_v18  ;;  %v585_v18 = vld [vmem:[%s24092_s2 + $0x3c8] sm:$0xff]  ;;  %v24180_v63 = vand.u32 4294901760, %v17279_v6 }
 0x236   : > { %2767 = vmatpush.msrb.mxu0 %v17071_v54  ;;  %2967 = vmatpush.msrb.mxu3 %v17103_v1 }
 0x237   : > { %2874 = vmatpush.msrb.mxu1 %v2873_v14  ;;  %2930 = vmatpush.msrb.mxu2 %v17161_v49  ;;  %v17271_v14 = vand.u32 4294901760, %v586_v10 }
 0x238   : > { %2769 = vmatpush.msrb.mxu0 %v17088_v27  ;;  %2969 = vmatpush.msrb.mxu3 %v17118_v12 }
 0x239   : > { %2880 = vmatpush.msrb.mxu1 %v2879_v19  ;;  %2933 = vmatpush.msrb.mxu2 %v17173_v3  ;;  %v17286_v19 = vsub.f32 %v587_v5, %v17262_v38  ;;  %v3141_v5 = vsub.f32 %v17251_v11, %v24173_v37  ;;  %v17302_v56 = vsub.f32 %v586_v10, %v17271_v14  ;;  %v3136_v37 = vand.u32 4294901760, %v3135_v13 }
 0x23a   : > { %2771 = vmatpush.msrb.mxu0 %v17103_v1  ;;  %2971 = vmatpush.msrb.mxu3 %v17133_v9 }
 0x23b   : > { %2886 = vmatpush.msrb.mxu1 %v2885_v34  ;;  %2936 = vmatpush.msrb.mxu2 %v17185_v42  ;;  %24461 = vst [vmem:[#allocation10_spill] sm:$0xff] %v17286_v19  ;;  %v17294_v34 = vand.u32 4294901760, %v585_v18  ;;  %v24182_v10 = vand.u32 4294901760, %v17286_v19  ;;  %v3142_v13 = vand.u32 4294901760, %v3141_v5 }
 0x23c   : > { %2773 = vmatpush.msrb.mxu0 %v17118_v12  ;;  %2973 = vmatpush.msrb.mxu3 %v17148_v57  ;;  %24462 = vst [vmem:[#allocation11_spill] sm:$0xff] %v17302_v56 }
 0x23d   : > { %2888 = vmatmul.f32.vlgmr.msrb.gmra.mxu1 %v15724_v52  ;;  %2939 = vmatpush.msrb.mxu2 %v17195_v48  ;;  %v17324_v20 = vsub.f32 %v585_v18, %v17294_v34  ;;  %v3153_v18 = vsub.f32 %v17279_v6, %v24180_v63  ;;  %v3159_v5 = vsub.f32 %v17286_v19, %v24182_v10 }
 0x23e   : > { %3055 = vmatpush.msra.mxu1 %v16953_v39  ;;  %2775 = vmatpush.msrb.mxu0 %v17133_v9  ;;  %v3147_v39 = vsub.f32 %v17267_v7, %v24178_v23  ;;  %v17340_v23 = vsub.f32 %v584_v41, %v17310_v61 }
 0x23f   : > { %2975 = vmatpush.msrb.mxu3 %v17163_v17  ;;  %2942 = vmatmul.f32.vlgmr.msrb.gmra.mxu2 %v24460_v59 }
 0x240   : > { %3057 = vmatpush.msra.mxu1 %v16963_v24  ;;  %3092 = vmatpush.msra.mxu2 %v17217_v62  ;;  %v581_v24 = vld [vmem:[%s24092_s2 + $0x3a8] sm:$0xff]  ;;  %v3148_v63 = vand.u32 4294901760, %v3147_v39  ;;  %v17370_v39 = vsub.f32 %v582_v47, %v17342_v8 }
 0x241   : > { %2777 = vmatpush.msrb.mxu0 %v17148_v57  ;;  %2977 = vmatpush.msrb.mxu3 %v17175_v51  ;;  %v17357_v59 = vand.u32 4294901760, %v581_v24 }
 0x242   : > { %2981 = vmatmul.f32.vlgmr.msrb.gmra.mxu3 %v24459_v43  ;;  %3059 = vmatpush.msra.mxu1 %v16976_v15  ;;  %v580_v15 = vld [vmem:[%s24092_s2 + $0x3a0] sm:$0xff]  ;;  %v579_v43 = vld [vmem:[%s24092_s2 + $0x398] sm:$0xff] }
 0x243   : > { %3094 = vmatpush.msra.mxu2 %v17225_v60  ;;  %3137 = vmatpush.msra.mxu3 %v3136_v37  ;;  %v24463_v37 = vand.u32 4294901760, %v17302_v56  ;;  %v17372_v41 = vand.u32 4294901760, %v580_v15  ;;  %v17386_v0 = vsub.f32 %v581_v24, %v17357_v59  ;;  %v17388_v19 = vand.u32 4294901760, %v579_v43 }
 0x244   : > { %2779 = vmatpush.msrb.mxu0 %v17163_v17  ;;  %3061 = vmatpush.msra.mxu1 %v16989_v46  ;;  %v3154_v46 = vand.u32 4294901760, %v3153_v18 }
 0x245   : > { %3096 = vmatpush.msra.mxu2 %v17244_v28  ;;  %3143 = vmatpush.msra.mxu3 %v3142_v13  ;;  %v3165_v10 = vsub.f32 %v17302_v56, %v24463_v37  ;;  %v3160_v13 = vand.u32 4294901760, %v3159_v5  ;;  %v578_v37 = vld [vmem:[%s24092_s2 + $0x390] sm:$0xff]  ;;  %v24464_v56 = vand.u32 4294901760, %v16974_v53  ;;  %v24466_v53 = vand.u32 4294901760, %v16987_v2 }
 0x246   : > { %2781 = vmatpush.msrb.mxu0 %v17175_v51  ;;  %3063 = vmatpush.msra.mxu1 %v17000_v16  ;;  %v24465_v16 = vand.u32 4294901760, %v17324_v20  ;;  %v17399_v24 = vsub.f32 %v580_v15, %v17372_v41  ;;  %v17401_v18 = vand.u32 4294901760, %v578_v37  ;;  %v24468_v2 = vand.u32 4294901760, %v16998_v36 }
 0x247   : > { %2787 = vmatmul.f32.vlgmr.msrb.gmra.mxu0 %v15745_v30  ;;  %3098 = vmatpush.msra.mxu2 %v17255_v25  ;;  %v3166_v5 = vand.u32 4294901760, %v3165_v10 }
 0x248   : > { %2988 = vmatpush.msra.mxu0 %v24464_v56  ;;  %3149 = vmatpush.msra.mxu3 %v3148_v63  ;;  %v3171_v47 = vsub.f32 %v17324_v20, %v24465_v16  ;;  %v24467_v63 = vand.u32 4294901760, %v17340_v23  ;;  %v3188_v16 = vand.u32 4294901760, %v17370_v39 }
 0x249   : > { %3065 = vmatpush.msra.mxu1 %v17020_v21  ;;  %3100 = vmatpush.msra.mxu2 %v17262_v38  ;;  %v577_v21 = vld [vmem:[%s24092_s2 + $0x388] sm:$0xff] }
 0x24a   : > { %2992 = vmatpush.msra.mxu0 %v24466_v53  ;;  %3155 = vmatpush.msra.mxu3 %v3154_v46  ;;  %v3177_v56 = vsub.f32 %v17340_v23, %v24467_v63  ;;  %v3172_v10 = vand.u32 4294901760, %v3171_v47  ;;  %v24469_v46 = vand.u32 4294901760, %v17355_v35  ;;  %v3194_v53 = vand.u32 4294901760, %v17386_v0 }
 0x24b   : > { %3067 = vmatpush.msra.mxu1 %v17034_v33  ;;  %3102 = vmatpush.msra.mxu2 %v17271_v14  ;;  %v17415_v63 = vsub.f32 %v579_v43, %v17388_v19  ;;  %v576_v33 = vld [vmem:[%s24092_s2 + $0x380] sm:$0xff]  ;;  %v17422_v36 = vand.u32 4294901760, %v577_v21  ;;  %v3189_v43 = vsub.f32 %v17370_v39, %v3188_v16 }
 0x24c   : > { %2996 = vmatpush.msra.mxu0 %v24468_v2  ;;  %3161 = vmatpush.msra.mxu3 %v3160_v13  ;;  %v3183_v15 = vsub.f32 %v17355_v35, %v24469_v46  ;;  %v24470_v13 = vand.u32 4294901760, %v17015_v40  ;;  %v3178_v47 = vand.u32 4294901760, %v3177_v56  ;;  %v3200_v2 = vand.u32 4294901760, %v17399_v24 }
 0x24d   : > { %3069 = vmatpush.msra.mxu1 %v17045_v58  ;;  %3104 = vmatpush.msra.mxu2 %v17294_v34  ;;  %v17431_v46 = vsub.f32 %v578_v37, %v17401_v18  ;;  %v17435_v58 = vand.u32 4294901760, %v576_v33  ;;  %v24471_v40 = vand.u32 4294901760, %v17032_v29  ;;  %v3195_v56 = vsub.f32 %v17386_v0, %v3194_v53 }
 0x24e   : > { %3000 = vmatpush.msra.mxu0 %v24470_v13  ;;  %3167 = vmatpush.msra.mxu3 %v3166_v5  ;;  %v3184_v5 = vand.u32 4294901760, %v3183_v15  ;;  %v3206_v13 = vand.u32 4294901760, %v17415_v63  ;;  %v24472_v37 = vand.u32 4294901760, %v17054_v22  ;;  %v3190_v29 = vand.u32 4294901760, %v3189_v43 }
 0x24f   : > { %3071 = vmatpush.msra.mxu1 %v17071_v54  ;;  %3106 = vmatpush.msra.mxu2 %v17310_v61  ;;  %v17446_v54 = vsub.f32 %v577_v21, %v17422_v36  ;;  %v3212_v15 = vand.u32 4294901760, %v17431_v46  ;;  %v24473_v21 = vand.u32 4294901760, %v17063_v50  ;;  %v3196_v22 = vand.u32 4294901760, %v3195_v56 }
 0x250   : > { %3004 = vmatpush.msra.mxu0 %v24471_v40  ;;  %3173 = vmatpush.msra.mxu3 %v3172_v10  ;;  %v3201_v10 = vsub.f32 %v17399_v24, %v3200_v2  ;;  %v24474_v43 = vand.u32 4294901760, %v17079_v31  ;;  %v24476_v56 = vand.u32 4294901760, %v17116_v4 }
 0x251   : > { %3073 = vmatpush.msra.mxu1 %v17088_v27  ;;  %3108 = vmatpush.msra.mxu2 %v17326_v55  ;;  %v17457_v27 = vsub.f32 %v576_v33, %v17435_v58  ;;  %v3213_v50 = vsub.f32 %v17431_v46, %v3212_v15 }
 0x252   : > { %3008 = vmatpush.msra.mxu0 %v24472_v37  ;;  %3179 = vmatpush.msra.mxu3 %v3178_v47  ;;  %v3207_v47 = vsub.f32 %v17415_v63, %v3206_v13  ;;  %v3202_v33 = vand.u32 4294901760, %v3201_v10  ;;  %v24478_v37 = vand.u32 4294901760, %v17146_v26  ;;  %v24481_v26 = vand.u32 4294901760, %v17173_v3 }
 0x253   : > { %3075 = vmatpush.msra.mxu1 %v17103_v1  ;;  %3110 = vmatpush.msra.mxu2 %v17342_v8  ;;  %v3218_v1 = vand.u32 4294901760, %v17446_v54  ;;  %v3224_v40 = vand.u32 4294901760, %v17457_v27  ;;  %v24484_v10 = vand.u32 4294901760, %v17267_v7  ;;  %v24485_v3 = vand.u32 4294901760, %v17195_v48  ;;  %v607_v48 = vld [vmem:[%s24092_s2 + $0x478] sm:$0xff] }
 0x254   : > { %3012 = vmatpush.msra.mxu0 %v24473_v21  ;;  %3185 = vmatpush.msra.mxu3 %v3184_v5  ;;  %v3208_v5 = vand.u32 4294901760, %v3207_v47  ;;  %v24486_v21 = vand.u32 4294901760, %v17279_v6 }
 0x255   : > { %3077 = vmatpush.msra.mxu1 %v17118_v12  ;;  %3112 = vmatpush.msra.mxu2 %v17357_v59  ;;  %v24475_v12 = vand.u32 4294901760, %v17101_v45  ;;  %v3219_v31 = vsub.f32 %v17446_v54, %v3218_v1  ;;  %v3225_v45 = vsub.f32 %v17457_v27, %v3224_v40 }
 0x256   : > { %3016 = vmatpush.msra.mxu0 %v24474_v43  ;;  %3191 = vmatpush.msra.mxu3 %v3190_v29  ;;  %v24482_v29 = vand.u32 4294901760, %v17251_v11 }
 0x257   : > { %3079 = vmatpush.msra.mxu1 %v17133_v9  ;;  %3114 = vmatpush.msra.mxu2 %v17372_v41  ;;  %v3214_v9 = vand.u32 4294901760, %v3213_v50  ;;  %v3220_v4 = vand.u32 4294901760, %v3219_v31  ;;  %v602_v31 = vld [vmem:[%s24092_s2 + $0x450] sm:$0xff] }
 0x258   : > { %3020 = vmatpush.msra.mxu0 %v24475_v12  ;;  %3197 = vmatpush.msra.mxu3 %v3196_v22 }
 0x259   : > { %3081 = vmatpush.msra.mxu1 %v17148_v57  ;;  %3116 = vmatpush.msra.mxu2 %v17388_v19  ;;  %v24477_v57 = vand.u32 4294901760, %v17131_v44  ;;  %v24479_v44 = vand.u32 4294901760, %v17161_v49  ;;  %v24483_v49 = vand.u32 4294901760, %v17185_v42  ;;  %v24487_v42 = vld [vmem:[#allocation10_spill] sm:$0xff] }
 0x25a   : > { %3024 = vmatpush.msra.mxu0 %v24476_v56  ;;  %3203 = vmatpush.msra.mxu3 %v3202_v33  ;;  %v603_v33 = vld [vmem:[%s24092_s2 + $0x458] sm:$0xff]  ;;  %v17608_v56 = vand.u32 4294901760, %v602_v31 }
 0x25b   : > { %3083 = vmatpush.msra.mxu1 %v17163_v17  ;;  %3118 = vmatpush.msra.mxu2 %v17401_v18  ;;  %v3226_v17 = vand.u32 4294901760, %v3225_v45 }
 0x25c   : > { %3028 = vmatpush.msra.mxu0 %v24477_v57  ;;  %3209 = vmatpush.msra.mxu3 %v3208_v5  ;;  %v599_v57 = vld [vmem:[%s24092_s2 + $0x438] sm:$0xff] }
 0x25d   : > { %3085 = vmatpush.msra.mxu1 %v17175_v51  ;;  %3120 = vmatpush.msra.mxu2 %v17422_v36  ;;  %v24480_v51 = vand.u32 4294901760, %v17237_v32 }
 0x25e   : > { %3032 = vmatpush.msra.mxu0 %v24478_v37  ;;  %3215 = vmatpush.msra.mxu3 %v3214_v9 }
 0x25f   : > { %3087 = vmatmul.f32.vlgmr.msra.gmra.mxu1 %v15724_v52  ;;  %3122 = vmatpush.msra.mxu2 %v17435_v58 }
 0x260   : > { %3288 = vmatpush.msrb.mxu1 %v17217_v62  ;;  %3036 = vmatpush.msra.mxu0 %v24479_v44 }
 0x261   : > { %3221 = vmatpush.msra.mxu3 %v3220_v4  ;;  %3128 = vmatmul.f32.vlgmr.msra.gmra.mxu2 %v15745_v30 }
 0x262   : > { %3290 = vmatpush.msrb.mxu1 %v17225_v60  ;;  %3329 = vmatpush.msrb.mxu2 %v24480_v51  ;;  %v597_v51 = vld [vmem:[%s24092_s2 + $0x428] sm:$0xff] }
 0x263   : > { %3040 = vmatpush.msra.mxu0 %v24481_v26  ;;  %3227 = vmatpush.msra.mxu3 %v3226_v17  ;;  %v24494_v26 = vld [vmem:[#allocation9_spill] sm:$0xff] }
 0x264   : > { %3229 = vmatmul.f32.vlgmr.msra.gmra.mxu3 %v15724_v52  ;;  %3292 = vmatpush.msrb.mxu1 %v17244_v28 }
 0x265   : > { %3333 = vmatpush.msrb.mxu2 %v24482_v29  ;;  %3396 = vmatpush.msrb.mxu3 %v17217_v62  ;;  %v24488_v62 = vand.u32 4294901760, %v24487_v42 }
 0x266   : > { %3044 = vmatpush.msra.mxu0 %v24483_v49  ;;  %3294 = vmatpush.msrb.mxu1 %v17255_v25 }
 0x267   : > { %3337 = vmatpush.msrb.mxu2 %v24484_v10  ;;  %3398 = vmatpush.msrb.mxu3 %v17225_v60  ;;  %v24489_v60 = vld [vmem:[#allocation11_spill] sm:$0xff]  ;;  %v596_v10 = vld [vmem:[%s24092_s2 + $0x420] sm:$0xff] }
 0x268   : > { %3048 = vmatpush.msra.mxu0 %v24485_v3  ;;  %3296 = vmatpush.msrb.mxu1 %v17262_v38  ;;  %v24490_v22 = vand.u32 4294901760, %v24489_v60  ;;  %v17691_v3 = vand.u32 4294901760, %v597_v51 }
 0x269   : > { %3050 = vmatmul.f32.vlgmr.msra.gmra.mxu0 %v15724_v52  ;;  %3341 = vmatpush.msrb.mxu2 %v24486_v21 }
 0x26a   : > { %3235 = vmatpush.msrb.mxu0 %v17237_v32  ;;  %3400 = vmatpush.msrb.mxu3 %v17244_v28  ;;  %v606_v28 = vld [vmem:[%s24092_s2 + $0x470] sm:$0xff]  ;;  %v17541_v32 = vand.u32 4294901760, %v607_v48 }
 0x26b   : > { %3298 = vmatpush.msrb.mxu1 %v17271_v14  ;;  %3345 = vmatpush.msrb.mxu2 %v24488_v62  ;;  %v17551_v47 = vand.u32 4294901760, %v606_v28 }
 0x26c   : > { %3238 = vmatpush.msrb.mxu0 %v17251_v11  ;;  %3402 = vmatpush.msrb.mxu3 %v17255_v25  ;;  %v24491_v11 = vand.u32 4294901760, %v17324_v20  ;;  %v605_v25 = vld [vmem:[%s24092_s2 + $0x468] sm:$0xff]  ;;  %v17562_v43 = vsub.f32 %v607_v48, %v17541_v32  ;;  %v17706_v48 = vand.u32 4294901760, %v596_v10 }
 0x26d   : > { %3300 = vmatpush.msrb.mxu1 %v17294_v34  ;;  %3349 = vmatpush.msrb.mxu2 %v24490_v22 }
 0x26e   : > { %3241 = vmatpush.msrb.mxu0 %v17267_v7  ;;  %3404 = vmatpush.msrb.mxu3 %v17262_v38  ;;  %v24492_v38 = vand.u32 4294901760, %v17340_v23  ;;  %v604_v7 = vld [vmem:[%s24092_s2 + $0x460] sm:$0xff]  ;;  %v24206_v12 = vand.u32 4294901760, %v17562_v43 }
 0x26f   : > { %3302 = vmatpush.msrb.mxu1 %v17310_v61  ;;  %3353 = vmatpush.msrb.mxu2 %v24491_v11  ;;  %v17577_v50 = vand.u32 4294901760, %v604_v7 }
 0x270   : > { %3244 = vmatpush.msrb.mxu0 %v17279_v6  ;;  %3406 = vmatpush.msrb.mxu3 %v17271_v14  ;;  %v17564_v6 = vand.u32 4294901760, %v605_v25  ;;  %v24493_v14 = vand.u32 4294901760, %v17355_v35 }
 0x271   : > { %3304 = vmatpush.msrb.mxu1 %v17326_v55  ;;  %3357 = vmatpush.msrb.mxu2 %v24492_v38  ;;  %v593_v38 = vld [vmem:[%s24092_s2 + $0x408] sm:$0xff] }
 0x272   : > { %3247 = vmatpush.msrb.mxu0 %v24487_v42  ;;  %3408 = vmatpush.msrb.mxu3 %v17294_v34  ;;  %v17575_v34 = vsub.f32 %v606_v28, %v17551_v47  ;;  %v17586_v5 = vsub.f32 %v605_v25, %v17564_v6  ;;  %v595_v42 = vld [vmem:[%s24092_s2 + $0x418] sm:$0xff]  ;;  %v17719_v28 = vsub.f32 %v597_v51, %v17691_v3 }
 0x273   : > { %3306 = vmatpush.msrb.mxu1 %v17342_v8  ;;  %3361 = vmatpush.msrb.mxu2 %v24493_v14  ;;  %v17721_v11 = vand.u32 4294901760, %v595_v42 }
 0x274   : > { %3250 = vmatpush.msrb.mxu0 %v24489_v60  ;;  %3410 = vmatpush.msrb.mxu3 %v17310_v61  ;;  %v17588_v61 = vand.u32 4294901760, %v603_v33 }
 0x275   : > { %3308 = vmatpush.msrb.mxu1 %v17357_v59  ;;  %3365 = vmatpush.msrb.mxu2 %v3188_v16  ;;  %v17603_v16 = vsub.f32 %v604_v7, %v17577_v50 }
 0x276   : > { %3253 = vmatpush.msrb.mxu0 %v17324_v20  ;;  %3412 = vmatpush.msrb.mxu3 %v17326_v55  ;;  %v601_v55 = vld [vmem:[%s24092_s2 + $0x448] sm:$0xff]  ;;  %v24204_v20 = vand.u32 4294901760, %v17575_v34  ;;  %v17620_v9 = vsub.f32 %v603_v33, %v17588_v61  ;;  %v17734_v33 = vsub.f32 %v596_v10, %v17706_v48 }
 0x277   : > { %3310 = vmatpush.msrb.mxu1 %v17372_v41  ;;  %3369 = vmatpush.msrb.mxu2 %v3194_v53  ;;  %v600_v53 = vld [vmem:[%s24092_s2 + $0x440] sm:$0xff] }
 0x278   : > { %3256 = vmatpush.msrb.mxu0 %v17340_v23  ;;  %3414 = vmatpush.msrb.mxu3 %v17342_v8  ;;  %v3476_v8 = vsub.f32 %v17562_v43, %v24206_v12  ;;  %v24203_v23 = vand.u32 4294901760, %v17586_v5  ;;  %v17633_v45 = vand.u32 4294901760, %v600_v53  ;;  %v24201_v4 = vand.u32 4294901760, %v17620_v9 }
 0x279   : > { %3312 = vmatpush.msrb.mxu1 %v17388_v19  ;;  %3373 = vmatpush.msrb.mxu2 %v3200_v2  ;;  %v17622_v2 = vand.u32 4294901760, %v601_v55 }
 0x27a   : > { %3259 = vmatpush.msrb.mxu0 %v17355_v35  ;;  %3416 = vmatpush.msrb.mxu3 %v17357_v59  ;;  %v3482_v35 = vsub.f32 %v17575_v34, %v24204_v20  ;;  %v24202_v59 = vand.u32 4294901760, %v17603_v16  ;;  %v17667_v44 = vsub.f32 %v600_v53, %v17633_v45  ;;  %v3500_v29 = vsub.f32 %v17620_v9, %v24201_v4  ;;  %v24495_v53 = vld [vmem:[#allocation8_spill] sm:$0xff]  ;;  %v614_v4 = vld [vmem:[%s24092_s2 + $0x4b0] sm:$0xff] }
 0x27b   : > { %3314 = vmatpush.msrb.mxu1 %v17401_v18  ;;  %3377 = vmatpush.msrb.mxu2 %v3206_v13  ;;  %v3488_v13 = vsub.f32 %v17586_v5, %v24203_v23  ;;  %v17651_v37 = vsub.f32 %v601_v55, %v17622_v2  ;;  %v592_v55 = vld [vmem:[%s24092_s2 + $0x400] sm:$0xff]  ;;  %v17930_v12 = vand.u32 4294901760, %v614_v4 }
 0x27c   : > { %3262 = vmatpush.msrb.mxu0 %v17370_v39  ;;  %3418 = vmatpush.msrb.mxu3 %v17372_v41  ;;  %v17642_v39 = vsub.f32 %v602_v31, %v17608_v56  ;;  %v3477_v41 = vand.u32 4294901760, %v3476_v8  ;;  %v3494_v17 = vsub.f32 %v17603_v16, %v24202_v59  ;;  %v24197_v21 = vand.u32 4294901760, %v17667_v44 }
 0x27d   : > { %3316 = vmatpush.msrb.mxu1 %v17422_v36  ;;  %3381 = vmatpush.msrb.mxu2 %v3212_v15  ;;  %v598_v15 = vld [vmem:[%s24092_s2 + $0x430] sm:$0xff]  ;;  %v24198_v49 = vand.u32 4294901760, %v17651_v37  ;;  %v3501_v60 = vand.u32 4294901760, %v3500_v29 }
 0x27e   : > { %3265 = vmatpush.msrb.mxu0 %v17386_v0  ;;  %3420 = vmatpush.msrb.mxu3 %v17388_v19  ;;  %v17659_v19 = vand.u32 4294901760, %v599_v57  ;;  %v3483_v0 = vand.u32 4294901760, %v3482_v35  ;;  %v3518_v25 = vsub.f32 %v17667_v44, %v24197_v21  ;;  %v24193_v35 = vand.u32 4294901760, %v17719_v28  ;;  %v615_v21 = vld [vmem:[%s24092_s2 + $0x4b8] sm:$0xff] }
 0x27f   : > { %3318 = vmatpush.msrb.mxu1 %v17435_v58  ;;  %3385 = vmatpush.msrb.mxu2 %v3218_v1  ;;  %v3489_v1 = vand.u32 4294901760, %v3488_v13  ;;  %v3512_v22 = vsub.f32 %v17651_v37, %v24198_v49  ;;  %v17914_v23 = vand.u32 4294901760, %v615_v21 }
 0x280   : > { %3268 = vmatpush.msrb.mxu0 %v17399_v24  ;;  %3422 = vmatpush.msrb.mxu3 %v17401_v18  ;;  %v24199_v24 = vand.u32 4294901760, %v17642_v39  ;;  %v17676_v18 = vand.u32 4294901760, %v598_v15 }
 0x281   : > { %3322 = vmatmul.f32.vlgmr.msrb.gmra.mxu1 %v24494_v26  ;;  %3389 = vmatpush.msrb.mxu2 %v3224_v40  ;;  %v17689_v40 = vsub.f32 %v599_v57, %v17659_v19  ;;  %v3513_v31 = vand.u32 4294901760, %v3512_v22  ;;  %v17749_v57 = vsub.f32 %v595_v42, %v17721_v11  ;;  %v623_v22 = vld [vmem:[%s24092_s2 + $0x4f8] sm:$0xff]  ;;  %v17943_v20 = vsub.f32 %v615_v21, %v17914_v23 }
 0x282   : > { %3478 = vmatpush.msra.mxu1 %v3477_v41  ;;  %3271 = vmatpush.msrb.mxu0 %v17415_v63  ;;  %v3495_v63 = vand.u32 4294901760, %v3494_v17  ;;  %v17704_v62 = vsub.f32 %v598_v15, %v17676_v18  ;;  %v3519_v41 = vand.u32 4294901760, %v3518_v25  ;;  %v24192_v15 = vand.u32 4294901760, %v17734_v33 }
 0x283   : > { %3424 = vmatpush.msrb.mxu3 %v17422_v36  ;;  %3391 = vmatmul.f32.vlgmr.msrb.gmra.mxu2 %v15724_v52  ;;  %v3506_v36 = vsub.f32 %v17642_v39, %v24199_v24  ;;  %v17763_v17 = vand.u32 4294901760, %v592_v55  ;;  %v24191_v29 = vand.u32 4294901760, %v17749_v57 }
 0x284   : > { %3484 = vmatpush.msra.mxu1 %v3483_v0  ;;  %3576 = vmatpush.msra.mxu2 %v17562_v43  ;;  %v24194_v14 = vand.u32 4294901760, %v17704_v62  ;;  %v3542_v42 = vsub.f32 %v17734_v33, %v24192_v15 }
 0x285   : > { %3274 = vmatpush.msrb.mxu0 %v17431_v46  ;;  %3426 = vmatpush.msrb.mxu3 %v17435_v58  ;;  %v594_v46 = vld [vmem:[%s24092_s2 + $0x410] sm:$0xff]  ;;  %v24195_v58 = vand.u32 4294901760, %v17689_v40  ;;  %v3507_v7 = vand.u32 4294901760, %v3506_v36  ;;  %v3548_v25 = vsub.f32 %v17749_v57, %v24191_v29 }
 0x286   : > { %3428 = vmatmul.f32.vlgmr.msrb.gmra.mxu3 %v15724_v52  ;;  %3490 = vmatpush.msra.mxu1 %v3489_v1  ;;  %v3530_v13 = vsub.f32 %v17704_v62, %v24194_v14  ;;  %v3536_v1 = vsub.f32 %v17719_v28, %v24193_v35  ;;  %v618_v29 = vld [vmem:[%s24092_s2 + $0x4d0] sm:$0xff] }
 0x287   : > { %3579 = vmatpush.msra.mxu2 %v17575_v34  ;;  %3629 = vmatpush.msra.mxu3 %v17541_v32  ;;  %v3524_v8 = vsub.f32 %v17689_v40, %v24195_v58  ;;  %v616_v58 = vld [vmem:[%s24092_s2 + $0x4c0] sm:$0xff] }
 0x288   : > { %3277 = vmatpush.msrb.mxu0 %v17446_v54  ;;  %3496 = vmatpush.msra.mxu1 %v3495_v63  ;;  %v17736_v54 = vand.u32 4294901760, %v594_v46  ;;  %v3531_v63 = vand.u32 4294901760, %v3530_v13  ;;  %v3549_v13 = vand.u32 4294901760, %v3548_v25  ;;  %v17898_v24 = vand.u32 4294901760, %v616_v58 }
 0x289   : > { %3582 = vmatpush.msra.mxu2 %v17586_v5  ;;  %3631 = vmatpush.msra.mxu3 %v17551_v47  ;;  %v3525_v51 = vand.u32 4294901760, %v3524_v8 }
 0x28a   : > { %3280 = vmatpush.msrb.mxu0 %v17457_v27  ;;  %3502 = vmatpush.msra.mxu1 %v3501_v60  ;;  %v17751_v27 = vand.u32 4294901760, %v593_v38  ;;  %v17761_v0 = vsub.f32 %v594_v46, %v17736_v54  ;;  %v17783_v60 = vsub.f32 %v592_v55, %v17763_v17  ;;  %v3537_v46 = vand.u32 4294901760, %v3536_v1 }
 0x28b   : > { %3283 = vmatmul.f32.vlgmr.msrb.gmra.mxu0 %v24495_v53  ;;  %3585 = vmatpush.msra.mxu2 %v17603_v16 }
 0x28c   : > { %3433 = vmatpush.msra.mxu0 %v17541_v32  ;;  %3633 = vmatpush.msra.mxu3 %v17564_v6  ;;  %v17773_v10 = vsub.f32 %v593_v38, %v17751_v27  ;;  %v24189_v36 = vand.u32 4294901760, %v17761_v0  ;;  %v24190_v8 = vand.u32 4294901760, %v17783_v60 }
 0x28d   : > { %3508 = vmatpush.msra.mxu1 %v3507_v7  ;;  %3588 = vmatpush.msra.mxu2 %v17620_v9  ;;  %v622_v7 = vld [vmem:[%s24092_s2 + $0x4f0] sm:$0xff] }
 0x28e   : > { %3435 = vmatpush.msra.mxu0 %v17551_v47  ;;  %3635 = vmatpush.msra.mxu3 %v17577_v50  ;;  %v24188_v38 = vand.u32 4294901760, %v17773_v10  ;;  %v3554_v55 = vsub.f32 %v17761_v0, %v24189_v36  ;;  %v17813_v1 = vand.u32 4294901760, %v622_v7 }
 0x28f   : > { %3514 = vmatpush.msra.mxu1 %v3513_v31  ;;  %3591 = vmatpush.msra.mxu2 %v17642_v39  ;;  %v3543_v31 = vand.u32 4294901760, %v3542_v42 }
 0x290   : > { %3437 = vmatpush.msra.mxu0 %v17564_v6  ;;  %3637 = vmatpush.msra.mxu3 %v17588_v61  ;;  %v3555_v42 = vand.u32 4294901760, %v3554_v55 }
 0x291   : > { %3520 = vmatpush.msra.mxu1 %v3519_v41  ;;  %3594 = vmatpush.msra.mxu2 %v17651_v37  ;;  %v17805_v41 = vand.u32 4294901760, %v623_v22 }
 0x292   : > { %3439 = vmatpush.msra.mxu0 %v17577_v50  ;;  %3639 = vmatpush.msra.mxu3 %v17608_v56 }
 0x293   : > { %3526 = vmatpush.msra.mxu1 %v3525_v51  ;;  %3597 = vmatpush.msra.mxu2 %v17667_v44  ;;  %v3560_v51 = vsub.f32 %v17773_v10, %v24188_v38  ;;  %v17825_v25 = vsub.f32 %v623_v22, %v17805_v41  ;;  %v620_v38 = vld [vmem:[%s24092_s2 + $0x4e0] sm:$0xff]  ;;  %v17839_v22 = vsub.f32 %v622_v7, %v17813_v1 }
 0x294   : > { %3441 = vmatpush.msra.mxu0 %v17588_v61  ;;  %3641 = vmatpush.msra.mxu3 %v17622_v2 }
 0x295   : > { %3532 = vmatpush.msra.mxu1 %v3531_v63  ;;  %3600 = vmatpush.msra.mxu2 %v17689_v40  ;;  %v621_v63 = vld [vmem:[%s24092_s2 + $0x4e8] sm:$0xff]  ;;  %v3561_v55 = vand.u32 4294901760, %v3560_v51  ;;  %v24196_v15 = vand.u32 4294901760, %v17825_v25  ;;  %v24200_v35 = vand.u32 4294901760, %v17839_v22 }
 0x296   : > { %3443 = vmatpush.msra.mxu0 %v17608_v56  ;;  %3643 = vmatpush.msra.mxu3 %v17633_v45  ;;  %v17832_v36 = vand.u32 4294901760, %v621_v63 }
 0x297   : > { %3538 = vmatpush.msra.mxu1 %v3537_v46  ;;  %3603 = vmatpush.msra.mxu2 %v17704_v62  ;;  %v3566_v46 = vsub.f32 %v17783_v60, %v24190_v8  ;;  %v17843_v8 = vand.u32 4294901760, %v620_v38 }
 0x298   : > { %3445 = vmatpush.msra.mxu0 %v17622_v2  ;;  %3645 = vmatpush.msra.mxu3 %v17659_v19  ;;  %v17855_v7 = vsub.f32 %v621_v63, %v17832_v36  ;;  %v3817_v63 = vsub.f32 %v17825_v25, %v24196_v15 }
 0x299   : > { %3544 = vmatpush.msra.mxu1 %v3543_v31  ;;  %3606 = vmatpush.msra.mxu2 %v17719_v28  ;;  %v619_v31 = vld [vmem:[%s24092_s2 + $0x4d8] sm:$0xff]  ;;  %v17867_v14 = vsub.f32 %v620_v38, %v17843_v8 }
 0x29a   : > { %3447 = vmatpush.msra.mxu0 %v17633_v45  ;;  %3647 = vmatpush.msra.mxu3 %v17676_v18  ;;  %v17850_v51 = vand.u32 4294901760, %v619_v31  ;;  %v24205_v38 = vand.u32 4294901760, %v17855_v7 }
 0x29b   : > { %3550 = vmatpush.msra.mxu1 %v3549_v13  ;;  %3609 = vmatpush.msra.mxu2 %v17734_v33  ;;  %v3567_v13 = vand.u32 4294901760, %v3566_v46  ;;  %v617_v46 = vld [vmem:[%s24092_s2 + $0x4c8] sm:$0xff]  ;;  %v24207_v49 = vand.u32 4294901760, %v17867_v14 }
 0x29c   : > { %3449 = vmatpush.msra.mxu0 %v17659_v19  ;;  %3649 = vmatpush.msra.mxu3 %v17691_v3 }
 0x29d   : > { %3556 = vmatpush.msra.mxu1 %v3555_v42  ;;  %3612 = vmatpush.msra.mxu2 %v17749_v57  ;;  %v17859_v42 = vand.u32 4294901760, %v618_v29 }
 0x29e   : > { %3451 = vmatpush.msra.mxu0 %v17676_v18  ;;  %3651 = vmatpush.msra.mxu3 %v17706_v48 }
 0x29f   : > { %3562 = vmatpush.msra.mxu1 %v3561_v55  ;;  %3615 = vmatpush.msra.mxu2 %v17761_v0  ;;  %v17874_v55 = vsub.f32 %v619_v31, %v17850_v51  ;;  %v3823_v31 = vsub.f32 %v17839_v22, %v24200_v35  ;;  %v17890_v15 = vsub.f32 %v618_v29, %v17859_v42  ;;  %v3818_v35 = vand.u32 4294901760, %v3817_v63 }
 0x2a0   : > { %3453 = vmatpush.msra.mxu0 %v17691_v3  ;;  %3653 = vmatpush.msra.mxu3 %v17721_v11 }
 0x2a1   : > { %3568 = vmatpush.msra.mxu1 %v3567_v13  ;;  %3618 = vmatpush.msra.mxu2 %v17773_v10  ;;  %24496 = vst [vmem:[#allocation10_spill] sm:$0xff] %v17874_v55  ;;  %v17882_v13 = vand.u32 4294901760, %v617_v46  ;;  %v24209_v29 = vand.u32 4294901760, %v17874_v55  ;;  %v3824_v63 = vand.u32 4294901760, %v3823_v31 }
 0x2a2   : > { %3455 = vmatpush.msra.mxu0 %v17706_v48  ;;  %3655 = vmatpush.msra.mxu3 %v17736_v54  ;;  %24497 = vst [vmem:[#allocation11_spill] sm:$0xff] %v17890_v15 }
 0x2a3   : > { %3570 = vmatmul.f32.vlgmr.msra.gmra.mxu1 %v15724_v52  ;;  %3621 = vmatpush.msra.mxu2 %v17783_v60  ;;  %v17912_v59 = vsub.f32 %v617_v46, %v17882_v13  ;;  %v3835_v46 = vsub.f32 %v17867_v14, %v24207_v49  ;;  %v3841_v31 = vsub.f32 %v17874_v55, %v24209_v29 }
 0x2a4   : > { %3737 = vmatpush.msrb.mxu1 %v17541_v32  ;;  %3457 = vmatpush.msra.mxu0 %v17721_v11  ;;  %v3829_v32 = vsub.f32 %v17855_v7, %v24205_v38  ;;  %v17928_v38 = vsub.f32 %v616_v58, %v17898_v24 }
 0x2a5   : > { %3657 = vmatpush.msra.mxu3 %v17751_v27  ;;  %3624 = vmatmul.f32.vlgmr.msra.gmra.mxu2 %v24495_v53 }
 0x2a6   : > { %3739 = vmatpush.msrb.mxu1 %v17551_v47  ;;  %3774 = vmatpush.msrb.mxu2 %v17805_v41  ;;  %v613_v47 = vld [vmem:[%s24092_s2 + $0x4a8] sm:$0xff]  ;;  %v3830_v49 = vand.u32 4294901760, %v3829_v32  ;;  %v17958_v32 = vsub.f32 %v614_v4, %v17930_v12 }
 0x2a7   : > { %3459 = vmatpush.msra.mxu0 %v17736_v54  ;;  %3659 = vmatpush.msra.mxu3 %v17763_v17  ;;  %v17945_v53 = vand.u32 4294901760, %v613_v47 }
 0x2a8   : > { %3663 = vmatmul.f32.vlgmr.msra.gmra.mxu3 %v24494_v26  ;;  %3741 = vmatpush.msrb.mxu1 %v17564_v6  ;;  %v612_v6 = vld [vmem:[%s24092_s2 + $0x4a0] sm:$0xff]  ;;  %v611_v26 = vld [vmem:[%s24092_s2 + $0x498] sm:$0xff] }
 0x2a9   : > { %3776 = vmatpush.msrb.mxu2 %v17813_v1  ;;  %3819 = vmatpush.msrb.mxu3 %v3818_v35  ;;  %v24498_v35 = vand.u32 4294901760, %v17890_v15  ;;  %v17960_v58 = vand.u32 4294901760, %v612_v6  ;;  %v17974_v21 = vsub.f32 %v613_v47, %v17945_v53  ;;  %v17976_v55 = vand.u32 4294901760, %v611_v26 }
 0x2aa   : > { %3461 = vmatpush.msra.mxu0 %v17751_v27  ;;  %3743 = vmatpush.msrb.mxu1 %v17577_v50  ;;  %v3836_v50 = vand.u32 4294901760, %v3835_v46 }
 0x2ab   : > { %3778 = vmatpush.msrb.mxu2 %v17832_v36  ;;  %3825 = vmatpush.msrb.mxu3 %v3824_v63  ;;  %v3847_v29 = vsub.f32 %v17890_v15, %v24498_v35  ;;  %v3842_v63 = vand.u32 4294901760, %v3841_v31  ;;  %v610_v35 = vld [vmem:[%s24092_s2 + $0x490] sm:$0xff]  ;;  %v24499_v15 = vand.u32 4294901760, %v17562_v43  ;;  %v24501_v43 = vand.u32 4294901760, %v17575_v34 }
 0x2ac   : > { %3463 = vmatpush.msra.mxu0 %v17763_v17  ;;  %3745 = vmatpush.msrb.mxu1 %v17588_v61  ;;  %v24500_v61 = vand.u32 4294901760, %v17912_v59  ;;  %v17987_v47 = vsub.f32 %v612_v6, %v17960_v58  ;;  %v17989_v46 = vand.u32 4294901760, %v610_v35  ;;  %v24503_v34 = vand.u32 4294901760, %v17586_v5 }
 0x2ad   : > { %3469 = vmatmul.f32.vlgmr.msra.gmra.mxu0 %v15745_v30  ;;  %3780 = vmatpush.msrb.mxu2 %v17843_v8  ;;  %v3848_v31 = vand.u32 4294901760, %v3847_v29 }
 0x2ae   : > { %3670 = vmatpush.msrb.mxu0 %v24499_v15  ;;  %3831 = vmatpush.msrb.mxu3 %v3830_v49  ;;  %v3853_v4 = vsub.f32 %v17912_v59, %v24500_v61  ;;  %v24502_v49 = vand.u32 4294901760, %v17928_v38  ;;  %v3870_v61 = vand.u32 4294901760, %v17958_v32 }
 0x2af   : > { %3747 = vmatpush.msrb.mxu1 %v17608_v56  ;;  %3782 = vmatpush.msrb.mxu2 %v17850_v51  ;;  %v609_v56 = vld [vmem:[%s24092_s2 + $0x488] sm:$0xff] }
 0x2b0   : > { %3674 = vmatpush.msrb.mxu0 %v24501_v43  ;;  %3837 = vmatpush.msrb.mxu3 %v3836_v50  ;;  %v3859_v15 = vsub.f32 %v17928_v38, %v24502_v49  ;;  %v3854_v29 = vand.u32 4294901760, %v3853_v4  ;;  %v24504_v50 = vand.u32 4294901760, %v17943_v20  ;;  %v3876_v43 = vand.u32 4294901760, %v17974_v21 }
 0x2b1   : > { %3749 = vmatpush.msrb.mxu1 %v17622_v2  ;;  %3784 = vmatpush.msrb.mxu2 %v17859_v42  ;;  %v18003_v49 = vsub.f32 %v611_v26, %v17976_v55  ;;  %v608_v2 = vld [vmem:[%s24092_s2 + $0x480] sm:$0xff]  ;;  %v18010_v5 = vand.u32 4294901760, %v609_v56  ;;  %v3871_v26 = vsub.f32 %v17958_v32, %v3870_v61 }
 0x2b2   : > { %3678 = vmatpush.msrb.mxu0 %v24503_v34  ;;  %3843 = vmatpush.msrb.mxu3 %v3842_v63  ;;  %v3865_v6 = vsub.f32 %v17943_v20, %v24504_v50  ;;  %v24505_v63 = vand.u32 4294901760, %v17603_v16  ;;  %v3860_v4 = vand.u32 4294901760, %v3859_v15  ;;  %v3882_v34 = vand.u32 4294901760, %v17987_v47 }
 0x2b3   : > { %3751 = vmatpush.msrb.mxu1 %v17633_v45  ;;  %3786 = vmatpush.msrb.mxu2 %v17882_v13  ;;  %v18019_v50 = vsub.f32 %v610_v35, %v17989_v46  ;;  %v18023_v45 = vand.u32 4294901760, %v608_v2  ;;  %v24506_v16 = vand.u32 4294901760, %v17620_v9  ;;  %v3877_v15 = vsub.f32 %v17974_v21, %v3876_v43 }
 0x2b4   : > { %3682 = vmatpush.msrb.mxu0 %v24505_v63  ;;  %3849 = vmatpush.msrb.mxu3 %v3848_v31  ;;  %v3866_v31 = vand.u32 4294901760, %v3865_v6  ;;  %v3888_v63 = vand.u32 4294901760, %v18003_v49  ;;  %v24507_v35 = vand.u32 4294901760, %v17642_v39  ;;  %v3872_v9 = vand.u32 4294901760, %v3871_v26 }
 0x2b5   : > { %3753 = vmatpush.msrb.mxu1 %v17659_v19  ;;  %3788 = vmatpush.msrb.mxu2 %v17898_v24  ;;  %v18034_v19 = vsub.f32 %v609_v56, %v18010_v5  ;;  %v3894_v6 = vand.u32 4294901760, %v18019_v50  ;;  %v24508_v56 = vand.u32 4294901760, %v17651_v37  ;;  %v3878_v39 = vand.u32 4294901760, %v3877_v15 }
 0x2b6   : > { %3686 = vmatpush.msrb.mxu0 %v24506_v16  ;;  %3855 = vmatpush.msrb.mxu3 %v3854_v29  ;;  %v3883_v29 = vsub.f32 %v17987_v47, %v3882_v34  ;;  %v24509_v26 = vand.u32 4294901760, %v17667_v44  ;;  %v24511_v15 = vand.u32 4294901760, %v17704_v62 }
 0x2b7   : > { %3755 = vmatpush.msrb.mxu1 %v17676_v18  ;;  %3790 = vmatpush.msrb.mxu2 %v17914_v23  ;;  %v18045_v18 = vsub.f32 %v608_v2, %v18023_v45  ;;  %v3895_v37 = vsub.f32 %v18019_v50, %v3894_v6 }
 0x2b8   : > { %3690 = vmatpush.msrb.mxu0 %v24507_v35  ;;  %3861 = vmatpush.msrb.mxu3 %v3860_v4  ;;  %v3889_v4 = vsub.f32 %v18003_v49, %v3888_v63  ;;  %v3884_v2 = vand.u32 4294901760, %v3883_v29  ;;  %v24513_v35 = vand.u32 4294901760, %v17734_v33  ;;  %v24516_v33 = vand.u32 4294901760, %v17761_v0 }
 0x2b9   : > { %3757 = vmatpush.msrb.mxu1 %v17691_v3  ;;  %3792 = vmatpush.msrb.mxu2 %v17930_v12  ;;  %v3900_v3 = vand.u32 4294901760, %v18034_v19  ;;  %v3906_v16 = vand.u32 4294901760, %v18045_v18  ;;  %v24519_v29 = vand.u32 4294901760, %v17855_v7  ;;  %v24520_v0 = vand.u32 4294901760, %v17783_v60  ;;  %v639_v60 = vld [vmem:[%s24092_s2 + $0x578] sm:$0xff] }
 0x2ba   : > { %3694 = vmatpush.msrb.mxu0 %v24508_v56  ;;  %3867 = vmatpush.msrb.mxu3 %v3866_v31  ;;  %v3890_v31 = vand.u32 4294901760, %v3889_v4  ;;  %v24521_v56 = vand.u32 4294901760, %v17867_v14 }
 0x2bb   : > { %3759 = vmatpush.msrb.mxu1 %v17706_v48  ;;  %3794 = vmatpush.msrb.mxu2 %v17945_v53  ;;  %v24510_v48 = vand.u32 4294901760, %v17689_v40  ;;  %v3901_v44 = vsub.f32 %v18034_v19, %v3900_v3  ;;  %v3907_v40 = vsub.f32 %v18045_v18, %v3906_v16 }
 0x2bc   : > { %3698 = vmatpush.msrb.mxu0 %v24509_v26  ;;  %3873 = vmatpush.msrb.mxu3 %v3872_v9  ;;  %v24517_v9 = vand.u32 4294901760, %v17839_v22 }
 0x2bd   : > { %3761 = vmatpush.msrb.mxu1 %v17721_v11  ;;  %3796 = vmatpush.msrb.mxu2 %v17960_v58  ;;  %v3896_v11 = vand.u32 4294901760, %v3895_v37  ;;  %v3902_v62 = vand.u32 4294901760, %v3901_v44  ;;  %v634_v44 = vld [vmem:[%s24092_s2 + $0x550] sm:$0xff] }
 0x2be   : > { %3702 = vmatpush.msrb.mxu0 %v24510_v48  ;;  %3879 = vmatpush.msrb.mxu3 %v3878_v39 }
 0x2bf   : > { %3763 = vmatpush.msrb.mxu1 %v17736_v54  ;;  %3798 = vmatpush.msrb.mxu2 %v17976_v55  ;;  %v24512_v54 = vand.u32 4294901760, %v17719_v28  ;;  %v24514_v28 = vand.u32 4294901760, %v17749_v57  ;;  %v24518_v57 = vand.u32 4294901760, %v17773_v10  ;;  %v24522_v10 = vld [vmem:[#allocation10_spill] sm:$0xff] }
 0x2c0   : > { %3706 = vmatpush.msrb.mxu0 %v24511_v15  ;;  %3885 = vmatpush.msrb.mxu3 %v3884_v2  ;;  %v635_v2 = vld [vmem:[%s24092_s2 + $0x558] sm:$0xff]  ;;  %v18196_v15 = vand.u32 4294901760, %v634_v44 }
 0x2c1   : > { %3765 = vmatpush.msrb.mxu1 %v17751_v27  ;;  %3800 = vmatpush.msrb.mxu2 %v17989_v46  ;;  %v3908_v27 = vand.u32 4294901760, %v3907_v40 }
 0x2c2   : > { %3710 = vmatpush.msrb.mxu0 %v24512_v54  ;;  %3891 = vmatpush.msrb.mxu3 %v3890_v31  ;;  %v631_v54 = vld [vmem:[%s24092_s2 + $0x538] sm:$0xff] }
 0x2c3   : > { %3767 = vmatpush.msrb.mxu1 %v17763_v17  ;;  %3802 = vmatpush.msrb.mxu2 %v18010_v5  ;;  %v24515_v17 = vand.u32 4294901760, %v17825_v25 }
 0x2c4   : > { %3714 = vmatpush.msrb.mxu0 %v24513_v35  ;;  %3897 = vmatpush.msrb.mxu3 %v3896_v11 }
 0x2c5   : > { %3769 = vmatmul.f32.vlgmr.msrb.gmra.mxu1 %v15724_v52  ;;  %3804 = vmatpush.msrb.mxu2 %v18023_v45 }
 0x2c6   : > { %3970 = vmatpush.msra.mxu1 %v17805_v41  ;;  %3718 = vmatpush.msrb.mxu0 %v24514_v28 }
 0x2c7   : > { %3903 = vmatpush.msrb.mxu3 %v3902_v62  ;;  %3810 = vmatmul.f32.vlgmr.msrb.gmra.mxu2 %v15745_v30 }
 0x2c8   : > { %3972 = vmatpush.msra.mxu1 %v17813_v1  ;;  %4011 = vmatpush.msra.mxu2 %v24515_v17 }
 0x2c9   : > { %3722 = vmatpush.msrb.mxu0 %v24516_v33  ;;  %3909 = vmatpush.msrb.mxu3 %v3908_v27  ;;  %v24529_v33 = vld [vmem:[#allocation9_spill] sm:$0xff] }
 0x2ca   : > { %3911 = vmatmul.f32.vlgmr.msrb.gmra.mxu3 %v15724_v52  ;;  %3974 = vmatpush.msra.mxu1 %v17832_v36 }
 0x2cb   : > { %4015 = vmatpush.msra.mxu2 %v24517_v9  ;;  %4078 = vmatpush.msra.mxu3 %v17805_v41  ;;  %v24523_v41 = vand.u32 4294901760, %v24522_v10 }
 0x2cc   : > { %3726 = vmatpush.msrb.mxu0 %v24518_v57  ;;  %3976 = vmatpush.msra.mxu1 %v17843_v8 }
 0x2cd   : > { %4019 = vmatpush.msra.mxu2 %v24519_v29  ;;  %4080 = vmatpush.msra.mxu3 %v17813_v1  ;;  %v24524_v1 = vld [vmem:[#allocation11_spill] sm:$0xff] }
 0x2ce   : > { %3730 = vmatpush.msrb.mxu0 %v24520_v0  ;;  %3978 = vmatpush.msra.mxu1 %v17850_v51  ;;  %v24525_v39 = vand.u32 4294901760, %v24524_v1  ;;  %v628_v0 = vld [vmem:[%s24092_s2 + $0x520] sm:$0xff] }
 0x2cf   : > { %3732 = vmatmul.f32.vlgmr.msrb.gmra.mxu0 %v15724_v52  ;;  %4023 = vmatpush.msra.mxu2 %v24521_v56 }
 0x2d0   : > { %3917 = vmatpush.msra.mxu0 %v17825_v25  ;;  %4082 = vmatpush.msra.mxu3 %v17832_v36  ;;  %v638_v36 = vld [vmem:[%s24092_s2 + $0x570] sm:$0xff]  ;;  %v18129_v25 = vand.u32 4294901760, %v639_v60 }
 0x2d1   : > { %3980 = vmatpush.msra.mxu1 %v17859_v42  ;;  %4027 = vmatpush.msra.mxu2 %v24523_v41  ;;  %v18139_v4 = vand.u32 4294901760, %v638_v36  ;;  %v627_v41 = vld [vmem:[%s24092_s2 + $0x518] sm:$0xff] }
 0x2d2   : > { %3920 = vmatpush.msra.mxu0 %v17839_v22  ;;  %4084 = vmatpush.msra.mxu3 %v17843_v8  ;;  %v24526_v22 = vand.u32 4294901760, %v17912_v59  ;;  %v637_v8 = vld [vmem:[%s24092_s2 + $0x568] sm:$0xff]  ;;  %v18150_v26 = vsub.f32 %v639_v60, %v18129_v25  ;;  %v18288_v60 = vpop.f32.mrf.mxu2 }
 0x2d3   : > { %3982 = vmatpush.msra.mxu1 %v17882_v13  ;;  %4031 = vmatpush.msra.mxu2 %v24525_v39  ;;  %24530 = vst [vmem:[#allocation10_spill] sm:$0xff] %v18288_v60  ;;  %v18298_v39 = vand.u32 4294901760, %v628_v0 }
 0x2d4   : > { %3923 = vmatpush.msra.mxu0 %v17855_v7  ;;  %4086 = vmatpush.msra.mxu3 %v17850_v51  ;;  %v24527_v51 = vand.u32 4294901760, %v17928_v38  ;;  %v636_v7 = vld [vmem:[%s24092_s2 + $0x560] sm:$0xff]  ;;  %v24230_v48 = vand.u32 4294901760, %v18150_v26 }
 0x2d5   : > { %3984 = vmatpush.msra.mxu1 %v17898_v24  ;;  %4035 = vmatpush.msra.mxu2 %v24526_v22  ;;  %v18165_v37 = vand.u32 4294901760, %v636_v7 }
 0x2d6   : > { %3926 = vmatpush.msra.mxu0 %v17867_v14  ;;  %4088 = vmatpush.msra.mxu3 %v17859_v42  ;;  %v18152_v14 = vand.u32 4294901760, %v637_v8  ;;  %v24528_v42 = vand.u32 4294901760, %v17943_v20 }
 0x2d7   : > { %3986 = vmatpush.msra.mxu1 %v17914_v23  ;;  %4039 = vmatpush.msra.mxu2 %v24527_v51 }
 0x2d8   : > { %3929 = vmatpush.msra.mxu0 %v24522_v10  ;;  %4090 = vmatpush.msra.mxu3 %v17882_v13  ;;  %v18163_v13 = vsub.f32 %v638_v36, %v18139_v4  ;;  %v18174_v31 = vsub.f32 %v637_v8, %v18152_v14  ;;  %v18300_v36 = vpop.f32.mrf.mxu1 }
 0x2d9   : > { %3988 = vmatpush.msra.mxu1 %v17930_v12  ;;  %4043 = vmatpush.msra.mxu2 %v24528_v42  ;;  %24531 = vst [vmem:[#allocation11_spill] sm:$0xff] %v18300_v36 }
 0x2da   : > { %3932 = vmatpush.msra.mxu0 %v24524_v1  ;;  %4092 = vmatpush.msra.mxu3 %v17898_v24  ;;  %v18176_v24 = vand.u32 4294901760, %v635_v2 }
 0x2db   : > { %3990 = vmatpush.msra.mxu1 %v17945_v53  ;;  %4047 = vmatpush.msra.mxu2 %v3870_v61  ;;  %v18191_v61 = vsub.f32 %v636_v7, %v18165_v37  ;;  %v18315_v7 = vand.u32 4294901760, %v627_v41 }
 0x2dc   : > { %3935 = vmatpush.msra.mxu0 %v17912_v59  ;;  %4094 = vmatpush.msra.mxu3 %v17914_v23  ;;  %v633_v23 = vld [vmem:[%s24092_s2 + $0x548] sm:$0xff]  ;;  %v24229_v59 = vand.u32 4294901760, %v18163_v13  ;;  %v18208_v11 = vsub.f32 %v635_v2, %v18176_v24 }
 0x2dd   : > { %3992 = vmatpush.msra.mxu1 %v17960_v58  ;;  %4051 = vmatpush.msra.mxu2 %v3876_v43  ;;  %v632_v43 = vld [vmem:[%s24092_s2 + $0x540] sm:$0xff]  ;;  %v625_v2 = vld [vmem:[%s24092_s2 + $0x508] sm:$0xff] }
 0x2de   : > { %3938 = vmatpush.msra.mxu0 %v17928_v38  ;;  %4096 = vmatpush.msra.mxu3 %v17930_v12  ;;  %v4158_v12 = vsub.f32 %v18150_v26, %v24230_v48  ;;  %v24227_v38 = vand.u32 4294901760, %v18174_v31  ;;  %v18221_v40 = vand.u32 4294901760, %v632_v43  ;;  %v24224_v62 = vand.u32 4294901760, %v18208_v11 }
 0x2df   : > { %3994 = vmatpush.msra.mxu1 %v17976_v55  ;;  %4055 = vmatpush.msra.mxu2 %v3882_v34  ;;  %v18210_v34 = vand.u32 4294901760, %v633_v23 }
 0x2e0   : > { %3941 = vmatpush.msra.mxu0 %v17943_v20  ;;  %4098 = vmatpush.msra.mxu3 %v17945_v53  ;;  %v4164_v20 = vsub.f32 %v18163_v13, %v24229_v59  ;;  %v24226_v53 = vand.u32 4294901760, %v18191_v61  ;;  %v18257_v17 = vsub.f32 %v632_v43, %v18221_v40  ;;  %v4182_v57 = vsub.f32 %v18208_v11, %v24224_v62 }
 0x2e1   : > { %3996 = vmatpush.msra.mxu1 %v17989_v46  ;;  %4059 = vmatpush.msra.mxu2 %v3888_v63  ;;  %v4170_v63 = vsub.f32 %v18174_v31, %v24227_v38  ;;  %v18239_v35 = vsub.f32 %v633_v23, %v18210_v34 }
 0x2e2   : > { %3944 = vmatpush.msra.mxu0 %v17958_v32  ;;  %4100 = vmatpush.msra.mxu3 %v17960_v58  ;;  %v18230_v32 = vsub.f32 %v634_v44, %v18196_v15  ;;  %v4159_v58 = vand.u32 4294901760, %v4158_v12  ;;  %v4165_v27 = vand.u32 4294901760, %v4164_v20  ;;  %v4176_v28 = vsub.f32 %v18191_v61, %v24226_v53  ;;  %v18324_v44 = vpop.f32.mrf.mxu3  ;;  %v652_v53 = vld [vmem:[%s24092_s2 + $0x5e0] sm:$0xff] }
 0x2e3   : > { %3998 = vmatpush.msra.mxu1 %v18010_v5  ;;  %4063 = vmatpush.msra.mxu2 %v3894_v6  ;;  %v630_v6 = vld [vmem:[%s24092_s2 + $0x530] sm:$0xff]  ;;  %v4171_v9 = vand.u32 4294901760, %v4170_v63  ;;  %v24221_v29 = vand.u32 4294901760, %v18239_v35  ;;  %v24220_v10 = vand.u32 4294901760, %v18257_v17  ;;  %v4183_v22 = vand.u32 4294901760, %v4182_v57  ;;  %24532 = vst [vmem:[#allocation12_spill] sm:$0xff] %v18324_v44 }
 0x2e4   : > { %3947 = vmatpush.msra.mxu0 %v17974_v21  ;;  %4102 = vmatpush.msra.mxu3 %v17976_v55  ;;  %v18247_v55 = vand.u32 4294901760, %v631_v54  ;;  %v18249_v21 = vpop.f32.mrf.mxu0  ;;  %v24534_v63 = vld [vmem:[#allocation8_spill] sm:$0xff]  ;;  %v18457_v48 = vand.u32 4294901760, %v652_v53 }
 0x2e5   : > { %4000 = vmatpush.msra.mxu1 %v18023_v45  ;;  %4067 = vmatpush.msra.mxu2 %v3900_v3  ;;  %v629_v3 = vld [vmem:[%s24092_s2 + $0x528] sm:$0xff]  ;;  %v4200_v42 = vsub.f32 %v18257_v17, %v24220_v10  ;;  %v647_v44 = vld [vmem:[%s24092_s2 + $0x5b8] sm:$0xff] }
 0x2e6   : > { %3950 = vmatpush.msra.mxu0 %v17987_v47  ;;  %4104 = vmatpush.msra.mxu3 %v17989_v46  ;;  %v24222_v47 = vand.u32 4294901760, %v18230_v32  ;;  %v18266_v46 = vand.u32 4294901760, %v630_v6  ;;  %v18281_v56 = vand.u32 4294901760, %v629_v3  ;;  %v18536_v60 = vand.u32 4294901760, %v647_v44 }
 0x2e7   : > { %4004 = vmatmul.f32.vlgmr.msra.gmra.mxu1 %v24529_v33  ;;  %4071 = vmatpush.msra.mxu2 %v3906_v16  ;;  %v18279_v16 = vsub.f32 %v631_v54, %v18247_v55 }
 0x2e8   : > { %4160 = vmatpush.msrb.mxu1 %v4159_v58  ;;  %3953 = vmatpush.msra.mxu0 %v18003_v49  ;;  %v4177_v49 = vand.u32 4294901760, %v4176_v28  ;;  %v18296_v1 = vsub.f32 %v630_v6, %v18266_v46  ;;  %v18313_v51 = vsub.f32 %v629_v3, %v18281_v56  ;;  %v624_v58 = vld [vmem:[%s24092_s2 + $0x500] sm:$0xff]  ;;  %v18347_v28 = vsub.f32 %v627_v41, %v18315_v7  ;;  %v18365_v41 = vpop.f32.mrf.mxu2 }
 0x2e9   : > { %4106 = vmatpush.msra.mxu3 %v18010_v5  ;;  %4073 = vmatmul.f32.vlgmr.msra.gmra.mxu2 %v15724_v52  ;;  %v4188_v5 = vsub.f32 %v18230_v32, %v24222_v47  ;;  %v24218_v8 = vand.u32 4294901760, %v18279_v16  ;;  %v4201_v3 = vand.u32 4294901760, %v4200_v42  ;;  %24535 = vst [vmem:[#allocation14_spill] sm:$0xff] %v18365_v41  ;;  %v18375_v42 = vpop.f32.mrf.mxu1 }
 0x2ea   : > { %4166 = vmatpush.msrb.mxu1 %v4165_v27  ;;  %4258 = vmatpush.msrb.mxu2 %v18150_v26  ;;  %v24217_v43 = vand.u32 4294901760, %v18296_v1  ;;  %v24215_v27 = vand.u32 4294901760, %v18313_v51  ;;  %24536 = vst [vmem:[#allocation15_spill] sm:$0xff] %v18375_v42 }
 0x2eb   : > { %3956 = vmatpush.msra.mxu0 %v18019_v50  ;;  %4108 = vmatpush.msra.mxu3 %v18023_v45  ;;  %v4194_v50 = vsub.f32 %v18239_v35, %v24221_v29  ;;  %v626_v45 = vld [vmem:[%s24092_s2 + $0x510] sm:$0xff]  ;;  %v4189_v23 = vand.u32 4294901760, %v4188_v5  ;;  %v4206_v6 = vsub.f32 %v18279_v16, %v24218_v8 }
 0x2ec   : > { %4110 = vmatmul.f32.vlgmr.msra.gmra.mxu3 %v15724_v52  ;;  %4172 = vmatpush.msrb.mxu1 %v4171_v9  ;;  %v18332_v12 = vand.u32 4294901760, %v626_v45  ;;  %v18334_v20 = vpop.f32.mrf.mxu0  ;;  %v4212_v9 = vsub.f32 %v18296_v1, %v24217_v43  ;;  %v654_v8 = vld [vmem:[%s24092_s2 + $0x5f0] sm:$0xff] }
 0x2ed   : > { %4261 = vmatpush.msrb.mxu2 %v18163_v13  ;;  %4311 = vmatpush.msrb.mxu3 %v18129_v25  ;;  %24533 = vst [vmem:[#allocation13_spill] sm:$0xff] %v18334_v20  ;;  %v4195_v54 = vand.u32 4294901760, %v4194_v50  ;;  %v4207_v5 = vand.u32 4294901760, %v4206_v6  ;;  %v24219_v50 = vand.u32 4294901760, %v18347_v28  ;;  %v18421_v47 = vand.u32 4294901760, %v654_v8 }
 0x2ee   : > { %3959 = vmatpush.msra.mxu0 %v18034_v19  ;;  %4178 = vmatpush.msrb.mxu1 %v4177_v49  ;;  %v18330_v19 = vsub.f32 %v628_v0, %v18298_v39  ;;  %v18359_v0 = vsub.f32 %v626_v45, %v18332_v12  ;;  %v18361_v49 = vand.u32 4294901760, %v624_v58 }
 0x2ef   : > { %4264 = vmatpush.msrb.mxu2 %v18174_v31  ;;  %4313 = vmatpush.msrb.mxu3 %v18139_v4  ;;  %v18453_v59 = vsub.f32 %v654_v8, %v18421_v47 }
 0x2f0   : > { %3962 = vmatpush.msra.mxu0 %v18045_v18  ;;  %4184 = vmatpush.msrb.mxu1 %v4183_v22  ;;  %v18349_v18 = vand.u32 4294901760, %v625_v2  ;;  %v24216_v57 = vand.u32 4294901760, %v18330_v19  ;;  %v4218_v22 = vsub.f32 %v18313_v51, %v24215_v27  ;;  %v24223_v6 = vand.u32 4294901760, %v18359_v0  ;;  %v18415_v29 = vpop.f32.mrf.mxu2 }
 0x2f1   : > { %3965 = vmatmul.f32.vlgmr.msra.gmra.mxu0 %v24534_v63  ;;  %4267 = vmatpush.msrb.mxu2 %v18191_v61  ;;  %v18385_v27 = vsub.f32 %v624_v58, %v18361_v49  ;;  %v4230_v58 = vsub.f32 %v18347_v28, %v24219_v50  ;;  %24539 = vst [vmem:[#allocation18_spill] sm:$0xff] %v18415_v29  ;;  %v18426_v62 = vpop.f32.mrf.mxu1 }
 0x2f2   : > { %4115 = vmatpush.msrb.mxu0 %v18129_v25  ;;  %4315 = vmatpush.msrb.mxu3 %v18152_v14  ;;  %v18373_v45 = vsub.f32 %v625_v2, %v18349_v18  ;;  %24540 = vst [vmem:[#allocation19_spill] sm:$0xff] %v18426_v62 }
 0x2f3   : > { %4190 = vmatpush.msrb.mxu1 %v4189_v23  ;;  %4270 = vmatpush.msrb.mxu2 %v18208_v11  ;;  %v4213_v23 = vand.u32 4294901760, %v4212_v9  ;;  %v18394_v9 = vpop.f32.mrf.mxu3  ;;  %v24228_v50 = vand.u32 4294901760, %v18385_v27 }
 0x2f4   : > { %4117 = vmatpush.msrb.mxu0 %v18139_v4  ;;  %4317 = vmatpush.msrb.mxu3 %v18165_v37  ;;  %v18387_v2 = vpop.f32.mrf.mxu0  ;;  %24538 = vst [vmem:[#allocation17_spill] sm:$0xff] %v18394_v9  ;;  %v24225_v43 = vand.u32 4294901760, %v18373_v45 }
 0x2f5   : > { %4196 = vmatpush.msrb.mxu1 %v4195_v54  ;;  %4273 = vmatpush.msrb.mxu2 %v18230_v32  ;;  %v4224_v54 = vsub.f32 %v18330_v19, %v24216_v57  ;;  %24537 = vst [vmem:[#allocation16_spill] sm:$0xff] %v18387_v2  ;;  %v4219_v57 = vand.u32 4294901760, %v4218_v22  ;;  %v4236_v22 = vsub.f32 %v18359_v0, %v24223_v6  ;;  %v653_v6 = vld [vmem:[%s24092_s2 + $0x5e8] sm:$0xff]  ;;  %v646_v2 = vld [vmem:[%s24092_s2 + $0x5b0] sm:$0xff] }
 0x2f6   : > { %4119 = vmatpush.msrb.mxu0 %v18152_v14  ;;  %4319 = vmatpush.msrb.mxu3 %v18176_v24 }
 0x2f7   : > { %4202 = vmatpush.msrb.mxu1 %v4201_v3  ;;  %4276 = vmatpush.msrb.mxu2 %v18239_v35  ;;  %v655_v3 = vld [vmem:[%s24092_s2 + $0x5f8] sm:$0xff] }
 0x2f8   : > { %4121 = vmatpush.msrb.mxu0 %v18165_v37  ;;  %4321 = vmatpush.msrb.mxu3 %v18196_v15  ;;  %v18411_v10 = vand.u32 4294901760, %v655_v3  ;;  %v18471_v42 = vpop.f32.mrf.mxu2 }
 0x2f9   : > { %4208 = vmatpush.msrb.mxu1 %v4207_v5  ;;  %4279 = vmatpush.msrb.mxu2 %v18257_v17  ;;  %v4225_v5 = vand.u32 4294901760, %v4224_v54  ;;  %v4242_v54 = vsub.f32 %v18373_v45, %v24225_v43  ;;  %24543 = vst [vmem:[#allocation22_spill] sm:$0xff] %v18471_v42 }
 0x2fa   : > { %4123 = vmatpush.msrb.mxu0 %v18176_v24  ;;  %4323 = vmatpush.msrb.mxu3 %v18210_v34  ;;  %v18435_v43 = vsub.f32 %v655_v3, %v18411_v10 }
 0x2fb   : > { %4214 = vmatpush.msrb.mxu1 %v4213_v23  ;;  %4282 = vmatpush.msrb.mxu2 %v18279_v16  ;;  %v4231_v23 = vand.u32 4294901760, %v4230_v58  ;;  %v4248_v58 = vsub.f32 %v18385_v27, %v24228_v50  ;;  %v18449_v50 = vpop.f32.mrf.mxu3  ;;  %v4243_v3 = vand.u32 4294901760, %v4242_v54 }
 0x2fc   : > { %4125 = vmatpush.msrb.mxu0 %v18196_v15  ;;  %4325 = vmatpush.msrb.mxu3 %v18221_v40  ;;  %v18440_v38 = vpop.f32.mrf.mxu0  ;;  %24542 = vst [vmem:[#allocation21_spill] sm:$0xff] %v18449_v50  ;;  %v18480_v50 = vpop.f32.mrf.mxu1 }
 0x2fd   : > { %4220 = vmatpush.msrb.mxu1 %v4219_v57  ;;  %4285 = vmatpush.msrb.mxu2 %v18296_v1  ;;  %v4237_v57 = vand.u32 4294901760, %v4236_v22  ;;  %24541 = vst [vmem:[#allocation20_spill] sm:$0xff] %v18440_v38  ;;  %v651_v22 = vld [vmem:[%s24092_s2 + $0x5d8] sm:$0xff]  ;;  %v650_v38 = vld [vmem:[%s24092_s2 + $0x5d0] sm:$0xff] }
 0x2fe   : > { %4127 = vmatpush.msrb.mxu0 %v18210_v34  ;;  %4327 = vmatpush.msrb.mxu3 %v18247_v55  ;;  %v18464_v54 = vand.u32 4294901760, %v651_v22  ;;  %v18475_v29 = vand.u32 4294901760, %v650_v38  ;;  %24544 = vst [vmem:[#allocation23_spill] sm:$0xff] %v18480_v50  ;;  %v648_v50 = vld [vmem:[%s24092_s2 + $0x5c0] sm:$0xff] }
 0x2ff   : > { %4226 = vmatpush.msrb.mxu1 %v4225_v5  ;;  %4288 = vmatpush.msrb.mxu2 %v18313_v51  ;;  %v18444_v5 = vand.u32 4294901760, %v653_v6 }
 0x300   : > { %4129 = vmatpush.msrb.mxu0 %v18221_v40  ;;  %4329 = vmatpush.msrb.mxu3 %v18266_v46  ;;  %v18492_v42 = vsub.f32 %v651_v22, %v18464_v54  ;;  %v24550_v22 = vand.u32 4294901760, %v18453_v59 }
 0x301   : > { %4232 = vmatpush.msrb.mxu1 %v4231_v23  ;;  %4291 = vmatpush.msrb.mxu2 %v18330_v19  ;;  %v4249_v23 = vand.u32 4294901760, %v4248_v58  ;;  %v18469_v8 = vsub.f32 %v653_v6, %v18444_v5  ;;  %v649_v58 = vld [vmem:[%s24092_s2 + $0x5c8] sm:$0xff]  ;;  %v18485_v6 = vsub.f32 %v652_v53, %v18457_v48 }
 0x302   : > { %4131 = vmatpush.msrb.mxu0 %v18247_v55  ;;  %4331 = vmatpush.msrb.mxu3 %v18281_v56  ;;  %24547 = vst [vmem:[#allocation25_spill] sm:$0xff] %v18492_v42 }
 0x303   : > { %4238 = vmatpush.msrb.mxu1 %v4237_v57  ;;  %4294 = vmatpush.msrb.mxu2 %v18347_v28  ;;  %24545 = vst [vmem:[#allocation24_spill] sm:$0xff] %v18485_v6  ;;  %v18504_v62 = vpop.f32.mrf.mxu3 }
 0x304   : > { %4133 = vmatpush.msrb.mxu0 %v18266_v46  ;;  %4333 = vmatpush.msrb.mxu3 %v18298_v39  ;;  %v18497_v20 = vpop.f32.mrf.mxu0  ;;  %24549 = vst [vmem:[#allocation27_spill] sm:$0xff] %v18504_v62  ;;  %v18520_v62 = vand.u32 4294901760, %v648_v50  ;;  %v18546_v41 = vpop.f32.mrf.mxu1 }
 0x305   : > { %4244 = vmatpush.msrb.mxu1 %v4243_v3  ;;  %4297 = vmatpush.msrb.mxu2 %v18359_v0  ;;  %v24546_v3 = vand.u32 4294901760, %v18435_v43  ;;  %24548 = vst [vmem:[#allocation26_spill] sm:$0xff] %v18497_v20  ;;  %v18512_v20 = vsub.f32 %v650_v38, %v18475_v29 }
 0x306   : > { %4135 = vmatpush.msrb.mxu0 %v18281_v56  ;;  %4335 = vmatpush.msrb.mxu3 %v18315_v7  ;;  %24555 = vst [vmem:[#allocation31_spill] sm:$0xff] %v18546_v41 }
 0x307   : > { %4250 = vmatpush.msrb.mxu1 %v4249_v23  ;;  %4300 = vmatpush.msrb.mxu2 %v18373_v45  ;;  %v4499_v57 = vsub.f32 %v18435_v43, %v24546_v3  ;;  %v18502_v23 = vand.u32 4294901760, %v649_v58  ;;  %v4505_v3 = vsub.f32 %v18453_v59, %v24550_v22  ;;  %24551 = vst [vmem:[#allocation28_spill] sm:$0xff] %v18512_v20 }
 0x308   : > { %4137 = vmatpush.msrb.mxu0 %v18298_v39  ;;  %4337 = vmatpush.msrb.mxu3 %v18332_v12 }
 0x309   : > { %4252 = vmatmul.f32.vlgmr.msrb.gmra.mxu1 %v15724_v52  ;;  %4303 = vmatpush.msrb.mxu2 %v18385_v27  ;;  %v4500_v22 = vand.u32 4294901760, %v4499_v57  ;;  %v18534_v9 = vsub.f32 %v649_v58, %v18502_v23  ;;  %v18538_v57 = vpop.f32.mrf.mxu2  ;;  %v4506_v38 = vand.u32 4294901760, %v4505_v3  ;;  %v24556_v58 = vand.u32 4294901760, %v18485_v6 }
 0x30a   : > { %4419 = vmatpush.msra.mxu1 %v18129_v25  ;;  %4139 = vmatpush.msrb.mxu0 %v18315_v7  ;;  %v24552_v25 = vand.u32 4294901760, %v18469_v8  ;;  %24554 = vst [vmem:[#allocation30_spill] sm:$0xff] %v18538_v57  ;;  %v18554_v57 = vsub.f32 %v648_v50, %v18520_v62  ;;  %v18556_v3 = vand.u32 4294901760, %v646_v2 }
 0x30b   : > { %4339 = vmatpush.msrb.mxu3 %v18349_v18  ;;  %4306 = vmatmul.f32.vlgmr.msrb.gmra.mxu2 %v24534_v63  ;;  %24553 = vst [vmem:[#allocation29_spill] sm:$0xff] %v18534_v9  ;;  %v645_v63 = vld [vmem:[%s24092_s2 + $0x5a8] sm:$0xff]  ;;  %v18575_v36 = vpop.f32.mrf.mxu3 }
 0x30c   : > { %4421 = vmatpush.msra.mxu1 %v18139_v4  ;;  %4456 = vmatpush.msra.mxu2 %v18411_v10  ;;  %v4511_v53 = vsub.f32 %v18469_v8, %v24552_v25  ;;  %v4517_v25 = vsub.f32 %v18485_v6, %v24556_v58  ;;  %v24557_v4 = vand.u32 4294901760, %v18492_v42  ;;  %v18571_v6 = vsub.f32 %v647_v44, %v18536_v60 }
 0x30d   : > { %4141 = vmatpush.msrb.mxu0 %v18332_v12  ;;  %4341 = vmatpush.msrb.mxu3 %v18361_v49  ;;  %24559 = vst [vmem:[#allocation33_spill] sm:$0xff] %v18575_v36  ;;  %v18588_v58 = vsub.f32 %v646_v2, %v18556_v3 }
 0x30e   : > { %4345 = vmatmul.f32.vlgmr.msrb.gmra.mxu3 %v24529_v33  ;;  %4423 = vmatpush.msra.mxu1 %v18152_v14  ;;  %v4523_v41 = vsub.f32 %v18492_v42, %v24557_v4  ;;  %v644_v14 = vld [vmem:[%s24092_s2 + $0x5a0] sm:$0xff]  ;;  %v18565_v33 = vpop.f32.mrf.mxu0  ;;  %v4512_v50 = vand.u32 4294901760, %v4511_v53  ;;  %v24560_v4 = vand.u32 4294901760, %v18512_v20  ;;  %v4518_v44 = vand.u32 4294901760, %v4517_v25 }
 0x30f   : > { %4458 = vmatpush.msra.mxu2 %v18421_v47  ;;  %4501 = vmatpush.msra.mxu3 %v4500_v22  ;;  %24558 = vst [vmem:[#allocation32_spill] sm:$0xff] %v18565_v33  ;;  %v18573_v22 = vand.u32 4294901760, %v645_v63  ;;  %v18590_v36 = vand.u32 4294901760, %v644_v14 }
 0x310   : > { %4143 = vmatpush.msrb.mxu0 %v18349_v18  ;;  %4425 = vmatpush.msra.mxu1 %v18165_v37  ;;  %v4529_v33 = vsub.f32 %v18512_v20, %v24560_v4  ;;  %v643_v37 = vld [vmem:[%s24092_s2 + $0x598] sm:$0xff]  ;;  %v642_v4 = vld [vmem:[%s24092_s2 + $0x590] sm:$0xff]  ;;  %v24561_v20 = vand.u32 4294901760, %v18150_v26 }
 0x311   : > { %4460 = vmatpush.msra.mxu2 %v18444_v5  ;;  %4507 = vmatpush.msra.mxu3 %v4506_v38  ;;  %v4524_v38 = vand.u32 4294901760, %v4523_v41  ;;  %v18604_v53 = vsub.f32 %v645_v63, %v18573_v22  ;;  %v18606_v42 = vand.u32 4294901760, %v643_v37  ;;  %v18608_v41 = vpop.f32.mrf.mxu2 }
 0x312   : > { %4145 = vmatpush.msrb.mxu0 %v18361_v49  ;;  %4427 = vmatpush.msra.mxu1 %v18176_v24  ;;  %v24562_v24 = vand.u32 4294901760, %v18534_v9  ;;  %24563 = vst [vmem:[#allocation34_spill] sm:$0xff] %v18608_v41  ;;  %v4530_v26 = vand.u32 4294901760, %v4529_v33  ;;  %v18623_v41 = vand.u32 4294901760, %v642_v4  ;;  %v24567_v33 = vand.u32 4294901760, %v18174_v31 }
 0x313   : > { %4151 = vmatmul.f32.vlgmr.msrb.gmra.mxu0 %v15745_v30  ;;  %4462 = vmatpush.msra.mxu2 %v18457_v48  ;;  %v18637_v25 = vsub.f32 %v643_v37, %v18606_v42  ;;  %v24570_v37 = vand.u32 4294901760, %v18588_v58 }
 0x314   : > { %4352 = vmatpush.msra.mxu0 %v24561_v20  ;;  %4513 = vmatpush.msra.mxu3 %v4512_v50  ;;  %v4535_v2 = vsub.f32 %v18534_v9, %v24562_v24  ;;  %v18612_v20 = vpop.f32.mrf.mxu1  ;;  %v24565_v50 = vand.u32 4294901760, %v18163_v13  ;;  %v24566_v24 = vand.u32 4294901760, %v18554_v57  ;;  %v18621_v9 = vsub.f32 %v644_v14, %v18590_v36 }
 0x315   : > { %4429 = vmatpush.msra.mxu1 %v18196_v15  ;;  %4464 = vmatpush.msra.mxu2 %v18464_v54  ;;  %24564 = vst [vmem:[#allocation35_spill] sm:$0xff] %v18612_v20  ;;  %v641_v15 = vld [vmem:[%s24092_s2 + $0x588] sm:$0xff]  ;;  %v18642_v20 = vpop.f32.mrf.mxu3 }
 0x316   : > { %4356 = vmatpush.msra.mxu0 %v24565_v50  ;;  %4519 = vmatpush.msra.mxu3 %v4518_v44  ;;  %v4541_v63 = vsub.f32 %v18554_v57, %v24566_v24  ;;  %v2106_v13 = vpop.f32.mrf.mxu0  ;;  %v4536_v44 = vand.u32 4294901760, %v4535_v2  ;;  %v24568_v50 = vand.u32 4294901760, %v18571_v6  ;;  %v18646_v31 = vand.u32 4294901760, %v641_v15 }
 0x317   : > { %4431 = vmatpush.msra.mxu1 %v18210_v34  ;;  %4466 = vmatpush.msra.mxu2 %v18475_v29  ;;  %v640_v34 = vld [vmem:[%s24092_s2 + $0x580] sm:$0xff]  ;;  %v18655_v24 = vsub.f32 %v642_v4, %v18623_v41 }
 0x318   : > { %4360 = vmatpush.msra.mxu0 %v24567_v33  ;;  %4525 = vmatpush.msra.mxu3 %v4524_v38  ;;  %v4547_v14 = vsub.f32 %v18571_v6, %v24568_v50  ;;  %v24569_v38 = vand.u32 4294901760, %v18191_v61  ;;  %v4542_v2 = vand.u32 4294901760, %v4541_v63  ;;  %v4553_v33 = vsub.f32 %v18588_v58, %v24570_v37 }
 0x319   : > { %4433 = vmatpush.msra.mxu1 %v18221_v40  ;;  %4468 = vmatpush.msra.mxu2 %v18502_v23  ;;  %v18659_v40 = vand.u32 4294901760, %v640_v34  ;;  %v24571_v61 = vand.u32 4294901760, %v18208_v11  ;;  %v24572_v63 = vand.u32 4294901760, %v18604_v53  ;;  %v24241_v37 = vand.u32 4294901760, %v18637_v25  ;;  %v2261_v50 = vpop.f32.mrf.mxu2 }
 0x31a   : > { %4364 = vmatpush.msra.mxu0 %v24569_v38  ;;  %4531 = vmatpush.msra.mxu3 %v4530_v26  ;;  %v4548_v26 = vand.u32 4294901760, %v4547_v14  ;;  %v24573_v11 = vand.u32 4294901760, %v18230_v32  ;;  %v24574_v14 = vand.u32 4294901760, %v18621_v9 }
 0x31b   : > { %4435 = vmatpush.msra.mxu1 %v18247_v55  ;;  %4470 = vmatpush.msra.mxu2 %v18520_v62  ;;  %v4559_v38 = vsub.f32 %v18604_v53, %v24572_v63  ;;  %v18670_v55 = vsub.f32 %v641_v15, %v18646_v31  ;;  %v18684_v15 = vsub.f32 %v640_v34, %v18659_v40  ;;  %v24576_v34 = vand.u32 4294901760, %v18257_v17  ;;  %v14949_v17 = vld [vmem:[%s24093_s3 + $0x5] ss:$0 sm:$0xff] }
 0x31c   : > { %4368 = vmatpush.msra.mxu0 %v24571_v61  ;;  %4537 = vmatpush.msra.mxu3 %v4536_v44  ;;  %v2207_v4 = vpop.f32.mrf.mxu1  ;;  %v4554_v44 = vand.u32 4294901760, %v4553_v33  ;;  %v4565_v61 = vsub.f32 %v18621_v9, %v24574_v14 }
 0x31d   : > { %4437 = vmatpush.msra.mxu1 %v18266_v46  ;;  %4472 = vmatpush.msra.mxu2 %v18536_v60  ;;  %v14948_v46 = vld [vmem:[%s24093_s3 + $0x4] ss:$0 sm:$0xff]  ;;  %v4560_v33 = vand.u32 4294901760, %v4559_v38  ;;  %v2300_v14 = vpop.f32.mrf.mxu3 }
 0x31e   : > { %4372 = vmatpush.msra.mxu0 %v24573_v11  ;;  %4543 = vmatpush.msra.mxu3 %v4542_v2  ;;  %v18686_v32 = vpop.f32.mrf.mxu0  ;;  %v24575_v2 = vand.u32 4294901760, %v18239_v35  ;;  %v4571_v11 = vsub.f32 %v18637_v25, %v24241_v37  ;;  %v4566_v63 = vand.u32 4294901760, %v4565_v61  ;;  %v24577_v35 = vand.u32 4294901760, %v18655_v24 }
 0x31f   : > { %4439 = vmatpush.msra.mxu1 %v18281_v56  ;;  %4474 = vmatpush.msra.mxu2 %v18556_v3  ;;  %v4582_v56 = vand.u32 4294901760, %v18670_v55  ;;  %v2107_v38 = vadd.f32 %v14948_v46, %v2106_v13  ;;  %v24579_v61 = vand.u32 4294901760, %v18296_v1 }
 0x320   : > { %4376 = vmatpush.msra.mxu0 %v24575_v2  ;;  %4549 = vmatpush.msra.mxu3 %v4548_v26  ;;  %v4577_v26 = vsub.f32 %v18655_v24, %v24577_v35  ;;  %v24578_v2 = vand.u32 4294901760, %v18279_v16  ;;  %v4572_v37 = vand.u32 4294901760, %v4571_v11  ;;  %v24580_v11 = vand.u32 4294901760, %v18313_v51 }
 0x321   : > { %4441 = vmatpush.msra.mxu1 %v18298_v39  ;;  %4476 = vmatpush.msra.mxu2 %v18573_v22  ;;  %v4588_v39 = vand.u32 4294901760, %v18684_v15  ;;  %v2208_v46 = vadd.f32 %v2207_v4, %v2107_v38  ;;  %v24582_v51 = vand.u32 4294901760, %v18347_v28  ;;  %v14950_v28 = vld [vmem:[%s24093_s3 + $0x6] ss:$0 sm:$0xff] }
 0x322   : > { %4380 = vmatpush.msra.mxu0 %v24576_v34  ;;  %4555 = vmatpush.msra.mxu3 %v4554_v44  ;;  %v2447_v44 = vpop.f32.mrf.mxu2  ;;  %v4578_v16 = vand.u32 4294901760, %v4577_v26 }
 0x323   : > { %4443 = vmatpush.msra.mxu1 %v18315_v7  ;;  %4478 = vmatpush.msra.mxu2 %v18590_v36  ;;  %v4583_v7 = vsub.f32 %v18670_v55, %v4582_v56  ;;  %v2448_v34 = vadd.f32 %v14949_v17, %v2447_v44  ;;  %v2262_v4 = vadd.f32 %v2261_v50, %v2208_v46  ;;  %v24583_v50 = vand.u32 4294901760, %v18435_v43 }
 0x324   : > { %4384 = vmatpush.msra.mxu0 %v24578_v2  ;;  %4561 = vmatpush.msra.mxu3 %v4560_v33  ;;  %v2406_v13 = vpop.f32.mrf.mxu1  ;;  %v24584_v17 = vand.u32 4294901760, %v18359_v0  ;;  %v24586_v0 = vand.u32 4294901760, %v18373_v45 }
 0x325   : > { %4445 = vmatpush.msra.mxu1 %v18332_v12  ;;  %4480 = vmatpush.msra.mxu2 %v18606_v42  ;;  %v4589_v12 = vsub.f32 %v18684_v15, %v4588_v39  ;;  %v2548_v35 = vpop.f32.mrf.mxu3  ;;  %v4584_v1 = vand.u32 4294901760, %v4583_v7  ;;  %v2301_v38 = vadd.f32 %v2300_v14, %v2262_v4  ;;  %v14945_v14 = vld [vmem:[%s24093_s3 + $0x1] ss:$0 sm:$0xff] }
 0x326   : > { %4388 = vmatpush.msra.mxu0 %v24579_v61  ;;  %4567 = vmatpush.msra.mxu3 %v4566_v63  ;;  %v2602_v33 = vpop.f32.mrf.mxu0 }
 0x327   : > { %4447 = vmatpush.msra.mxu1 %v18349_v18  ;;  %4482 = vmatpush.msra.mxu2 %v18623_v41  ;;  %v24581_v18 = vand.u32 4294901760, %v18330_v19  ;;  %v4590_v63 = vand.u32 4294901760, %v4589_v12  ;;  %v2370_v7 = vadd.f32 %v18686_v32, %v2301_v38  ;;  %v24588_v32 = vand.u32 4294901760, %v18385_v27  ;;  %v24599_v38 = vld [vmem:[#allocation16_spill] sm:$0xff] }
 0x328   : > { %4392 = vmatpush.msra.mxu0 %v24580_v11  ;;  %4573 = vmatpush.msra.mxu3 %v4572_v37  ;;  %v2549_v37 = vadd.f32 %v2548_v35, %v2448_v34 }
 0x329   : > { %4449 = vmatpush.msra.mxu1 %v18361_v49  ;;  %4484 = vmatpush.msra.mxu2 %v18646_v31  ;;  %v14944_v49 = vld [vmem:[%s24093_s3] ss:$0 sm:$0xff]  ;;  %v2407_v45 = vadd.f32 %v2406_v13, %v2370_v7  ;;  %v24595_v13 = vld [vmem:[#allocation10_spill] sm:$0xff] }
 0x32a   : > { %4396 = vmatpush.msra.mxu0 %v24581_v18  ;;  %4579 = vmatpush.msra.mxu3 %v4578_v16  ;;  %v2710_v26 = vpop.f32.mrf.mxu2  ;;  %v2603_v2 = vadd.f32 %v2602_v33, %v2549_v37  ;;  %v24585_v16 = vand.u32 4294901760, %v18453_v59  ;;  %v24589_v33 = vld [vmem:[#allocation11_spill] sm:$0xff]  ;;  %v24596_v37 = vld [vmem:[#allocation17_spill] sm:$0xff] }
 0x32b   : > { %4451 = vmatmul.f32.vlgmr.msra.gmra.mxu1 %v15724_v52  ;;  %4486 = vmatpush.msra.mxu2 %v18659_v40 }
 0x32c   : > { %4652 = vmatpush.msrb.mxu1 %v18411_v10  ;;  %4400 = vmatpush.msra.mxu0 %v24582_v51  ;;  %v2641_v19 = vpop.f32.mrf.mxu1 }
 0x32d   : > { %4585 = vmatpush.msra.mxu3 %v4584_v1  ;;  %4492 = vmatmul.f32.vlgmr.msra.gmra.mxu2 %v15745_v30  ;;  %v743_v30 = vadd.f32 %v14944_v49, %v18249_v21  ;;  %v2747_v61 = vpop.f32.mrf.mxu3  ;;  %v2642_v46 = vadd.f32 %v2641_v19, %v2603_v2  ;;  %v24587_v21 = vand.u32 4294901760, %v18469_v8  ;;  %v24591_v1 = vld [vmem:[#allocation24_spill] sm:$0xff] }
 0x32e   : > { %4654 = vmatpush.msrb.mxu1 %v18421_v47  ;;  %4693 = vmatpush.msrb.mxu2 %v24583_v50  ;;  %v2788_v44 = vpop.f32.mrf.mxu0  ;;  %v24592_v18 = vand.u32 4294901760, %v24591_v1 }
 0x32f   : > { %4404 = vmatpush.msra.mxu0 %v24584_v17  ;;  %4591 = vmatpush.msra.mxu3 %v4590_v63  ;;  %v2789_v12 = vadd.f32 %v14950_v28, %v2788_v44  ;;  %v844_v11 = vadd.f32 %v24589_v33, %v743_v30  ;;  %v24593_v63 = vld [vmem:[#allocation25_spill] sm:$0xff] }
 0x330   : > { %4593 = vmatmul.f32.vlgmr.msra.gmra.mxu3 %v15724_v52  ;;  %4656 = vmatpush.msrb.mxu1 %v18444_v5  ;;  %v24594_v51 = vand.u32 4294901760, %v24593_v63  ;;  %v24600_v17 = vld [vmem:[#allocation29_spill] sm:$0xff] }
 0x331   : > { %4697 = vmatpush.msrb.mxu2 %v24585_v16  ;;  %4760 = vmatpush.msrb.mxu3 %v18411_v10  ;;  %v24590_v10 = vld [vmem:[#allocation14_spill] sm:$0xff]  ;;  %v898_v49 = vadd.f32 %v24595_v13, %v844_v11  ;;  %v24601_v44 = vand.u32 4294901760, %v24600_v17  ;;  %v24604_v16 = vld [vmem:[#allocation19_spill] sm:$0xff]  ;;  %v24606_v33 = vld [vmem:[#allocation13_spill] sm:$0xff] }
 0x332   : > { %4408 = vmatpush.msra.mxu0 %v24586_v0  ;;  %4658 = vmatpush.msrb.mxu1 %v18457_v48  ;;  %v1084_v34 = vadd.f32 %v14945_v14, %v24590_v10  ;;  %v2943_v35 = vpop.f32.mrf.mxu2  ;;  %v14951_v14 = vld [vmem:[%s24093_s3 + $0x7] ss:$0 sm:$0xff] }
 0x333   : > { %4701 = vmatpush.msrb.mxu2 %v24587_v21  ;;  %4762 = vmatpush.msrb.mxu3 %v18421_v47  ;;  %v2711_v47 = vadd.f32 %v2710_v26, %v2642_v46 }
 0x334   : > { %4412 = vmatpush.msra.mxu0 %v24588_v32  ;;  %4660 = vmatpush.msrb.mxu1 %v18464_v54  ;;  %v2889_v4 = vpop.f32.mrf.mxu1  ;;  %v1185_v19 = vadd.f32 %v24596_v37, %v1084_v34 }
 0x335   : > { %4414 = vmatmul.f32.vlgmr.msra.gmra.mxu0 %v15724_v52  ;;  %4705 = vmatpush.msrb.mxu2 %v24592_v18  ;;  %v2890_v27 = vadd.f32 %v2889_v4, %v2789_v12  ;;  %v2982_v50 = vpop.f32.mrf.mxu3  ;;  %v2748_v2 = vadd.f32 %v2747_v61, %v2711_v47  ;;  %v24603_v61 = vand.u32 4294901760, %v18554_v57 }
 0x336   : > { %4599 = vmatpush.msrb.mxu0 %v18435_v43  ;;  %4764 = vmatpush.msrb.mxu3 %v18444_v5  ;;  %v4801_v43 = vsel %vm4796_vm4, %v2407_v45, 0  ;;  %v24597_v5 = vld [vmem:[#allocation28_spill] sm:$0xff]  ;;  %v3051_v28 = vpop.f32.mrf.mxu0  ;;  %v24607_v45 = vand.u32 4294901760, %v18588_v58 }
 0x337   : > { %4662 = vmatpush.msrb.mxu1 %v18475_v29  ;;  %4709 = vmatpush.msrb.mxu2 %v24594_v51  ;;  %v24598_v26 = vand.u32 4294901760, %v24597_v5  ;;  %v18787_v30 = vand.u32 4294901760, %v4801_v43  ;;  %v4953_v46 = vsel %vm4796_vm4, %v2748_v2, 0 }
 0x338   : > { %4602 = vmatpush.msrb.mxu0 %v18453_v59  ;;  %4766 = vmatpush.msrb.mxu3 %v18457_v48  ;;  %v1239_v59 = vadd.f32 %v24599_v38, %v1185_v19  ;;  %v2944_v48 = vadd.f32 %v2943_v35, %v2890_v27  ;;  %v18814_v35 = vand.u32 4294901760, %v4953_v46  ;;  %v14946_v19 = vld [vmem:[%s24093_s3 + $0x2] ss:$0 sm:$0xff]  ;;  %v24614_v38 = vand.u32 4294901760, %v18655_v24 }
 0x339   : > { %4664 = vmatpush.msrb.mxu1 %v18502_v23  ;;  %4713 = vmatpush.msrb.mxu2 %v24598_v26  ;;  %v18806_v21 = vsub.f32 %v4801_v43, %v18787_v30  ;;  %v24613_v43 = vand.u32 4294901760, %v18637_v25 }
 0x33a   : > { %4605 = vmatpush.msrb.mxu0 %v18469_v8  ;;  %4768 = vmatpush.msrb.mxu3 %v18464_v54  ;;  %v24602_v54 = vld [vmem:[#allocation12_spill] sm:$0xff]  ;;  %v3129_v7 = vpop.f32.mrf.mxu2  ;;  %v1278_v0 = vadd.f32 %v24604_v16, %v1239_v59  ;;  %v2983_v12 = vadd.f32 %v2982_v50, %v2944_v48  ;;  %v14947_v50 = vld [vmem:[%s24093_s3 + $0x3] ss:$0 sm:$0xff]  ;;  %v14952_v59 = vld [vmem:[%s24093_s3 + $0x8] ss:$0 sm:$0xff] }
 0x33b   : > { %4666 = vmatpush.msrb.mxu1 %v18520_v62  ;;  %4717 = vmatpush.msrb.mxu2 %v24601_v44  ;;  %v937_v8 = vadd.f32 %v24602_v54, %v898_v49  ;;  %v3130_v32 = vadd.f32 %v14951_v14, %v3129_v7  ;;  %v4846_v27 = vand.u32 4294901760, %v18806_v21  ;;  %v18830_v49 = vsub.f32 %v4953_v46, %v18814_v35  ;;  %v24615_v48 = vld [vmem:[#allocation20_spill] sm:$0xff]  ;;  %v24617_v7 = vld [vmem:[#allocation9_spill] sm:$0xff] }
 0x33c   : > { %4608 = vmatpush.msrb.mxu0 %v24591_v1  ;;  %4770 = vmatpush.msrb.mxu3 %v18475_v29  ;;  %v24605_v29 = vand.u32 4294901760, %v18571_v6  ;;  %v3088_v11 = vpop.f32.mrf.mxu1  ;;  %v3052_v10 = vadd.f32 %v3051_v28, %v2983_v12  ;;  %v24608_v1 = vld [vmem:[#allocation18_spill] sm:$0xff]  ;;  %v1425_v28 = vadd.f32 %v14946_v19, %v24615_v48 }
 0x33d   : > { %4668 = vmatpush.msrb.mxu1 %v18536_v60  ;;  %4721 = vmatpush.msrb.mxu2 %v24603_v61  ;;  %v3230_v34 = vpop.f32.mrf.mxu3  ;;  %v1347_v18 = vadd.f32 %v24608_v1, %v1278_v0 }
 0x33e   : > { %4611 = vmatpush.msrb.mxu0 %v24593_v63  ;;  %4772 = vmatpush.msrb.mxu3 %v18502_v23  ;;  %v1006_v23 = vadd.f32 %v24606_v33, %v937_v8  ;;  %v3284_v4 = vpop.f32.mrf.mxu0  ;;  %v3231_v47 = vadd.f32 %v3230_v34, %v3130_v32  ;;  %v24610_v63 = vld [vmem:[#allocation15_spill] sm:$0xff]  ;;  %v3089_v13 = vadd.f32 %v3088_v11, %v3052_v10  ;;  %v24620_v10 = vld [vmem:[#allocation22_spill] sm:$0xff]  ;;  %v24621_v34 = vld [vmem:[#allocation32_spill] sm:$0xff] }
 0x33f   : > { %4670 = vmatpush.msrb.mxu1 %v18556_v3  ;;  %4725 = vmatpush.msrb.mxu2 %v24605_v29 }
 0x340   : > { %4614 = vmatpush.msrb.mxu0 %v24597_v5  ;;  %4774 = vmatpush.msrb.mxu3 %v18520_v62  ;;  %v24609_v62 = vand.u32 4294901760, %v18604_v53  ;;  %v1043_v51 = vadd.f32 %v24610_v63, %v1006_v23  ;;  %v3285_v37 = vadd.f32 %v3284_v4, %v3231_v47  ;;  %v5105_v5 = vsel %vm4796_vm4, %v3089_v13, 0  ;;  %v24622_v47 = vld [vmem:[#allocation8_spill] sm:$0xff]  ;;  %v24623_v63 = vld [vmem:[#allocation27_spill] sm:$0xff] }
 0x341   : > { %4672 = vmatpush.msrb.mxu1 %v18573_v22  ;;  %4729 = vmatpush.msrb.mxu2 %v24607_v45  ;;  %v18867_v14 = vand.u32 4294901760, %v5105_v5 }
 0x342   : > { %4617 = vmatpush.msrb.mxu0 %v24600_v17  ;;  %4776 = vmatpush.msrb.mxu3 %v18536_v60  ;;  %v24611_v60 = vand.u32 4294901760, %v18621_v9  ;;  %v3392_v8 = vpop.f32.mrf.mxu2 }
 0x343   : > { %4674 = vmatpush.msrb.mxu1 %v18590_v36  ;;  %4733 = vmatpush.msrb.mxu2 %v24609_v62 }
 0x344   : > { %4620 = vmatpush.msrb.mxu0 %v18554_v57  ;;  %4778 = vmatpush.msrb.mxu3 %v18556_v3  ;;  %v24612_v57 = vld [vmem:[#allocation21_spill] sm:$0xff]  ;;  %v3323_v26 = vpop.f32.mrf.mxu1 }
 0x345   : > { %4676 = vmatpush.msrb.mxu1 %v18606_v42  ;;  %4737 = vmatpush.msrb.mxu2 %v24611_v60  ;;  %v1384_v3 = vadd.f32 %v24612_v57, %v1347_v18  ;;  %v3429_v29 = vpop.f32.mrf.mxu3 }
 0x346   : > { %4623 = vmatpush.msrb.mxu0 %v18571_v6  ;;  %4780 = vmatpush.msrb.mxu3 %v18573_v22  ;;  %v4847_v6 = vsub.f32 %v18806_v21, %v4846_v27  ;;  %v4798_v22 = vsel %vm4796_vm4, %v1043_v51, 0  ;;  %v3470_v17 = vpop.f32.mrf.mxu0  ;;  %v24624_v51 = vld [vmem:[#allocation35_spill] sm:$0xff] }
 0x347   : > { %4678 = vmatpush.msrb.mxu1 %v18623_v41  ;;  %4741 = vmatpush.msrb.mxu2 %v24613_v43  ;;  %v4950_v2 = vsel %vm4796_vm4, %v1384_v3, 0  ;;  %v18865_v44 = vand.u32 4294901760, %v4798_v22  ;;  %v3471_v16 = vadd.f32 %v14952_v59, %v3470_v17 }
 0x348   : > { %4626 = vmatpush.msrb.mxu0 %v18588_v58  ;;  %4782 = vmatpush.msrb.mxu3 %v18590_v36  ;;  %v4998_v36 = vand.u32 4294901760, %v18830_v49  ;;  %v3324_v58 = vadd.f32 %v3323_v26, %v3285_v37  ;;  %v18875_v61 = vand.u32 4294901760, %v4950_v2  ;;  %v24625_v37 = vld [vmem:[#allocation26_spill] sm:$0xff]  ;;  %v24627_v26 = vld [vmem:[#allocation31_spill] sm:$0xff] }
 0x349   : > { %4680 = vmatpush.msrb.mxu1 %v18646_v31  ;;  %4745 = vmatpush.msrb.mxu2 %v24614_v38  ;;  %v4821_v46 = vsub.f32 %v4798_v22, %v18865_v44 }
 0x34a   : > { %4629 = vmatpush.msrb.mxu0 %v18604_v53  ;;  %4784 = vmatpush.msrb.mxu3 %v18606_v42  ;;  %v4848_v53 = vand.u32 4294901760, %v4847_v6  ;;  %v24616_v42 = vld [vmem:[#allocation30_spill] sm:$0xff]  ;;  %v3625_v18 = vpop.f32.mrf.mxu2 }
 0x34b   : > { %4682 = vmatpush.msrb.mxu1 %v18659_v40  ;;  %4749 = vmatpush.msrb.mxu2 %v4582_v56  ;;  %v1766_v54 = vadd.f32 %v14947_v50, %v24616_v42  ;;  %v3393_v56 = vadd.f32 %v3392_v8, %v3324_v58 }
 0x34c   : > { %4632 = vmatpush.msrb.mxu0 %v18621_v9  ;;  %4786 = vmatpush.msrb.mxu3 %v18623_v41  ;;  %v4999_v9 = vsub.f32 %v18830_v49, %v4998_v36  ;;  %v24618_v41 = vld [vmem:[#allocation23_spill] sm:$0xff]  ;;  %v3571_v32 = vpop.f32.mrf.mxu1 }
 0x34d   : > { %4686 = vmatmul.f32.vlgmr.msrb.gmra.mxu1 %v24617_v7  ;;  %4753 = vmatpush.msrb.mxu2 %v4588_v39  ;;  %v1526_v0 = vadd.f32 %v24618_v41, %v1425_v28  ;;  %v18886_v39 = vsub.f32 %v5105_v5, %v18867_v14  ;;  %v3430_v33 = vadd.f32 %v3429_v29, %v3393_v56  ;;  %v3664_v19 = vpop.f32.mrf.mxu3 }
 0x34e   : > { %4849 = vmatpush.xpose.msra.mxu1 %v4848_v53  ;;  %4635 = vmatpush.msrb.mxu0 %v18637_v25  ;;  %v24619_v25 = vld [vmem:[#allocation33_spill] sm:$0xff]  ;;  %v3572_v23 = vadd.f32 %v3571_v32, %v3471_v16  ;;  %v5000_v11 = vand.u32 4294901760, %v4999_v9  ;;  %v3733_v43 = vpop.f32.mrf.mxu0 }
 0x34f   : > { %4788 = vmatpush.msrb.mxu3 %v18646_v31  ;;  %4755 = vmatmul.f32.vlgmr.msrb.gmra.mxu2 %v15724_v52  ;;  %v1867_v12 = vadd.f32 %v24619_v25, %v1766_v54  ;;  %v18894_v31 = vsub.f32 %v4950_v2, %v18875_v61  ;;  %v5150_v1 = vand.u32 4294901760, %v18886_v39  ;;  %v5257_v4 = vsel %vm4796_vm4, %v3430_v33, 0 }
 0x350   : > { %4638 = vmatpush.msrb.mxu0 %v18655_v24  ;;  %4872 = vmatpush.xpose.msra.mxu2 %v18806_v21  ;;  %v1580_v24 = vadd.f32 %v24620_v10, %v1526_v0  ;;  %v3626_v62 = vadd.f32 %v3625_v18, %v3572_v23  ;;  %v18918_v3 = vand.u32 4294901760, %v5257_v4  ;;  %v24626_v21 = vld [vmem:[#allocation34_spill] sm:$0xff] }
 0x351   : > { %4790 = vmatpush.msrb.mxu3 %v18659_v40  ;;  %v1921_v45 = vadd.f32 %v24621_v34, %v1867_v12  ;;  %v4822_v40 = vand.u32 4294901760, %v4821_v46  ;;  %v5151_v60 = vsub.f32 %v18886_v39, %v5150_v1 }
 0x352   : > { %4943 = vmatpush.xpose.msrb.mxu1 %v18787_v30  ;;  %4792 = vmatmul.f32.vlgmr.msrb.gmra.mxu3 %v15724_v52  ;;  %v4974_v52 = vand.u32 4294901760, %v18894_v31  ;;  %v3665_v6 = vadd.f32 %v3664_v19, %v3626_v62  ;;  %v18927_v58 = vsub.f32 %v5257_v4, %v18918_v3  ;;  %v3811_v8 = vpop.f32.mrf.mxu2 }
 0x353   : > { %4895 = vmatpush.xpose.msra.mxu3 %v18787_v30  ;;  %4641 = vmatpush.msrb.mxu0 %v18670_v55  ;;  %v1619_v55 = vadd.f32 %v24623_v63, %v1580_v24  ;;  %v1960_v13 = vadd.f32 %v24624_v51, %v1921_v45  ;;  %v5152_v5 = vand.u32 4294901760, %v5151_v60 }
 0x354   : > { %4971 = vmatpush.xpose.msrb.mxu2 %v18814_v35  ;;  %v3734_v22 = vadd.f32 %v3733_v43, %v3665_v6  ;;  %v3770_v2 = vpop.f32.mrf.mxu1  ;;  %v5302_v28 = vand.u32 4294901760, %v18927_v58 }
 0x355   : > { %4644 = vmatpush.msrb.mxu0 %v18684_v15  ;;  %4851 = vmatmul.f32.vlgmr.msra.gmra.mxu1 %v18865_v44  ;;  %v4823_v15 = vsub.f32 %v4821_v46, %v4822_v40  ;;  %v1688_v57 = vadd.f32 %v24625_v37, %v1619_v55  ;;  %v3912_v0 = vpop.f32.mrf.mxu3 }
 0x356   : > { %4647 = vmatmul.f32.vlgmr.msrb.gmra.mxu0 %v24622_v47  ;;  %5047 = vmatpush.xpose.msra.mxu1 %v18814_v35  ;;  %v3771_v48 = vadd.f32 %v3770_v2, %v3734_v22 }
 0x357   : > { %5001 = vmatpush.xpose.msrb.mxu3 %v5000_v11  ;;  %4819 = vmatpush.xpose.msra.mxu0 %v18787_v30  ;;  %v4975_v30 = vsub.f32 %v18894_v31, %v4974_v52  ;;  %v4824_v50 = vand.u32 4294901760, %v4823_v15  ;;  %v1725_v38 = vadd.f32 %v24627_v26, %v1688_v57 }
 0x358   : > { %4875 = vmatmul.f32.vlgmr.msra.gmra.mxu2 %v4821_v46  ;;  %v5527_v42 = vand.u32 4294901760, %v3771_v48 }
 0x359   : > { %5073 = vmatpush.xpose.msra.mxu2 %v4998_v36  ;;  %v4976_v36 = vand.u32 4294901760, %v4975_v30 }
 0x35a   : > { %4899 = vmatmul.f32.vlgmr.msra.gmra.mxu3 %v4822_v40  ;;  %v5554_v56 = vsub.f32 %v3771_v48, %v5527_v42  ;;  %v427_v48 = vld [vmem:[%s18993_s28] sm:$0xff] }
 0x35b   : > { %4921 = vmatpush.xpose.msrb.mxu0 %v4846_v27  ;;  %v2029_v27 = vadd.f32 %v24626_v21, %v1960_v13  ;;  %5095 = vmatpush.xpose.msra.mxu3 %v18814_v35  ;;  %v5102_v35 = vsel %vm4796_vm4, %v1725_v38, 0 }
 0x35c   : > { %v5124_v53 = vand.u32 4294901760, %v5102_v35  ;;  %v5555_v25 = vand.u32 4294901760, %v5554_v56 }
 0x35d   : > { %4945 = vmatmul.f32.vlgmr.msrb.gmra.mxu1 %v18865_v44  ;;  %v2066_v59 = vadd.f32 %v18642_v20, %v2029_v27  ;;  %v14953_v20 = vld [vmem:[%s24093_s3 + $0x9] ss:$0 sm:$0xff] }
 0x35e   : > { %4825 = vmatmul.f32.vlgmr.msra.gmra.mxu0 %v4824_v50  ;;  %5153 = vmatpush.xpose.msrb.mxu1 %v5152_v5  ;;  %v5125_v7 = vsub.f32 %v5102_v35, %v5124_v53  ;;  %v3812_v16 = vadd.f32 %v14953_v20, %v3811_v8  ;;  %v5556_v23 = vsub.f32 %v5554_v56, %v5555_v25 }
 0x35f   : > { %5024 = vmatpush.xpose.msra.mxu0 %v18830_v49  ;;  %v5254_v17 = vsel %vm4796_vm4, %v2066_v59, 0  ;;  %v5303_v49 = vsub.f32 %v18927_v58, %v5302_v28 }
 0x360   : > { %4977 = vmatmul.f32.vlgmr.msrb.gmra.mxu2 %v4976_v36  ;;  %v5276_v54 = vand.u32 4294901760, %v5254_v17  ;;  %v5126_v46 = vand.u32 4294901760, %v5125_v7  ;;  %v5557_v34 = vand.u32 4294901760, %v5556_v23 }
 0x361   : > { %5176 = vmatpush.xpose.msrb.mxu2 %v18886_v39  ;;  %v5304_v9 = vand.u32 4294901760, %v5303_v49 }
 0x362   : > { %5003 = vmatmul.f32.vlgmr.msrb.gmra.mxu3 %v18875_v61  ;;  %v5277_v41 = vsub.f32 %v5254_v17, %v5276_v54  ;;  %v5127_v33 = vsub.f32 %v5125_v7, %v5126_v46 }
 0x363   : > { %5199 = vmatpush.xpose.msrb.mxu3 %v18867_v14 }
 0x364   : > { %v5278_v12 = vand.u32 4294901760, %v5277_v41  ;;  %v4005_v32 = vpop.f32.mrf.mxu1 }
 0x365   : > { %5051 = vmatmul.f32.vlgmr.msra.gmra.mxu1 %v4974_v52 }
 0x366   : > { %4923 = vmatmul.f32.vlgmr.msrb.gmra.mxu0 %v18865_v44  ;;  %5247 = vmatpush.xpose.msra.mxu1 %v18867_v14  ;;  %v3913_v44 = vadd.f32 %v3912_v0, %v3812_v16  ;;  %v5279_v10 = vsub.f32 %v5277_v41, %v5278_v12 }
 0x367   : > { %5123 = vmatpush.xpose.msrb.mxu0 %v18867_v14 }
 0x368   : > { %5075 = vmatmul.f32.vlgmr.msra.gmra.mxu2 %v18875_v61  ;;  %v5280_v39 = vand.u32 4294901760, %v5279_v10 }
 0x369   : > { %5275 = vmatpush.xpose.msra.mxu2 %v18918_v3 }
 0x36a   : > { %5097 = vmatmul.f32.vlgmr.msra.gmra.mxu3 %v18875_v61 }
 0x36b   : > { %5305 = vmatpush.xpose.msra.mxu3 %v5304_v9 }
 0x36c   : > { %v4074_v11 = vpop.f32.mrf.mxu2 }
 0x36d   : > { %5155 = vmatmul.f32.vlgmr.msrb.gmra.mxu1 %v5124_v53 }
 0x36e   : > { %5027 = vmatmul.f32.vlgmr.msra.gmra.mxu0 %v18894_v31  ;;  %5351 = vmatpush.xpose.msrb.mxu1 %v18918_v3  ;;  %v3966_v14 = vpop.f32.mrf.mxu0  ;;  %v5128_v31 = vand.u32 4294901760, %v5127_v33 }
 0x36f   : > { %5225 = vmatpush.xpose.msra.mxu0 %v5150_v1  ;;  %v3967_v29 = vadd.f32 %v3966_v14, %v3913_v44  ;;  %v4111_v45 = vpop.f32.mrf.mxu3 }
 0x370   : > { %5179 = vmatmul.f32.vlgmr.msrb.gmra.mxu2 %v5125_v7 }
 0x371   : > { %5377 = vmatpush.xpose.msrb.mxu2 %v5302_v28  ;;  %v4006_v61 = vadd.f32 %v4005_v32, %v3967_v29 }
 0x372   : > { %5203 = vmatmul.f32.vlgmr.msrb.gmra.mxu3 %v5126_v46 }
 0x373   : > { %5399 = vmatpush.xpose.msrb.mxu3 %v18918_v3  ;;  %v4075_v24 = vadd.f32 %v4074_v11, %v4006_v61 }
 0x375   : > { %5249 = vmatmul.f32.vlgmr.msra.gmra.mxu1 %v5124_v53  ;;  %v4112_v40 = vadd.f32 %v4111_v45, %v4075_v24 }
 0x376   : > { %5129 = vmatmul.f32.vlgmr.msrb.gmra.mxu0 %v5128_v31  ;;  %5558 = vmatpush.msra.mxu1 %v5557_v34 }
 0x377   : > { %5328 = vmatpush.xpose.msrb.mxu0 %v18927_v58  ;;  %v18954_v1 = vand.u32 4294901760, %v4112_v40 }
 0x378   : > { %5281 = vmatmul.f32.vlgmr.msra.gmra.mxu2 %v5280_v39 }
 0x379   : > { %v18957_v18 = vsub.f32 %v4112_v40, %v18954_v1  ;;  %5581 = vmatpush.msra.mxu2 %v5554_v56 }
 0x37a   : > { %5307 = vmatmul.f32.vlgmr.msra.gmra.mxu3 %v5276_v54 }
 0x37b   : > { %v5704_v52 = vand.u32 4294901760, %v18957_v18  ;;  %5604 = vmatpush.msra.mxu3 %v5527_v42 }
 0x37d   : > { %5355 = vmatmul.f32.vlgmr.msrb.gmra.mxu1 %v5278_v12  ;;  %v5705_v4 = vsub.f32 %v18957_v18, %v5704_v52 }
 0x37e   : > { %5227 = vmatmul.f32.vlgmr.msra.gmra.mxu0 %v5124_v53  ;;  %5652 = vmatpush.msrb.mxu1 %v5527_v42 }
 0x37f   : > { %5528 = vmatpush.msra.mxu0 %v5527_v42  ;;  %v5706_v62 = vand.u32 4294901760, %v5705_v4 }
 0x380   : > { %5379 = vmatmul.f32.vlgmr.msrb.gmra.mxu2 %v5276_v54 }
 0x381   : > { %5677 = vmatpush.msrb.mxu2 %v18954_v1 }
 0x382   : > { %5401 = vmatmul.f32.vlgmr.msrb.gmra.mxu3 %v5276_v54 }
 0x383   : > { %5707 = vmatpush.msrb.mxu3 %v5706_v62 }
 0x386   : > { %5331 = vmatmul.f32.vlgmr.msrb.gmra.mxu0 %v5277_v41  ;;  %v18964_v47 = vpop.f32.mrf.mxu1 }
 0x387   : > { %5630 = vmatpush.msrb.mxu0 %v5555_v25 }
 0x38e   : > { %v18970_v51 = vpop.f32.mrf.mxu2 }
 0x390   : > { %v18968_v55 = vpop.f32.mrf.mxu0 }
 0x391   : > { %v18972_v13 = vpop.f32.mrf.mxu3 }
 0x3a8   : > { %v18966_v63 = vpop.f32.mrf.mxu1 }
 0x3b0   : > { %v18978_v37 = vpop.f32.mrf.mxu2 }
 0x3b2   : > { %v18976_v60 = vpop.f32.mrf.mxu0 }
 0x3b3   : > { %v18980_v57 = vpop.f32.mrf.mxu3 }
 0x3ca   : > { %v18974_v15 = vpop.f32.mrf.mxu1 }
 0x3d2   : > { %v4852_v3 = vpop.f32.mrf.mxu1  ;;  %v18984_v43 = vpop.f32.mrf.mxu2 }
 0x3d3   : > { %v18982_v19 = vpop.f32.mrf.mxu0 }
 0x3d5   : > { %v18986_v6 = vpop.f32.mrf.mxu3 }
 0x3da   : > { %v4946_v22 = vpop.f32.mrf.mxu1 }
 0x3db   : > { %v4826_v30 = vpop.f32.mrf.mxu0  ;;  %v4876_v21 = vpop.f32.mrf.mxu2 }
 0x3dc   : > { %v4853_v27 = vadd.f32 %v4852_v3, %v4826_v30 }
 0x3dd   : > { %v4900_v50 = vpop.f32.mrf.mxu3 }
 0x3de   : > { %v4877_v5 = vadd.f32 %v4876_v21, %v4853_v27 }
 0x3e0   : > { %v4901_v26 = vadd.f32 %v4900_v50, %v4877_v5 }
 0x3e2   : > { %v5052_v35 = vpop.f32.mrf.mxu1 }
 0x3e3   : > { %v4924_v38 = vpop.f32.mrf.mxu0  ;;  %v4978_v58 = vpop.f32.mrf.mxu2 }
 0x3e4   : > { %v4925_v36 = vadd.f32 %v4924_v38, %v4901_v26 }
 0x3e5   : > { %v5004_v59 = vpop.f32.mrf.mxu3 }
 0x3e6   : > { %v4947_v2 = vadd.f32 %v4946_v22, %v4925_v36  ;;  %v5005_v17 = vadd.f32 %v5004_v59, %v4978_v58 }
 0x3e8   : > { %v5405_v28 = vmul.f32 0.35355338, %v4947_v2 }
 0x3ea   : > { %v5409_v53 = vadd.f32 %v5405_v28, %v427_v48  ;;  %v5156_v16 = vpop.f32.mrf.mxu1 }
 0x3eb   : > { %v5028_v42 = vpop.f32.mrf.mxu0  ;;  %v5076_v20 = vpop.f32.mrf.mxu2 }
 0x3ec   : > { %v5029_v49 = vadd.f32 %v5028_v42, %v5005_v17  ;;  %v5413_v54 = vsel %vm4796_vm4, %v5409_v53, -inf }
 0x3ed   : > { %v5098_v8 = vpop.f32.mrf.mxu3  ;;  %5414 = vmax.xlane.f32.xlu1 %v5413_v54 }
 0x3ee   : > { %v5053_v7 = vadd.f32 %v5052_v35, %v5029_v49 }
 0x3f0   : > { %v5077_v56 = vadd.f32 %v5076_v20, %v5053_v7 }
 0x3f2   : > { %v5099_v9 = vadd.f32 %v5098_v8, %v5077_v56  ;;  %v5250_v33 = vpop.f32.mrf.mxu1 }
 0x3f3   : > { %v5130_v41 = vpop.f32.mrf.mxu0  ;;  %v5180_v0 = vpop.f32.mrf.mxu2 }
 0x3f4   : > { %v5406_v46 = vmul.f32 0.35355338, %v5099_v9  ;;  %v5157_v25 = vadd.f32 %v5156_v16, %v5130_v41 }
 0x3f5   : > { %v5204_v44 = vpop.f32.mrf.mxu3 }
 0x3f6   : > { %v5181_v12 = vadd.f32 %v5180_v0, %v5157_v25  ;;  %v5410_v14 = vadd.f32 %v5406_v46, %v427_v48  ;;  %v14954_v0 = vld [vmem:[%s24093_s3 + $0xa] ss:$0 sm:$0xff] }
 0x3f7   : > { %v4153_v46 = vadd.f32 %v14954_v0, %v18968_v55 }
 0x3f8   : > { %v5416_v29 = vsel %vm4796_vm4, %v5410_v14, -inf  ;;  %v5205_v32 = vadd.f32 %v5204_v44, %v5181_v12 }
 0x3f9   : > { %5417 = vmax.xlane.f32.xlu1 %v5416_v29  ;;  %v4254_v25 = vadd.f32 %v18964_v47, %v4153_v46 }
 0x3fa   : > { %v5356_v62 = vpop.f32.mrf.mxu1 }
 0x3fb   : > { %v5228_v23 = vpop.f32.mrf.mxu0  ;;  %v5282_v11 = vpop.f32.mrf.mxu2  ;;  %v4308_v44 = vadd.f32 %v18970_v51, %v4254_v25 }
 0x3fc   : > { %v5229_v61 = vadd.f32 %v5228_v23, %v5205_v32 }
 0x3fd   : > { %v5308_v24 = vpop.f32.mrf.mxu3  ;;  %v4347_v29 = vadd.f32 %v18972_v13, %v4308_v44 }
 0x3fe   : > { %v5251_v10 = vadd.f32 %v5250_v33, %v5229_v61  ;;  %v5309_v34 = vadd.f32 %v5308_v24, %v5282_v11 }
 0x3ff   : > { %v4416_v33 = vadd.f32 %v18976_v60, %v4347_v29 }
 0x400   : > { %v5407_v31 = vmul.f32 0.35355338, %v5251_v10 }
 0x401   : > { %v4453_v47 = vadd.f32 %v18966_v63, %v4416_v33 }
 0x402   : > { %v5411_v45 = vadd.f32 %v5407_v31, %v427_v48 }
 0x403   : > { %v5332_v40 = vpop.f32.mrf.mxu0  ;;  %v5380_v30 = vpop.f32.mrf.mxu2  ;;  %v19028_v13 = vand.u32 4294901760, %v4453_v47 }
 0x404   : > { %v5333_v39 = vadd.f32 %v5332_v40, %v5309_v34  ;;  %v5419_v4 = vsel %vm4796_vm4, %v5411_v45, -inf }
 0x405   : > { %5420 = vmax.xlane.f32.xlu2 %v5419_v4  ;;  %v5402_v27 = vpop.f32.mrf.mxu3  ;;  %v19032_v40 = vsub.f32 %v4453_v47, %v19028_v13 }
 0x406   : > { %v5357_v3 = vadd.f32 %v5356_v62, %v5333_v39 }
 0x408   : > { %v5381_v21 = vadd.f32 %v5380_v30, %v5357_v3 }
 0x40a   : > { %v5403_v22 = vadd.f32 %v5402_v27, %v5381_v21  ;;  %v5853_v27 = vand.u32 4294901760, %v19032_v40 }
 0x40c   : > { %v5408_v50 = vmul.f32 0.35355338, %v5403_v22 }
 0x40e   : > { %v5412_v5 = vadd.f32 %v5408_v50, %v427_v48 }
 0x410   : > { %v5422_v26 = vsel %vm4796_vm4, %v5412_v5, -inf }
 0x411   : > { %5423 = vmax.xlane.f32.xlu2 %v5422_v26 }
 0x460   : > { %v5415_v38 = vpop.xlane.xlu1 %5414 }
 0x461   : > { %v5425_v58 = vsub.f32 %v5409_v53, %v5415_v38 }
 0x463   : > { %v5429_v36 = vmul.f32 1.442695, %v5425_v58 }
 0x465   : > { %14984 = vpow2.f32 %v5429_v36 }
 0x46b   : > { %v14985_v59 = vpop.eup %14984 }
 0x46c   : > { %v5418_v2 = vpop.xlane.xlu1 %5417  ;;  %v5437_v35 = vsel %vm4796_vm4, %v14985_v59, 0.0 }
 0x46d   : > { %v5426_v28 = vsub.f32 %v5410_v14, %v5418_v2  ;;  %5438 = vadd.xlane.f32.xlu0 %v5437_v35  ;;  %v14955_v14 = vld [vmem:[%s24093_s3 + $0xb] ss:$0 sm:$0xff] }
 0x46e   : > { %v4494_v32 = vadd.f32 %v14955_v14, %v18978_v37 }
 0x46f   : > { %v5431_v17 = vmul.f32 1.442695, %v5426_v28 }
 0x470   : > { %v4595_v55 = vadd.f32 %v18980_v57, %v4494_v32 }
 0x471   : > { %14986 = vpow2.f32 %v5431_v17 }
 0x472   : > { %v4649_v51 = vadd.f32 %v18982_v19, %v4595_v55 }
 0x474   : > { %v4688_v60 = vadd.f32 %v18974_v15, %v4649_v51 }
 0x476   : > { %v4757_v4 = vadd.f32 %v18984_v43, %v4688_v60 }
 0x477   : > { %v19001_v42 = vpop.eup %14986 }
 0x478   : > { %v5421_v20 = vpop.xlane.xlu2 %5420  ;;  %v5440_v48 = vsel %vm4796_vm4, %v19001_v42, 0.0  ;;  %v4794_v15 = vadd.f32 %v18986_v6, %v4757_v4  ;;  %v5854_v6 = vsub.f32 %v19032_v40, %v5853_v27 }
 0x479   : > { %v5427_v49 = vsub.f32 %v5411_v45, %v5421_v20  ;;  %5441 = vadd.xlane.f32.xlu1 %v5440_v48 }
 0x47a   : > { %v19044_v36 = vand.u32 4294901760, %v4794_v15 }
 0x47b   : > { %v5433_v54 = vmul.f32 1.442695, %v5427_v49 }
 0x47c   : > { %v19049_v49 = vsub.f32 %v4794_v15, %v19044_v36 }
 0x47d   : > { %14988 = vpow2.f32 %v5433_v54 }
 0x483   : > { %v19005_v53 = vpop.eup %14988 }
 0x484   : > { %v5424_v8 = vpop.xlane.xlu2 %5423  ;;  %v5443_v7 = vsel %vm4796_vm4, %v19005_v53, 0.0 }
 0x485   : > { %v5428_v56 = vsub.f32 %v5412_v5, %v5424_v8  ;;  %5444 = vadd.xlane.f32.xlu2 %v5443_v7 }
 0x487   : > { %v5435_v16 = vmul.f32 1.442695, %v5428_v56 }
 0x489   : > { %14990 = vpow2.f32 %v5435_v16 }
 0x48f   : > { %v19009_v9 = vpop.eup %14990 }
 0x490   : > { %v5446_v41 = vsel %vm4796_vm4, %v19009_v9, 0.0 }
 0x491   : > { %5447 = vadd.xlane.f32.xlu0 %v5446_v41 }
 0x4e0   : > { %v5439_v12 = vpop.xlane.xlu0 %5438 }
 0x4e1   : > { %14992 = vrcp.f32 %v5439_v12  ;;  %v5460_v10 = vand.u32 2147483648, %v5439_v12  ;;  %v5458_v31 = vand.u32 2147483647, %v5439_v12  ;;  %vm5454_vm6 = vweird.f32 %v5439_v12 }
 0x4e3   : > { %v5461_v45 = vor.u32 1.1754944e-38, %v5460_v10  ;;  %vm5459_vm8 = vcmp.eq.f32.partialorder %v5458_v31, 8.507059e+37 }
 0x4e7   : > { %v14993_v23 = vpop.eup %14992 }
 0x4e8   : > { %v5450_v61 = vmul.f32 %v14993_v23, %v5439_v12  ;;  %vm5455_vm5 = vweird.f32 %v14993_v23 }
 0x4e9   : > { %vm5456_vm7 = vmor %vm5454_vm6, %vm5455_vm5 }
 0x4ea   : > { %v5451_v11 = vsub.f32 1.0, %v5450_v61 }
 0x4ec   : > { %v5452_v24 = vmul.f32 %v14993_v23, %v5451_v11  ;;  %v5442_v34 = vpop.xlane.xlu1 %5441 }
 0x4ed   : > { %14994 = vrcp.f32 %v5442_v34  ;;  %v5475_v22 = vand.u32 2147483648, %v5442_v34  ;;  %v5473_v26 = vand.u32 2147483647, %v5442_v34  ;;  %vm5469_vm10 = vweird.f32 %v5442_v34 }
 0x4ee   : > { %v5453_v37 = vadd.f32 %v14993_v23, %v5452_v24 }
 0x4ef   : > { %vm5474_vm12 = vcmp.eq.f32.partialorder %v5473_v26, 8.507059e+37  ;;  %v6106_v26 = vld [vmem:[%s24094_s4 + $0x8] sm:$0xff] }
 0x4f0   : > { %v5457_v57 = vsel %vm5456_vm7, %v14993_v23, %v5453_v37 }
 0x4f1   : > { %v5462_v63 = vsel %vm5459_vm8, %v5461_v45, %v5457_v57 }
 0x4f2   : > { %v5463_v19 = vmul.f32 %v14985_v59, %v5462_v63  ;;  %v5476_v59 = vor.u32 1.1754944e-38, %v5475_v22 }
 0x4f3   : > { %v14995_v39 = vpop.eup %14994 }
 0x4f4   : > { %v5465_v62 = vmul.f32 %v14995_v39, %v5442_v34  ;;  %v5510_v3 = vsel %vm4796_vm4, %v5463_v19, 0  ;;  %vm5470_vm9 = vweird.f32 %v14995_v39 }
 0x4f5   : > { %v5529_v30 = vand.u32 4294901760, %v5510_v3  ;;  %vm5471_vm11 = vmor %vm5469_vm10, %vm5470_vm9 }
 0x4f6   : > { %v5466_v21 = vsub.f32 1.0, %v5465_v62 }
 0x4f7   : > { %5560 = vmatmul.f32.vlgmr.msra.gmra.mxu1 %v5529_v30  ;;  %v5530_v50 = vsub.f32 %v5510_v3, %v5529_v30 }
 0x4f8   : > { %v5467_v5 = vmul.f32 %v14995_v39, %v5466_v21  ;;  %5753 = vmatpush.msra.mxu1 %v18954_v1  ;;  %v5445_v38 = vpop.xlane.xlu2 %5444 }
 0x4f9   : > { %14996 = vrcp.f32 %v5445_v38  ;;  %5584 = vmatmul.f32.vlgmr.msra.gmra.mxu2 %v5530_v50  ;;  %v5531_v58 = vand.u32 4294901760, %v5530_v50  ;;  %v5490_v16 = vand.u32 2147483648, %v5445_v38  ;;  %v5488_v0 = vand.u32 2147483647, %v5445_v38 }
 0x4fa   : > { %v5468_v43 = vadd.f32 %v14995_v39, %v5467_v5  ;;  %5779 = vmatpush.msra.mxu2 %v5704_v52  ;;  %v5855_v52 = vand.u32 4294901760, %v5854_v6  ;;  %vm5484_vm14 = vweird.f32 %v5445_v38 }
 0x4fb   : > { %5608 = vmatmul.f32.vlgmr.msra.gmra.mxu3 %v5531_v58  ;;  %v5532_v35 = vsub.f32 %v5530_v50, %v5531_v58  ;;  %v5491_v12 = vor.u32 1.1754944e-38, %v5490_v16  ;;  %vm5489_vm0 = vcmp.eq.f32.partialorder %v5488_v0, 8.507059e+37 }
 0x4fc   : > { %v5472_v2 = vsel %vm5471_vm11, %v14995_v39, %v5468_v43  ;;  %5801 = vmatpush.msra.mxu3 %v18954_v1  ;;  %v6002_v1 = vand.u32 4294901760, %v19049_v49 }
 0x4fd   : > { %v5477_v28 = vsel %vm5474_vm12, %v5476_v59, %v5472_v2  ;;  %v5533_v20 = vand.u32 4294901760, %v5532_v35 }
 0x4fe   : > { %v5478_v17 = vmul.f32 %v19001_v42, %v5477_v28 }
 0x4ff   : > { %v14997_v48 = vpop.eup %14996  ;;  %5654 = vmatmul.f32.vlgmr.msrb.gmra.mxu1 %v5529_v30  ;;  %5534 = vmatmul.f32.vlgmr.msra.gmra.mxu0 %v5533_v20 }
 0x500   : > { %v5480_v54 = vmul.f32 %v14997_v48, %v5445_v38  ;;  %5856 = vmatpush.msrb.mxu1 %v5855_v52  ;;  %v5659_v8 = vsel %vm4796_vm4, %v5478_v17, 0  ;;  %5730 = vmatpush.msra.mxu0 %v18957_v18  ;;  %vm5485_vm13 = vweird.f32 %v14997_v48  ;;  %v6003_v18 = vsub.f32 %v19049_v49, %v6002_v1  ;;  %v6107_v52 = vld [vmem:[%s24094_s4 + $0x10] sm:$0xff] }
 0x501   : > { %v5678_v7 = vand.u32 4294901760, %v5659_v8  ;;  %vm5486_vm15 = vmor %vm5484_vm14, %vm5485_vm13  ;;  %v6276_v38 = vand.u32 4294901760, %v6106_v26 }
 0x502   : > { %v5481_v56 = vsub.f32 1.0, %v5480_v54  ;;  %v6004_v55 = vand.u32 4294901760, %v6003_v18 }
 0x503   : > { %v5679_v42 = vsub.f32 %v5659_v8, %v5678_v7  ;;  %5709 = vmatmul.f32.vlgmr.msrb.gmra.mxu3 %v5678_v7  ;;  %v6303_v43 = vsub.f32 %v6106_v26, %v6276_v38 }
 0x504   : > { %v5482_v41 = vmul.f32 %v14997_v48, %v5481_v56  ;;  %v5448_v46 = vpop.xlane.xlu0 %5447  ;;  %5902 = vmatpush.msrb.mxu3 %v19028_v13 }
 0x505   : > { %14998 = vrcp.f32 %v5448_v46  ;;  %v5680_v44 = vand.u32 4294901760, %v5679_v42  ;;  %v5505_v24 = vand.u32 2147483648, %v5448_v46  ;;  %vm5499_vm2 = vweird.f32 %v5448_v46 }
 0x506   : > { %v5483_v25 = vadd.f32 %v14997_v48, %v5482_v41  ;;  %v6304_v58 = vand.u32 4294901760, %v6303_v43 }
 0x507   : > { %5632 = vmatmul.f32.vlgmr.msrb.gmra.mxu0 %v5529_v30  ;;  %5757 = vmatmul.f32.vlgmr.msra.gmra.mxu1 %v5680_v44  ;;  %v5681_v29 = vsub.f32 %v5679_v42, %v5680_v44  ;;  %v5506_v60 = vor.u32 1.1754944e-38, %v5505_v24 }
 0x508   : > { %v5487_v14 = vsel %vm5486_vm15, %v14997_v48, %v5483_v25  ;;  %5826 = vmatpush.msrb.mxu0 %v19028_v13  ;;  %5950 = vmatpush.msra.mxu1 %v19028_v13  ;;  %v5503_v13 = vand.u32 2147483647, %v5448_v46  ;;  %v6425_v48 = vand.u32 4294901760, %v6107_v52 }
 0x509   : > { %v5492_v32 = vsel %vm5489_vm0, %v5491_v12, %v5487_v14  ;;  %v5682_v23 = vand.u32 4294901760, %v5681_v29 }
 0x50a   : > { %v5493_v33 = vmul.f32 %v19005_v53, %v5492_v32  ;;  %vm5504_vm5 = vcmp.eq.f32.partialorder %v5503_v13, 8.507059e+37  ;;  %v19082_v56 = vsub.f32 %v6107_v52, %v6425_v48 }
 0x50b   : > { %v14999_v61 = vpop.eup %14998  ;;  %5683 = vmatmul.f32.vlgmr.msrb.gmra.mxu2 %v5682_v23  ;;  %5803 = vmatmul.f32.vlgmr.msra.gmra.mxu3 %v5678_v7 }
 0x50c   : > { %v5495_v47 = vmul.f32 %v14999_v61, %v5448_v46  ;;  %v5808_v11 = vsel %vm4796_vm4, %v5493_v33, 0  ;;  %5879 = vmatpush.msrb.mxu2 %v19032_v40  ;;  %6005 = vmatpush.msra.mxu3 %v6004_v55  ;;  %vm5500_vm1 = vweird.f32 %v14999_v61  ;;  %v6453_v41 = vand.u32 4294901760, %v19082_v56  ;;  %v6108_v33 = vld [vmem:[%s24094_s4 + $0x18] sm:$0xff] }
 0x50d   : > { %v5827_v51 = vand.u32 4294901760, %v5808_v11  ;;  %vm5501_vm3 = vmor %vm5499_vm2, %vm5500_vm1 }
 0x50e   : > { %v5496_v10 = vsub.f32 1.0, %v5495_v47  ;;  %v6454_v44 = vsub.f32 %v19082_v56, %v6453_v41 }
 0x50f   : > { %v5828_v31 = vsub.f32 %v5808_v11, %v5827_v51  ;;  %5733 = vmatmul.f32.vlgmr.msra.gmra.mxu0 %v5679_v42  ;;  %5858 = vmatmul.f32.vlgmr.msrb.gmra.mxu1 %v5827_v51  ;;  %v6574_v11 = vand.u32 4294901760, %v6108_v33 }
 0x510   : > { %v5497_v34 = vmul.f32 %v14999_v61, %v5496_v10  ;;  %5928 = vmatpush.msra.mxu0 %v5853_v27  ;;  %6051 = vmatpush.msrb.mxu1 %v19044_v36 }
 0x511   : > { %v5829_v53 = vand.u32 4294901760, %v5828_v31 }
 0x512   : > { %v5498_v37 = vadd.f32 %v14999_v61, %v5497_v34  ;;  %v19090_v34 = vsub.f32 %v6108_v33, %v6574_v11 }
 0x513   : > { %v5830_v45 = vsub.f32 %v5828_v31, %v5829_v53  ;;  %5781 = vmatmul.f32.vlgmr.msra.gmra.mxu2 %v5678_v7  ;;  %5906 = vmatmul.f32.vlgmr.msrb.gmra.mxu3 %v5829_v53 }
 0x514   : > { %v5502_v57 = vsel %vm5501_vm3, %v14999_v61, %v5498_v37  ;;  %5975 = vmatpush.msra.mxu2 %v19044_v36  ;;  %6099 = vmatpush.msrb.mxu3 %v19044_v36  ;;  %v6305_v36 = vsub.f32 %v6303_v43, %v6304_v58  ;;  %v6455_v61 = vand.u32 4294901760, %v6454_v44 }
 0x515   : > { %v5507_v63 = vsel %vm5504_vm5, %v5506_v60, %v5502_v57  ;;  %v5831_v19 = vand.u32 4294901760, %v5830_v45  ;;  %v6602_v60 = vand.u32 4294901760, %v19090_v34 }
 0x516   : > { %v5508_v40 = vmul.f32 %v19009_v9, %v5507_v63  ;;  %v6105_v9 = vld [vmem:[%s24094_s4] sm:$0xff]  ;;  %v6306_v2 = vand.u32 4294901760, %v6305_v36 }
 0x517   : > { %5832 = vmatmul.f32.vlgmr.msrb.gmra.mxu0 %v5831_v19  ;;  %5952 = vmatmul.f32.vlgmr.msra.gmra.mxu1 %v5827_v51  ;;  %v6127_v27 = vand.u32 4294901760, %v6105_v9 }
 0x518   : > { %v5957_v39 = vsel %vm4796_vm4, %v5508_v40, 0  ;;  %6028 = vmatpush.msrb.mxu0 %v19049_v49 }
 0x519   : > { %v5976_v4 = vand.u32 4294901760, %v5957_v39  ;;  %v6154_v15 = vsub.f32 %v6105_v9, %v6127_v27 }
 0x51b   : > { %v5977_v62 = vsub.f32 %v5957_v39, %v5976_v4  ;;  %5882 = vmatmul.f32.vlgmr.msrb.gmra.mxu2 %v5828_v31  ;;  %6007 = vmatmul.f32.vlgmr.msra.gmra.mxu3 %v5976_v4  ;;  %v6155_v22 = vand.u32 4294901760, %v6154_v15 }
 0x51c   : > { %6077 = vmatpush.msrb.mxu2 %v6002_v1  ;;  %6204 = vmatpush.msra.mxu3 %v6127_v27 }
 0x51d   : > { %v5978_v3 = vand.u32 4294901760, %v5977_v62  ;;  %v6156_v50 = vsub.f32 %v6154_v15, %v6155_v22 }
 0x51f   : > { %v5979_v30 = vsub.f32 %v5977_v62, %v5978_v3  ;;  %5930 = vmatmul.f32.vlgmr.msra.gmra.mxu0 %v5827_v51  ;;  %6055 = vmatmul.f32.vlgmr.msrb.gmra.mxu1 %v5978_v3  ;;  %v6157_v5 = vand.u32 4294901760, %v6156_v50 }
 0x520   : > { %6128 = vmatpush.msra.mxu0 %v6127_v27 }
 0x521   : > { %v5980_v21 = vand.u32 4294901760, %v5979_v30  ;;  %6158 = vmatpush.msra.mxu1 %v6157_v5 }
 0x523   : > { %5981 = vmatmul.f32.vlgmr.msra.gmra.mxu2 %v5980_v21  ;;  %6101 = vmatmul.f32.vlgmr.msrb.gmra.mxu3 %v5976_v4 }
 0x524   : > { %6181 = vmatpush.msra.mxu2 %v6154_v15  ;;  %6252 = vmatpush.msrb.mxu1 %v6127_v27 }
 0x525   : > { %6307 = vmatpush.msrb.mxu3 %v6306_v2 }
 0x527   : > { %6031 = vmatmul.f32.vlgmr.msrb.gmra.mxu0 %v5977_v62  ;;  %v6603_v62 = vsub.f32 %v19090_v34, %v6602_v60 }
 0x528   : > { %6230 = vmatpush.msrb.mxu0 %v6155_v22 }
 0x529   : > { %v6604_v15 = vand.u32 4294901760, %v6603_v62 }
 0x52b   : > { %6079 = vmatmul.f32.vlgmr.msrb.gmra.mxu2 %v5976_v4 }
 0x52c   : > { %6277 = vmatpush.msrb.mxu2 %v6276_v38 }
 0x574   : > { %v5561_v6 = vpop.f32.mrf.mxu1 }
 0x57c   : > { %v5535_v59 = vpop.f32.mrf.mxu0  ;;  %v5585_v28 = vpop.f32.mrf.mxu2 }
 0x57d   : > { %v5562_v35 = vadd.f32 %v5561_v6, %v5535_v59  ;;  %v5655_v54 = vpop.f32.mrf.mxu1 }
 0x57e   : > { %v5609_v17 = vpop.f32.mrf.mxu3 }
 0x57f   : > { %v5586_v20 = vadd.f32 %v5585_v28, %v5562_v35 }
 0x581   : > { %v5610_v49 = vadd.f32 %v5609_v17, %v5586_v20 }
 0x584   : > { %v5633_v8 = vpop.f32.mrf.mxu0 }
 0x585   : > { %v5634_v7 = vadd.f32 %v5633_v8, %v5610_v49  ;;  %v5758_v18 = vpop.f32.mrf.mxu1 }
 0x586   : > { %v5710_v16 = vpop.f32.mrf.mxu3 }
 0x587   : > { %v5656_v1 = vadd.f32 %v5655_v54, %v5634_v7 }
 0x589   : > { %v6110_v42 = vsel %vm4796_vm4, %v5656_v1, 0 }
 0x58a   : > { %v6129_v0 = vand.u32 4294901760, %v6110_v42 }
 0x58c   : > { %v6130_v46 = vsub.f32 %v6110_v42, %v6129_v0  ;;  %v5734_v25 = vpop.f32.mrf.mxu0  ;;  %6160 = vmatmul.f32.vlgmr.msra.gmra.mxu1 %v6129_v0 }
 0x58d   : > { %6353 = vmatpush.msra.mxu1 %v6276_v38  ;;  %v5859_v13 = vpop.f32.mrf.mxu1 }
 0x58e   : > { %v6131_v12 = vand.u32 4294901760, %v6130_v46  ;;  %v5684_v14 = vpop.f32.mrf.mxu2  ;;  %6184 = vmatmul.f32.vlgmr.msra.gmra.mxu2 %v6130_v46  ;;  %v5804_v47 = vpop.f32.mrf.mxu3 }
 0x58f   : > { %v5711_v29 = vadd.f32 %v5710_v16, %v5684_v14  ;;  %6379 = vmatpush.msra.mxu2 %v6304_v58 }
 0x590   : > { %v6132_v32 = vsub.f32 %v6130_v46, %v6131_v12  ;;  %6208 = vmatmul.f32.vlgmr.msra.gmra.mxu3 %v6131_v12 }
 0x591   : > { %v5735_v23 = vadd.f32 %v5734_v25, %v5711_v29  ;;  %6401 = vmatpush.msra.mxu3 %v6276_v38 }
 0x592   : > { %v6133_v55 = vand.u32 4294901760, %v6132_v32 }
 0x593   : > { %v5759_v10 = vadd.f32 %v5758_v18, %v5735_v23 }
 0x594   : > { %v5833_v51 = vpop.f32.mrf.mxu0  ;;  %6134 = vmatmul.f32.vlgmr.msra.gmra.mxu0 %v6133_v55  ;;  %6254 = vmatmul.f32.vlgmr.msrb.gmra.mxu1 %v6129_v0 }
 0x595   : > { %6330 = vmatpush.msra.mxu0 %v6303_v43  ;;  %6456 = vmatpush.msrb.mxu1 %v6455_v61  ;;  %v5860_v63 = vadd.f32 %v5859_v13, %v5833_v51  ;;  %v5953_v21 = vpop.f32.mrf.mxu1 }
 0x596   : > { %v5782_v24 = vpop.f32.mrf.mxu2  ;;  %v5907_v57 = vpop.f32.mrf.mxu3 }
 0x597   : > { %v5783_v31 = vadd.f32 %v5782_v24, %v5759_v10 }
 0x599   : > { %v5805_v53 = vadd.f32 %v5804_v47, %v5783_v31 }
 0x59b   : > { %v6259_v37 = vsel %vm4796_vm4, %v5805_v53, 0 }
 0x59c   : > { %v6278_v45 = vand.u32 4294901760, %v6259_v37  ;;  %6232 = vmatmul.f32.vlgmr.msrb.gmra.mxu0 %v6129_v0  ;;  %v5931_v40 = vpop.f32.mrf.mxu0 }
 0x59d   : > { %6426 = vmatpush.msrb.mxu0 %v6425_v48  ;;  %v6056_v2 = vpop.f32.mrf.mxu1 }
 0x59e   : > { %v6279_v19 = vsub.f32 %v6259_v37, %v6278_v45  ;;  %v5883_v39 = vpop.f32.mrf.mxu2  ;;  %6309 = vmatmul.f32.vlgmr.msrb.gmra.mxu3 %v6278_v45  ;;  %v6008_v5 = vpop.f32.mrf.mxu3 }
 0x59f   : > { %v5884_v4 = vadd.f32 %v5883_v39, %v5860_v63  ;;  %6502 = vmatpush.msrb.mxu3 %v6425_v48 }
 0x5a0   : > { %v6280_v3 = vand.u32 4294901760, %v6279_v19 }
 0x5a1   : > { %v5908_v30 = vadd.f32 %v5907_v57, %v5884_v4 }
 0x5a2   : > { %v6281_v9 = vsub.f32 %v6279_v19, %v6280_v3  ;;  %6357 = vmatmul.f32.vlgmr.msra.gmra.mxu1 %v6280_v3 }
 0x5a3   : > { %v5932_v27 = vadd.f32 %v5931_v40, %v5908_v30  ;;  %6550 = vmatpush.msra.mxu1 %v6425_v48 }
 0x5a4   : > { %v6282_v22 = vand.u32 4294901760, %v6281_v9  ;;  %6333 = vmatmul.f32.vlgmr.msra.gmra.mxu0 %v6279_v19  ;;  %v6032_v6 = vpop.f32.mrf.mxu0 }
 0x5a5   : > { %v5954_v50 = vadd.f32 %v5953_v21, %v5932_v27  ;;  %6528 = vmatpush.msra.mxu0 %v6453_v41 }
 0x5a6   : > { %v5982_v26 = vpop.f32.mrf.mxu2  ;;  %6283 = vmatmul.f32.vlgmr.msrb.gmra.mxu2 %v6282_v22  ;;  %6403 = vmatmul.f32.vlgmr.msra.gmra.mxu3 %v6278_v45  ;;  %v6102_v48 = vpop.f32.mrf.mxu3 }
 0x5a7   : > { %v6408_v38 = vsel %vm4796_vm4, %v5954_v50, 0  ;;  %v6009_v43 = vadd.f32 %v6008_v5, %v5982_v26  ;;  %6479 = vmatpush.msrb.mxu2 %v19082_v56  ;;  %6605 = vmatpush.msra.mxu3 %v6604_v15 }
 0x5a8   : > { %v6427_v58 = vand.u32 4294901760, %v6408_v38 }
 0x5a9   : > { %v6033_v36 = vadd.f32 %v6032_v6, %v6009_v43  ;;  %v14956_v6 = vld [vmem:[%s24095_s5] ss:$0 sm:$0xff] }
 0x5aa   : > { %v6428_v59 = vsub.f32 %v6408_v38, %v6427_v58  ;;  %6458 = vmatmul.f32.vlgmr.msrb.gmra.mxu1 %v6427_v58 }
 0x5ab   : > { %6651 = vmatpush.msrb.mxu1 %v6574_v11  ;;  %v6057_v28 = vadd.f32 %v6056_v2, %v6033_v36  ;;  %v15024_v2 = vld [vmem:[%s15214_s19] sm:$0xff] }
 0x5ac   : > { %v6429_v35 = vand.u32 4294901760, %v6428_v59 }
 0x5ae   : > { %v6080_v17 = vpop.f32.mrf.mxu2  ;;  %6381 = vmatmul.f32.vlgmr.msra.gmra.mxu2 %v6278_v45  ;;  %6506 = vmatmul.f32.vlgmr.msrb.gmra.mxu3 %v6429_v35  ;;  %v6430_v20 = vsub.f32 %v6428_v59, %v6429_v35 }
 0x5af   : > { %v6081_v52 = vadd.f32 %v6080_v17, %v6057_v28  ;;  %6575 = vmatpush.msra.mxu2 %v6574_v11  ;;  %6699 = vmatpush.msrb.mxu3 %v6574_v11  ;;  %v6762_v28 = vld [vmem:[%s24098_s8 + $0x78] sm:$0xff]  ;;  %v6761_v17 = vld [vmem:[%s24098_s8 + $0x70] sm:$0xff] }
 0x5b0   : > { %v6431_v49 = vand.u32 4294901760, %v6430_v20  ;;  %v6760_v20 = vld [vmem:[%s24098_s8 + $0x68] sm:$0xff] }
 0x5b1   : > { %v6103_v54 = vadd.f32 %v6102_v48, %v6081_v52  ;;  %v19115_v52 = vand.u32 4294901760, %v6762_v28  ;;  %v19117_v48 = vand.u32 4294901760, %v6761_v17 }
 0x5b2   : > { %6432 = vmatmul.f32.vlgmr.msrb.gmra.mxu0 %v6431_v49  ;;  %6552 = vmatmul.f32.vlgmr.msra.gmra.mxu1 %v6427_v58  ;;  %v19119_v49 = vand.u32 4294901760, %v6760_v20 }
 0x5b3   : > { %v6557_v8 = vsel %vm4796_vm4, %v6103_v54, 0  ;;  %6628 = vmatpush.msrb.mxu0 %v19090_v34  ;;  %v6759_v54 = vld [vmem:[%s24098_s8 + $0x60] sm:$0xff] }
 0x5b4   : > { %v6576_v7 = vand.u32 4294901760, %v6557_v8 }
 0x5b6   : > { %v6577_v56 = vsub.f32 %v6557_v8, %v6576_v7  ;;  %6482 = vmatmul.f32.vlgmr.msrb.gmra.mxu2 %v6428_v59  ;;  %6607 = vmatmul.f32.vlgmr.msra.gmra.mxu3 %v6576_v7  ;;  %v6758_v8 = vld [vmem:[%s24098_s8 + $0x58] sm:$0xff] }
 0x5b7   : > { %6677 = vmatpush.msrb.mxu2 %v6602_v60  ;;  %6964 = vmatpush.msra.mxu3 %v19115_v52 }
 0x5b8   : > { %v6578_v1 = vand.u32 4294901760, %v6577_v56 }
 0x5b9   : > { %6966 = vmatpush.msra.mxu3 %v19117_v48 }
 0x5ba   : > { %v6579_v16 = vsub.f32 %v6577_v56, %v6578_v1  ;;  %6530 = vmatmul.f32.vlgmr.msra.gmra.mxu0 %v6427_v58  ;;  %6655 = vmatmul.f32.vlgmr.msrb.gmra.mxu1 %v6578_v1  ;;  %v19132_v1 = vand.u32 4294901760, %v6758_v8 }
 0x5bb   : > { %6768 = vmatpush.msra.mxu0 %v19115_v52  ;;  %6968 = vmatpush.msra.mxu3 %v19119_v49 }
 0x5bc   : > { %v6580_v42 = vand.u32 4294901760, %v6579_v16 }
 0x5bd   : > { %6770 = vmatpush.msra.mxu0 %v19117_v48 }
 0x5be   : > { %6581 = vmatmul.f32.vlgmr.msra.gmra.mxu2 %v6580_v42  ;;  %6701 = vmatmul.f32.vlgmr.msrb.gmra.mxu3 %v6576_v7  ;;  %v6756_v42 = vld [vmem:[%s24098_s8 + $0x48] sm:$0xff] }
 0x5bf   : > { %6772 = vmatpush.msra.mxu0 %v19119_v49 }
 0x5c2   : > { %6631 = vmatmul.f32.vlgmr.msrb.gmra.mxu0 %v6577_v56  ;;  %v19130_v56 = vand.u32 4294901760, %v6759_v54 }
 0x5c4   : > { %6774 = vmatpush.msra.mxu0 %v19130_v56  ;;  %6970 = vmatpush.msra.mxu3 %v19130_v56 }
 0x5c6   : > { %6679 = vmatmul.f32.vlgmr.msrb.gmra.mxu2 %v6576_v7  ;;  %v6757_v7 = vld [vmem:[%s24098_s8 + $0x50] sm:$0xff]  ;;  %6776 = vmatpush.msra.mxu0 %v19132_v1 }
 0x5c7   : > { %v19134_v16 = vand.u32 4294901760, %v6757_v7  ;;  %6972 = vmatpush.msra.mxu3 %v19132_v1 }
 0x5c9   : > { %6778 = vmatpush.msra.mxu0 %v19134_v16  ;;  %6974 = vmatpush.msra.mxu3 %v19134_v16 }
 0x609   : > { %v6161_v0 = vpop.f32.mrf.mxu1 }
 0x611   : > { %v6135_v41 = vpop.f32.mrf.mxu0  ;;  %v6185_v44 = vpop.f32.mrf.mxu2 }
 0x612   : > { %v6255_v12 = vpop.f32.mrf.mxu1  ;;  %v6162_v24 = vadd.f32 %v6161_v0, %v6135_v41  ;;  %v6755_v41 = vld [vmem:[%s24098_s8 + $0x40] sm:$0xff]  ;;  %v19143_v0 = vsub.f32 %v6762_v28, %v19115_v52 }
 0x613   : > { %v6209_v46 = vpop.f32.mrf.mxu3 }
 0x614   : > { %v6186_v37 = vadd.f32 %v6185_v44, %v6162_v24  ;;  %v19152_v44 = vand.u32 4294901760, %v6756_v42  ;;  %6911 = vmatpush.msra.mxu2 %v19143_v0 }
 0x616   : > { %v6210_v19 = vadd.f32 %v6209_v46, %v6186_v37  ;;  %v19146_v46 = vsub.f32 %v6761_v17, %v19117_v48  ;;  %6780 = vmatpush.msra.mxu0 %v19152_v44  ;;  %6976 = vmatpush.msra.mxu3 %v19152_v44 }
 0x618   : > { %6914 = vmatpush.msra.mxu2 %v19146_v46 }
 0x619   : > { %v6233_v25 = vpop.f32.mrf.mxu0 }
 0x61a   : > { %v6234_v62 = vadd.f32 %v6233_v25, %v6210_v19  ;;  %v19149_v25 = vsub.f32 %v6760_v20, %v19119_v49  ;;  %v6751_v19 = vld [vmem:[%s24098_s8 + $0x20] sm:$0xff] }
 0x61c   : > { %v6256_v27 = vadd.f32 %v6255_v12, %v6234_v62  ;;  %v19156_v12 = vsub.f32 %v6759_v54, %v19130_v56  ;;  %6917 = vmatpush.msra.mxu2 %v19149_v25 }
 0x61e   : > { %6920 = vmatpush.msra.mxu2 %v19156_v12 }
 0x61f   : > { %v6358_v29 = vpop.f32.mrf.mxu1 }
 0x621   : > { %v6310_v18 = vpop.f32.mrf.mxu3  ;;  %v6334_v14 = vpop.f32.mrf.mxu0 }
 0x627   : > { %v6459_v55 = vpop.f32.mrf.mxu1 }
 0x629   : > { %v6284_v32 = vpop.f32.mrf.mxu2  ;;  %v6404_v33 = vpop.f32.mrf.mxu3 }
 0x62a   : > { %v6311_v11 = vadd.f32 %v6310_v18, %v6284_v32  ;;  %v19159_v18 = vsub.f32 %v6758_v8, %v19132_v1  ;;  %v6810_v32 = vand.u32 4294901760, %v19143_v0 }
 0x62c   : > { %v6335_v34 = vadd.f32 %v6334_v14, %v6311_v11  ;;  %v19162_v14 = vsub.f32 %v6757_v7, %v19134_v16  ;;  %v6811_v11 = vsub.f32 %v19143_v0, %v6810_v32  ;;  %6923 = vmatpush.msra.mxu2 %v19159_v18  ;;  %v7124_v0 = vld [vmem:[%s24100_s10 + $0x78] sm:$0xff] }
 0x62e   : > { %v6359_v60 = vadd.f32 %v6358_v29, %v6335_v34  ;;  %v19164_v29 = vand.u32 4294901760, %v6755_v41  ;;  %v6840_v24 = vand.u32 4294901760, %v19162_v14  ;;  %v6754_v34 = vld [vmem:[%s24098_s8 + $0x38] sm:$0xff]  ;;  %v6812_v37 = vand.u32 4294901760, %v6811_v11  ;;  %6926 = vmatpush.msra.mxu2 %v19162_v14 }
 0x62f   : > { %v6433_v23 = vpop.f32.mrf.mxu0  ;;  %v6553_v53 = vpop.f32.mrf.mxu1 }
 0x630   : > { %v6460_v31 = vadd.f32 %v6459_v55, %v6433_v23  ;;  %v6822_v23 = vand.u32 4294901760, %v19149_v25  ;;  %v6834_v55 = vand.u32 4294901760, %v19159_v18  ;;  %6813 = vmatpush.msra.mxu1 %v6812_v37  ;;  %6782 = vmatpush.msra.mxu0 %v19164_v29 }
 0x631   : > { %v6382_v61 = vpop.f32.mrf.mxu2  ;;  %v6507_v47 = vpop.f32.mrf.mxu3  ;;  %6978 = vmatpush.msra.mxu3 %v19164_v29 }
 0x632   : > { %v6383_v40 = vadd.f32 %v6382_v61, %v6359_v60  ;;  %v6828_v61 = vand.u32 4294901760, %v19156_v12 }
 0x634   : > { %v6405_v21 = vadd.f32 %v6404_v33, %v6383_v40  ;;  %v6816_v33 = vand.u32 4294901760, %v19146_v46 }
 0x636   : > { %v6705_v5 = vadd.f32 %v6405_v21, %v6256_v27 }
 0x637   : > { %v6531_v51 = vpop.f32.mrf.mxu0  ;;  %v6656_v9 = vpop.f32.mrf.mxu1 }
 0x639   : > { %v6483_v10 = vpop.f32.mrf.mxu2  ;;  %v6608_v57 = vpop.f32.mrf.mxu3 }
 0x63a   : > { %v6484_v13 = vadd.f32 %v6483_v10, %v6460_v31  ;;  %v6823_v10 = vsub.f32 %v19149_v25, %v6822_v23  ;;  %v19190_v31 = vsub.f32 %v6755_v41, %v19164_v29  ;;  %v7122_v25 = vld [vmem:[%s24100_s10 + $0x68] sm:$0xff] }
 0x63c   : > { %v6508_v45 = vadd.f32 %v6507_v47, %v6484_v13  ;;  %v19174_v47 = vsub.f32 %v6756_v42, %v19152_v44  ;;  %v6753_v13 = vld [vmem:[%s24098_s8 + $0x30] sm:$0xff]  ;;  %v6824_v40 = vand.u32 4294901760, %v6823_v10 }
 0x63e   : > { %v6532_v3 = vadd.f32 %v6531_v51, %v6508_v45  ;;  %v6817_v51 = vsub.f32 %v19146_v46, %v6816_v33  ;;  %v6829_v45 = vsub.f32 %v19156_v12, %v6828_v61  ;;  %6929 = vmatpush.msra.mxu2 %v19174_v47  ;;  %v7123_v46 = vld [vmem:[%s24100_s10 + $0x70] sm:$0xff]  ;;  %v19367_v12 = vand.u32 4294901760, %v7124_v0 }
 0x63f   : > { %v6632_v4 = vpop.f32.mrf.mxu0 }
 0x640   : > { %v6554_v15 = vadd.f32 %v6553_v53, %v6532_v3  ;;  %v6752_v53 = vld [vmem:[%s24098_s8 + $0x28] sm:$0xff]  ;;  %v6818_v60 = vand.u32 4294901760, %v6817_v51  ;;  %v6841_v3 = vsub.f32 %v19162_v14, %v6840_v24  ;;  %v6830_v21 = vand.u32 4294901760, %v6829_v45  ;;  %6932 = vmatpush.msra.mxu2 %v19190_v31 }
 0x641   : > { %v6582_v63 = vpop.f32.mrf.mxu2  ;;  %v6702_v38 = vpop.f32.mrf.mxu3  ;;  %v19220_v62 = vand.u32 4294901760, %v6752_v53  ;;  %v19371_v14 = vand.u32 4294901760, %v7122_v25 }
 0x642   : > { %v6609_v39 = vadd.f32 %v6608_v57, %v6582_v63  ;;  %v6706_v58 = vadd.f32 %v6705_v5, %v6554_v15  ;;  %v6835_v57 = vsub.f32 %v19159_v18, %v6834_v55  ;;  %v6846_v63 = vand.u32 4294901760, %v19174_v47  ;;  %6819 = vmatpush.msra.mxu1 %v6818_v60  ;;  %v6750_v60 = vld [vmem:[%s24098_s8 + $0x18] sm:$0xff] }
 0x643   : > { %v19235_v15 = vand.u32 4294901760, %v6751_v19  ;;  %v19295_v45 = vand.u32 4294901760, %v6750_v60  ;;  %v19369_v18 = vand.u32 4294901760, %v7123_v46 }
 0x644   : > { %v6633_v30 = vadd.f32 %v6632_v4, %v6609_v39  ;;  %v19216_v39 = vand.u32 4294901760, %v6754_v34  ;;  %v19218_v4 = vand.u32 4294901760, %v6753_v13  ;;  %6825 = vmatpush.msra.mxu1 %v6824_v40 }
 0x646   : > { %v6657_v22 = vadd.f32 %v6656_v9, %v6633_v30  ;;  %v6852_v30 = vand.u32 4294901760, %v19190_v31  ;;  %v19229_v9 = vsub.f32 %v6754_v34, %v19216_v39  ;;  %v19233_v27 = vsub.f32 %v6753_v13, %v19218_v4  ;;  %6831 = vmatpush.msra.mxu1 %v6830_v21  ;;  %6784 = vmatpush.msra.mxu0 %v19216_v39  ;;  %v24628_v34 = vld [vmem:[#allocation7_spill] sm:$0xff] }
 0x647   : > { %6980 = vmatpush.msra.mxu3 %v19216_v39 }
 0x648   : > { %v6858_v5 = vand.u32 4294901760, %v19229_v9  ;;  %6786 = vmatpush.msra.mxu0 %v19218_v4  ;;  %6935 = vmatpush.msra.mxu2 %v19229_v9 }
 0x649   : > { %v6680_v50 = vpop.f32.mrf.mxu2  ;;  %6982 = vmatpush.msra.mxu3 %v19218_v4 }
 0x64a   : > { %v6681_v26 = vadd.f32 %v6680_v50, %v6657_v22  ;;  %v6836_v22 = vand.u32 4294901760, %v6835_v57  ;;  %v6847_v50 = vsub.f32 %v19174_v47, %v6846_v63  ;;  %6788 = vmatpush.msra.mxu0 %v19220_v62  ;;  %6938 = vmatpush.msra.mxu2 %v19233_v27  ;;  %v6749_v57 = vld [vmem:[%s24098_s8 + $0x10] sm:$0xff] }
 0x64b   : > { %6984 = vmatpush.msra.mxu3 %v19220_v62  ;;  %v19301_v40 = vand.u32 4294901760, %v6749_v57 }
 0x64c   : > { %v6703_v43 = vadd.f32 %v6702_v38, %v6681_v26  ;;  %v19245_v26 = vsub.f32 %v6752_v53, %v19220_v62  ;;  %v6842_v38 = vand.u32 4294901760, %v6841_v3  ;;  %6837 = vmatpush.msra.mxu1 %v6836_v22  ;;  %6790 = vmatpush.msra.mxu0 %v19235_v15  ;;  %v6748_v3 = vld [vmem:[%s24098_s8 + $0x8] sm:$0xff] }
 0x64d   : > { %6986 = vmatpush.msra.mxu3 %v19235_v15  ;;  %v6887_v22 = vsub.f32 %v6749_v57, %v19301_v40 }
 0x64e   : > { %v6707_v36 = vadd.f32 %v6706_v58, %v6703_v43  ;;  %v6853_v43 = vsub.f32 %v19190_v31, %v6852_v30  ;;  %v6864_v58 = vand.u32 4294901760, %v19233_v27  ;;  %6843 = vmatpush.msra.mxu1 %v6842_v38  ;;  %6941 = vmatpush.msra.mxu2 %v19245_v26  ;;  %v6747_v38 = vld [vmem:[%s24098_s8] sm:$0xff]  ;;  %v19393_v31 = vsub.f32 %v7123_v46, %v19369_v18 }
 0x64f   : > { %6792 = vmatpush.msra.mxu0 %v19295_v45  ;;  %6988 = vmatpush.msra.mxu3 %v19295_v45 }
 0x650   : > { %v6712_v59 = vadd.f32 %v14956_v6, %v6707_v36  ;;  %v19255_v6 = vsub.f32 %v6751_v19, %v19235_v15  ;;  %v6848_v36 = vand.u32 4294901760, %v6847_v50  ;;  %v6854_v28 = vand.u32 4294901760, %v6853_v43 }
 0x651   : > { %v6865_v17 = vsub.f32 %v19233_v27, %v6864_v58  ;;  %v6881_v19 = vsub.f32 %v6750_v60, %v19295_v45  ;;  %v19309_v50 = vand.u32 4294901760, %v6748_v3  ;;  %6794 = vmatpush.msra.mxu0 %v19301_v40  ;;  %6990 = vmatpush.msra.mxu3 %v19301_v40 }
 0x652   : > { %v19103_v35 = vadd.f32 %v15024_v2, %v6712_v59  ;;  %v6859_v59 = vsub.f32 %v19229_v9, %v6858_v5  ;;  %v6870_v2 = vand.u32 4294901760, %v19245_v26  ;;  %v6876_v20 = vand.u32 4294901760, %v19255_v6  ;;  %6849 = vmatpush.msra.mxu1 %v6848_v36  ;;  %6944 = vmatpush.msra.mxu2 %v19255_v6 }
 0x653   : > { %v6866_v41 = vand.u32 4294901760, %v6865_v17  ;;  %v6882_v21 = vand.u32 4294901760, %v6881_v19  ;;  %v6888_v36 = vand.u32 4294901760, %v6887_v22  ;;  %6796 = vmatpush.msra.mxu0 %v19309_v50  ;;  %6992 = vmatpush.msra.mxu3 %v19309_v50 }
 0x654   : > { %6714 = vadd.xlane.f32.xlu1 %v19103_v35  ;;  %v6860_v8 = vand.u32 4294901760, %v6859_v59  ;;  %v6871_v7 = vsub.f32 %v19245_v26, %v6870_v2  ;;  %6855 = vmatpush.msra.mxu1 %v6854_v28  ;;  %v6877_v11 = vsub.f32 %v19255_v6, %v6876_v20  ;;  %v6893_v59 = vsub.f32 %v6748_v3, %v19309_v50  ;;  %v14957_v26 = vld [vmem:[%s24096_s6 + $0x1] ss:$0 sm:$0xff] }
 0x655   : > { %6947 = vmatpush.msra.mxu2 %v6881_v19  ;;  %v6883_v43 = vsub.f32 %v6881_v19, %v6882_v21  ;;  %v6797_v28 = vand.u32 4294901760, %v6747_v38 }
 0x656   : > { %6861 = vmatpush.msra.mxu1 %v6860_v8  ;;  %v6872_v10 = vand.u32 4294901760, %v6871_v7  ;;  %v6878_v53 = vand.u32 4294901760, %v6877_v11  ;;  %v6894_v8 = vand.u32 4294901760, %v6893_v59 }
 0x657   : > { %6950 = vmatpush.msra.mxu2 %v6887_v22  ;;  %v6884_v17 = vand.u32 4294901760, %v6883_v43  ;;  %v6899_v7 = vsub.f32 %v6747_v38, %v6797_v28  ;;  %6798 = vmatpush.msra.mxu0 %v6797_v28  ;;  %v7115_v38 = vld [vmem:[%s24100_s10 + $0x30] sm:$0xff] }
 0x658   : > { %6867 = vmatpush.msra.mxu1 %v6866_v41  ;;  %6994 = vmatpush.msra.mxu3 %v6797_v28  ;;  %v6895_v41 = vsub.f32 %v6893_v59, %v6894_v8 }
 0x659   : > { %6953 = vmatpush.msra.mxu2 %v6893_v59  ;;  %7005 = vmatpush.msrb.mxu0 %v6810_v32  ;;  %v6900_v11 = vand.u32 4294901760, %v6899_v7  ;;  %v7120_v32 = vld [vmem:[%s24100_s10 + $0x58] sm:$0xff] }
 0x65a   : > { %6873 = vmatpush.msra.mxu1 %v6872_v10 }
 0x65b   : > { %6956 = vmatpush.msra.mxu2 %v6899_v7  ;;  %7009 = vmatpush.msrb.mxu0 %v6816_v33  ;;  %v6901_v10 = vsub.f32 %v6899_v7, %v6900_v11 }
 0x65c   : > { %6879 = vmatpush.msra.mxu1 %v6878_v53 }
 0x65d   : > { %7013 = vmatpush.msrb.mxu0 %v6822_v23  ;;  %v6902_v53 = vand.u32 4294901760, %v6901_v10  ;;  %v19381_v23 = vand.u32 4294901760, %v7120_v32  ;;  %7130 = vmatpush.msrb.mxu2 %v19367_v12 }
 0x65e   : > { %6885 = vmatpush.msra.mxu1 %v6884_v17 }
 0x65f   : > { %7017 = vmatpush.msrb.mxu0 %v6828_v61  ;;  %v7119_v61 = vld [vmem:[%s24100_s10 + $0x50] sm:$0xff]  ;;  %7132 = vmatpush.msrb.mxu2 %v19369_v18 }
 0x661   : > { %7021 = vmatpush.msrb.mxu0 %v6834_v55  ;;  %v7118_v55 = vld [vmem:[%s24100_s10 + $0x48] sm:$0xff]  ;;  %7134 = vmatpush.msrb.mxu2 %v19371_v14 }
 0x663   : > { %7025 = vmatpush.msrb.mxu0 %v6840_v24  ;;  %v19390_v24 = vsub.f32 %v7124_v0, %v19367_v12 }
 0x665   : > { %7029 = vmatpush.msrb.mxu0 %v6846_v63  ;;  %v19396_v63 = vsub.f32 %v7122_v25, %v19371_v14  ;;  %v7172_v27 = vand.u32 4294901760, %v19390_v24  ;;  %v7111_v25 = vld [vmem:[%s24100_s10 + $0x10] sm:$0xff] }
 0x667   : > { %7033 = vmatpush.msrb.mxu0 %v6852_v30  ;;  %v19407_v30 = vand.u32 4294901760, %v7118_v55 }
 0x669   : > { %7037 = vmatpush.msrb.mxu0 %v6858_v5  ;;  %v7184_v5 = vand.u32 4294901760, %v19396_v63 }
 0x66b   : > { %7041 = vmatpush.msrb.mxu0 %v6864_v58  ;;  %v7185_v19 = vsub.f32 %v19396_v63, %v7184_v5 }
 0x66d   : > { %7045 = vmatpush.msrb.mxu0 %v6870_v2 }
 0x66f   : > { %7049 = vmatpush.msrb.mxu0 %v6876_v20  ;;  %v19424_v20 = vsub.f32 %v7118_v55, %v19407_v30 }
 0x671   : > { %7053 = vmatpush.msrb.mxu0 %v6882_v21  ;;  %v7208_v17 = vand.u32 4294901760, %v19424_v20 }
 0x673   : > { %7057 = vmatpush.msrb.mxu0 %v6888_v36  ;;  %v7209_v46 = vsub.f32 %v19424_v20, %v7208_v17 }
 0x675   : > { %7061 = vmatpush.msrb.mxu0 %v6894_v8  ;;  %v7186_v8 = vand.u32 4294901760, %v7185_v19  ;;  %v7210_v19 = vand.u32 4294901760, %v7209_v46 }
 0x677   : > { %7065 = vmatpush.msrb.mxu0 %v6900_v11 }
 0x6c7   : > { %v6715_v54 = vpop.xlane.xlu1 %6714 }
 0x6c8   : > { %v6716_v42 = vmul.f32 0.03125, %v6715_v54  ;;  %v6889_v54 = vsub.f32 %v6887_v22, %v6888_v36  ;;  %v7117_v22 = vld [vmem:[%s24100_s10 + $0x40] sm:$0xff]  ;;  %v7114_v36 = vld [vmem:[%s24100_s10 + $0x28] sm:$0xff] }
 0x6c9   : > { %v19464_v7 = vand.u32 4294901760, %v7117_v22 }
 0x6ca   : > { %v6717_v51 = vsub.f32 %v19103_v35, %v6716_v42  ;;  %v6890_v42 = vand.u32 4294901760, %v6889_v54  ;;  %v7113_v54 = vld [vmem:[%s24100_s10 + $0x20] sm:$0xff] }
 0x6cc   : > { %v19287_v13 = vmul.f32 %v24628_v34, %v6717_v51  ;;  %6891 = vmatpush.msra.mxu1 %v6890_v42  ;;  %v6896_v51 = vand.u32 4294901760, %v6895_v41  ;;  %v19469_v41 = vand.u32 4294901760, %v7115_v38 }
 0x6ce   : > { %v6719_v37 = vmul.f32 %v19287_v13, %v19287_v13  ;;  %6897 = vmatpush.msra.mxu1 %v6896_v51 }
 0x6d0   : > { %6720 = vadd.xlane.f32.xlu2 %v6719_v37  ;;  %6903 = vmatpush.msra.mxu1 %v6902_v53  ;;  %v14958_v37 = vld [vmem:[%s24097_s7 + $0x1] ss:$0 sm:$0xff]  ;;  %v19474_v53 = vand.u32 4294901760, %v7114_v36 }
 0x6d2   : > { %7072 = vmatpush.msrb.mxu1 %v19115_v52 }
 0x6d4   : > { %7074 = vmatpush.msrb.mxu1 %v19117_v48 }
 0x6d6   : > { %7076 = vmatpush.msrb.mxu1 %v19119_v49 }
 0x6d8   : > { %7078 = vmatpush.msrb.mxu1 %v19130_v56 }
 0x6da   : > { %7080 = vmatpush.msrb.mxu1 %v19132_v1 }
 0x6dc   : > { %7082 = vmatpush.msrb.mxu1 %v19134_v16 }
 0x6de   : > { %7084 = vmatpush.msrb.mxu1 %v19152_v44 }
 0x6e0   : > { %7086 = vmatpush.msrb.mxu1 %v19164_v29  ;;  %v7121_v29 = vld [vmem:[%s24100_s10 + $0x60] sm:$0xff] }
 0x6e1   : > { %v19379_v33 = vand.u32 4294901760, %v7121_v29 }
 0x6e2   : > { %7088 = vmatpush.msrb.mxu1 %v19216_v39 }
 0x6e3   : > { %v19400_v39 = vsub.f32 %v7121_v29, %v19379_v33  ;;  %7136 = vmatpush.msrb.mxu2 %v19379_v33 }
 0x6e4   : > { %7090 = vmatpush.msrb.mxu1 %v19218_v4  ;;  %v19403_v4 = vsub.f32 %v7120_v32, %v19381_v23  ;;  %v19503_v32 = vsub.f32 %v7114_v36, %v19474_v53 }
 0x6e5   : > { %v7190_v58 = vand.u32 4294901760, %v19400_v39  ;;  %7138 = vmatpush.msrb.mxu2 %v19381_v23 }
 0x6e6   : > { %7092 = vmatpush.msrb.mxu1 %v19220_v62  ;;  %v19405_v62 = vand.u32 4294901760, %v7119_v61  ;;  %v7196_v6 = vand.u32 4294901760, %v19403_v4 }
 0x6e7   : > { %v7191_v3 = vsub.f32 %v19400_v39, %v7190_v58 }
 0x6e8   : > { %7094 = vmatpush.msrb.mxu1 %v19235_v15  ;;  %v7178_v15 = vand.u32 4294901760, %v19393_v31  ;;  %v19421_v2 = vsub.f32 %v7119_v61, %v19405_v62  ;;  %7140 = vmatpush.msrb.mxu2 %v19405_v62 }
 0x6e9   : > { %v7192_v51 = vand.u32 4294901760, %v7191_v3  ;;  %v7232_v3 = vand.u32 4294901760, %v19503_v32 }
 0x6ea   : > { %7096 = vmatpush.msrb.mxu1 %v19295_v45  ;;  %v7173_v45 = vsub.f32 %v19390_v24, %v7172_v27  ;;  %v7179_v57 = vsub.f32 %v19393_v31, %v7178_v15  ;;  %v7202_v21 = vand.u32 4294901760, %v19421_v2  ;;  %7142 = vmatpush.msrb.mxu2 %v19407_v30 }
 0x6ec   : > { %7098 = vmatpush.msrb.mxu1 %v19301_v40  ;;  %v7174_v43 = vand.u32 4294901760, %v7173_v45  ;;  %v7203_v10 = vsub.f32 %v19421_v2, %v7202_v21  ;;  %7144 = vmatpush.msrb.mxu2 %v19464_v7  ;;  %v19520_v45 = vand.u32 4294901760, %v7111_v25 }
 0x6ee   : > { %7100 = vmatpush.msrb.mxu1 %v19309_v50  ;;  %v7116_v50 = vld [vmem:[%s24100_s10 + $0x38] sm:$0xff]  ;;  %7175 = vmatpush.msrb.mxu3 %v7174_v43 }
 0x6ef   : > { %v19467_v42 = vand.u32 4294901760, %v7116_v50 }
 0x6f0   : > { %7102 = vmatpush.msrb.mxu1 %v6797_v28  ;;  %v7197_v28 = vsub.f32 %v19403_v4, %v7196_v6 }
 0x6f1   : > { %7146 = vmatpush.msrb.mxu2 %v19467_v42 }
 0x6f2   : > { %v7198_v0 = vand.u32 4294901760, %v7197_v28 }
 0x6f3   : > { %7148 = vmatpush.msrb.mxu2 %v19469_v41 }
 0x6f5   : > { %7150 = vmatpush.msrb.mxu2 %v19474_v53 }
 0x743   : > { %v6721_v52 = vpop.xlane.xlu2 %6720 }
 0x744   : > { %v6722_v48 = vmul.f32 0.032258064, %v6721_v52  ;;  %v7112_v52 = vld [vmem:[%s24100_s10 + $0x18] sm:$0xff] }
 0x745   : > { %v19505_v61 = vand.u32 4294901760, %v7112_v52 }
 0x746   : > { %v6725_v49 = vadd.f32 1e-06, %v6722_v48  ;;  %v19480_v48 = vsub.f32 %v7117_v22, %v19464_v7 }
 0x747   : > { %v19529_v22 = vsub.f32 %v7112_v52, %v19505_v61 }
 0x748   : > { %15000 = vrsqrt.f32 %v6725_v49  ;;  %vm6732_vm6 = vweird.f32 %v6725_v49 }
 0x74e   : > { %v15001_v56 = vpop.eup %15000 }
 0x74f   : > { %v6727_v1 = vmul.f32 %v15001_v56, %v6725_v49  ;;  %vm6733_vm7 = vweird.f32 %v15001_v56  ;;  %v19483_v49 = vsub.f32 %v7116_v50, %v19467_v42 }
 0x750   : > { %vm6734_vm8 = vmor %vm6732_vm6, %vm6733_vm7 }
 0x751   : > { %v6728_v16 = vmul.f32 %v15001_v56, %v6727_v1  ;;  %v19489_v1 = vand.u32 4294901760, %v7113_v54  ;;  %v7220_v29 = vand.u32 4294901760, %v19483_v49 }
 0x753   : > { %v6729_v44 = vmul.f32 0.5, %v6728_v16  ;;  %7152 = vmatpush.msrb.mxu2 %v19489_v1 }
 0x755   : > { %v6730_v47 = vsub.f32 1.5, %v6729_v44  ;;  %v7214_v44 = vand.u32 4294901760, %v19480_v48  ;;  %7154 = vmatpush.msrb.mxu2 %v19505_v61 }
 0x757   : > { %v6731_v9 = vmul.f32 %v15001_v56, %v6730_v47  ;;  %v7204_v47 = vand.u32 4294901760, %v7203_v10  ;;  %7156 = vmatpush.msrb.mxu2 %v19520_v45 }
 0x759   : > { %v6735_v60 = vsel %vm6734_vm8, %v15001_v56, %v6731_v9  ;;  %v19487_v56 = vsub.f32 %v7115_v38, %v19469_v41  ;;  %v7110_v9 = vld [vmem:[%s24100_s10 + $0x8] sm:$0xff] }
 0x75a   : > { %v6736_v40 = vmul.f32 %v6735_v60, %v19287_v13  ;;  %v7180_v13 = vand.u32 4294901760, %v7179_v57  ;;  %v19518_v60 = vsub.f32 %v7113_v54, %v19489_v1  ;;  %v19531_v50 = vand.u32 4294901760, %v7110_v9 }
 0x75c   : > { %v6740_v59 = vmul.f32 %v14957_v26, %v6736_v40  ;;  %7181 = vmatpush.msrb.mxu3 %v7180_v13  ;;  %v7215_v26 = vsub.f32 %v19480_v48, %v7214_v44  ;;  %v7221_v40 = vsub.f32 %v19483_v49, %v7220_v29  ;;  %v7238_v36 = vand.u32 4294901760, %v19518_v60  ;;  %7158 = vmatpush.msrb.mxu2 %v19531_v50 }
 0x75e   : > { %v6746_v11 = vadd.f32 %v14958_v37, %v6740_v59  ;;  %7187 = vmatpush.msrb.mxu3 %v7186_v8  ;;  %v7226_v37 = vand.u32 4294901760, %v19487_v56  ;;  %v7216_v43 = vand.u32 4294901760, %v7215_v26  ;;  %v19540_v59 = vsub.f32 %v7111_v25, %v19520_v45 }
 0x75f   : > { %v7222_v54 = vand.u32 4294901760, %v7221_v40  ;;  %v7233_v8 = vsub.f32 %v19503_v32, %v7232_v3  ;;  %v7239_v52 = vsub.f32 %v19518_v60, %v7238_v36 }
 0x760   : > { %v19491_v16 = vand.u32 4294901760, %v6746_v11  ;;  %7193 = vmatpush.msrb.mxu3 %v7192_v51  ;;  %v7227_v13 = vsub.f32 %v19487_v56, %v7226_v37  ;;  %v19549_v51 = vsub.f32 %v7110_v9, %v19531_v50 }
 0x761   : > { %v7234_v46 = vand.u32 4294901760, %v7233_v8 }
 0x762   : > { %6905 = vmatmul.f32.vlgmr.msra.gmra.mxu1 %v19491_v16  ;;  %v6800_v55 = vsub.f32 %v6746_v11, %v19491_v16  ;;  %7199 = vmatpush.msrb.mxu3 %v7198_v0  ;;  %v7244_v11 = vand.u32 4294901760, %v19529_v22  ;;  %v7228_v10 = vand.u32 4294901760, %v7227_v13  ;;  %v7250_v0 = vand.u32 4294901760, %v19540_v59 }
 0x763   : > { %7326 = vmatpush.msra.mxu1 %v19367_v12 }
 0x764   : > { %6959 = vmatmul.f32.vlgmr.msra.gmra.mxu2 %v6800_v55  ;;  %v6801_v57 = vand.u32 4294901760, %v6800_v55  ;;  %7205 = vmatpush.msrb.mxu3 %v7204_v47  ;;  %v7245_v25 = vsub.f32 %v19529_v22, %v7244_v11  ;;  %v7240_v47 = vand.u32 4294901760, %v7239_v52  ;;  %v7251_v9 = vsub.f32 %v19540_v59, %v7250_v0  ;;  %v14659_v52 = vld [vmem:[%s24092_s2 + $0x640] sm:$0xff] }
 0x765   : > { %7328 = vmatpush.msra.mxu1 %v19369_v18 }
 0x766   : > { %6998 = vmatmul.f32.vlgmr.msra.gmra.mxu3 %v6801_v57  ;;  %v6802_v38 = vsub.f32 %v6800_v55, %v6801_v57  ;;  %v7256_v55 = vand.u32 4294901760, %v19549_v51  ;;  %v7246_v26 = vand.u32 4294901760, %v7245_v25 }
 0x767   : > { %7330 = vmatpush.msra.mxu1 %v19371_v14  ;;  %7211 = vmatpush.msrb.mxu3 %v7210_v19  ;;  %v7252_v19 = vand.u32 4294901760, %v7251_v9 }
 0x768   : > { %v6803_v28 = vand.u32 4294901760, %v6802_v38  ;;  %v7257_v57 = vsub.f32 %v19549_v51, %v7256_v55 }
 0x769   : > { %7217 = vmatpush.msrb.mxu3 %v7216_v43  ;;  %7332 = vmatpush.msra.mxu1 %v19379_v33 }
 0x76a   : > { %6804 = vmatmul.f32.vlgmr.msra.gmra.mxu0 %v6803_v28  ;;  %7104 = vmatmul.f32.vlgmr.msrb.gmra.mxu1 %v19491_v16  ;;  %v7258_v40 = vand.u32 4294901760, %v7257_v57  ;;  %v19714_v57 = vand.u32 4294901760, %v14659_v52 }
 0x76b   : > { %7273 = vmatpush.msra.mxu0 %v19390_v24  ;;  %7223 = vmatpush.msrb.mxu3 %v7222_v54 }
 0x76c   : > { %7334 = vmatpush.msra.mxu1 %v19381_v23 }
 0x76d   : > { %7276 = vmatpush.msra.mxu0 %v19393_v31  ;;  %7229 = vmatpush.msrb.mxu3 %v7228_v10  ;;  %v14660_v10 = vld [vmem:[%s24092_s2 + $0x648] sm:$0xff] }
 0x76e   : > { %7336 = vmatpush.msra.mxu1 %v19405_v62 }
 0x76f   : > { %7279 = vmatpush.msra.mxu0 %v19396_v63  ;;  %7235 = vmatpush.msrb.mxu3 %v7234_v46 }
 0x770   : > { %7338 = vmatpush.msra.mxu1 %v19407_v30 }
 0x771   : > { %7282 = vmatpush.msra.mxu0 %v19400_v39  ;;  %7241 = vmatpush.msrb.mxu3 %v7240_v47 }
 0x772   : > { %7067 = vmatmul.f32.vlgmr.msrb.gmra.mxu0 %v19491_v16  ;;  %7340 = vmatpush.msra.mxu1 %v19464_v7  ;;  %v7109_v16 = vld [vmem:[%s24100_s10] sm:$0xff] }
 0x773   : > { %7285 = vmatpush.msra.mxu0 %v19403_v4  ;;  %7247 = vmatpush.msrb.mxu3 %v7246_v26  ;;  %v7159_v38 = vand.u32 4294901760, %v7109_v16 }
 0x774   : > { %7342 = vmatpush.msra.mxu1 %v19467_v42 }
 0x775   : > { %7288 = vmatpush.msra.mxu0 %v19421_v2  ;;  %7253 = vmatpush.msrb.mxu3 %v7252_v19  ;;  %v7261_v43 = vsub.f32 %v7109_v16, %v7159_v38 }
 0x776   : > { %7344 = vmatpush.msra.mxu1 %v19469_v41  ;;  %7160 = vmatpush.msrb.mxu2 %v7159_v38 }
 0x777   : > { %7291 = vmatpush.msra.mxu0 %v19424_v20  ;;  %7259 = vmatpush.msrb.mxu3 %v7258_v40  ;;  %v7262_v13 = vand.u32 4294901760, %v7261_v43 }
 0x778   : > { %7346 = vmatpush.msra.mxu1 %v19474_v53  ;;  %7367 = vmatpush.msra.mxu2 %v7172_v27 }
 0x779   : > { %7294 = vmatpush.msra.mxu0 %v19480_v48  ;;  %v7263_v28 = vsub.f32 %v7261_v43, %v7262_v13 }
 0x77a   : > { %7348 = vmatpush.msra.mxu1 %v19489_v1  ;;  %7371 = vmatpush.msra.mxu2 %v7178_v15 }
 0x77b   : > { %7297 = vmatpush.msra.mxu0 %v19483_v49  ;;  %v7264_v54 = vand.u32 4294901760, %v7263_v28 }
 0x77c   : > { %7350 = vmatpush.msra.mxu1 %v19505_v61  ;;  %7375 = vmatpush.msra.mxu2 %v7184_v5 }
 0x77d   : > { %7300 = vmatpush.msra.mxu0 %v19487_v56  ;;  %7265 = vmatpush.msrb.mxu3 %v7264_v54 }
 0x77e   : > { %7352 = vmatpush.msra.mxu1 %v19520_v45  ;;  %7379 = vmatpush.msra.mxu2 %v7190_v58 }
 0x77f   : > { %7303 = vmatpush.msra.mxu0 %v19503_v32  ;;  %7434 = vmatpush.msra.mxu3 %v19367_v12  ;;  %v14959_v12 = vld [vmem:[%s24099_s9] ss:$0 sm:$0xff] }
 0x780   : > { %7354 = vmatpush.msra.mxu1 %v19531_v50  ;;  %7383 = vmatpush.msra.mxu2 %v7196_v6 }
 0x781   : > { %7306 = vmatpush.msra.mxu0 %v19518_v60  ;;  %7436 = vmatpush.msra.mxu3 %v19369_v18  ;;  %v14665_v60 = vld [vmem:[%s24092_s2 + $0x670] sm:$0xff] }
 0x782   : > { %7356 = vmatpush.msra.mxu1 %v7159_v38  ;;  %7387 = vmatpush.msra.mxu2 %v7202_v21  ;;  %v14960_v21 = vld [vmem:[%s24101_s11] ss:$0 sm:$0xff] }
 0x783   : > { %7309 = vmatpush.msra.mxu0 %v19529_v22  ;;  %7438 = vmatpush.msra.mxu3 %v19371_v14  ;;  %v19667_v22 = vand.u32 4294901760, %v14665_v60 }
 0x784   : > { %7391 = vmatpush.msra.mxu2 %v7208_v17 }
 0x785   : > { %7312 = vmatpush.msra.mxu0 %v19540_v59  ;;  %7440 = vmatpush.msra.mxu3 %v19379_v33  ;;  %v14661_v59 = vld [vmem:[%s24092_s2 + $0x650] sm:$0xff]  ;;  %v19696_v46 = vsub.f32 %v14665_v60, %v19667_v22 }
 0x786   : > { %7395 = vmatpush.msra.mxu2 %v7214_v44 }
 0x787   : > { %7315 = vmatpush.msra.mxu0 %v19549_v51  ;;  %7442 = vmatpush.msra.mxu3 %v19381_v23  ;;  %v19684_v51 = vand.u32 4294901760, %v14661_v59  ;;  %v7795_v40 = vand.u32 4294901760, %v19696_v46 }
 0x788   : > { %7399 = vmatpush.msra.mxu2 %v7220_v29 }
 0x789   : > { %7318 = vmatpush.msra.mxu0 %v7261_v43  ;;  %7444 = vmatpush.msra.mxu3 %v19405_v62  ;;  %v19712_v26 = vsub.f32 %v14661_v59, %v19684_v51  ;;  %v7796_v54 = vsub.f32 %v19696_v46, %v7795_v40 }
 0x78a   : > { %7403 = vmatpush.msra.mxu2 %v7226_v37  ;;  %v14666_v37 = vld [vmem:[%s24092_s2 + $0x678] sm:$0xff] }
 0x78b   : > { %7446 = vmatpush.msra.mxu3 %v19407_v30 }
 0x78c   : > { %7407 = vmatpush.msra.mxu2 %v7232_v3  ;;  %v19665_v3 = vand.u32 4294901760, %v14666_v37 }
 0x78d   : > { %7448 = vmatpush.msra.mxu3 %v19464_v7 }
 0x78e   : > { %7411 = vmatpush.msra.mxu2 %v7238_v36  ;;  %v14662_v36 = vld [vmem:[%s24092_s2 + $0x658] sm:$0xff]  ;;  %7747 = vmatpush.msrb.mxu0 %v19665_v3 }
 0x78f   : > { %7450 = vmatpush.msra.mxu3 %v19467_v42 }
 0x790   : > { %7415 = vmatpush.msra.mxu2 %v7244_v11  ;;  %v19682_v11 = vand.u32 4294901760, %v14662_v36  ;;  %7749 = vmatpush.msrb.mxu0 %v19667_v22 }
 0x791   : > { %7452 = vmatpush.msra.mxu3 %v19469_v41 }
 0x792   : > { %7419 = vmatpush.msra.mxu2 %v7250_v0  ;;  %v19693_v0 = vsub.f32 %v14666_v37, %v19665_v3  ;;  %v19709_v9 = vsub.f32 %v14662_v36, %v19682_v11  ;;  %v14651_v36 = vld [vmem:[%s24092_s2 + $0x600] sm:$0xff] }
 0x793   : > { %7454 = vmatpush.msra.mxu3 %v19474_v53 }
 0x794   : > { %7423 = vmatpush.msra.mxu2 %v7256_v55  ;;  %v19703_v55 = vand.u32 4294901760, %v14660_v10  ;;  %v7789_v19 = vand.u32 4294901760, %v19693_v0  ;;  %v7813_v43 = vand.u32 4294901760, %v19709_v9 }
 0x795   : > { %7456 = vmatpush.msra.mxu3 %v19489_v1 }
 0x796   : > { %7427 = vmatpush.msra.mxu2 %v7262_v13  ;;  %v19725_v13 = vsub.f32 %v14660_v10, %v19703_v55  ;;  %v7790_v28 = vsub.f32 %v19693_v0, %v7789_v19 }
 0x797   : > { %7458 = vmatpush.msra.mxu3 %v19505_v61 }
 0x799   : > { %7460 = vmatpush.msra.mxu3 %v19520_v45  ;;  %v14664_v45 = vld [vmem:[%s24092_s2 + $0x668] sm:$0xff] }
 0x79b   : > { %7462 = vmatpush.msra.mxu3 %v19531_v50  ;;  %v14663_v50 = vld [vmem:[%s24092_s2 + $0x660] sm:$0xff] }
 0x79c   : > { %v19680_v8 = vand.u32 4294901760, %v14663_v50 }
 0x79d   : > { %7464 = vmatpush.msra.mxu3 %v7159_v38 }
 0x79e   : > { %v19706_v47 = vsub.f32 %v14663_v50, %v19680_v8 }
 0x7a0   : > { %v7807_v38 = vand.u32 4294901760, %v19706_v47 }
 0x7df   : > { %v6906_v18 = vpop.f32.mrf.mxu1 }
 0x7e7   : > { %v6805_v14 = vpop.f32.mrf.mxu0  ;;  %v6960_v24 = vpop.f32.mrf.mxu2 }
 0x7e8   : > { %v6806_v33 = vadd.f32 %v14959_v12, %v6805_v14  ;;  %v7105_v30 = vpop.f32.mrf.mxu1  ;;  %v19741_v14 = vsub.f32 %v14659_v52, %v19714_v57 }
 0x7e9   : > { %v6999_v63 = vpop.f32.mrf.mxu3 }
 0x7ea   : > { %v6907_v23 = vadd.f32 %v6906_v18, %v6806_v33  ;;  %v7819_v18 = vand.u32 4294901760, %v19712_v26  ;;  %v14658_v33 = vld [vmem:[%s24092_s2 + $0x638] sm:$0xff] }
 0x7ec   : > { %v6961_v31 = vadd.f32 %v6960_v24, %v6907_v23  ;;  %v14657_v23 = vld [vmem:[%s24092_s2 + $0x630] sm:$0xff]  ;;  %v14656_v24 = vld [vmem:[%s24092_s2 + $0x628] sm:$0xff] }
 0x7ee   : > { %v7000_v39 = vadd.f32 %v6999_v63, %v6961_v31  ;;  %v7791_v31 = vand.u32 4294901760, %v7790_v28  ;;  %v7797_v63 = vand.u32 4294901760, %v7796_v54 }
 0x7ef   : > { %v7068_v4 = vpop.f32.mrf.mxu0 }
 0x7f0   : > { %v7069_v62 = vadd.f32 %v7068_v4, %v7000_v39  ;;  %v7808_v39 = vsub.f32 %v19706_v47, %v7807_v38  ;;  %v7814_v4 = vsub.f32 %v19709_v9, %v7813_v43  ;;  %7792 = vmatpush.msrb.mxu1 %v7791_v31 }
 0x7f2   : > { %v7106_v27 = vadd.f32 %v7105_v30, %v7069_v62  ;;  %v7825_v62 = vand.u32 4294901760, %v19725_v13  ;;  %v14655_v30 = vld [vmem:[%s24092_s2 + $0x620] sm:$0xff]  ;;  %7798 = vmatpush.msrb.mxu1 %v7797_v63 }
 0x7f4   : > { %v7108_v15 = vmax.f32 %v7106_v27, 0.0 }
 0x7f6   : > { %v7161_v5 = vand.u32 4294901760, %v7108_v15 }
 0x7f8   : > { %v7162_v58 = vsub.f32 %v7108_v15, %v7161_v5  ;;  %7267 = vmatmul.f32.vlgmr.msrb.gmra.mxu3 %v7161_v5  ;;  %v19766_v15 = vand.u32 4294901760, %v14658_v33 }
 0x7f9   : > { %7943 = vmatpush.msrb.mxu3 %v19665_v3 }
 0x7fa   : > { %v7163_v6 = vand.u32 4294901760, %v7162_v58  ;;  %7321 = vmatmul.f32.vlgmr.msra.gmra.mxu0 %v7162_v58 }
 0x7fb   : > { %7945 = vmatpush.msrb.mxu3 %v19667_v22 }
 0x7fc   : > { %v7164_v2 = vsub.f32 %v7162_v58, %v7163_v6  ;;  %7360 = vmatmul.f32.vlgmr.msra.gmra.mxu1 %v7163_v6  ;;  %v19770_v58 = vand.u32 4294901760, %v14656_v24  ;;  %v7820_v6 = vsub.f32 %v19712_v26, %v7819_v18 }
 0x7fe   : > { %v7165_v20 = vand.u32 4294901760, %v7164_v2  ;;  %v7831_v2 = vand.u32 4294901760, %v19741_v14 }
 0x800   : > { %7166 = vmatmul.f32.vlgmr.msrb.gmra.mxu2 %v7165_v20  ;;  %7466 = vmatmul.f32.vlgmr.msra.gmra.mxu3 %v7161_v5  ;;  %v14654_v20 = vld [vmem:[%s24092_s2 + $0x618] sm:$0xff] }
 0x801   : > { %7890 = vmatpush.msrb.mxu2 %v19693_v0 }
 0x803   : > { %7893 = vmatpush.msrb.mxu2 %v19696_v46 }
 0x808   : > { %7429 = vmatmul.f32.vlgmr.msra.gmra.mxu2 %v7161_v5  ;;  %v19768_v5 = vand.u32 4294901760, %v14657_v23 }
 0x877   : > { %v7322_v53 = vpop.f32.mrf.mxu0 }
 0x879   : > { %v7361_v49 = vpop.f32.mrf.mxu1 }
 0x87b   : > { %v7268_v17 = vpop.f32.mrf.mxu3 }
 0x883   : > { %v7167_v7 = vpop.f32.mrf.mxu2  ;;  %v7467_v29 = vpop.f32.mrf.mxu3 }
 0x884   : > { %v7168_v42 = vadd.f32 %v14960_v21, %v7167_v7  ;;  %v7809_v21 = vand.u32 4294901760, %v7808_v39  ;;  %v19786_v7 = vsub.f32 %v14657_v23, %v19768_v5 }
 0x886   : > { %v7269_v41 = vadd.f32 %v7268_v17, %v7168_v42  ;;  %v19783_v17 = vsub.f32 %v14658_v33, %v19766_v15  ;;  %v19788_v42 = vand.u32 4294901760, %v14655_v30  ;;  %v7843_v37 = vand.u32 4294901760, %v19786_v7 }
 0x888   : > { %v7323_v48 = vadd.f32 %v7322_v53, %v7269_v41  ;;  %v7826_v41 = vsub.f32 %v19725_v13, %v7825_v62  ;;  %v14653_v53 = vld [vmem:[%s24092_s2 + $0x610] sm:$0xff]  ;;  %v19816_v60 = vsub.f32 %v14655_v30, %v19788_v42 }
 0x88a   : > { %v7362_v56 = vadd.f32 %v7361_v49, %v7323_v48  ;;  %v7815_v48 = vand.u32 4294901760, %v7814_v4  ;;  %v7837_v49 = vand.u32 4294901760, %v19783_v17  ;;  %v7827_v50 = vand.u32 4294901760, %v7826_v41 }
 0x88b   : > { %v7430_v1 = vpop.f32.mrf.mxu2  ;;  %v7855_v33 = vand.u32 4294901760, %v19816_v60 }
 0x88c   : > { %v7431_v44 = vadd.f32 %v7430_v1, %v7362_v56  ;;  %v19801_v56 = vsub.f32 %v14656_v24, %v19770_v58  ;;  %v19803_v1 = vand.u32 4294901760, %v14654_v20  ;;  %v7838_v59 = vsub.f32 %v19783_v17, %v7837_v49 }
 0x88d   : > { %v19845_v24 = vand.u32 4294901760, %v14651_v36 }
 0x88e   : > { %v7468_v32 = vadd.f32 %v7467_v29, %v7431_v44  ;;  %v7832_v44 = vsub.f32 %v19741_v14, %v7831_v2  ;;  %v14652_v29 = vld [vmem:[%s24092_s2 + $0x608] sm:$0xff]  ;;  %v7849_v10 = vand.u32 4294901760, %v19801_v56  ;;  %v19831_v52 = vsub.f32 %v14654_v20, %v19803_v1 }
 0x88f   : > { %v19833_v28 = vand.u32 4294901760, %v14652_v29  ;;  %v7839_v63 = vand.u32 4294901760, %v7838_v59  ;;  %v7856_v20 = vsub.f32 %v19816_v60, %v7855_v33  ;;  %v19865_v41 = vsub.f32 %v14651_v36, %v19845_v24 }
 0x890   : > { %v19653_v61 = vadd.f32 %v7468_v32, %v19103_v35  ;;  %v19669_v35 = vand.u32 4294901760, %v14664_v45  ;;  %v7821_v32 = vand.u32 4294901760, %v7820_v6  ;;  %v7833_v54 = vand.u32 4294901760, %v7832_v44 }
 0x891   : > { %v7850_v39 = vsub.f32 %v19801_v56, %v7849_v10  ;;  %v7861_v4 = vand.u32 4294901760, %v19831_v52  ;;  %v19855_v30 = vsub.f32 %v14652_v29, %v19833_v28  ;;  %v7879_v59 = vand.u32 4294901760, %v19865_v41 }
 0x892   : > { %24629 = vst [vmem:[#allocation11_spill] sm:$0xff] %v19653_v61  ;;  %7471 = vadd.xlane.f32.xlu0 %v19653_v61  ;;  %v19699_v25 = vsub.f32 %v14664_v45, %v19669_v35  ;;  %7947 = vmatpush.msrb.mxu3 %v19669_v35  ;;  %v19818_v45 = vand.u32 4294901760, %v14653_v53 }
 0x893   : > { %7751 = vmatpush.msrb.mxu0 %v19669_v35  ;;  %v7862_v44 = vsub.f32 %v19831_v52, %v7861_v4  ;;  %v7873_v29 = vand.u32 4294901760, %v19855_v30 }
 0x894   : > { %v7801_v16 = vand.u32 4294901760, %v19699_v25  ;;  %7896 = vmatpush.msrb.mxu2 %v19699_v25  ;;  %7949 = vmatpush.msrb.mxu3 %v19680_v8  ;;  %v19843_v23 = vsub.f32 %v14653_v53, %v19818_v45 }
 0x895   : > { %7753 = vmatpush.msrb.mxu0 %v19680_v8 }
 0x896   : > { %v7802_v12 = vsub.f32 %v19699_v25, %v7801_v16  ;;  %7899 = vmatpush.msrb.mxu2 %v19706_v47  ;;  %7951 = vmatpush.msrb.mxu3 %v19682_v11 }
 0x897   : > { %7755 = vmatpush.msrb.mxu0 %v19682_v11 }
 0x898   : > { %v7803_v27 = vand.u32 4294901760, %v7802_v12  ;;  %7902 = vmatpush.msrb.mxu2 %v19709_v9  ;;  %7953 = vmatpush.msrb.mxu3 %v19684_v51  ;;  %v7844_v12 = vsub.f32 %v19786_v7, %v7843_v37 }
 0x899   : > { %7757 = vmatpush.msrb.mxu0 %v19684_v51 }
 0x89a   : > { %7804 = vmatpush.msrb.mxu1 %v7803_v27  ;;  %7905 = vmatpush.msrb.mxu2 %v19712_v26  ;;  %v7845_v6 = vand.u32 4294901760, %v7844_v12  ;;  %v7863_v12 = vand.u32 4294901760, %v7862_v44 }
 0x89b   : > { %7955 = vmatpush.msrb.mxu3 %v19703_v55  ;;  %7759 = vmatpush.msrb.mxu0 %v19703_v55 }
 0x89c   : > { %7810 = vmatpush.msrb.mxu1 %v7809_v21  ;;  %7908 = vmatpush.msrb.mxu2 %v19725_v13  ;;  %v7867_v21 = vand.u32 4294901760, %v19843_v23 }
 0x89d   : > { %7957 = vmatpush.msrb.mxu3 %v19714_v57  ;;  %7761 = vmatpush.msrb.mxu0 %v19714_v57 }
 0x89e   : > { %7816 = vmatpush.msrb.mxu1 %v7815_v48  ;;  %7911 = vmatpush.msrb.mxu2 %v19741_v14  ;;  %v7851_v48 = vand.u32 4294901760, %v7850_v39  ;;  %v7868_v36 = vsub.f32 %v19843_v23, %v7867_v21  ;;  %v7880_v39 = vsub.f32 %v19865_v41, %v7879_v59 }
 0x89f   : > { %7959 = vmatpush.msrb.mxu3 %v19766_v15  ;;  %7763 = vmatpush.msrb.mxu0 %v19766_v15 }
 0x8a0   : > { %7822 = vmatpush.msrb.mxu1 %v7821_v32  ;;  %7914 = vmatpush.msrb.mxu2 %v19783_v17 }
 0x8a1   : > { %7961 = vmatpush.msrb.mxu3 %v19768_v5  ;;  %7765 = vmatpush.msrb.mxu0 %v19768_v5 }
 0x8a2   : > { %7828 = vmatpush.msrb.mxu1 %v7827_v50  ;;  %7917 = vmatpush.msrb.mxu2 %v19786_v7  ;;  %v7857_v50 = vand.u32 4294901760, %v7856_v20  ;;  %v14673_v20 = vld [vmem:[%s24092_s2 + $0x6b0] sm:$0xff] }
 0x8a3   : > { %7963 = vmatpush.msrb.mxu3 %v19770_v58  ;;  %7767 = vmatpush.msrb.mxu0 %v19770_v58 }
 0x8a4   : > { %7834 = vmatpush.msrb.mxu1 %v7833_v54  ;;  %7920 = vmatpush.msrb.mxu2 %v19801_v56 }
 0x8a5   : > { %7965 = vmatpush.msrb.mxu3 %v19788_v42  ;;  %7769 = vmatpush.msrb.mxu0 %v19788_v42 }
 0x8a6   : > { %7840 = vmatpush.msrb.mxu1 %v7839_v63  ;;  %7923 = vmatpush.msrb.mxu2 %v19816_v60  ;;  %v7869_v63 = vand.u32 4294901760, %v7868_v36 }
 0x8a7   : > { %7967 = vmatpush.msrb.mxu3 %v19803_v1  ;;  %7771 = vmatpush.msrb.mxu0 %v19803_v1 }
 0x8a8   : > { %7846 = vmatpush.msrb.mxu1 %v7845_v6  ;;  %7926 = vmatpush.msrb.mxu2 %v19831_v52  ;;  %v7881_v6 = vand.u32 4294901760, %v7880_v39 }
 0x8a9   : > { %7969 = vmatpush.msrb.mxu3 %v19818_v45  ;;  %7773 = vmatpush.msrb.mxu0 %v19818_v45 }
 0x8aa   : > { %7852 = vmatpush.msrb.mxu1 %v7851_v48  ;;  %7929 = vmatpush.msrb.mxu2 %v19843_v23 }
 0x8ab   : > { %7971 = vmatpush.msrb.mxu3 %v19833_v28  ;;  %7775 = vmatpush.msrb.mxu0 %v19833_v28 }
 0x8ac   : > { %7858 = vmatpush.msrb.mxu1 %v7857_v50  ;;  %7932 = vmatpush.msrb.mxu2 %v19855_v30 }
 0x8ad   : > { %7973 = vmatpush.msrb.mxu3 %v19845_v24  ;;  %7777 = vmatpush.msrb.mxu0 %v19845_v24 }
 0x8ae   : > { %7864 = vmatpush.msrb.mxu1 %v7863_v12  ;;  %7935 = vmatpush.msrb.mxu2 %v19865_v41 }
 0x8af   : > { %7984 = vmatpush.msra.mxu0 %v7789_v19  ;;  %v14678_v19 = vld [vmem:[%s24092_s2 + $0x6d8] sm:$0xff] }
 0x8b0   : > { %7870 = vmatpush.msrb.mxu1 %v7869_v63 }
 0x8b1   : > { %7988 = vmatpush.msra.mxu0 %v7795_v40 }
 0x8b3   : > { %7992 = vmatpush.msra.mxu0 %v7801_v16 }
 0x8b5   : > { %7996 = vmatpush.msra.mxu0 %v7807_v38 }
 0x8b7   : > { %8000 = vmatpush.msra.mxu0 %v7813_v43  ;;  %v19987_v43 = vand.u32 4294901760, %v14678_v19 }
 0x8b9   : > { %8004 = vmatpush.msra.mxu0 %v7819_v18  ;;  %v14677_v18 = vld [vmem:[%s24092_s2 + $0x6d0] sm:$0xff] }
 0x8bb   : > { %8008 = vmatpush.msra.mxu0 %v7825_v62 }
 0x8bd   : > { %8012 = vmatpush.msra.mxu0 %v7831_v2  ;;  %v14676_v2 = vld [vmem:[%s24092_s2 + $0x6c8] sm:$0xff] }
 0x8bf   : > { %8016 = vmatpush.msra.mxu0 %v7837_v49 }
 0x8c1   : > { %8020 = vmatpush.msra.mxu0 %v7843_v37 }
 0x8c3   : > { %8024 = vmatpush.msra.mxu0 %v7849_v10 }
 0x8c5   : > { %8028 = vmatpush.msra.mxu0 %v7855_v33 }
 0x8c7   : > { %8032 = vmatpush.msra.mxu0 %v7861_v4 }
 0x8c9   : > { %8036 = vmatpush.msra.mxu0 %v7867_v21 }
 0x8cb   : > { %8040 = vmatpush.msra.mxu0 %v7873_v29 }
 0x8cd   : > { %8044 = vmatpush.msra.mxu0 %v7879_v59 }
 0x905   : > { %v7472_v31 = vpop.xlane.xlu0 %7471 }
 0x906   : > { %v7473_v27 = vmul.f32 0.03125, %v7472_v31  ;;  %v7874_v31 = vsub.f32 %v19855_v30, %v7873_v29  ;;  %v14672_v29 = vld [vmem:[%s24092_s2 + $0x6a8] sm:$0xff] }
 0x907   : > { %v20062_v59 = vand.u32 4294901760, %v14672_v29 }
 0x908   : > { %v7474_v53 = vsub.f32 %v19653_v61, %v7473_v27  ;;  %v7875_v27 = vand.u32 4294901760, %v7874_v31  ;;  %v14671_v31 = vld [vmem:[%s24092_s2 + $0x6a0] sm:$0xff] }
 0x90a   : > { %v19876_v32 = vmul.f32 %v24628_v34, %v7474_v53  ;;  %7876 = vmatpush.msrb.mxu1 %v7875_v27  ;;  %v20051_v53 = vand.u32 4294901760, %v14673_v20  ;;  %v20078_v27 = vand.u32 4294901760, %v14671_v31 }
 0x90c   : > { %v7476_v54 = vmul.f32 %v19876_v32, %v19876_v32  ;;  %7882 = vmatpush.msrb.mxu1 %v7881_v6  ;;  %v20081_v6 = vsub.f32 %v14672_v29, %v20062_v59 }
 0x90e   : > { %7477 = vadd.xlane.f32.xlu1 %v7476_v54  ;;  %8051 = vmatpush.msra.mxu1 %v19665_v3  ;;  %v14682_v3 = vld [vmem:[%s24092_s2 + $0x6f8] sm:$0xff]  ;;  %v20065_v54 = vsub.f32 %v14673_v20, %v20051_v53 }
 0x910   : > { %8053 = vmatpush.msra.mxu1 %v19667_v22  ;;  %v19945_v22 = vand.u32 4294901760, %v14682_v3  ;;  %v8184_v39 = vand.u32 4294901760, %v20065_v54 }
 0x912   : > { %8055 = vmatpush.msra.mxu1 %v19669_v35  ;;  %v14681_v35 = vld [vmem:[%s24092_s2 + $0x6f0] sm:$0xff]  ;;  %8088 = vmatpush.msra.mxu2 %v19945_v22 }
 0x914   : > { %8057 = vmatpush.msra.mxu1 %v19680_v8  ;;  %v19952_v8 = vsub.f32 %v14682_v3, %v19945_v22 }
 0x916   : > { %8059 = vmatpush.msra.mxu1 %v19682_v11  ;;  %v19954_v11 = vand.u32 4294901760, %v14681_v35  ;;  %v8130_v0 = vand.u32 4294901760, %v19952_v8 }
 0x918   : > { %8061 = vmatpush.msra.mxu1 %v19684_v51  ;;  %v14680_v51 = vld [vmem:[%s24092_s2 + $0x6e8] sm:$0xff]  ;;  %8090 = vmatpush.msra.mxu2 %v19954_v11  ;;  %v19964_v25 = vsub.f32 %v14681_v35, %v19954_v11  ;;  %v8131_v47 = vsub.f32 %v19952_v8, %v8130_v0  ;;  %v14670_v35 = vld [vmem:[%s24092_s2 + $0x698] sm:$0xff] }
 0x919   : > { %v19961_v46 = vand.u32 4294901760, %v14680_v51 }
 0x91a   : > { %8063 = vmatpush.msra.mxu1 %v19703_v55  ;;  %v14679_v55 = vld [vmem:[%s24092_s2 + $0x6e0] sm:$0xff]  ;;  %v8136_v9 = vand.u32 4294901760, %v19964_v25  ;;  %v8132_v40 = vand.u32 4294901760, %v8131_v47  ;;  %v8190_v47 = vand.u32 4294901760, %v20081_v6 }
 0x91b   : > { %8092 = vmatpush.msra.mxu2 %v19961_v46  ;;  %v19974_v26 = vand.u32 4294901760, %v14679_v55 }
 0x91c   : > { %8065 = vmatpush.msra.mxu1 %v19714_v57  ;;  %v19977_v57 = vsub.f32 %v14680_v51, %v19961_v46  ;;  %v8137_v16 = vsub.f32 %v19964_v25, %v8136_v9  ;;  %8133 = vmatpush.msra.mxu3 %v8132_v40  ;;  %v20094_v40 = vsub.f32 %v14671_v31, %v20078_v27 }
 0x91d   : > { %8094 = vmatpush.msra.mxu2 %v19974_v26  ;;  %v19990_v13 = vsub.f32 %v14679_v55, %v19974_v26  ;;  %v8185_v55 = vsub.f32 %v20065_v54, %v8184_v39 }
 0x91e   : > { %8067 = vmatpush.msra.mxu1 %v19766_v15  ;;  %v8142_v38 = vand.u32 4294901760, %v19977_v57  ;;  %v8138_v14 = vand.u32 4294901760, %v8137_v16  ;;  %v19999_v15 = vand.u32 4294901760, %v14677_v18  ;;  %v14669_v16 = vld [vmem:[%s24092_s2 + $0x690] sm:$0xff] }
 0x91f   : > { %8096 = vmatpush.msra.mxu2 %v19987_v43 }
 0x920   : > { %8069 = vmatpush.msra.mxu1 %v19768_v5  ;;  %v8143_v62 = vsub.f32 %v19977_v57, %v8142_v38  ;;  %v20002_v5 = vsub.f32 %v14678_v19, %v19987_v43  ;;  %8139 = vmatpush.msra.mxu3 %v8138_v14  ;;  %v20013_v49 = vsub.f32 %v14677_v18, %v19999_v15  ;;  %v20091_v19 = vand.u32 4294901760, %v14670_v35 }
 0x921   : > { %8098 = vmatpush.msra.mxu2 %v19999_v15  ;;  %v8186_v18 = vand.u32 4294901760, %v8185_v55  ;;  %v8191_v14 = vsub.f32 %v20081_v6, %v8190_v47 }
 0x922   : > { %8071 = vmatpush.msra.mxu1 %v19770_v58  ;;  %v8148_v58 = vand.u32 4294901760, %v19990_v13  ;;  %v8144_v17 = vand.u32 4294901760, %v8143_v62  ;;  %v8154_v7 = vand.u32 4294901760, %v20002_v5  ;;  %v8160_v60 = vand.u32 4294901760, %v20013_v49 }
 0x923   : > { %v20103_v62 = vand.u32 4294901760, %v14669_v16 }
 0x924   : > { %8073 = vmatpush.msra.mxu1 %v19788_v42  ;;  %v20010_v42 = vand.u32 4294901760, %v14676_v2  ;;  %v8149_v56 = vsub.f32 %v19990_v13, %v8148_v58  ;;  %8145 = vmatpush.msra.mxu3 %v8144_v17  ;;  %v8155_v37 = vsub.f32 %v20002_v5, %v8154_v7  ;;  %v8161_v23 = vsub.f32 %v20013_v49, %v8160_v60 }
 0x925   : > { %v8196_v17 = vand.u32 4294901760, %v20094_v40 }
 0x926   : > { %8075 = vmatpush.msra.mxu1 %v19803_v1  ;;  %v14675_v1 = vld [vmem:[%s24092_s2 + $0x6c0] sm:$0xff]  ;;  %8100 = vmatpush.msra.mxu2 %v20010_v42  ;;  %v20029_v10 = vsub.f32 %v14676_v2, %v20010_v42  ;;  %v8150_v52 = vand.u32 4294901760, %v8149_v56  ;;  %v8156_v33 = vand.u32 4294901760, %v8155_v37  ;;  %v8162_v21 = vand.u32 4294901760, %v8161_v23  ;;  %v14668_v56 = vld [vmem:[%s24092_s2 + $0x688] sm:$0xff] }
 0x927   : > { %v20106_v2 = vsub.f32 %v14670_v35, %v20091_v19  ;;  %v14667_v23 = vld [vmem:[%s24092_s2 + $0x680] sm:$0xff] }
 0x928   : > { %8077 = vmatpush.msra.mxu1 %v19818_v45  ;;  %v20026_v45 = vand.u32 4294901760, %v14675_v1  ;;  %8151 = vmatpush.msra.mxu3 %v8150_v52  ;;  %v20114_v52 = vand.u32 4294901760, %v14668_v56 }
 0x929   : > { %v8202_v37 = vand.u32 4294901760, %v20106_v2 }
 0x92a   : > { %8079 = vmatpush.msra.mxu1 %v19833_v28  ;;  %v14674_v28 = vld [vmem:[%s24092_s2 + $0x6b8] sm:$0xff]  ;;  %8102 = vmatpush.msra.mxu2 %v20026_v45  ;;  %v20042_v30 = vsub.f32 %v14675_v1, %v20026_v45  ;;  %v8192_v1 = vand.u32 4294901760, %v8191_v14  ;;  %v20133_v29 = vsub.f32 %v14668_v56, %v20114_v52 }
 0x92b   : > { %v20039_v4 = vand.u32 4294901760, %v14674_v28  ;;  %8157 = vmatpush.msra.mxu3 %v8156_v33  ;;  %v8197_v33 = vsub.f32 %v20094_v40, %v8196_v17  ;;  %v8203_v20 = vsub.f32 %v20106_v2, %v8202_v37 }
 0x92c   : > { %8081 = vmatpush.msra.mxu1 %v19845_v24  ;;  %v8166_v24 = vand.u32 4294901760, %v20029_v10  ;;  %v8172_v44 = vand.u32 4294901760, %v20042_v30 }
 0x92d   : > { %8104 = vmatpush.msra.mxu2 %v20039_v4  ;;  %v20054_v48 = vsub.f32 %v14674_v28, %v20039_v4  ;;  %8163 = vmatpush.msra.mxu3 %v8162_v21  ;;  %v20117_v28 = vsub.f32 %v14669_v16, %v20103_v62 }
 0x92e   : > { %v8167_v41 = vsub.f32 %v20029_v10, %v8166_v24  ;;  %v8173_v12 = vsub.f32 %v20042_v30, %v8172_v44 }
 0x92f   : > { %8106 = vmatpush.msra.mxu2 %v20051_v53  ;;  %v8178_v36 = vand.u32 4294901760, %v20054_v48  ;;  %v8208_v21 = vand.u32 4294901760, %v20117_v28 }
 0x930   : > { %v8168_v50 = vand.u32 4294901760, %v8167_v41  ;;  %v8174_v3 = vand.u32 4294901760, %v8173_v12  ;;  %v20130_v41 = vand.u32 4294901760, %v14667_v23  ;;  %v8204_v12 = vand.u32 4294901760, %v8203_v20 }
 0x931   : > { %v8179_v63 = vsub.f32 %v20054_v48, %v8178_v36  ;;  %8108 = vmatpush.msra.mxu2 %v20062_v59  ;;  %v8209_v31 = vsub.f32 %v20117_v28, %v8208_v21 }
 0x932   : > { %8169 = vmatpush.msra.mxu3 %v8168_v50  ;;  %v8198_v50 = vand.u32 4294901760, %v8197_v33 }
 0x933   : > { %v8180_v51 = vand.u32 4294901760, %v8179_v63  ;;  %8110 = vmatpush.msra.mxu2 %v20078_v27  ;;  %v24242_v63 = vand.u32 4294901760, %v20133_v29  ;;  %v8210_v35 = vand.u32 4294901760, %v8209_v31 }
 0x934   : > { %8175 = vmatpush.msra.mxu3 %v8174_v3  ;;  %v20141_v3 = vsub.f32 %v14667_v23, %v20130_v41 }
 0x935   : > { %8112 = vmatpush.msra.mxu2 %v20091_v19 }
 0x936   : > { %8181 = vmatpush.msra.mxu3 %v8180_v51  ;;  %v8215_v51 = vsub.f32 %v20133_v29, %v24242_v63  ;;  %v8220_v55 = vand.u32 4294901760, %v20141_v3 }
 0x937   : > { %8114 = vmatpush.msra.mxu2 %v20103_v62 }
 0x938   : > { %8187 = vmatpush.msra.mxu3 %v8186_v18  ;;  %v8216_v16 = vand.u32 4294901760, %v8215_v51  ;;  %v8221_v18 = vsub.f32 %v20141_v3, %v8220_v55  ;;  %v14961_v51 = vld [vmem:[%s24096_s6 + $0x2] ss:$0 sm:$0xff] }
 0x939   : > { %8116 = vmatpush.msra.mxu2 %v20114_v52 }
 0x93a   : > { %8193 = vmatpush.msra.mxu3 %v8192_v1  ;;  %v8222_v1 = vand.u32 4294901760, %v8221_v18 }
 0x93b   : > { %8118 = vmatpush.msra.mxu2 %v20130_v41 }
 0x93c   : > { %8199 = vmatpush.msra.mxu3 %v8198_v50 }
 0x93e   : > { %8205 = vmatpush.msra.mxu3 %v8204_v12 }
 0x940   : > { %8211 = vmatpush.msra.mxu3 %v8210_v35 }
 0x942   : > { %8217 = vmatpush.msra.mxu3 %v8216_v16  ;;  %v14962_v16 = vld [vmem:[%s24097_s7 + $0x2] ss:$0 sm:$0xff] }
 0x944   : > { %8223 = vmatpush.msra.mxu3 %v8222_v1 }
 0x981   : > { %v7478_v14 = vpop.xlane.xlu1 %7477 }
 0x982   : > { %v7479_v56 = vmul.f32 0.032258064, %v7478_v14 }
 0x984   : > { %v7482_v33 = vadd.f32 1e-06, %v7479_v56 }
 0x986   : > { %15002 = vrsqrt.f32 %v7482_v33  ;;  %vm7489_vm10 = vweird.f32 %v7482_v33 }
 0x98c   : > { %v15003_v23 = vpop.eup %15002 }
 0x98d   : > { %v7484_v20 = vmul.f32 %v15003_v23, %v7482_v33  ;;  %vm7490_vm9 = vweird.f32 %v15003_v23 }
 0x98e   : > { %vm7491_vm11 = vmor %vm7489_vm10, %vm7490_vm9 }
 0x98f   : > { %v7485_v50 = vmul.f32 %v15003_v23, %v7484_v20 }
 0x991   : > { %v7486_v31 = vmul.f32 0.5, %v7485_v50 }
 0x993   : > { %v7487_v63 = vsub.f32 1.5, %v7486_v31 }
 0x995   : > { %v7488_v12 = vmul.f32 %v15003_v23, %v7487_v63 }
 0x997   : > { %v7492_v35 = vsel %vm7491_vm11, %v15003_v23, %v7488_v12 }
 0x998   : > { %v7493_v18 = vmul.f32 %v7492_v35, %v19876_v32  ;;  %v14687_v35 = vld [vmem:[%s24092_s2 + $0x720] sm:$0xff] }
 0x99a   : > { %v7497_v14 = vmul.f32 %v14961_v51, %v7493_v18 }
 0x99c   : > { %v7503_v56 = vadd.f32 %v14962_v16, %v7497_v14  ;;  %v14686_v14 = vld [vmem:[%s24092_s2 + $0x718] sm:$0xff] }
 0x99e   : > { %v20157_v1 = vand.u32 4294901760, %v7503_v56 }
 0x9a0   : > { %v20160_v20 = vsub.f32 %v7503_v56, %v20157_v1  ;;  %7884 = vmatmul.f32.vlgmr.msrb.gmra.mxu1 %v20157_v1 }
 0x9a1   : > { %8284 = vmatpush.msrb.mxu1 %v19945_v22 }
 0x9a2   : > { %24630 = vst [vmem:[#allocation14_spill] sm:$0xff] %v20160_v20  ;;  %7938 = vmatmul.f32.vlgmr.msrb.gmra.mxu2 %v20160_v20  ;;  %v20166_v63 = vand.u32 4294901760, %v20160_v20 }
 0x9a3   : > { %8286 = vmatpush.msrb.mxu1 %v19954_v11  ;;  %8325 = vmatpush.msrb.mxu2 %v8130_v0  ;;  %v14696_v0 = vld [vmem:[%s24092_s2 + $0x768] sm:$0xff] }
 0x9a4   : > { %24631 = vst [vmem:[#allocation24_spill] sm:$0xff] %v20166_v63  ;;  %7977 = vmatmul.f32.vlgmr.msrb.gmra.mxu3 %v20166_v63  ;;  %v7781_v32 = vsub.f32 %v20160_v20, %v20166_v63 }
 0x9a5   : > { %8288 = vmatpush.msrb.mxu1 %v19961_v46  ;;  %8329 = vmatpush.msrb.mxu2 %v8136_v9 }
 0x9a6   : > { %8392 = vmatpush.msrb.mxu3 %v19945_v22  ;;  %v20178_v33 = vand.u32 4294901760, %v7781_v32  ;;  %v14698_v22 = vld [vmem:[%s24092_s2 + $0x778] sm:$0xff]  ;;  %v20375_v32 = vand.u32 4294901760, %v14687_v35 }
 0x9a7   : > { %8290 = vmatpush.msrb.mxu1 %v19974_v26  ;;  %8333 = vmatpush.msrb.mxu2 %v8142_v38 }
 0x9a8   : > { %8394 = vmatpush.msrb.mxu3 %v19954_v11  ;;  %7783 = vmatmul.f32.vlgmr.msrb.gmra.mxu0 %v20178_v33  ;;  %v20210_v11 = vand.u32 4294901760, %v14698_v22 }
 0x9a9   : > { %8083 = vmatmul.f32.vlgmr.msra.gmra.mxu1 %v20157_v1  ;;  %8231 = vmatpush.msrb.mxu0 %v19952_v8  ;;  %v14697_v8 = vld [vmem:[%s24092_s2 + $0x770] sm:$0xff] }
 0x9aa   : > { %8292 = vmatpush.msrb.mxu1 %v19987_v43  ;;  %8337 = vmatpush.msrb.mxu2 %v8148_v58  ;;  %v20231_v9 = vsub.f32 %v14698_v22, %v20210_v11  ;;  %v14693_v58 = vld [vmem:[%s24092_s2 + $0x750] sm:$0xff] }
 0x9ab   : > { %8396 = vmatpush.msrb.mxu3 %v19961_v46  ;;  %8124 = vmatmul.f32.vlgmr.msra.gmra.mxu2 %v20178_v33  ;;  %v20220_v46 = vand.u32 4294901760, %v14697_v8 }
 0x9ac   : > { %8234 = vmatpush.msrb.mxu0 %v19964_v25  ;;  %8294 = vmatpush.msrb.mxu1 %v19999_v15  ;;  %v14695_v25 = vld [vmem:[%s24092_s2 + $0x760] sm:$0xff] }
 0x9ad   : > { %8341 = vmatpush.msrb.mxu2 %v8154_v7  ;;  %8398 = vmatpush.msrb.mxu3 %v19974_v26  ;;  %v20233_v26 = vand.u32 4294901760, %v14696_v0  ;;  %v20244_v38 = vsub.f32 %v14697_v8, %v20220_v46  ;;  %v14692_v7 = vld [vmem:[%s24092_s2 + $0x748] sm:$0xff] }
 0x9ae   : > { %8225 = vmatmul.f32.vlgmr.msra.gmra.mxu3 %v20157_v1  ;;  %8237 = vmatpush.msrb.mxu0 %v19977_v57  ;;  %v14694_v57 = vld [vmem:[%s24092_s2 + $0x758] sm:$0xff] }
 0x9af   : > { %8296 = vmatpush.msrb.mxu1 %v20010_v42  ;;  %8345 = vmatpush.msrb.mxu2 %v8160_v60  ;;  %v20276_v60 = vand.u32 4294901760, %v14693_v58 }
 0x9b0   : > { %8400 = vmatpush.msrb.mxu3 %v19987_v43  ;;  %8240 = vmatpush.msrb.mxu0 %v19990_v13  ;;  %v20246_v43 = vand.u32 4294901760, %v14695_v25  ;;  %v24260_v13 = vand.u32 4294901760, %v20231_v9 }
 0x9b1   : > { %8298 = vmatpush.msrb.mxu1 %v20026_v45  ;;  %8349 = vmatpush.msrb.mxu2 %v8166_v24 }
 0x9b2   : > { %8402 = vmatpush.msrb.mxu3 %v19999_v15  ;;  %8046 = vmatmul.f32.vlgmr.msra.gmra.mxu0 %v20157_v1  ;;  %v20255_v15 = vsub.f32 %v14696_v0, %v20233_v26 }
 0x9b3   : > { %8243 = vmatpush.msrb.mxu0 %v20002_v5  ;;  %8300 = vmatpush.msrb.mxu1 %v20039_v4  ;;  %v20257_v5 = vand.u32 4294901760, %v14694_v57 }
 0x9b4   : > { %8353 = vmatpush.msrb.mxu2 %v8172_v44  ;;  %8404 = vmatpush.msrb.mxu3 %v20010_v42  ;;  %v24259_v42 = vand.u32 4294901760, %v20244_v38  ;;  %v24258_v24 = vand.u32 4294901760, %v20255_v15 }
 0x9b5   : > { %8246 = vmatpush.msrb.mxu0 %v20013_v49  ;;  %8302 = vmatpush.msrb.mxu1 %v20051_v53  ;;  %v20272_v49 = vsub.f32 %v14695_v25, %v20246_v43  ;;  %v20390_v25 = vand.u32 4294901760, %v14686_v14 }
 0x9b6   : > { %8357 = vmatpush.msrb.mxu2 %v8178_v36  ;;  %8406 = vmatpush.msrb.mxu3 %v20026_v45  ;;  %v14691_v45 = vld [vmem:[%s24092_s2 + $0x740] sm:$0xff]  ;;  %v14690_v36 = vld [vmem:[%s24092_s2 + $0x738] sm:$0xff] }
 0x9b7   : > { %8249 = vmatpush.msrb.mxu0 %v20029_v10  ;;  %8304 = vmatpush.msrb.mxu1 %v20062_v59  ;;  %v8472_v10 = vsub.f32 %v20231_v9, %v24260_v13  ;;  %v20302_v44 = vand.u32 4294901760, %v14691_v45 }
 0x9b8   : > { %8361 = vmatpush.msrb.mxu2 %v8184_v39  ;;  %8408 = vmatpush.msrb.mxu3 %v20039_v4  ;;  %v20289_v4 = vsub.f32 %v14694_v57, %v20257_v5  ;;  %v8484_v39 = vsub.f32 %v20255_v15, %v24258_v24  ;;  %v14705_v24 = vld [vmem:[%s24092_s2 + $0x7b0] sm:$0xff] }
 0x9b9   : > { %8252 = vmatpush.msrb.mxu0 %v20042_v30  ;;  %8306 = vmatpush.msrb.mxu1 %v20078_v27  ;;  %v20291_v30 = vand.u32 4294901760, %v14692_v7  ;;  %v20336_v23 = vsub.f32 %v14691_v45, %v20302_v44  ;;  %v20599_v34 = vand.u32 4294901760, %v14705_v24 }
 0x9ba   : > { %8365 = vmatpush.msrb.mxu2 %v8190_v47  ;;  %8410 = vmatpush.msrb.mxu3 %v20051_v53  ;;  %v8478_v53 = vsub.f32 %v20244_v38, %v24259_v42 }
 0x9bb   : > { %8255 = vmatpush.msrb.mxu0 %v20054_v48  ;;  %8308 = vmatpush.msrb.mxu1 %v20091_v19  ;;  %v24256_v48 = vand.u32 4294901760, %v20272_v49  ;;  %v20320_v47 = vsub.f32 %v14692_v7, %v20291_v30  ;;  %v24251_v18 = vand.u32 4294901760, %v20336_v23 }
 0x9bc   : > { %8369 = vmatpush.msrb.mxu2 %v8196_v17  ;;  %8412 = vmatpush.msrb.mxu3 %v20062_v59  ;;  %v20310_v59 = vsub.f32 %v14693_v58, %v20276_v60  ;;  %v20327_v17 = vand.u32 4294901760, %v14690_v36  ;;  %v14684_v58 = vld [vmem:[%s24092_s2 + $0x708] sm:$0xff] }
 0x9bd   : > { %8258 = vmatpush.msrb.mxu0 %v20065_v54  ;;  %8310 = vmatpush.msrb.mxu1 %v20103_v62  ;;  %v8473_v54 = vand.u32 4294901760, %v8472_v10  ;;  %v24252_v51 = vand.u32 4294901760, %v20320_v47  ;;  %v8514_v57 = vsub.f32 %v20336_v23, %v24251_v18  ;;  %v20403_v10 = vsub.f32 %v14687_v35, %v20375_v32 }
 0x9be   : > { %8373 = vmatpush.msrb.mxu2 %v8202_v37  ;;  %8414 = vmatpush.msrb.mxu3 %v20078_v27  ;;  %v24255_v27 = vand.u32 4294901760, %v20289_v4  ;;  %v8479_v37 = vand.u32 4294901760, %v8478_v53  ;;  %v24254_v50 = vand.u32 4294901760, %v20310_v59 }
 0x9bf   : > { %8261 = vmatpush.msrb.mxu0 %v20081_v6  ;;  %8312 = vmatpush.msrb.mxu1 %v20114_v52  ;;  %v14689_v6 = vld [vmem:[%s24092_s2 + $0x730] sm:$0xff]  ;;  %v8508_v8 = vsub.f32 %v20320_v47, %v24252_v51  ;;  %v14707_v51 = vld [vmem:[%s24092_s2 + $0x7c0] sm:$0xff] }
 0x9c0   : > { %8377 = vmatpush.msrb.mxu2 %v8208_v21  ;;  %8416 = vmatpush.msrb.mxu3 %v20091_v19  ;;  %v24632_v19 = vand.u32 4294901760, %v20133_v29  ;;  %v8490_v21 = vsub.f32 %v20272_v49, %v24256_v48  ;;  %v20344_v31 = vand.u32 4294901760, %v14689_v6  ;;  %v8496_v12 = vsub.f32 %v20289_v4, %v24255_v27 }
 0x9c1   : > { %8264 = vmatpush.msrb.mxu0 %v20094_v40  ;;  %8314 = vmatpush.msrb.mxu1 %v20130_v41  ;;  %v14688_v40 = vld [vmem:[%s24092_s2 + $0x728] sm:$0xff]  ;;  %v8509_v53 = vand.u32 4294901760, %v8508_v8  ;;  %v20567_v48 = vand.u32 4294901760, %v14707_v51 }
 0x9c2   : > { %8381 = vmatpush.msrb.mxu2 %v24632_v19  ;;  %8418 = vmatpush.msrb.mxu3 %v20103_v62  ;;  %v8485_v62 = vand.u32 4294901760, %v8484_v39  ;;  %v20360_v16 = vand.u32 4294901760, %v14688_v40  ;;  %v20373_v56 = vsub.f32 %v14689_v6, %v20344_v31  ;;  %v8497_v22 = vand.u32 4294901760, %v8496_v12 }
 0x9c3   : > { %8318 = vmatmul.f32.vlgmr.msrb.gmra.mxu1 %v20166_v63  ;;  %8267 = vmatpush.msrb.mxu0 %v20106_v2  ;;  %v20358_v2 = vsub.f32 %v14690_v36, %v20327_v17  ;;  %v14683_v36 = vld [vmem:[%s24092_s2 + $0x700] sm:$0xff]  ;;  %v20418_v6 = vsub.f32 %v14686_v14, %v20390_v25  ;;  %v8515_v19 = vand.u32 4294901760, %v8514_v57  ;;  %v14714_v57 = vld [vmem:[%s24092_s2 + $0x7f8] sm:$0xff] }
 0x9c4   : > { %8474 = vmatpush.msra.mxu1 %v8473_v54  ;;  %8385 = vmatpush.msrb.mxu2 %v8220_v55  ;;  %v8491_v55 = vand.u32 4294901760, %v8490_v21  ;;  %v20388_v0 = vsub.f32 %v14688_v40, %v20360_v16  ;;  %v24249_v45 = vand.u32 4294901760, %v20373_v56  ;;  %v24246_v21 = vand.u32 4294901760, %v20403_v10 }
 0x9c5   : > { %8420 = vmatpush.msrb.mxu3 %v20114_v52  ;;  %8387 = vmatmul.f32.vlgmr.msrb.gmra.mxu2 %v20157_v1  ;;  %v8502_v52 = vsub.f32 %v20310_v59, %v24254_v50  ;;  %v14706_v50 = vld [vmem:[%s24092_s2 + $0x7b8] sm:$0xff] }
 0x9c6   : > { %8480 = vmatpush.msra.mxu1 %v8479_v37  ;;  %8572 = vmatpush.msra.mxu2 %v20231_v9  ;;  %v24248_v39 = vand.u32 4294901760, %v20388_v0  ;;  %v8526_v37 = vsub.f32 %v20373_v56, %v24249_v45  ;;  %v20583_v13 = vand.u32 4294901760, %v14706_v50 }
 0x9c7   : > { %8270 = vmatpush.msrb.mxu0 %v20117_v28  ;;  %8422 = vmatpush.msrb.mxu3 %v20130_v41  ;;  %v14685_v28 = vld [vmem:[%s24092_s2 + $0x710] sm:$0xff]  ;;  %v24250_v41 = vand.u32 4294901760, %v20358_v2  ;;  %v8503_v7 = vand.u32 4294901760, %v8502_v52 }
 0x9c8   : > { %8424 = vmatmul.f32.vlgmr.msrb.gmra.mxu3 %v20157_v1  ;;  %8486 = vmatpush.msra.mxu1 %v8485_v62  ;;  %v20432_v62 = vand.u32 4294901760, %v14683_v36  ;;  %v8532_v35 = vsub.f32 %v20388_v0, %v24248_v39  ;;  %v8527_v52 = vand.u32 4294901760, %v8526_v37  ;;  %v14709_v39 = vld [vmem:[%s24092_s2 + $0x7d0] sm:$0xff]  ;;  %v20612_v61 = vsub.f32 %v14706_v50, %v20583_v13 }
 0x9c9   : > { %8575 = vmatpush.msra.mxu2 %v20244_v38  ;;  %8625 = vmatpush.msra.mxu3 %v20210_v11  ;;  %v8520_v54 = vsub.f32 %v20358_v2, %v24250_v41 }
 0x9ca   : > { %8273 = vmatpush.msrb.mxu0 %v20133_v29  ;;  %8492 = vmatpush.msra.mxu1 %v8491_v55  ;;  %v20405_v29 = vand.u32 4294901760, %v14685_v28  ;;  %v24245_v55 = vand.u32 4294901760, %v20418_v6 }
 0x9cb   : > { %8578 = vmatpush.msra.mxu2 %v20255_v15  ;;  %8627 = vmatpush.msra.mxu3 %v20220_v46  ;;  %v8521_v12 = vand.u32 4294901760, %v8520_v54 }
 0x9cc   : > { %8276 = vmatpush.msrb.mxu0 %v20141_v3  ;;  %8498 = vmatpush.msra.mxu1 %v8497_v22  ;;  %v20420_v3 = vand.u32 4294901760, %v14684_v58  ;;  %v20430_v40 = vsub.f32 %v14685_v28, %v20405_v29  ;;  %v8538_v22 = vsub.f32 %v20403_v10, %v24246_v21  ;;  %v20452_v28 = vsub.f32 %v14683_v36, %v20432_v62  ;;  %v14713_v36 = vld [vmem:[%s24092_s2 + $0x7f0] sm:$0xff] }
 0x9cd   : > { %8279 = vmatmul.f32.vlgmr.msrb.gmra.mxu0 %v20160_v20  ;;  %8581 = vmatpush.msra.mxu2 %v20272_v49 }
 0x9ce   : > { %8429 = vmatpush.msra.mxu0 %v20210_v11  ;;  %8629 = vmatpush.msra.mxu3 %v20233_v26  ;;  %v20442_v14 = vsub.f32 %v14684_v58, %v20420_v3  ;;  %v24243_v8 = vand.u32 4294901760, %v20430_v40  ;;  %v8533_v58 = vand.u32 4294901760, %v8532_v35  ;;  %v8539_v54 = vand.u32 4294901760, %v8538_v22 }
 0x9cf   : > { %8504 = vmatpush.msra.mxu1 %v8503_v7  ;;  %8584 = vmatpush.msra.mxu2 %v20289_v4  ;;  %v8544_v7 = vsub.f32 %v20418_v6, %v24245_v55  ;;  %v24247_v37 = vand.u32 4294901760, %v20452_v28  ;;  %v20482_v22 = vand.u32 4294901760, %v14713_v36  ;;  %v14711_v55 = vld [vmem:[%s24092_s2 + $0x7e0] sm:$0xff] }
 0x9d0   : > { %8431 = vmatpush.msra.mxu0 %v20220_v46  ;;  %8631 = vmatpush.msra.mxu3 %v20246_v43 }
 0x9d1   : > { %8510 = vmatpush.msra.mxu1 %v8509_v53  ;;  %8587 = vmatpush.msra.mxu2 %v20310_v59  ;;  %v24244_v53 = vand.u32 4294901760, %v20442_v14  ;;  %v8545_v35 = vand.u32 4294901760, %v8544_v7  ;;  %v8562_v7 = vsub.f32 %v20452_v28, %v24247_v37  ;;  %v20512_v37 = vand.u32 4294901760, %v14711_v55 }
 0x9d2   : > { %8433 = vmatpush.msra.mxu0 %v20233_v26  ;;  %8633 = vmatpush.msra.mxu3 %v20257_v5 }
 0x9d3   : > { %8516 = vmatpush.msra.mxu1 %v8515_v19  ;;  %8590 = vmatpush.msra.mxu2 %v20320_v47  ;;  %v8550_v19 = vsub.f32 %v20430_v40, %v24243_v8  ;;  %v14712_v8 = vld [vmem:[%s24092_s2 + $0x7e8] sm:$0xff]  ;;  %v20536_v18 = vsub.f32 %v14711_v55, %v20512_v37 }
 0x9d4   : > { %8435 = vmatpush.msra.mxu0 %v20246_v43  ;;  %8635 = vmatpush.msra.mxu3 %v20276_v60  ;;  %v20501_v21 = vand.u32 4294901760, %v14712_v8 }
 0x9d5   : > { %8522 = vmatpush.msra.mxu1 %v8521_v12  ;;  %8593 = vmatpush.msra.mxu2 %v20336_v23  ;;  %v20474_v12 = vand.u32 4294901760, %v14714_v57  ;;  %v24263_v27 = vand.u32 4294901760, %v20536_v18 }
 0x9d6   : > { %8437 = vmatpush.msra.mxu0 %v20257_v5  ;;  %8637 = vmatpush.msra.mxu3 %v20291_v30 }
 0x9d7   : > { %8528 = vmatpush.msra.mxu1 %v8527_v52  ;;  %8596 = vmatpush.msra.mxu2 %v20358_v2  ;;  %v8556_v52 = vsub.f32 %v20442_v14, %v24244_v53  ;;  %v20494_v53 = vsub.f32 %v14714_v57, %v20474_v12  ;;  %v20508_v57 = vsub.f32 %v14713_v36, %v20482_v22 }
 0x9d8   : > { %8439 = vmatpush.msra.mxu0 %v20276_v60  ;;  %8639 = vmatpush.msra.mxu3 %v20302_v44  ;;  %v20524_v36 = vsub.f32 %v14712_v8, %v20501_v21 }
 0x9d9   : > { %8534 = vmatpush.msra.mxu1 %v8533_v58  ;;  %8599 = vmatpush.msra.mxu2 %v20373_v56  ;;  %v8551_v58 = vand.u32 4294901760, %v8550_v19  ;;  %v8557_v19 = vand.u32 4294901760, %v8556_v52  ;;  %v24253_v45 = vand.u32 4294901760, %v20494_v53  ;;  %v24257_v41 = vand.u32 4294901760, %v20508_v57 }
 0x9da   : > { %8441 = vmatpush.msra.mxu0 %v20291_v30  ;;  %8641 = vmatpush.msra.mxu3 %v20327_v17  ;;  %v24261_v55 = vand.u32 4294901760, %v20524_v36 }
 0x9db   : > { %8540 = vmatpush.msra.mxu1 %v8539_v54  ;;  %8602 = vmatpush.msra.mxu2 %v20388_v0  ;;  %v14710_v54 = vld [vmem:[%s24092_s2 + $0x7d8] sm:$0xff]  ;;  %v8813_v8 = vsub.f32 %v20494_v53, %v24253_v45 }
 0x9dc   : > { %8443 = vmatpush.msra.mxu0 %v20302_v44  ;;  %8643 = vmatpush.msra.mxu3 %v20344_v31  ;;  %v20519_v52 = vand.u32 4294901760, %v14710_v54 }
 0x9dd   : > { %8546 = vmatpush.msra.mxu1 %v8545_v35  ;;  %8605 = vmatpush.msra.mxu2 %v20403_v10  ;;  %v8563_v35 = vand.u32 4294901760, %v8562_v7  ;;  %v14708_v7 = vld [vmem:[%s24092_s2 + $0x7c8] sm:$0xff] }
 0x9de   : > { %8445 = vmatpush.msra.mxu0 %v20327_v17  ;;  %8645 = vmatpush.msra.mxu3 %v20360_v16 }
 0x9df   : > { %8552 = vmatpush.msra.mxu1 %v8551_v58  ;;  %8608 = vmatpush.msra.mxu2 %v20418_v6  ;;  %v20528_v58 = vand.u32 4294901760, %v14709_v39 }
 0x9e0   : > { %8447 = vmatpush.msra.mxu0 %v20344_v31  ;;  %8647 = vmatpush.msra.mxu3 %v20375_v32 }
 0x9e1   : > { %8558 = vmatpush.msra.mxu1 %v8557_v19  ;;  %8611 = vmatpush.msra.mxu2 %v20430_v40  ;;  %v20543_v19 = vsub.f32 %v14710_v54, %v20519_v52  ;;  %v8819_v54 = vsub.f32 %v20508_v57, %v24257_v41  ;;  %v20559_v45 = vsub.f32 %v14709_v39, %v20528_v58  ;;  %v8814_v41 = vand.u32 4294901760, %v8813_v8 }
 0x9e2   : > { %8449 = vmatpush.msra.mxu0 %v20360_v16  ;;  %8649 = vmatpush.msra.mxu3 %v20390_v25 }
 0x9e3   : > { %8564 = vmatpush.msra.mxu1 %v8563_v35  ;;  %8614 = vmatpush.msra.mxu2 %v20442_v14  ;;  %24633 = vst [vmem:[#allocation25_spill] sm:$0xff] %v20543_v19  ;;  %v20551_v35 = vand.u32 4294901760, %v14708_v7  ;;  %v8820_v8 = vand.u32 4294901760, %v8819_v54  ;;  %v24635_v54 = vand.u32 4294901760, %v20543_v19 }
 0x9e4   : > { %8451 = vmatpush.msra.mxu0 %v20375_v32  ;;  %8651 = vmatpush.msra.mxu3 %v20405_v29  ;;  %24634 = vst [vmem:[#allocation10_spill] sm:$0xff] %v20559_v45 }
 0x9e5   : > { %8566 = vmatmul.f32.vlgmr.msra.gmra.mxu1 %v20157_v1  ;;  %8617 = vmatpush.msra.mxu2 %v20452_v28  ;;  %v20581_v42 = vsub.f32 %v14708_v7, %v20551_v35  ;;  %v8831_v7 = vsub.f32 %v20536_v18, %v24263_v27  ;;  %v8837_v39 = vsub.f32 %v20543_v19, %v24635_v54 }
 0x9e6   : > { %8733 = vmatpush.msrb.mxu1 %v20210_v11  ;;  %8453 = vmatpush.msra.mxu0 %v20390_v25  ;;  %v8825_v11 = vsub.f32 %v20524_v36, %v24261_v55  ;;  %v20597_v55 = vsub.f32 %v14707_v51, %v20567_v48 }
 0x9e7   : > { %8653 = vmatpush.msra.mxu3 %v20420_v3  ;;  %8620 = vmatmul.f32.vlgmr.msra.gmra.mxu2 %v20160_v20 }
 0x9e8   : > { %8735 = vmatpush.msrb.mxu1 %v20220_v46  ;;  %8770 = vmatpush.msrb.mxu2 %v20474_v12  ;;  %v14704_v46 = vld [vmem:[%s24092_s2 + $0x7a8] sm:$0xff]  ;;  %v8826_v27 = vand.u32 4294901760, %v8825_v11  ;;  %v20627_v11 = vsub.f32 %v14705_v24, %v20599_v34 }
 0x9e9   : > { %8455 = vmatpush.msra.mxu0 %v20405_v29  ;;  %8655 = vmatpush.msra.mxu3 %v20432_v62  ;;  %v20614_v20 = vand.u32 4294901760, %v14704_v46 }
 0x9ea   : > { %8659 = vmatmul.f32.vlgmr.msra.gmra.mxu3 %v20166_v63  ;;  %8737 = vmatpush.msrb.mxu1 %v20233_v26  ;;  %v14703_v26 = vld [vmem:[%s24092_s2 + $0x7a0] sm:$0xff]  ;;  %v14702_v63 = vld [vmem:[%s24092_s2 + $0x798] sm:$0xff] }
 0x9eb   : > { %8772 = vmatpush.msrb.mxu2 %v20482_v22  ;;  %8815 = vmatpush.msrb.mxu3 %v8814_v41  ;;  %v24636_v41 = vand.u32 4294901760, %v20559_v45  ;;  %v20629_v51 = vand.u32 4294901760, %v14703_v26  ;;  %v20643_v50 = vsub.f32 %v14704_v46, %v20614_v20  ;;  %v20645_v19 = vand.u32 4294901760, %v14702_v63 }
 0x9ec   : > { %8457 = vmatpush.msra.mxu0 %v20420_v3  ;;  %8739 = vmatpush.msrb.mxu1 %v20246_v43  ;;  %v8832_v43 = vand.u32 4294901760, %v8831_v7 }
 0x9ed   : > { %8774 = vmatpush.msrb.mxu2 %v20501_v21  ;;  %8821 = vmatpush.msrb.mxu3 %v8820_v8  ;;  %v8843_v54 = vsub.f32 %v20559_v45, %v24636_v41  ;;  %v8838_v8 = vand.u32 4294901760, %v8837_v39  ;;  %v14701_v41 = vld [vmem:[%s24092_s2 + $0x790] sm:$0xff]  ;;  %v24637_v45 = vand.u32 4294901760, %v20231_v9  ;;  %v24639_v9 = vand.u32 4294901760, %v20244_v38 }
 0x9ee   : > { %8459 = vmatpush.msra.mxu0 %v20432_v62  ;;  %8741 = vmatpush.msrb.mxu1 %v20257_v5  ;;  %v24638_v5 = vand.u32 4294901760, %v20581_v42  ;;  %v20656_v46 = vsub.f32 %v14703_v26, %v20629_v51  ;;  %v20658_v7 = vand.u32 4294901760, %v14701_v41  ;;  %v24641_v38 = vand.u32 4294901760, %v20255_v15 }
 0x9ef   : > { %8465 = vmatmul.f32.vlgmr.msra.gmra.mxu0 %v20178_v33  ;;  %8776 = vmatpush.msrb.mxu2 %v20512_v37  ;;  %v8844_v39 = vand.u32 4294901760, %v8843_v54 }
 0x9f0   : > { %8666 = vmatpush.msrb.mxu0 %v24637_v45  ;;  %8827 = vmatpush.msrb.mxu3 %v8826_v27  ;;  %v8849_v24 = vsub.f32 %v20581_v42, %v24638_v5  ;;  %v24640_v27 = vand.u32 4294901760, %v20597_v55  ;;  %v8866_v5 = vand.u32 4294901760, %v20627_v11 }
 0x9f1   : > { %8743 = vmatpush.msrb.mxu1 %v20276_v60  ;;  %8778 = vmatpush.msrb.mxu2 %v20519_v52  ;;  %v14700_v60 = vld [vmem:[%s24092_s2 + $0x788] sm:$0xff] }
 0x9f2   : > { %8670 = vmatpush.msrb.mxu0 %v24639_v9  ;;  %8833 = vmatpush.msrb.mxu3 %v8832_v43  ;;  %v8855_v45 = vsub.f32 %v20597_v55, %v24640_v27  ;;  %v8850_v54 = vand.u32 4294901760, %v8849_v24  ;;  %v24642_v43 = vand.u32 4294901760, %v20612_v61  ;;  %v8872_v9 = vand.u32 4294901760, %v20643_v50 }
 0x9f3   : > { %8745 = vmatpush.msrb.mxu1 %v20291_v30  ;;  %8780 = vmatpush.msrb.mxu2 %v20528_v58  ;;  %v20672_v27 = vsub.f32 %v14702_v63, %v20645_v19  ;;  %v14699_v30 = vld [vmem:[%s24092_s2 + $0x780] sm:$0xff]  ;;  %v20679_v15 = vand.u32 4294901760, %v14700_v60  ;;  %v8867_v63 = vsub.f32 %v20627_v11, %v8866_v5 }
 0x9f4   : > { %8674 = vmatpush.msrb.mxu0 %v24641_v38  ;;  %8839 = vmatpush.msrb.mxu3 %v8838_v8  ;;  %v8861_v26 = vsub.f32 %v20612_v61, %v24642_v43  ;;  %v24643_v8 = vand.u32 4294901760, %v20272_v49  ;;  %v8856_v24 = vand.u32 4294901760, %v8855_v45  ;;  %v8878_v38 = vand.u32 4294901760, %v20656_v46 }
 0x9f5   : > { %8747 = vmatpush.msrb.mxu1 %v20302_v44  ;;  %8782 = vmatpush.msrb.mxu2 %v20551_v35  ;;  %v20688_v43 = vsub.f32 %v14701_v41, %v20658_v7  ;;  %v20692_v44 = vand.u32 4294901760, %v14699_v30  ;;  %v24644_v49 = vand.u32 4294901760, %v20289_v4  ;;  %v8873_v45 = vsub.f32 %v20643_v50, %v8872_v9 }
 0x9f6   : > { %8678 = vmatpush.msrb.mxu0 %v24643_v8  ;;  %8845 = vmatpush.msrb.mxu3 %v8844_v39  ;;  %v8862_v39 = vand.u32 4294901760, %v8861_v26  ;;  %v8884_v8 = vand.u32 4294901760, %v20672_v27  ;;  %v24645_v41 = vand.u32 4294901760, %v20310_v59  ;;  %v8868_v4 = vand.u32 4294901760, %v8867_v63 }
 0x9f7   : > { %8749 = vmatpush.msrb.mxu1 %v20327_v17  ;;  %8784 = vmatpush.msrb.mxu2 %v20567_v48  ;;  %v20703_v17 = vsub.f32 %v14700_v60, %v20679_v15  ;;  %v8890_v26 = vand.u32 4294901760, %v20688_v43  ;;  %v24646_v60 = vand.u32 4294901760, %v20320_v47  ;;  %v8874_v59 = vand.u32 4294901760, %v8873_v45 }
 0x9f8   : > { %8682 = vmatpush.msrb.mxu0 %v24644_v49  ;;  %8851 = vmatpush.msrb.mxu3 %v8850_v54  ;;  %v8879_v54 = vsub.f32 %v20656_v46, %v8878_v38  ;;  %v24647_v63 = vand.u32 4294901760, %v20336_v23  ;;  %v24649_v45 = vand.u32 4294901760, %v20373_v56 }
 0x9f9   : > { %8751 = vmatpush.msrb.mxu1 %v20344_v31  ;;  %8786 = vmatpush.msrb.mxu2 %v20583_v13  ;;  %v20714_v31 = vsub.f32 %v14699_v30, %v20692_v44  ;;  %v8891_v47 = vsub.f32 %v20688_v43, %v8890_v26 }
 0x9fa   : > { %8686 = vmatpush.msrb.mxu0 %v24645_v41  ;;  %8857 = vmatpush.msrb.mxu3 %v8856_v24  ;;  %v8885_v24 = vsub.f32 %v20672_v27, %v8884_v8  ;;  %v8880_v30 = vand.u32 4294901760, %v8879_v54  ;;  %v24651_v41 = vand.u32 4294901760, %v20403_v10  ;;  %v24654_v10 = vand.u32 4294901760, %v20430_v40 }
 0x9fb   : > { %8753 = vmatpush.msrb.mxu1 %v20360_v16  ;;  %8788 = vmatpush.msrb.mxu2 %v20599_v34  ;;  %v8896_v16 = vand.u32 4294901760, %v20703_v17  ;;  %v8902_v49 = vand.u32 4294901760, %v20714_v31  ;;  %v24657_v54 = vand.u32 4294901760, %v20524_v36  ;;  %v24658_v40 = vand.u32 4294901760, %v20452_v28  ;;  %v14730_v28 = vld [vmem:[%s24092_s2 + $0x878] sm:$0xff] }
 0x9fc   : > { %8690 = vmatpush.msrb.mxu0 %v24646_v60  ;;  %8863 = vmatpush.msrb.mxu3 %v8862_v39  ;;  %v8886_v39 = vand.u32 4294901760, %v8885_v24  ;;  %v24659_v60 = vand.u32 4294901760, %v20536_v18 }
 0x9fd   : > { %8755 = vmatpush.msrb.mxu1 %v20375_v32  ;;  %8790 = vmatpush.msrb.mxu2 %v20614_v20  ;;  %v24648_v32 = vand.u32 4294901760, %v20358_v2  ;;  %v8897_v23 = vsub.f32 %v20703_v17, %v8896_v16  ;;  %v8903_v2 = vsub.f32 %v20714_v31, %v8902_v49 }
 0x9fe   : > { %8694 = vmatpush.msrb.mxu0 %v24647_v63  ;;  %8869 = vmatpush.msrb.mxu3 %v8868_v4  ;;  %v24655_v4 = vand.u32 4294901760, %v20508_v57 }
 0x9ff   : > { %8757 = vmatpush.msrb.mxu1 %v20390_v25  ;;  %8792 = vmatpush.msrb.mxu2 %v20629_v51  ;;  %v8892_v25 = vand.u32 4294901760, %v8891_v47  ;;  %v8898_v56 = vand.u32 4294901760, %v8897_v23  ;;  %v14725_v23 = vld [vmem:[%s24092_s2 + $0x850] sm:$0xff] }
 0xa00   : > { %8698 = vmatpush.msrb.mxu0 %v24648_v32  ;;  %8875 = vmatpush.msrb.mxu3 %v8874_v59 }
 0xa01   : > { %8759 = vmatpush.msrb.mxu1 %v20405_v29  ;;  %8794 = vmatpush.msrb.mxu2 %v20645_v19  ;;  %v24650_v29 = vand.u32 4294901760, %v20388_v0  ;;  %v24652_v0 = vand.u32 4294901760, %v20418_v6  ;;  %v24656_v6 = vand.u32 4294901760, %v20442_v14  ;;  %v24660_v14 = vld [vmem:[#allocation25_spill] sm:$0xff] }
 0xa02   : > { %8702 = vmatpush.msrb.mxu0 %v24649_v45  ;;  %8881 = vmatpush.msrb.mxu3 %v8880_v30  ;;  %v14726_v30 = vld [vmem:[%s24092_s2 + $0x858] sm:$0xff]  ;;  %v20865_v45 = vand.u32 4294901760, %v14725_v23 }
 0xa03   : > { %8761 = vmatpush.msrb.mxu1 %v20420_v3  ;;  %8796 = vmatpush.msrb.mxu2 %v20658_v7  ;;  %v8904_v3 = vand.u32 4294901760, %v8903_v2 }
 0xa04   : > { %8706 = vmatpush.msrb.mxu0 %v24650_v29  ;;  %8887 = vmatpush.msrb.mxu3 %v8886_v39  ;;  %v14722_v29 = vld [vmem:[%s24092_s2 + $0x838] sm:$0xff] }
 0xa05   : > { %8763 = vmatpush.msrb.mxu1 %v20432_v62  ;;  %8798 = vmatpush.msrb.mxu2 %v20679_v15  ;;  %v24653_v62 = vand.u32 4294901760, %v20494_v53 }
 0xa06   : > { %8710 = vmatpush.msrb.mxu0 %v24651_v41  ;;  %8893 = vmatpush.msrb.mxu3 %v8892_v25 }
 0xa07   : > { %8765 = vmatmul.f32.vlgmr.msrb.gmra.mxu1 %v20157_v1  ;;  %8800 = vmatpush.msrb.mxu2 %v20692_v44 }
 0xa08   : > { %8966 = vmatpush.msra.mxu1 %v20474_v12  ;;  %8714 = vmatpush.msrb.mxu0 %v24652_v0 }
 0xa09   : > { %8899 = vmatpush.msrb.mxu3 %v8898_v56  ;;  %8806 = vmatmul.f32.vlgmr.msrb.gmra.mxu2 %v20178_v33 }
 0xa0a   : > { %8968 = vmatpush.msra.mxu1 %v20482_v22  ;;  %9007 = vmatpush.msra.mxu2 %v24653_v62  ;;  %v14720_v62 = vld [vmem:[%s24092_s2 + $0x828] sm:$0xff] }
 0xa0b   : > { %8718 = vmatpush.msrb.mxu0 %v24654_v10  ;;  %8905 = vmatpush.msrb.mxu3 %v8904_v3  ;;  %v24667_v10 = vld [vmem:[#allocation24_spill] sm:$0xff] }
 0xa0c   : > { %8907 = vmatmul.f32.vlgmr.msrb.gmra.mxu3 %v20157_v1  ;;  %8970 = vmatpush.msra.mxu1 %v20501_v21 }
 0xa0d   : > { %9011 = vmatpush.msra.mxu2 %v24655_v4  ;;  %9074 = vmatpush.msra.mxu3 %v20474_v12  ;;  %v24661_v12 = vand.u32 4294901760, %v24660_v14 }
 0xa0e   : > { %8722 = vmatpush.msrb.mxu0 %v24656_v6  ;;  %8972 = vmatpush.msra.mxu1 %v20512_v37 }
 0xa0f   : > { %9015 = vmatpush.msra.mxu2 %v24657_v54  ;;  %9076 = vmatpush.msra.mxu3 %v20482_v22  ;;  %v24662_v22 = vld [vmem:[#allocation10_spill] sm:$0xff]  ;;  %v14719_v54 = vld [vmem:[%s24092_s2 + $0x820] sm:$0xff] }
 0xa10   : > { %8726 = vmatpush.msrb.mxu0 %v24658_v40  ;;  %8974 = vmatpush.msra.mxu1 %v20519_v52  ;;  %v24663_v59 = vand.u32 4294901760, %v24662_v22  ;;  %v20948_v40 = vand.u32 4294901760, %v14720_v62 }
 0xa11   : > { %8728 = vmatmul.f32.vlgmr.msrb.gmra.mxu0 %v20157_v1  ;;  %9019 = vmatpush.msra.mxu2 %v24659_v60 }
 0xa12   : > { %8913 = vmatpush.msra.mxu0 %v20494_v53  ;;  %9078 = vmatpush.msra.mxu3 %v20501_v21  ;;  %v14729_v21 = vld [vmem:[%s24092_s2 + $0x870] sm:$0xff]  ;;  %v20798_v53 = vand.u32 4294901760, %v14730_v28 }
 0xa13   : > { %8976 = vmatpush.msra.mxu1 %v20528_v58  ;;  %9023 = vmatpush.msra.mxu2 %v24661_v12  ;;  %v20808_v24 = vand.u32 4294901760, %v14729_v21 }
 0xa14   : > { %8916 = vmatpush.msra.mxu0 %v20508_v57  ;;  %9080 = vmatpush.msra.mxu3 %v20512_v37  ;;  %v24664_v57 = vand.u32 4294901760, %v20581_v42  ;;  %v14728_v37 = vld [vmem:[%s24092_s2 + $0x868] sm:$0xff]  ;;  %v20819_v63 = vsub.f32 %v14730_v28, %v20798_v53  ;;  %v20963_v28 = vand.u32 4294901760, %v14719_v54 }
 0xa15   : > { %8978 = vmatpush.msra.mxu1 %v20551_v35  ;;  %9027 = vmatpush.msra.mxu2 %v24663_v59 }
 0xa16   : > { %8919 = vmatpush.msra.mxu0 %v20524_v36  ;;  %9082 = vmatpush.msra.mxu3 %v20519_v52  ;;  %v24665_v52 = vand.u32 4294901760, %v20597_v55  ;;  %v14727_v36 = vld [vmem:[%s24092_s2 + $0x860] sm:$0xff]  ;;  %v24291_v32 = vand.u32 4294901760, %v20819_v63 }
 0xa17   : > { %8980 = vmatpush.msra.mxu1 %v20567_v48  ;;  %9031 = vmatpush.msra.mxu2 %v24664_v57  ;;  %v20834_v47 = vand.u32 4294901760, %v14727_v36 }
 0xa18   : > { %8922 = vmatpush.msra.mxu0 %v20536_v18  ;;  %9084 = vmatpush.msra.mxu3 %v20528_v58  ;;  %v20821_v18 = vand.u32 4294901760, %v14728_v37  ;;  %v24666_v58 = vand.u32 4294901760, %v20612_v61 }
 0xa19   : > { %8982 = vmatpush.msra.mxu1 %v20583_v13  ;;  %9035 = vmatpush.msra.mxu2 %v24665_v52  ;;  %v14716_v52 = vld [vmem:[%s24092_s2 + $0x808] sm:$0xff] }
 0xa1a   : > { %8925 = vmatpush.msra.mxu0 %v24660_v14  ;;  %9086 = vmatpush.msra.mxu3 %v20551_v35  ;;  %v20832_v35 = vsub.f32 %v14729_v21, %v20808_v24  ;;  %v20843_v39 = vsub.f32 %v14728_v37, %v20821_v18  ;;  %v14718_v14 = vld [vmem:[%s24092_s2 + $0x818] sm:$0xff]  ;;  %v20976_v21 = vsub.f32 %v14720_v62, %v20948_v40 }
 0xa1b   : > { %8984 = vmatpush.msra.mxu1 %v20599_v34  ;;  %9039 = vmatpush.msra.mxu2 %v24666_v58  ;;  %v20978_v57 = vand.u32 4294901760, %v14718_v14 }
 0xa1c   : > { %8928 = vmatpush.msra.mxu0 %v24662_v22  ;;  %9088 = vmatpush.msra.mxu3 %v20567_v48  ;;  %v20845_v48 = vand.u32 4294901760, %v14726_v30 }
 0xa1d   : > { %8986 = vmatpush.msra.mxu1 %v20614_v20  ;;  %9043 = vmatpush.msra.mxu2 %v8866_v5  ;;  %v20860_v5 = vsub.f32 %v14727_v36, %v20834_v47 }
 0xa1e   : > { %8931 = vmatpush.msra.mxu0 %v20581_v42  ;;  %9090 = vmatpush.msra.mxu3 %v20583_v13  ;;  %v14724_v13 = vld [vmem:[%s24092_s2 + $0x848] sm:$0xff]  ;;  %v24289_v42 = vand.u32 4294901760, %v20832_v35  ;;  %v20877_v25 = vsub.f32 %v14726_v30, %v20845_v48  ;;  %v20991_v30 = vsub.f32 %v14719_v54, %v20963_v28 }
 0xa1f   : > { %8988 = vmatpush.msra.mxu1 %v20629_v51  ;;  %9047 = vmatpush.msra.mxu2 %v8872_v9  ;;  %v14723_v9 = vld [vmem:[%s24092_s2 + $0x840] sm:$0xff] }
 0xa20   : > { %8934 = vmatpush.msra.mxu0 %v20597_v55  ;;  %9092 = vmatpush.msra.mxu3 %v20599_v34  ;;  %v9154_v34 = vsub.f32 %v20819_v63, %v24291_v32  ;;  %v24288_v55 = vand.u32 4294901760, %v20843_v39  ;;  %v20890_v2 = vand.u32 4294901760, %v14723_v9  ;;  %v24286_v56 = vand.u32 4294901760, %v20877_v25 }
 0xa21   : > { %8990 = vmatpush.msra.mxu1 %v20645_v19  ;;  %9051 = vmatpush.msra.mxu2 %v8878_v38  ;;  %v20879_v38 = vand.u32 4294901760, %v14724_v13 }
 0xa22   : > { %8937 = vmatpush.msra.mxu0 %v20612_v61  ;;  %9094 = vmatpush.msra.mxu3 %v20614_v20  ;;  %v9160_v61 = vsub.f32 %v20832_v35, %v24289_v42  ;;  %v24287_v20 = vand.u32 4294901760, %v20860_v5  ;;  %v20924_v0 = vsub.f32 %v14723_v9, %v20890_v2  ;;  %v9178_v4 = vsub.f32 %v20877_v25, %v24286_v56  ;;  %v24668_v9 = vld [vmem:[#allocation14_spill] sm:$0xff]  ;;  %v14737_v56 = vld [vmem:[%s24092_s2 + $0x8b0] sm:$0xff] }
 0xa23   : > { %8992 = vmatpush.msra.mxu1 %v20658_v7  ;;  %9055 = vmatpush.msra.mxu2 %v8884_v8  ;;  %v9166_v8 = vsub.f32 %v20843_v39, %v24288_v55  ;;  %v20908_v41 = vsub.f32 %v14724_v13, %v20879_v38  ;;  %v14715_v13 = vld [vmem:[%s24092_s2 + $0x800] sm:$0xff]  ;;  %v21187_v32 = vand.u32 4294901760, %v14737_v56 }
 0xa24   : > { %8940 = vmatpush.msra.mxu0 %v20627_v11  ;;  %9096 = vmatpush.msra.mxu3 %v20629_v51  ;;  %v20899_v11 = vsub.f32 %v14725_v23, %v20865_v45  ;;  %v9155_v51 = vand.u32 4294901760, %v9154_v34  ;;  %v9172_v3 = vsub.f32 %v20860_v5, %v24287_v20  ;;  %v24282_v60 = vand.u32 4294901760, %v20924_v0 }
 0xa25   : > { %8994 = vmatpush.msra.mxu1 %v20679_v15  ;;  %9059 = vmatpush.msra.mxu2 %v8890_v26  ;;  %v14721_v26 = vld [vmem:[%s24092_s2 + $0x830] sm:$0xff]  ;;  %v24283_v6 = vand.u32 4294901760, %v20908_v41  ;;  %v9179_v22 = vand.u32 4294901760, %v9178_v4 }
 0xa26   : > { %8943 = vmatpush.msra.mxu0 %v20643_v50  ;;  %9098 = vmatpush.msra.mxu3 %v20645_v19  ;;  %v20916_v19 = vand.u32 4294901760, %v14722_v29  ;;  %v9161_v50 = vand.u32 4294901760, %v9160_v61  ;;  %v9196_v37 = vsub.f32 %v20924_v0, %v24282_v60  ;;  %v24278_v61 = vand.u32 4294901760, %v20976_v21  ;;  %v14738_v60 = vld [vmem:[%s24092_s2 + $0x8b8] sm:$0xff] }
 0xa27   : > { %8996 = vmatpush.msra.mxu1 %v20692_v44  ;;  %9063 = vmatpush.msra.mxu2 %v8896_v16  ;;  %v9167_v16 = vand.u32 4294901760, %v9166_v8  ;;  %v9190_v59 = vsub.f32 %v20908_v41, %v24283_v6  ;;  %v21171_v55 = vand.u32 4294901760, %v14738_v60 }
 0xa28   : > { %8946 = vmatpush.msra.mxu0 %v20656_v46  ;;  %9100 = vmatpush.msra.mxu3 %v20658_v7  ;;  %v24284_v46 = vand.u32 4294901760, %v20899_v11  ;;  %v20933_v7 = vand.u32 4294901760, %v14721_v26 }
 0xa29   : > { %9000 = vmatmul.f32.vlgmr.msra.gmra.mxu1 %v24667_v10  ;;  %9067 = vmatpush.msra.mxu2 %v8902_v49  ;;  %v20946_v49 = vsub.f32 %v14722_v29, %v20916_v19  ;;  %v9191_v23 = vand.u32 4294901760, %v9190_v59  ;;  %v21006_v29 = vsub.f32 %v14718_v14, %v20978_v57  ;;  %v14746_v59 = vld [vmem:[%s24092_s2 + $0x8f8] sm:$0xff]  ;;  %v21200_v42 = vsub.f32 %v14738_v60, %v21171_v55 }
 0xa2a   : > { %9156 = vmatpush.msrb.mxu1 %v9155_v51  ;;  %8949 = vmatpush.msra.mxu0 %v20672_v27  ;;  %v9173_v27 = vand.u32 4294901760, %v9172_v3  ;;  %v20961_v12 = vsub.f32 %v14721_v26, %v20933_v7  ;;  %v9197_v51 = vand.u32 4294901760, %v9196_v37  ;;  %v24277_v26 = vand.u32 4294901760, %v20991_v30 }
 0xa2b   : > { %9102 = vmatpush.msra.mxu3 %v20679_v15  ;;  %9069 = vmatmul.f32.vlgmr.msra.gmra.mxu2 %v20157_v1  ;;  %v9184_v15 = vsub.f32 %v20899_v11, %v24284_v46  ;;  %v21020_v3 = vand.u32 4294901760, %v14715_v13  ;;  %v24276_v4 = vand.u32 4294901760, %v21006_v29 }
 0xa2c   : > { %9162 = vmatpush.msrb.mxu1 %v9161_v50  ;;  %9254 = vmatpush.msrb.mxu2 %v20819_v63  ;;  %v24279_v58 = vand.u32 4294901760, %v20961_v12  ;;  %v9220_v14 = vsub.f32 %v20991_v30, %v24277_v26 }
 0xa2d   : > { %8952 = vmatpush.msra.mxu0 %v20688_v43  ;;  %9104 = vmatpush.msra.mxu3 %v20692_v44  ;;  %v14717_v43 = vld [vmem:[%s24092_s2 + $0x810] sm:$0xff]  ;;  %v24280_v44 = vand.u32 4294901760, %v20946_v49  ;;  %v9185_v36 = vand.u32 4294901760, %v9184_v15  ;;  %v9226_v37 = vsub.f32 %v21006_v29, %v24276_v4 }
 0xa2e   : > { %9106 = vmatmul.f32.vlgmr.msra.gmra.mxu3 %v20157_v1  ;;  %9168 = vmatpush.msrb.mxu1 %v9167_v16  ;;  %v9208_v8 = vsub.f32 %v20961_v12, %v24279_v58  ;;  %v9214_v16 = vsub.f32 %v20976_v21, %v24278_v61  ;;  %v14741_v4 = vld [vmem:[%s24092_s2 + $0x8d0] sm:$0xff] }
 0xa2f   : > { %9257 = vmatpush.msrb.mxu2 %v20832_v35  ;;  %9307 = vmatpush.msrb.mxu3 %v20798_v53  ;;  %v9202_v34 = vsub.f32 %v20946_v49, %v24280_v44  ;;  %v14739_v44 = vld [vmem:[%s24092_s2 + $0x8c0] sm:$0xff] }
 0xa30   : > { %8955 = vmatpush.msra.mxu0 %v20703_v17  ;;  %9174 = vmatpush.msrb.mxu1 %v9173_v27  ;;  %v20993_v17 = vand.u32 4294901760, %v14717_v43  ;;  %v9209_v27 = vand.u32 4294901760, %v9208_v8  ;;  %v9227_v8 = vand.u32 4294901760, %v9226_v37  ;;  %v21155_v46 = vand.u32 4294901760, %v14739_v44 }
 0xa31   : > { %9260 = vmatpush.msrb.mxu2 %v20843_v39  ;;  %9309 = vmatpush.msrb.mxu3 %v20808_v24  ;;  %v9203_v62 = vand.u32 4294901760, %v9202_v34 }
 0xa32   : > { %8958 = vmatpush.msra.mxu0 %v20714_v31  ;;  %9180 = vmatpush.msrb.mxu1 %v9179_v22  ;;  %v21008_v31 = vand.u32 4294901760, %v14716_v52  ;;  %v21018_v50 = vsub.f32 %v14717_v43, %v20993_v17  ;;  %v21040_v22 = vsub.f32 %v14715_v13, %v21020_v3  ;;  %v9215_v43 = vand.u32 4294901760, %v9214_v16 }
 0xa33   : > { %8961 = vmatmul.f32.vlgmr.msra.gmra.mxu0 %v24668_v9  ;;  %9263 = vmatpush.msrb.mxu2 %v20860_v5 }
 0xa34   : > { %9111 = vmatpush.msrb.mxu0 %v20798_v53  ;;  %9311 = vmatpush.msrb.mxu3 %v20821_v18  ;;  %v21030_v54 = vsub.f32 %v14716_v52, %v21008_v31  ;;  %v24274_v15 = vand.u32 4294901760, %v21018_v50  ;;  %v24275_v34 = vand.u32 4294901760, %v21040_v22 }
 0xa35   : > { %9186 = vmatpush.msrb.mxu1 %v9185_v36  ;;  %9266 = vmatpush.msrb.mxu2 %v20877_v25  ;;  %v14745_v36 = vld [vmem:[%s24092_s2 + $0x8f0] sm:$0xff] }
 0xa36   : > { %9113 = vmatpush.msrb.mxu0 %v20808_v24  ;;  %9313 = vmatpush.msrb.mxu3 %v20834_v47  ;;  %v24273_v52 = vand.u32 4294901760, %v21030_v54  ;;  %v9232_v13 = vsub.f32 %v21018_v50, %v24274_v15  ;;  %v21070_v16 = vand.u32 4294901760, %v14745_v36 }
 0xa37   : > { %9192 = vmatpush.msrb.mxu1 %v9191_v23  ;;  %9269 = vmatpush.msrb.mxu2 %v20899_v11  ;;  %v9221_v23 = vand.u32 4294901760, %v9220_v14 }
 0xa38   : > { %9115 = vmatpush.msrb.mxu0 %v20821_v18  ;;  %9315 = vmatpush.msrb.mxu3 %v20845_v48  ;;  %v9233_v14 = vand.u32 4294901760, %v9232_v13 }
 0xa39   : > { %9198 = vmatpush.msrb.mxu1 %v9197_v51  ;;  %9272 = vmatpush.msrb.mxu2 %v20908_v41  ;;  %v21062_v51 = vand.u32 4294901760, %v14746_v59 }
 0xa3a   : > { %9117 = vmatpush.msrb.mxu0 %v20834_v47  ;;  %9317 = vmatpush.msrb.mxu3 %v20865_v45 }
 0xa3b   : > { %9204 = vmatpush.msrb.mxu1 %v9203_v62  ;;  %9275 = vmatpush.msrb.mxu2 %v20924_v0  ;;  %v9238_v62 = vsub.f32 %v21030_v54, %v24273_v52  ;;  %v21082_v37 = vsub.f32 %v14746_v59, %v21062_v51  ;;  %v14743_v52 = vld [vmem:[%s24092_s2 + $0x8e0] sm:$0xff]  ;;  %v21096_v59 = vsub.f32 %v14745_v36, %v21070_v16 }
 0xa3c   : > { %9119 = vmatpush.msrb.mxu0 %v20845_v48  ;;  %9319 = vmatpush.msrb.mxu3 %v20879_v38 }
 0xa3d   : > { %9210 = vmatpush.msrb.mxu1 %v9209_v27  ;;  %9278 = vmatpush.msrb.mxu2 %v20946_v49  ;;  %v14744_v27 = vld [vmem:[%s24092_s2 + $0x8e8] sm:$0xff]  ;;  %v9239_v13 = vand.u32 4294901760, %v9238_v62  ;;  %v24281_v26 = vand.u32 4294901760, %v21082_v37  ;;  %v24285_v61 = vand.u32 4294901760, %v21096_v59 }
 0xa3e   : > { %9121 = vmatpush.msrb.mxu0 %v20865_v45  ;;  %9321 = vmatpush.msrb.mxu3 %v20890_v2  ;;  %v21089_v15 = vand.u32 4294901760, %v14744_v27 }
 0xa3f   : > { %9216 = vmatpush.msrb.mxu1 %v9215_v43  ;;  %9281 = vmatpush.msrb.mxu2 %v20961_v12  ;;  %v9244_v43 = vsub.f32 %v21040_v22, %v24275_v34  ;;  %v21100_v34 = vand.u32 4294901760, %v14743_v52 }
 0xa40   : > { %9123 = vmatpush.msrb.mxu0 %v20879_v38  ;;  %9323 = vmatpush.msrb.mxu3 %v20916_v19  ;;  %v21112_v36 = vsub.f32 %v14744_v27, %v21089_v15  ;;  %v9495_v27 = vsub.f32 %v21082_v37, %v24281_v26 }
 0xa41   : > { %9222 = vmatpush.msrb.mxu1 %v9221_v23  ;;  %9284 = vmatpush.msrb.mxu2 %v20976_v21  ;;  %v14742_v23 = vld [vmem:[%s24092_s2 + $0x8d8] sm:$0xff]  ;;  %v21124_v58 = vsub.f32 %v14743_v52, %v21100_v34 }
 0xa42   : > { %9125 = vmatpush.msrb.mxu0 %v20890_v2  ;;  %9325 = vmatpush.msrb.mxu3 %v20933_v7  ;;  %v21107_v62 = vand.u32 4294901760, %v14742_v23  ;;  %v24290_v52 = vand.u32 4294901760, %v21112_v36 }
 0xa43   : > { %9228 = vmatpush.msrb.mxu1 %v9227_v8  ;;  %9287 = vmatpush.msrb.mxu2 %v20991_v30  ;;  %v9245_v8 = vand.u32 4294901760, %v9244_v43  ;;  %v14740_v43 = vld [vmem:[%s24092_s2 + $0x8c8] sm:$0xff]  ;;  %v24292_v6 = vand.u32 4294901760, %v21124_v58 }
 0xa44   : > { %9127 = vmatpush.msrb.mxu0 %v20916_v19  ;;  %9327 = vmatpush.msrb.mxu3 %v20948_v40 }
 0xa45   : > { %9234 = vmatpush.msrb.mxu1 %v9233_v14  ;;  %9290 = vmatpush.msrb.mxu2 %v21006_v29  ;;  %v21116_v14 = vand.u32 4294901760, %v14741_v4 }
 0xa46   : > { %9129 = vmatpush.msrb.mxu0 %v20933_v7  ;;  %9329 = vmatpush.msrb.mxu3 %v20963_v28 }
 0xa47   : > { %9240 = vmatpush.msrb.mxu1 %v9239_v13  ;;  %9293 = vmatpush.msrb.mxu2 %v21018_v50  ;;  %v21131_v13 = vsub.f32 %v14742_v23, %v21107_v62  ;;  %v9501_v23 = vsub.f32 %v21096_v59, %v24285_v61  ;;  %v21147_v26 = vsub.f32 %v14741_v4, %v21116_v14  ;;  %v9496_v61 = vand.u32 4294901760, %v9495_v27 }
 0xa48   : > { %9131 = vmatpush.msrb.mxu0 %v20948_v40  ;;  %9331 = vmatpush.msrb.mxu3 %v20978_v57 }
 0xa49   : > { %9246 = vmatpush.msrb.mxu1 %v9245_v8  ;;  %9296 = vmatpush.msrb.mxu2 %v21030_v54  ;;  %24669 = vst [vmem:[#allocation17_spill] sm:$0xff] %v21131_v13  ;;  %v21139_v8 = vand.u32 4294901760, %v14740_v43  ;;  %v24294_v4 = vand.u32 4294901760, %v21131_v13  ;;  %v9502_v27 = vand.u32 4294901760, %v9501_v23 }
 0xa4a   : > { %9133 = vmatpush.msrb.mxu0 %v20963_v28  ;;  %9333 = vmatpush.msrb.mxu3 %v20993_v17  ;;  %24670 = vst [vmem:[#allocation28_spill] sm:$0xff] %v21147_v26 }
 0xa4b   : > { %9248 = vmatmul.f32.vlgmr.msrb.gmra.mxu1 %v20157_v1  ;;  %9299 = vmatpush.msrb.mxu2 %v21040_v22  ;;  %v21169_v20 = vsub.f32 %v14740_v43, %v21139_v8  ;;  %v9513_v43 = vsub.f32 %v21124_v58, %v24292_v6  ;;  %v9519_v23 = vsub.f32 %v21131_v13, %v24294_v4 }
 0xa4c   : > { %9415 = vmatpush.msra.mxu1 %v20798_v53  ;;  %9135 = vmatpush.msrb.mxu0 %v20978_v57  ;;  %v9507_v53 = vsub.f32 %v21112_v36, %v24290_v52  ;;  %v21185_v52 = vsub.f32 %v14739_v44, %v21155_v46 }
 0xa4d   : > { %9335 = vmatpush.msrb.mxu3 %v21008_v31  ;;  %9302 = vmatmul.f32.vlgmr.msrb.gmra.mxu2 %v24668_v9 }
 0xa4e   : > { %9417 = vmatpush.msra.mxu1 %v20808_v24  ;;  %9452 = vmatpush.msra.mxu2 %v21062_v51  ;;  %v14736_v24 = vld [vmem:[%s24092_s2 + $0x8a8] sm:$0xff]  ;;  %v9508_v6 = vand.u32 4294901760, %v9507_v53  ;;  %v21215_v53 = vsub.f32 %v14737_v56, %v21187_v32 }
 0xa4f   : > { %9137 = vmatpush.msrb.mxu0 %v20993_v17  ;;  %9337 = vmatpush.msrb.mxu3 %v21020_v3  ;;  %v21202_v9 = vand.u32 4294901760, %v14736_v24 }
 0xa50   : > { %9341 = vmatmul.f32.vlgmr.msrb.gmra.mxu3 %v24667_v10  ;;  %9419 = vmatpush.msra.mxu1 %v20821_v18  ;;  %v14735_v18 = vld [vmem:[%s24092_s2 + $0x8a0] sm:$0xff]  ;;  %v14734_v10 = vld [vmem:[%s24092_s2 + $0x898] sm:$0xff] }
 0xa51   : > { %9454 = vmatpush.msra.mxu2 %v21070_v16  ;;  %9497 = vmatpush.msra.mxu3 %v9496_v61  ;;  %v24671_v61 = vand.u32 4294901760, %v21147_v26  ;;  %v21217_v44 = vand.u32 4294901760, %v14735_v18  ;;  %v21231_v60 = vsub.f32 %v14736_v24, %v21202_v9  ;;  %v21233_v13 = vand.u32 4294901760, %v14734_v10 }
 0xa52   : > { %9139 = vmatpush.msrb.mxu0 %v21008_v31  ;;  %9421 = vmatpush.msra.mxu1 %v20834_v47  ;;  %v9514_v47 = vand.u32 4294901760, %v9513_v43 }
 0xa53   : > { %9456 = vmatpush.msra.mxu2 %v21089_v15  ;;  %9503 = vmatpush.msra.mxu3 %v9502_v27  ;;  %v9525_v4 = vsub.f32 %v21147_v26, %v24671_v61  ;;  %v9520_v27 = vand.u32 4294901760, %v9519_v23  ;;  %v14733_v61 = vld [vmem:[%s24092_s2 + $0x890] sm:$0xff]  ;;  %v24672_v26 = vand.u32 4294901760, %v20819_v63  ;;  %v24674_v63 = vand.u32 4294901760, %v20832_v35 }
 0xa54   : > { %9141 = vmatpush.msrb.mxu0 %v21020_v3  ;;  %9423 = vmatpush.msra.mxu1 %v20845_v48  ;;  %v24673_v48 = vand.u32 4294901760, %v21169_v20  ;;  %v21244_v24 = vsub.f32 %v14735_v18, %v21217_v44  ;;  %v21246_v43 = vand.u32 4294901760, %v14733_v61  ;;  %v24676_v35 = vand.u32 4294901760, %v20843_v39 }
 0xa55   : > { %9147 = vmatmul.f32.vlgmr.msrb.gmra.mxu0 %v20178_v33  ;;  %9458 = vmatpush.msra.mxu2 %v21100_v34  ;;  %v9526_v23 = vand.u32 4294901760, %v9525_v4 }
 0xa56   : > { %9348 = vmatpush.msra.mxu0 %v24672_v26  ;;  %9509 = vmatpush.msra.mxu3 %v9508_v6  ;;  %v9531_v56 = vsub.f32 %v21169_v20, %v24673_v48  ;;  %v24675_v6 = vand.u32 4294901760, %v21185_v52  ;;  %v9548_v48 = vand.u32 4294901760, %v21215_v53 }
 0xa57   : > { %9425 = vmatpush.msra.mxu1 %v20865_v45  ;;  %9460 = vmatpush.msra.mxu2 %v21107_v62  ;;  %v14732_v45 = vld [vmem:[%s24092_s2 + $0x888] sm:$0xff] }
 0xa58   : > { %9352 = vmatpush.msra.mxu0 %v24674_v63  ;;  %9515 = vmatpush.msra.mxu3 %v9514_v47  ;;  %v9537_v26 = vsub.f32 %v21185_v52, %v24675_v6  ;;  %v9532_v4 = vand.u32 4294901760, %v9531_v56  ;;  %v24677_v47 = vand.u32 4294901760, %v21200_v42  ;;  %v9554_v63 = vand.u32 4294901760, %v21231_v60 }
 0xa59   : > { %9427 = vmatpush.msra.mxu1 %v20879_v38  ;;  %9462 = vmatpush.msra.mxu2 %v21116_v14  ;;  %v21260_v6 = vsub.f32 %v14734_v10, %v21233_v13  ;;  %v14731_v38 = vld [vmem:[%s24092_s2 + $0x880] sm:$0xff]  ;;  %v21267_v39 = vand.u32 4294901760, %v14732_v45  ;;  %v9549_v10 = vsub.f32 %v21215_v53, %v9548_v48 }
 0xa5a   : > { %9356 = vmatpush.msra.mxu0 %v24676_v35  ;;  %9521 = vmatpush.msra.mxu3 %v9520_v27  ;;  %v9543_v18 = vsub.f32 %v21200_v42, %v24677_v47  ;;  %v24678_v27 = vand.u32 4294901760, %v20860_v5  ;;  %v9538_v56 = vand.u32 4294901760, %v9537_v26  ;;  %v9560_v35 = vand.u32 4294901760, %v21244_v24 }
 0xa5b   : > { %9429 = vmatpush.msra.mxu1 %v20890_v2  ;;  %9464 = vmatpush.msra.mxu2 %v21139_v8  ;;  %v21276_v47 = vsub.f32 %v14733_v61, %v21246_v43  ;;  %v21280_v2 = vand.u32 4294901760, %v14731_v38  ;;  %v24679_v5 = vand.u32 4294901760, %v20877_v25  ;;  %v9555_v26 = vsub.f32 %v21231_v60, %v9554_v63 }
 0xa5c   : > { %9360 = vmatpush.msra.mxu0 %v24678_v27  ;;  %9527 = vmatpush.msra.mxu3 %v9526_v23  ;;  %v9544_v23 = vand.u32 4294901760, %v9543_v18  ;;  %v9566_v27 = vand.u32 4294901760, %v21260_v6  ;;  %v24680_v61 = vand.u32 4294901760, %v20899_v11  ;;  %v9550_v25 = vand.u32 4294901760, %v9549_v10 }
 0xa5d   : > { %9431 = vmatpush.msra.mxu1 %v20916_v19  ;;  %9466 = vmatpush.msra.mxu2 %v21155_v46  ;;  %v21291_v19 = vsub.f32 %v14732_v45, %v21267_v39  ;;  %v9572_v18 = vand.u32 4294901760, %v21276_v47  ;;  %v24681_v45 = vand.u32 4294901760, %v20908_v41  ;;  %v9556_v11 = vand.u32 4294901760, %v9555_v26 }
 0xa5e   : > { %9364 = vmatpush.msra.mxu0 %v24679_v5  ;;  %9533 = vmatpush.msra.mxu3 %v9532_v4  ;;  %v9561_v4 = vsub.f32 %v21244_v24, %v9560_v35  ;;  %v24682_v10 = vand.u32 4294901760, %v20924_v0  ;;  %v24684_v26 = vand.u32 4294901760, %v20961_v12 }
 0xa5f   : > { %9433 = vmatpush.msra.mxu1 %v20933_v7  ;;  %9468 = vmatpush.msra.mxu2 %v21171_v55  ;;  %v21302_v7 = vsub.f32 %v14731_v38, %v21280_v2  ;;  %v9573_v41 = vsub.f32 %v21276_v47, %v9572_v18 }
 0xa60   : > { %9368 = vmatpush.msra.mxu0 %v24680_v61  ;;  %9539 = vmatpush.msra.mxu3 %v9538_v56  ;;  %v9567_v56 = vsub.f32 %v21260_v6, %v9566_v27  ;;  %v9562_v38 = vand.u32 4294901760, %v9561_v4  ;;  %v24686_v61 = vand.u32 4294901760, %v20991_v30  ;;  %v24689_v30 = vand.u32 4294901760, %v21018_v50 }
 0xa61   : > { %9435 = vmatpush.msra.mxu1 %v20948_v40  ;;  %9470 = vmatpush.msra.mxu2 %v21187_v32  ;;  %v9578_v40 = vand.u32 4294901760, %v21291_v19  ;;  %v9584_v5 = vand.u32 4294901760, %v21302_v7  ;;  %v24692_v4 = vand.u32 4294901760, %v21112_v36  ;;  %v24693_v50 = vand.u32 4294901760, %v21040_v22  ;;  %v14762_v22 = vld [vmem:[%s24092_s2 + $0x978] sm:$0xff] }
 0xa62   : > { %9372 = vmatpush.msra.mxu0 %v24681_v45  ;;  %9545 = vmatpush.msra.mxu3 %v9544_v23  ;;  %v9568_v23 = vand.u32 4294901760, %v9567_v56  ;;  %v24694_v45 = vand.u32 4294901760, %v21124_v58 }
 0xa63   : > { %9437 = vmatpush.msra.mxu1 %v20963_v28  ;;  %9472 = vmatpush.msra.mxu2 %v21202_v9  ;;  %v24683_v28 = vand.u32 4294901760, %v20946_v49  ;;  %v9579_v0 = vsub.f32 %v21291_v19, %v9578_v40  ;;  %v9585_v49 = vsub.f32 %v21302_v7, %v9584_v5 }
 0xa64   : > { %9376 = vmatpush.msra.mxu0 %v24682_v10  ;;  %9551 = vmatpush.msra.mxu3 %v9550_v25  ;;  %v24690_v25 = vand.u32 4294901760, %v21096_v59 }
 0xa65   : > { %9439 = vmatpush.msra.mxu1 %v20978_v57  ;;  %9474 = vmatpush.msra.mxu2 %v21217_v44  ;;  %v9574_v57 = vand.u32 4294901760, %v9573_v41  ;;  %v9580_v12 = vand.u32 4294901760, %v9579_v0  ;;  %v14757_v0 = vld [vmem:[%s24092_s2 + $0x950] sm:$0xff] }
 0xa66   : > { %9380 = vmatpush.msra.mxu0 %v24683_v28  ;;  %9557 = vmatpush.msra.mxu3 %v9556_v11 }
 0xa67   : > { %9441 = vmatpush.msra.mxu1 %v20993_v17  ;;  %9476 = vmatpush.msra.mxu2 %v21233_v13  ;;  %v24685_v17 = vand.u32 4294901760, %v20976_v21  ;;  %v24687_v21 = vand.u32 4294901760, %v21006_v29  ;;  %v24691_v29 = vand.u32 4294901760, %v21030_v54  ;;  %v24695_v54 = vld [vmem:[#allocation17_spill] sm:$0xff] }
 0xa68   : > { %9384 = vmatpush.msra.mxu0 %v24684_v26  ;;  %9563 = vmatpush.msra.mxu3 %v9562_v38  ;;  %v14758_v38 = vld [vmem:[%s24092_s2 + $0x958] sm:$0xff]  ;;  %v21453_v26 = vand.u32 4294901760, %v14757_v0 }
 0xa69   : > { %9443 = vmatpush.msra.mxu1 %v21008_v31  ;;  %9478 = vmatpush.msra.mxu2 %v21246_v43  ;;  %v9586_v31 = vand.u32 4294901760, %v9585_v49 }
 0xa6a   : > { %9388 = vmatpush.msra.mxu0 %v24685_v17  ;;  %9569 = vmatpush.msra.mxu3 %v9568_v23  ;;  %v14754_v17 = vld [vmem:[%s24092_s2 + $0x938] sm:$0xff] }
 0xa6b   : > { %9445 = vmatpush.msra.mxu1 %v21020_v3  ;;  %9480 = vmatpush.msra.mxu2 %v21267_v39  ;;  %v24688_v3 = vand.u32 4294901760, %v21082_v37 }
 0xa6c   : > { %9392 = vmatpush.msra.mxu0 %v24686_v61  ;;  %9575 = vmatpush.msra.mxu3 %v9574_v57 }
 0xa6d   : > { %9447 = vmatmul.f32.vlgmr.msra.gmra.mxu1 %v20157_v1  ;;  %9482 = vmatpush.msra.mxu2 %v21280_v2 }
 0xa6e   : > { %9648 = vmatpush.msrb.mxu1 %v21062_v51  ;;  %9396 = vmatpush.msra.mxu0 %v24687_v21 }
 0xa6f   : > { %9581 = vmatpush.msra.mxu3 %v9580_v12  ;;  %9488 = vmatmul.f32.vlgmr.msra.gmra.mxu2 %v20178_v33 }
 0xa70   : > { %9650 = vmatpush.msrb.mxu1 %v21070_v16  ;;  %9689 = vmatpush.msrb.mxu2 %v24688_v3  ;;  %v14752_v3 = vld [vmem:[%s24092_s2 + $0x928] sm:$0xff] }
 0xa71   : > { %9400 = vmatpush.msra.mxu0 %v24689_v30  ;;  %9587 = vmatpush.msra.mxu3 %v9586_v31  ;;  %v24702_v30 = vld [vmem:[#allocation24_spill] sm:$0xff] }
 0xa72   : > { %9589 = vmatmul.f32.vlgmr.msra.gmra.mxu3 %v20157_v1  ;;  %9652 = vmatpush.msrb.mxu1 %v21089_v15 }
 0xa73   : > { %9693 = vmatpush.msrb.mxu2 %v24690_v25  ;;  %9756 = vmatpush.msrb.mxu3 %v21062_v51  ;;  %v24696_v51 = vand.u32 4294901760, %v24695_v54 }
 0xa74   : > { %9404 = vmatpush.msra.mxu0 %v24691_v29  ;;  %9654 = vmatpush.msrb.mxu1 %v21100_v34 }
 0xa75   : > { %9697 = vmatpush.msrb.mxu2 %v24692_v4  ;;  %9758 = vmatpush.msrb.mxu3 %v21070_v16  ;;  %v24697_v16 = vld [vmem:[#allocation28_spill] sm:$0xff]  ;;  %v14751_v4 = vld [vmem:[%s24092_s2 + $0x920] sm:$0xff] }
 0xa76   : > { %9408 = vmatpush.msra.mxu0 %v24693_v50  ;;  %9656 = vmatpush.msrb.mxu1 %v21107_v62  ;;  %v24698_v11 = vand.u32 4294901760, %v24697_v16  ;;  %v21536_v50 = vand.u32 4294901760, %v14752_v3 }
 0xa77   : > { %9410 = vmatmul.f32.vlgmr.msra.gmra.mxu0 %v20157_v1  ;;  %9701 = vmatpush.msrb.mxu2 %v24694_v45 }
 0xa78   : > { %9595 = vmatpush.msrb.mxu0 %v21082_v37  ;;  %9760 = vmatpush.msrb.mxu3 %v21089_v15  ;;  %v14761_v15 = vld [vmem:[%s24092_s2 + $0x970] sm:$0xff]  ;;  %v21386_v37 = vand.u32 4294901760, %v14762_v22 }
 0xa79   : > { %9658 = vmatpush.msrb.mxu1 %v21116_v14  ;;  %9705 = vmatpush.msrb.mxu2 %v24696_v51  ;;  %v21396_v56 = vand.u32 4294901760, %v14761_v15 }
 0xa7a   : > { %9598 = vmatpush.msrb.mxu0 %v21096_v59  ;;  %9762 = vmatpush.msrb.mxu3 %v21100_v34  ;;  %v24699_v59 = vand.u32 4294901760, %v21169_v20  ;;  %v14760_v34 = vld [vmem:[%s24092_s2 + $0x968] sm:$0xff]  ;;  %v21407_v10 = vsub.f32 %v14762_v22, %v21386_v37  ;;  %v21551_v22 = vand.u32 4294901760, %v14751_v4 }
 0xa7b   : > { %9660 = vmatpush.msrb.mxu1 %v21139_v8  ;;  %9709 = vmatpush.msrb.mxu2 %v24698_v11 }
 0xa7c   : > { %9601 = vmatpush.msrb.mxu0 %v21112_v36  ;;  %9764 = vmatpush.msrb.mxu3 %v21107_v62  ;;  %v24700_v62 = vand.u32 4294901760, %v21185_v52  ;;  %v14759_v36 = vld [vmem:[%s24092_s2 + $0x960] sm:$0xff]  ;;  %v24318_v28 = vand.u32 4294901760, %v21407_v10 }
 0xa7d   : > { %9662 = vmatpush.msrb.mxu1 %v21155_v46  ;;  %9713 = vmatpush.msrb.mxu2 %v24699_v59  ;;  %v21422_v41 = vand.u32 4294901760, %v14759_v36 }
 0xa7e   : > { %9604 = vmatpush.msrb.mxu0 %v21124_v58  ;;  %9766 = vmatpush.msrb.mxu3 %v21116_v14  ;;  %v21409_v58 = vand.u32 4294901760, %v14760_v34  ;;  %v24701_v14 = vand.u32 4294901760, %v21200_v42 }
 0xa7f   : > { %9664 = vmatpush.msrb.mxu1 %v21171_v55  ;;  %9717 = vmatpush.msrb.mxu2 %v24700_v62  ;;  %v14748_v62 = vld [vmem:[%s24092_s2 + $0x908] sm:$0xff] }
 0xa80   : > { %9607 = vmatpush.msrb.mxu0 %v24695_v54  ;;  %9768 = vmatpush.msrb.mxu3 %v21139_v8  ;;  %v21420_v8 = vsub.f32 %v14761_v15, %v21396_v56  ;;  %v21431_v23 = vsub.f32 %v14760_v34, %v21409_v58  ;;  %v14750_v54 = vld [vmem:[%s24092_s2 + $0x918] sm:$0xff]  ;;  %v21564_v15 = vsub.f32 %v14752_v3, %v21536_v50 }
 0xa81   : > { %9666 = vmatpush.msrb.mxu1 %v21187_v32  ;;  %9721 = vmatpush.msrb.mxu2 %v24701_v14  ;;  %v21566_v59 = vand.u32 4294901760, %v14750_v54 }
 0xa82   : > { %9610 = vmatpush.msrb.mxu0 %v24697_v16  ;;  %9770 = vmatpush.msrb.mxu3 %v21155_v46  ;;  %v21433_v46 = vand.u32 4294901760, %v14758_v38 }
 0xa83   : > { %9668 = vmatpush.msrb.mxu1 %v21202_v9  ;;  %9725 = vmatpush.msrb.mxu2 %v9548_v48  ;;  %v21448_v48 = vsub.f32 %v14759_v36, %v21422_v41 }
 0xa84   : > { %9613 = vmatpush.msrb.mxu0 %v21169_v20  ;;  %9772 = vmatpush.msrb.mxu3 %v21171_v55  ;;  %v14756_v55 = vld [vmem:[%s24092_s2 + $0x948] sm:$0xff]  ;;  %v24316_v20 = vand.u32 4294901760, %v21420_v8  ;;  %v21465_v57 = vsub.f32 %v14758_v38, %v21433_v46  ;;  %v21579_v38 = vsub.f32 %v14751_v4, %v21551_v22 }
 0xa85   : > { %9670 = vmatpush.msrb.mxu1 %v21217_v44  ;;  %9729 = vmatpush.msrb.mxu2 %v9554_v63  ;;  %v14755_v63 = vld [vmem:[%s24092_s2 + $0x940] sm:$0xff] }
 0xa86   : > { %9616 = vmatpush.msrb.mxu0 %v21185_v52  ;;  %9774 = vmatpush.msrb.mxu3 %v21187_v32  ;;  %v9836_v32 = vsub.f32 %v21407_v10, %v24318_v28  ;;  %v24315_v52 = vand.u32 4294901760, %v21431_v23  ;;  %v21478_v49 = vand.u32 4294901760, %v14755_v63  ;;  %v24313_v12 = vand.u32 4294901760, %v21465_v57 }
 0xa87   : > { %9672 = vmatpush.msrb.mxu1 %v21233_v13  ;;  %9733 = vmatpush.msrb.mxu2 %v9560_v35  ;;  %v21467_v35 = vand.u32 4294901760, %v14756_v55 }
 0xa88   : > { %9619 = vmatpush.msrb.mxu0 %v21200_v42  ;;  %9776 = vmatpush.msrb.mxu3 %v21202_v9  ;;  %v9842_v42 = vsub.f32 %v21420_v8, %v24316_v20  ;;  %v24314_v9 = vand.u32 4294901760, %v21448_v48  ;;  %v21512_v21 = vsub.f32 %v14755_v63, %v21478_v49  ;;  %v9860_v25 = vsub.f32 %v21465_v57, %v24313_v12  ;;  %v24703_v63 = vld [vmem:[#allocation14_spill] sm:$0xff]  ;;  %v14769_v12 = vld [vmem:[%s24092_s2 + $0x9b0] sm:$0xff] }
 0xa89   : > { %9674 = vmatpush.msrb.mxu1 %v21246_v43  ;;  %9737 = vmatpush.msrb.mxu2 %v9566_v27  ;;  %v9848_v27 = vsub.f32 %v21431_v23, %v24315_v52  ;;  %v21496_v61 = vsub.f32 %v14756_v55, %v21467_v35  ;;  %v14747_v55 = vld [vmem:[%s24092_s2 + $0x900] sm:$0xff]  ;;  %v21775_v28 = vand.u32 4294901760, %v14769_v12 }
 0xa8a   : > { %9622 = vmatpush.msrb.mxu0 %v21215_v53  ;;  %9778 = vmatpush.msrb.mxu3 %v21217_v44  ;;  %v21487_v53 = vsub.f32 %v14757_v0, %v21453_v26  ;;  %v9837_v44 = vand.u32 4294901760, %v9836_v32  ;;  %v9854_v31 = vsub.f32 %v21448_v48, %v24314_v9  ;;  %v24309_v45 = vand.u32 4294901760, %v21512_v21 }
 0xa8b   : > { %9676 = vmatpush.msrb.mxu1 %v21267_v39  ;;  %9741 = vmatpush.msrb.mxu2 %v9572_v18  ;;  %v14753_v18 = vld [vmem:[%s24092_s2 + $0x930] sm:$0xff]  ;;  %v24310_v29 = vand.u32 4294901760, %v21496_v61  ;;  %v9861_v16 = vand.u32 4294901760, %v9860_v25 }
 0xa8c   : > { %9625 = vmatpush.msrb.mxu0 %v21231_v60  ;;  %9780 = vmatpush.msrb.mxu3 %v21233_v13  ;;  %v21504_v13 = vand.u32 4294901760, %v14754_v17  ;;  %v9843_v60 = vand.u32 4294901760, %v9842_v42  ;;  %v9878_v34 = vsub.f32 %v21512_v21, %v24309_v45  ;;  %v24305_v42 = vand.u32 4294901760, %v21564_v15  ;;  %v14770_v45 = vld [vmem:[%s24092_s2 + $0x9b8] sm:$0xff] }
 0xa8d   : > { %9678 = vmatpush.msrb.mxu1 %v21280_v2  ;;  %9745 = vmatpush.msrb.mxu2 %v9578_v40  ;;  %v9849_v40 = vand.u32 4294901760, %v9848_v27  ;;  %v9872_v11 = vsub.f32 %v21496_v61, %v24310_v29  ;;  %v21759_v52 = vand.u32 4294901760, %v14770_v45 }
 0xa8e   : > { %9628 = vmatpush.msrb.mxu0 %v21244_v24  ;;  %9782 = vmatpush.msrb.mxu3 %v21246_v43  ;;  %v24311_v24 = vand.u32 4294901760, %v21487_v53  ;;  %v21521_v43 = vand.u32 4294901760, %v14753_v18 }
 0xa8f   : > { %9682 = vmatmul.f32.vlgmr.msrb.gmra.mxu1 %v24702_v30  ;;  %9749 = vmatpush.msrb.mxu2 %v9584_v5  ;;  %v21534_v5 = vsub.f32 %v14754_v17, %v21504_v13  ;;  %v9873_v0 = vand.u32 4294901760, %v9872_v11  ;;  %v21594_v17 = vsub.f32 %v14750_v54, %v21566_v59  ;;  %v14778_v11 = vld [vmem:[%s24092_s2 + $0x9f8] sm:$0xff]  ;;  %v21788_v20 = vsub.f32 %v14770_v45, %v21759_v52 }
 0xa90   : > { %9838 = vmatpush.msra.mxu1 %v9837_v44  ;;  %9631 = vmatpush.msrb.mxu0 %v21260_v6  ;;  %v9855_v6 = vand.u32 4294901760, %v9854_v31  ;;  %v21549_v51 = vsub.f32 %v14753_v18, %v21521_v43  ;;  %v9879_v44 = vand.u32 4294901760, %v9878_v34  ;;  %v24304_v18 = vand.u32 4294901760, %v21579_v38 }
 0xa91   : > { %9784 = vmatpush.msrb.mxu3 %v21267_v39  ;;  %9751 = vmatmul.f32.vlgmr.msrb.gmra.mxu2 %v20157_v1  ;;  %v9866_v39 = vsub.f32 %v21487_v53, %v24311_v24  ;;  %v21608_v31 = vand.u32 4294901760, %v14747_v55  ;;  %v24303_v25 = vand.u32 4294901760, %v21594_v17 }
 0xa92   : > { %9844 = vmatpush.msra.mxu1 %v9843_v60  ;;  %9936 = vmatpush.msra.mxu2 %v21407_v10  ;;  %v24306_v14 = vand.u32 4294901760, %v21549_v51  ;;  %v9902_v54 = vsub.f32 %v21579_v38, %v24304_v18 }
 0xa93   : > { %9634 = vmatpush.msrb.mxu0 %v21276_v47  ;;  %9786 = vmatpush.msrb.mxu3 %v21280_v2  ;;  %v14749_v47 = vld [vmem:[%s24092_s2 + $0x910] sm:$0xff]  ;;  %v24307_v2 = vand.u32 4294901760, %v21534_v5  ;;  %v9867_v36 = vand.u32 4294901760, %v9866_v39  ;;  %v9908_v34 = vsub.f32 %v21594_v17, %v24303_v25 }
 0xa94   : > { %9788 = vmatmul.f32.vlgmr.msrb.gmra.mxu3 %v20157_v1  ;;  %9850 = vmatpush.msra.mxu1 %v9849_v40  ;;  %v9890_v27 = vsub.f32 %v21549_v51, %v24306_v14  ;;  %v9896_v40 = vsub.f32 %v21564_v15, %v24305_v42  ;;  %v14773_v25 = vld [vmem:[%s24092_s2 + $0x9d0] sm:$0xff] }
 0xa95   : > { %9939 = vmatpush.msra.mxu2 %v21420_v8  ;;  %9989 = vmatpush.msra.mxu3 %v21386_v37  ;;  %v9884_v32 = vsub.f32 %v21534_v5, %v24307_v2  ;;  %v14771_v2 = vld [vmem:[%s24092_s2 + $0x9c0] sm:$0xff] }
 0xa96   : > { %9637 = vmatpush.msrb.mxu0 %v21291_v19  ;;  %9856 = vmatpush.msra.mxu1 %v9855_v6  ;;  %v21581_v19 = vand.u32 4294901760, %v14749_v47  ;;  %v9891_v6 = vand.u32 4294901760, %v9890_v27  ;;  %v9909_v27 = vand.u32 4294901760, %v9908_v34  ;;  %v21743_v24 = vand.u32 4294901760, %v14771_v2 }
 0xa97   : > { %9942 = vmatpush.msra.mxu2 %v21431_v23  ;;  %9991 = vmatpush.msra.mxu3 %v21396_v56  ;;  %v9885_v3 = vand.u32 4294901760, %v9884_v32 }
 0xa98   : > { %9640 = vmatpush.msrb.mxu0 %v21302_v7  ;;  %9862 = vmatpush.msra.mxu1 %v9861_v16  ;;  %v21596_v7 = vand.u32 4294901760, %v14748_v62  ;;  %v21606_v60 = vsub.f32 %v14749_v47, %v21581_v19  ;;  %v21628_v16 = vsub.f32 %v14747_v55, %v21608_v31  ;;  %v9897_v47 = vand.u32 4294901760, %v9896_v40 }
 0xa99   : > { %9643 = vmatmul.f32.vlgmr.msrb.gmra.mxu0 %v24703_v63  ;;  %9945 = vmatpush.msra.mxu2 %v21448_v48 }
 0xa9a   : > { %9793 = vmatpush.msra.mxu0 %v21386_v37  ;;  %9993 = vmatpush.msra.mxu3 %v21409_v58  ;;  %v21618_v4 = vsub.f32 %v14748_v62, %v21596_v7  ;;  %v24301_v39 = vand.u32 4294901760, %v21606_v60  ;;  %v24302_v32 = vand.u32 4294901760, %v21628_v16 }
 0xa9b   : > { %9868 = vmatpush.msra.mxu1 %v9867_v36  ;;  %9948 = vmatpush.msra.mxu2 %v21465_v57  ;;  %v14777_v36 = vld [vmem:[%s24092_s2 + $0x9f0] sm:$0xff] }
 0xa9c   : > { %9795 = vmatpush.msra.mxu0 %v21396_v56  ;;  %9995 = vmatpush.msra.mxu3 %v21422_v41  ;;  %v24300_v62 = vand.u32 4294901760, %v21618_v4  ;;  %v9914_v55 = vsub.f32 %v21606_v60, %v24301_v39  ;;  %v21658_v40 = vand.u32 4294901760, %v14777_v36 }
 0xa9d   : > { %9874 = vmatpush.msra.mxu1 %v9873_v0  ;;  %9951 = vmatpush.msra.mxu2 %v21487_v53  ;;  %v9903_v0 = vand.u32 4294901760, %v9902_v54 }
 0xa9e   : > { %9797 = vmatpush.msra.mxu0 %v21409_v58  ;;  %9997 = vmatpush.msra.mxu3 %v21433_v46  ;;  %v9915_v54 = vand.u32 4294901760, %v9914_v55 }
 0xa9f   : > { %9880 = vmatpush.msra.mxu1 %v9879_v44  ;;  %9954 = vmatpush.msra.mxu2 %v21496_v61  ;;  %v21650_v44 = vand.u32 4294901760, %v14778_v11 }
 0xaa0   : > { %9799 = vmatpush.msra.mxu0 %v21422_v41  ;;  %9999 = vmatpush.msra.mxu3 %v21453_v26 }
 0xaa1   : > { %9886 = vmatpush.msra.mxu1 %v9885_v3  ;;  %9957 = vmatpush.msra.mxu2 %v21512_v21  ;;  %v9920_v3 = vsub.f32 %v21618_v4, %v24300_v62  ;;  %v21670_v34 = vsub.f32 %v14778_v11, %v21650_v44  ;;  %v14775_v62 = vld [vmem:[%s24092_s2 + $0x9e0] sm:$0xff]  ;;  %v21684_v11 = vsub.f32 %v14777_v36, %v21658_v40 }
 0xaa2   : > { %9801 = vmatpush.msra.mxu0 %v21433_v46  ;;  %10001 = vmatpush.msra.mxu3 %v21467_v35 }
 0xaa3   : > { %9892 = vmatpush.msra.mxu1 %v9891_v6  ;;  %9960 = vmatpush.msra.mxu2 %v21534_v5  ;;  %v14776_v6 = vld [vmem:[%s24092_s2 + $0x9e8] sm:$0xff]  ;;  %v9921_v55 = vand.u32 4294901760, %v9920_v3  ;;  %v24308_v18 = vand.u32 4294901760, %v21670_v34  ;;  %v24312_v42 = vand.u32 4294901760, %v21684_v11 }
 0xaa4   : > { %9803 = vmatpush.msra.mxu0 %v21453_v26  ;;  %10003 = vmatpush.msra.mxu3 %v21478_v49  ;;  %v21677_v39 = vand.u32 4294901760, %v14776_v6 }
 0xaa5   : > { %9898 = vmatpush.msra.mxu1 %v9897_v47  ;;  %9963 = vmatpush.msra.mxu2 %v21549_v51  ;;  %v9926_v47 = vsub.f32 %v21628_v16, %v24302_v32  ;;  %v21688_v32 = vand.u32 4294901760, %v14775_v62 }
 0xaa6   : > { %9805 = vmatpush.msra.mxu0 %v21467_v35  ;;  %10005 = vmatpush.msra.mxu3 %v21504_v13  ;;  %v21700_v36 = vsub.f32 %v14776_v6, %v21677_v39  ;;  %v10177_v6 = vsub.f32 %v21670_v34, %v24308_v18 }
 0xaa7   : > { %9904 = vmatpush.msra.mxu1 %v9903_v0  ;;  %9966 = vmatpush.msra.mxu2 %v21564_v15  ;;  %v14774_v0 = vld [vmem:[%s24092_s2 + $0x9d8] sm:$0xff]  ;;  %v21712_v14 = vsub.f32 %v14775_v62, %v21688_v32 }
 0xaa8   : > { %9807 = vmatpush.msra.mxu0 %v21478_v49  ;;  %10007 = vmatpush.msra.mxu3 %v21521_v43  ;;  %v21695_v3 = vand.u32 4294901760, %v14774_v0  ;;  %v24317_v62 = vand.u32 4294901760, %v21700_v36 }
 0xaa9   : > { %9910 = vmatpush.msra.mxu1 %v9909_v27  ;;  %9969 = vmatpush.msra.mxu2 %v21579_v38  ;;  %v9927_v27 = vand.u32 4294901760, %v9926_v47  ;;  %v14772_v47 = vld [vmem:[%s24092_s2 + $0x9c8] sm:$0xff]  ;;  %v24319_v29 = vand.u32 4294901760, %v21712_v14 }
 0xaaa   : > { %9809 = vmatpush.msra.mxu0 %v21504_v13  ;;  %10009 = vmatpush.msra.mxu3 %v21536_v50 }
 0xaab   : > { %9916 = vmatpush.msra.mxu1 %v9915_v54  ;;  %9972 = vmatpush.msra.mxu2 %v21594_v17  ;;  %v21704_v54 = vand.u32 4294901760, %v14773_v25 }
 0xaac   : > { %9811 = vmatpush.msra.mxu0 %v21521_v43  ;;  %10011 = vmatpush.msra.mxu3 %v21551_v22 }
 0xaad   : > { %9922 = vmatpush.msra.mxu1 %v9921_v55  ;;  %9975 = vmatpush.msra.mxu2 %v21606_v60  ;;  %v21719_v55 = vsub.f32 %v14774_v0, %v21695_v3  ;;  %v10183_v0 = vsub.f32 %v21684_v11, %v24312_v42  ;;  %v21735_v18 = vsub.f32 %v14773_v25, %v21704_v54  ;;  %v10178_v42 = vand.u32 4294901760, %v10177_v6 }
 0xaae   : > { %9813 = vmatpush.msra.mxu0 %v21536_v50  ;;  %10013 = vmatpush.msra.mxu3 %v21566_v59 }
 0xaaf   : > { %9928 = vmatpush.msra.mxu1 %v9927_v27  ;;  %9978 = vmatpush.msra.mxu2 %v21618_v4  ;;  %24704 = vst [vmem:[#allocation16_spill] sm:$0xff] %v21719_v55  ;;  %v21727_v27 = vand.u32 4294901760, %v14772_v47  ;;  %v24321_v25 = vand.u32 4294901760, %v21719_v55  ;;  %v10184_v6 = vand.u32 4294901760, %v10183_v0 }
 0xab0   : > { %9815 = vmatpush.msra.mxu0 %v21551_v22  ;;  %10015 = vmatpush.msra.mxu3 %v21581_v19  ;;  %24705 = vst [vmem:[#allocation29_spill] sm:$0xff] %v21735_v18 }
 0xab1   : > { %9930 = vmatmul.f32.vlgmr.msra.gmra.mxu1 %v20157_v1  ;;  %9981 = vmatpush.msra.mxu2 %v21628_v16  ;;  %v21757_v9 = vsub.f32 %v14772_v47, %v21727_v27  ;;  %v10195_v47 = vsub.f32 %v21712_v14, %v24319_v29  ;;  %v10201_v0 = vsub.f32 %v21719_v55, %v24321_v25 }
 0xab2   : > { %10097 = vmatpush.msrb.mxu1 %v21386_v37  ;;  %9817 = vmatpush.msra.mxu0 %v21566_v59  ;;  %v10189_v37 = vsub.f32 %v21700_v36, %v24317_v62  ;;  %v21773_v62 = vsub.f32 %v14771_v2, %v21743_v24 }
 0xab3   : > { %10017 = vmatpush.msra.mxu3 %v21596_v7  ;;  %9984 = vmatmul.f32.vlgmr.msra.gmra.mxu2 %v24703_v63 }
 0xab4   : > { %10099 = vmatpush.msrb.mxu1 %v21396_v56  ;;  %10134 = vmatpush.msrb.mxu2 %v21650_v44  ;;  %v14768_v56 = vld [vmem:[%s24092_s2 + $0x9a8] sm:$0xff]  ;;  %v10190_v29 = vand.u32 4294901760, %v10189_v37  ;;  %v21803_v37 = vsub.f32 %v14769_v12, %v21775_v28 }
 0xab5   : > { %9819 = vmatpush.msra.mxu0 %v21581_v19  ;;  %10019 = vmatpush.msra.mxu3 %v21608_v31  ;;  %v21790_v63 = vand.u32 4294901760, %v14768_v56 }
 0xab6   : > { %10023 = vmatmul.f32.vlgmr.msra.gmra.mxu3 %v24702_v30  ;;  %10101 = vmatpush.msrb.mxu1 %v21409_v58  ;;  %v14767_v58 = vld [vmem:[%s24092_s2 + $0x9a0] sm:$0xff]  ;;  %v14766_v30 = vld [vmem:[%s24092_s2 + $0x998] sm:$0xff] }
 0xab7   : > { %10136 = vmatpush.msrb.mxu2 %v21658_v40  ;;  %10179 = vmatpush.msrb.mxu3 %v10178_v42  ;;  %v24706_v42 = vand.u32 4294901760, %v21735_v18  ;;  %v21805_v2 = vand.u32 4294901760, %v14767_v58  ;;  %v21819_v45 = vsub.f32 %v14768_v56, %v21790_v63  ;;  %v21821_v55 = vand.u32 4294901760, %v14766_v30 }
 0xab8   : > { %9821 = vmatpush.msra.mxu0 %v21596_v7  ;;  %10103 = vmatpush.msrb.mxu1 %v21422_v41  ;;  %v10196_v41 = vand.u32 4294901760, %v10195_v47 }
 0xab9   : > { %10138 = vmatpush.msrb.mxu2 %v21677_v39  ;;  %10185 = vmatpush.msrb.mxu3 %v10184_v6  ;;  %v10207_v25 = vsub.f32 %v21735_v18, %v24706_v42  ;;  %v10202_v6 = vand.u32 4294901760, %v10201_v0  ;;  %v14765_v42 = vld [vmem:[%s24092_s2 + $0x990] sm:$0xff]  ;;  %v24707_v18 = vand.u32 4294901760, %v21407_v10  ;;  %v24709_v10 = vand.u32 4294901760, %v21420_v8 }
 0xaba   : > { %9823 = vmatpush.msra.mxu0 %v21608_v31  ;;  %10105 = vmatpush.msrb.mxu1 %v21433_v46  ;;  %v24708_v46 = vand.u32 4294901760, %v21757_v9  ;;  %v21832_v56 = vsub.f32 %v14767_v58, %v21805_v2  ;;  %v21834_v47 = vand.u32 4294901760, %v14765_v42  ;;  %v24711_v8 = vand.u32 4294901760, %v21431_v23 }
 0xabb   : > { %9829 = vmatmul.f32.vlgmr.msra.gmra.mxu0 %v20178_v33  ;;  %10140 = vmatpush.msrb.mxu2 %v21688_v32  ;;  %v10208_v0 = vand.u32 4294901760, %v10207_v25 }
 0xabc   : > { %10030 = vmatpush.msrb.mxu0 %v24707_v18  ;;  %10191 = vmatpush.msrb.mxu3 %v10190_v29  ;;  %v10213_v12 = vsub.f32 %v21757_v9, %v24708_v46  ;;  %v24710_v29 = vand.u32 4294901760, %v21773_v62  ;;  %v10230_v46 = vand.u32 4294901760, %v21803_v37 }
 0xabd   : > { %10107 = vmatpush.msrb.mxu1 %v21453_v26  ;;  %10142 = vmatpush.msrb.mxu2 %v21695_v3  ;;  %v14764_v26 = vld [vmem:[%s24092_s2 + $0x988] sm:$0xff] }
 0xabe   : > { %10034 = vmatpush.msrb.mxu0 %v24709_v10  ;;  %10197 = vmatpush.msrb.mxu3 %v10196_v41  ;;  %v10219_v18 = vsub.f32 %v21773_v62, %v24710_v29  ;;  %v10214_v25 = vand.u32 4294901760, %v10213_v12  ;;  %v24712_v41 = vand.u32 4294901760, %v21788_v20  ;;  %v10236_v10 = vand.u32 4294901760, %v21819_v45 }
 0xabf   : > { %10109 = vmatpush.msrb.mxu1 %v21467_v35  ;;  %10144 = vmatpush.msrb.mxu2 %v21704_v54  ;;  %v21848_v29 = vsub.f32 %v14766_v30, %v21821_v55  ;;  %v14763_v35 = vld [vmem:[%s24092_s2 + $0x980] sm:$0xff]  ;;  %v21855_v23 = vand.u32 4294901760, %v14764_v26  ;;  %v10231_v30 = vsub.f32 %v21803_v37, %v10230_v46 }
 0xac0   : > { %10038 = vmatpush.msrb.mxu0 %v24711_v8  ;;  %10203 = vmatpush.msrb.mxu3 %v10202_v6  ;;  %v10225_v58 = vsub.f32 %v21788_v20, %v24712_v41  ;;  %v24713_v6 = vand.u32 4294901760, %v21448_v48  ;;  %v10220_v12 = vand.u32 4294901760, %v10219_v18  ;;  %v10242_v8 = vand.u32 4294901760, %v21832_v56 }
 0xac1   : > { %10111 = vmatpush.msrb.mxu1 %v21478_v49  ;;  %10146 = vmatpush.msrb.mxu2 %v21727_v27  ;;  %v21864_v41 = vsub.f32 %v14765_v42, %v21834_v47  ;;  %v21868_v49 = vand.u32 4294901760, %v14763_v35  ;;  %v24714_v48 = vand.u32 4294901760, %v21465_v57  ;;  %v10237_v18 = vsub.f32 %v21819_v45, %v10236_v10 }
 0xac2   : > { %10042 = vmatpush.msrb.mxu0 %v24713_v6  ;;  %10209 = vmatpush.msrb.mxu3 %v10208_v0  ;;  %v10226_v0 = vand.u32 4294901760, %v10225_v58  ;;  %v10248_v6 = vand.u32 4294901760, %v21848_v29  ;;  %v24715_v42 = vand.u32 4294901760, %v21487_v53  ;;  %v10232_v57 = vand.u32 4294901760, %v10231_v30 }
 0xac3   : > { %10113 = vmatpush.msrb.mxu1 %v21504_v13  ;;  %10148 = vmatpush.msrb.mxu2 %v21743_v24  ;;  %v21879_v13 = vsub.f32 %v14764_v26, %v21855_v23  ;;  %v10254_v58 = vand.u32 4294901760, %v21864_v41  ;;  %v24716_v26 = vand.u32 4294901760, %v21496_v61  ;;  %v10238_v53 = vand.u32 4294901760, %v10237_v18 }
 0xac4   : > { %10046 = vmatpush.msrb.mxu0 %v24714_v48  ;;  %10215 = vmatpush.msrb.mxu3 %v10214_v25  ;;  %v10243_v25 = vsub.f32 %v21832_v56, %v10242_v8  ;;  %v24717_v30 = vand.u32 4294901760, %v21512_v21  ;;  %v24719_v18 = vand.u32 4294901760, %v21549_v51 }
 0xac5   : > { %10115 = vmatpush.msrb.mxu1 %v21521_v43  ;;  %10150 = vmatpush.msrb.mxu2 %v21759_v52  ;;  %v21890_v43 = vsub.f32 %v14763_v35, %v21868_v49  ;;  %v10255_v61 = vsub.f32 %v21864_v41, %v10254_v58 }
 0xac6   : > { %10050 = vmatpush.msrb.mxu0 %v24715_v42  ;;  %10221 = vmatpush.msrb.mxu3 %v10220_v12  ;;  %v10249_v12 = vsub.f32 %v21848_v29, %v10248_v6  ;;  %v10244_v35 = vand.u32 4294901760, %v10243_v25  ;;  %v24721_v42 = vand.u32 4294901760, %v21579_v38  ;;  %v24724_v38 = vand.u32 4294901760, %v21606_v60 }
 0xac7   : > { %10117 = vmatpush.msrb.mxu1 %v21536_v50  ;;  %10152 = vmatpush.msrb.mxu2 %v21775_v28  ;;  %v10260_v50 = vand.u32 4294901760, %v21879_v13  ;;  %v10266_v48 = vand.u32 4294901760, %v21890_v43  ;;  %v24727_v25 = vand.u32 4294901760, %v21700_v36  ;;  %v24728_v60 = vand.u32 4294901760, %v21628_v16  ;;  %v14794_v16 = vld [vmem:[%s24092_s2 + $0xa78] sm:$0xff] }
 0xac8   : > { %10054 = vmatpush.msrb.mxu0 %v24716_v26  ;;  %10227 = vmatpush.msrb.mxu3 %v10226_v0  ;;  %v10250_v0 = vand.u32 4294901760, %v10249_v12  ;;  %v24729_v26 = vand.u32 4294901760, %v21712_v14 }
 0xac9   : > { %10119 = vmatpush.msrb.mxu1 %v21551_v22  ;;  %10154 = vmatpush.msrb.mxu2 %v21790_v63  ;;  %v24718_v22 = vand.u32 4294901760, %v21534_v5  ;;  %v10261_v21 = vsub.f32 %v21879_v13, %v10260_v50  ;;  %v10267_v5 = vsub.f32 %v21890_v43, %v10266_v48 }
 0xaca   : > { %10058 = vmatpush.msrb.mxu0 %v24717_v30  ;;  %10233 = vmatpush.msrb.mxu3 %v10232_v57  ;;  %v24725_v57 = vand.u32 4294901760, %v21684_v11 }
 0xacb   : > { %10121 = vmatpush.msrb.mxu1 %v21566_v59  ;;  %10156 = vmatpush.msrb.mxu2 %v21805_v2  ;;  %v10256_v59 = vand.u32 4294901760, %v10255_v61  ;;  %v10262_v51 = vand.u32 4294901760, %v10261_v21  ;;  %v14789_v21 = vld [vmem:[%s24092_s2 + $0xa50] sm:$0xff] }
 0xacc   : > { %10062 = vmatpush.msrb.mxu0 %v24718_v22  ;;  %10239 = vmatpush.msrb.mxu3 %v10238_v53 }
 0xacd   : > { %10123 = vmatpush.msrb.mxu1 %v21581_v19  ;;  %10158 = vmatpush.msrb.mxu2 %v21821_v55  ;;  %v24720_v19 = vand.u32 4294901760, %v21564_v15  ;;  %v24722_v15 = vand.u32 4294901760, %v21594_v17  ;;  %v24726_v17 = vand.u32 4294901760, %v21618_v4  ;;  %v24730_v4 = vld [vmem:[#allocation16_spill] sm:$0xff] }
 0xace   : > { %10066 = vmatpush.msrb.mxu0 %v24719_v18  ;;  %10245 = vmatpush.msrb.mxu3 %v10244_v35  ;;  %v14790_v35 = vld [vmem:[%s24092_s2 + $0xa58] sm:$0xff]  ;;  %v22041_v18 = vand.u32 4294901760, %v14789_v21 }
 0xacf   : > { %10125 = vmatpush.msrb.mxu1 %v21596_v7  ;;  %10160 = vmatpush.msrb.mxu2 %v21834_v47  ;;  %v10268_v7 = vand.u32 4294901760, %v10267_v5 }
 0xad0   : > { %10070 = vmatpush.msrb.mxu0 %v24720_v19  ;;  %10251 = vmatpush.msrb.mxu3 %v10250_v0  ;;  %v14786_v19 = vld [vmem:[%s24092_s2 + $0xa38] sm:$0xff] }
 0xad1   : > { %10127 = vmatpush.msrb.mxu1 %v21608_v31  ;;  %10162 = vmatpush.msrb.mxu2 %v21855_v23  ;;  %v24723_v31 = vand.u32 4294901760, %v21670_v34 }
 0xad2   : > { %10074 = vmatpush.msrb.mxu0 %v24721_v42  ;;  %10257 = vmatpush.msrb.mxu3 %v10256_v59 }
 0xad3   : > { %10129 = vmatmul.f32.vlgmr.msrb.gmra.mxu1 %v20157_v1  ;;  %10164 = vmatpush.msrb.mxu2 %v21868_v49 }
 0xad4   : > { %10330 = vmatpush.msra.mxu1 %v21650_v44  ;;  %10078 = vmatpush.msrb.mxu0 %v24722_v15 }
 0xad5   : > { %10263 = vmatpush.msrb.mxu3 %v10262_v51  ;;  %10170 = vmatmul.f32.vlgmr.msrb.gmra.mxu2 %v20178_v33 }
 0xad6   : > { %10332 = vmatpush.msra.mxu1 %v21658_v40  ;;  %10371 = vmatpush.msra.mxu2 %v24723_v31  ;;  %v14784_v31 = vld [vmem:[%s24092_s2 + $0xa28] sm:$0xff] }
 0xad7   : > { %10082 = vmatpush.msrb.mxu0 %v24724_v38  ;;  %10269 = vmatpush.msrb.mxu3 %v10268_v7  ;;  %v24737_v38 = vld [vmem:[#allocation24_spill] sm:$0xff] }
 0xad8   : > { %10271 = vmatmul.f32.vlgmr.msrb.gmra.mxu3 %v20157_v1  ;;  %10334 = vmatpush.msra.mxu1 %v21677_v39 }
 0xad9   : > { %10375 = vmatpush.msra.mxu2 %v24725_v57  ;;  %10438 = vmatpush.msra.mxu3 %v21650_v44  ;;  %v24731_v44 = vand.u32 4294901760, %v24730_v4 }
 0xada   : > { %10086 = vmatpush.msrb.mxu0 %v24726_v17  ;;  %10336 = vmatpush.msra.mxu1 %v21688_v32 }
 0xadb   : > { %10379 = vmatpush.msra.mxu2 %v24727_v25  ;;  %10440 = vmatpush.msra.mxu3 %v21658_v40  ;;  %v24732_v40 = vld [vmem:[#allocation29_spill] sm:$0xff] }
 0xadc   : > { %10090 = vmatpush.msrb.mxu0 %v24728_v60  ;;  %10338 = vmatpush.msra.mxu1 %v21695_v3  ;;  %v24733_v53 = vand.u32 4294901760, %v24732_v40  ;;  %v14783_v25 = vld [vmem:[%s24092_s2 + $0xa20] sm:$0xff]  ;;  %v22124_v60 = vand.u32 4294901760, %v14784_v31 }
 0xadd   : > { %10092 = vmatmul.f32.vlgmr.msrb.gmra.mxu0 %v20157_v1  ;;  %10383 = vmatpush.msra.mxu2 %v24729_v26 }
 0xade   : > { %10277 = vmatpush.msra.mxu0 %v21670_v34  ;;  %10442 = vmatpush.msra.mxu3 %v21677_v39  ;;  %v14793_v39 = vld [vmem:[%s24092_s2 + $0xa70] sm:$0xff]  ;;  %v21974_v34 = vand.u32 4294901760, %v14794_v16 }
 0xadf   : > { %10340 = vmatpush.msra.mxu1 %v21704_v54  ;;  %10387 = vmatpush.msra.mxu2 %v24731_v44  ;;  %v21984_v12 = vand.u32 4294901760, %v14793_v39 }
 0xae0   : > { %10280 = vmatpush.msra.mxu0 %v21684_v11  ;;  %10444 = vmatpush.msra.mxu3 %v21688_v32  ;;  %v24734_v11 = vand.u32 4294901760, %v21757_v9  ;;  %v14792_v32 = vld [vmem:[%s24092_s2 + $0xa68] sm:$0xff]  ;;  %v21995_v30 = vsub.f32 %v14794_v16, %v21974_v34  ;;  %v22139_v16 = vand.u32 4294901760, %v14783_v25 }
 0xae1   : > { %10342 = vmatpush.msra.mxu1 %v21727_v27  ;;  %10391 = vmatpush.msra.mxu2 %v24733_v53 }
 0xae2   : > { %10283 = vmatpush.msra.mxu0 %v21700_v36  ;;  %10446 = vmatpush.msra.mxu3 %v21695_v3  ;;  %v24735_v3 = vand.u32 4294901760, %v21773_v62  ;;  %v14791_v36 = vld [vmem:[%s24092_s2 + $0xa60] sm:$0xff]  ;;  %v24345_v22 = vand.u32 4294901760, %v21995_v30 }
 0xae3   : > { %10344 = vmatpush.msra.mxu1 %v21743_v24  ;;  %10395 = vmatpush.msra.mxu2 %v24734_v11  ;;  %v22010_v61 = vand.u32 4294901760, %v14791_v36 }
 0xae4   : > { %10286 = vmatpush.msra.mxu0 %v21712_v14  ;;  %10448 = vmatpush.msra.mxu3 %v21704_v54  ;;  %v21997_v14 = vand.u32 4294901760, %v14792_v32  ;;  %v24736_v54 = vand.u32 4294901760, %v21788_v20 }
 0xae5   : > { %10346 = vmatpush.msra.mxu1 %v21759_v52  ;;  %10399 = vmatpush.msra.mxu2 %v24735_v3  ;;  %v14780_v3 = vld [vmem:[%s24092_s2 + $0xa08] sm:$0xff] }
 0xae6   : > { %10289 = vmatpush.msra.mxu0 %v24730_v4  ;;  %10450 = vmatpush.msra.mxu3 %v21727_v27  ;;  %v22008_v27 = vsub.f32 %v14793_v39, %v21984_v12  ;;  %v22019_v0 = vsub.f32 %v14792_v32, %v21997_v14  ;;  %v14782_v4 = vld [vmem:[%s24092_s2 + $0xa18] sm:$0xff]  ;;  %v22152_v39 = vsub.f32 %v14784_v31, %v22124_v60 }
 0xae7   : > { %10348 = vmatpush.msra.mxu1 %v21775_v28  ;;  %10403 = vmatpush.msra.mxu2 %v24736_v54  ;;  %v22154_v11 = vand.u32 4294901760, %v14782_v4 }
 0xae8   : > { %10292 = vmatpush.msra.mxu0 %v24732_v40  ;;  %10452 = vmatpush.msra.mxu3 %v21743_v24  ;;  %v22021_v24 = vand.u32 4294901760, %v14790_v35 }
 0xae9   : > { %10350 = vmatpush.msra.mxu1 %v21790_v63  ;;  %10407 = vmatpush.msra.mxu2 %v10230_v46  ;;  %v22036_v46 = vsub.f32 %v14791_v36, %v22010_v61 }
 0xaea   : > { %10295 = vmatpush.msra.mxu0 %v21757_v9  ;;  %10454 = vmatpush.msra.mxu3 %v21759_v52  ;;  %v14788_v52 = vld [vmem:[%s24092_s2 + $0xa48] sm:$0xff]  ;;  %v24343_v9 = vand.u32 4294901760, %v22008_v27  ;;  %v22053_v59 = vsub.f32 %v14790_v35, %v22021_v24  ;;  %v22167_v35 = vsub.f32 %v14783_v25, %v22139_v16 }
 0xaeb   : > { %10352 = vmatpush.msra.mxu1 %v21805_v2  ;;  %10411 = vmatpush.msra.mxu2 %v10236_v10  ;;  %v14787_v10 = vld [vmem:[%s24092_s2 + $0xa40] sm:$0xff] }
 0xaec   : > { %10298 = vmatpush.msra.mxu0 %v21773_v62  ;;  %10456 = vmatpush.msra.mxu3 %v21775_v28  ;;  %v10518_v28 = vsub.f32 %v21995_v30, %v24345_v22  ;;  %v24342_v62 = vand.u32 4294901760, %v22019_v0  ;;  %v22066_v5 = vand.u32 4294901760, %v14787_v10  ;;  %v24340_v51 = vand.u32 4294901760, %v22053_v59 }
 0xaed   : > { %10354 = vmatpush.msra.mxu1 %v21821_v55  ;;  %10415 = vmatpush.msra.mxu2 %v10242_v8  ;;  %v22055_v8 = vand.u32 4294901760, %v14788_v52 }
 0xaee   : > { %10301 = vmatpush.msra.mxu0 %v21788_v20  ;;  %10458 = vmatpush.msra.mxu3 %v21790_v63  ;;  %v10524_v20 = vsub.f32 %v22008_v27, %v24343_v9  ;;  %v24341_v63 = vand.u32 4294901760, %v22036_v46  ;;  %v22100_v15 = vsub.f32 %v14787_v10, %v22066_v5  ;;  %v10542_v57 = vsub.f32 %v22053_v59, %v24340_v51  ;;  %v24738_v10 = vld [vmem:[#allocation14_spill] sm:$0xff]  ;;  %v14801_v51 = vld [vmem:[%s24092_s2 + $0xab0] sm:$0xff] }
 0xaef   : > { %10356 = vmatpush.msra.mxu1 %v21834_v47  ;;  %10419 = vmatpush.msra.mxu2 %v10248_v6  ;;  %v10530_v6 = vsub.f32 %v22019_v0, %v24342_v62  ;;  %v22084_v42 = vsub.f32 %v14788_v52, %v22055_v8  ;;  %v14779_v52 = vld [vmem:[%s24092_s2 + $0xa00] sm:$0xff]  ;;  %v22363_v22 = vand.u32 4294901760, %v14801_v51 }
 0xaf0   : > { %10304 = vmatpush.msra.mxu0 %v21803_v37  ;;  %10460 = vmatpush.msra.mxu3 %v21805_v2  ;;  %v22075_v37 = vsub.f32 %v14789_v21, %v22041_v18  ;;  %v10519_v2 = vand.u32 4294901760, %v10518_v28  ;;  %v10536_v7 = vsub.f32 %v22036_v46, %v24341_v63  ;;  %v24336_v26 = vand.u32 4294901760, %v22100_v15 }
 0xaf1   : > { %10358 = vmatpush.msra.mxu1 %v21855_v23  ;;  %10423 = vmatpush.msra.mxu2 %v10254_v58  ;;  %v14785_v58 = vld [vmem:[%s24092_s2 + $0xa30] sm:$0xff]  ;;  %v24337_v17 = vand.u32 4294901760, %v22084_v42  ;;  %v10543_v40 = vand.u32 4294901760, %v10542_v57 }
 0xaf2   : > { %10307 = vmatpush.msra.mxu0 %v21819_v45  ;;  %10462 = vmatpush.msra.mxu3 %v21821_v55  ;;  %v22092_v55 = vand.u32 4294901760, %v14786_v19  ;;  %v10525_v45 = vand.u32 4294901760, %v10524_v20  ;;  %v10560_v32 = vsub.f32 %v22100_v15, %v24336_v26  ;;  %v24332_v20 = vand.u32 4294901760, %v22152_v39  ;;  %v14802_v26 = vld [vmem:[%s24092_s2 + $0xab8] sm:$0xff] }
 0xaf3   : > { %10360 = vmatpush.msra.mxu1 %v21868_v49  ;;  %10427 = vmatpush.msra.mxu2 %v10260_v50  ;;  %v10531_v50 = vand.u32 4294901760, %v10530_v6  ;;  %v10554_v53 = vsub.f32 %v22084_v42, %v24337_v17  ;;  %v22347_v62 = vand.u32 4294901760, %v14802_v26 }
 0xaf4   : > { %10310 = vmatpush.msra.mxu0 %v21832_v56  ;;  %10464 = vmatpush.msra.mxu3 %v21834_v47  ;;  %v24338_v56 = vand.u32 4294901760, %v22075_v37  ;;  %v22109_v47 = vand.u32 4294901760, %v14785_v58 }
 0xaf5   : > { %10364 = vmatmul.f32.vlgmr.msra.gmra.mxu1 %v24737_v38  ;;  %10431 = vmatpush.msra.mxu2 %v10266_v48  ;;  %v22122_v48 = vsub.f32 %v14786_v19, %v22092_v55  ;;  %v10555_v21 = vand.u32 4294901760, %v10554_v53  ;;  %v22182_v19 = vsub.f32 %v14782_v4, %v22154_v11  ;;  %v14810_v53 = vld [vmem:[%s24092_s2 + $0xaf8] sm:$0xff]  ;;  %v22376_v9 = vsub.f32 %v14802_v26, %v22347_v62 }
 0xaf6   : > { %10520 = vmatpush.msrb.mxu1 %v10519_v2  ;;  %10313 = vmatpush.msra.mxu0 %v21848_v29  ;;  %v10537_v29 = vand.u32 4294901760, %v10536_v7  ;;  %v22137_v44 = vsub.f32 %v14785_v58, %v22109_v47  ;;  %v10561_v2 = vand.u32 4294901760, %v10560_v32  ;;  %v24331_v58 = vand.u32 4294901760, %v22167_v35 }
 0xaf7   : > { %10466 = vmatpush.msra.mxu3 %v21855_v23  ;;  %10433 = vmatmul.f32.vlgmr.msra.gmra.mxu2 %v20157_v1  ;;  %v10548_v23 = vsub.f32 %v22075_v37, %v24338_v56  ;;  %v22196_v7 = vand.u32 4294901760, %v14779_v52  ;;  %v24330_v57 = vand.u32 4294901760, %v22182_v19 }
 0xaf8   : > { %10526 = vmatpush.msrb.mxu1 %v10525_v45  ;;  %10618 = vmatpush.msrb.mxu2 %v21995_v30  ;;  %v24333_v54 = vand.u32 4294901760, %v22137_v44  ;;  %v10584_v4 = vsub.f32 %v22167_v35, %v24331_v58 }
 0xaf9   : > { %10316 = vmatpush.msra.mxu0 %v21864_v41  ;;  %10468 = vmatpush.msra.mxu3 %v21868_v49  ;;  %v14781_v41 = vld [vmem:[%s24092_s2 + $0xa10] sm:$0xff]  ;;  %v24334_v49 = vand.u32 4294901760, %v22122_v48  ;;  %v10549_v36 = vand.u32 4294901760, %v10548_v23  ;;  %v10590_v32 = vsub.f32 %v22182_v19, %v24330_v57 }
 0xafa   : > { %10470 = vmatmul.f32.vlgmr.msra.gmra.mxu3 %v20157_v1  ;;  %10532 = vmatpush.msrb.mxu1 %v10531_v50  ;;  %v10572_v6 = vsub.f32 %v22137_v44, %v24333_v54  ;;  %v10578_v50 = vsub.f32 %v22152_v39, %v24332_v20  ;;  %v14805_v57 = vld [vmem:[%s24092_s2 + $0xad0] sm:$0xff] }
 0xafb   : > { %10621 = vmatpush.msrb.mxu2 %v22008_v27  ;;  %10671 = vmatpush.msrb.mxu3 %v21974_v34  ;;  %v10566_v28 = vsub.f32 %v22122_v48, %v24334_v49  ;;  %v14803_v49 = vld [vmem:[%s24092_s2 + $0xac0] sm:$0xff] }
 0xafc   : > { %10319 = vmatpush.msra.mxu0 %v21879_v13  ;;  %10538 = vmatpush.msrb.mxu1 %v10537_v29  ;;  %v22169_v13 = vand.u32 4294901760, %v14781_v41  ;;  %v10573_v29 = vand.u32 4294901760, %v10572_v6  ;;  %v10591_v6 = vand.u32 4294901760, %v10590_v32  ;;  %v22331_v56 = vand.u32 4294901760, %v14803_v49 }
 0xafd   : > { %10624 = vmatpush.msrb.mxu2 %v22019_v0  ;;  %10673 = vmatpush.msrb.mxu3 %v21984_v12  ;;  %v10567_v31 = vand.u32 4294901760, %v10566_v28 }
 0xafe   : > { %10322 = vmatpush.msra.mxu0 %v21890_v43  ;;  %10544 = vmatpush.msrb.mxu1 %v10543_v40  ;;  %v22184_v43 = vand.u32 4294901760, %v14780_v3  ;;  %v22194_v45 = vsub.f32 %v14781_v41, %v22169_v13  ;;  %v22216_v40 = vsub.f32 %v14779_v52, %v22196_v7  ;;  %v10579_v41 = vand.u32 4294901760, %v10578_v50 }
 0xaff   : > { %10325 = vmatmul.f32.vlgmr.msra.gmra.mxu0 %v24738_v10  ;;  %10627 = vmatpush.msrb.mxu2 %v22036_v46 }
 0xb00   : > { %10475 = vmatpush.msrb.mxu0 %v21974_v34  ;;  %10675 = vmatpush.msrb.mxu3 %v21997_v14  ;;  %v22206_v25 = vsub.f32 %v14780_v3, %v22184_v43  ;;  %v24328_v23 = vand.u32 4294901760, %v22194_v45  ;;  %v24329_v28 = vand.u32 4294901760, %v22216_v40 }
 0xb01   : > { %10550 = vmatpush.msrb.mxu1 %v10549_v36  ;;  %10630 = vmatpush.msrb.mxu2 %v22053_v59  ;;  %v14809_v36 = vld [vmem:[%s24092_s2 + $0xaf0] sm:$0xff] }
 0xb02   : > { %10477 = vmatpush.msrb.mxu0 %v21984_v12  ;;  %10677 = vmatpush.msrb.mxu3 %v22010_v61  ;;  %v24327_v3 = vand.u32 4294901760, %v22206_v25  ;;  %v10596_v52 = vsub.f32 %v22194_v45, %v24328_v23  ;;  %v22246_v50 = vand.u32 4294901760, %v14809_v36 }
 0xb03   : > { %10556 = vmatpush.msrb.mxu1 %v10555_v21  ;;  %10633 = vmatpush.msrb.mxu2 %v22075_v37  ;;  %v10585_v21 = vand.u32 4294901760, %v10584_v4 }
 0xb04   : > { %10479 = vmatpush.msrb.mxu0 %v21997_v14  ;;  %10679 = vmatpush.msrb.mxu3 %v22021_v24  ;;  %v10597_v4 = vand.u32 4294901760, %v10596_v52 }
 0xb05   : > { %10562 = vmatpush.msrb.mxu1 %v10561_v2  ;;  %10636 = vmatpush.msrb.mxu2 %v22084_v42  ;;  %v22238_v2 = vand.u32 4294901760, %v14810_v53 }
 0xb06   : > { %10481 = vmatpush.msrb.mxu0 %v22010_v61  ;;  %10681 = vmatpush.msrb.mxu3 %v22041_v18 }
 0xb07   : > { %10568 = vmatpush.msrb.mxu1 %v10567_v31  ;;  %10639 = vmatpush.msrb.mxu2 %v22100_v15  ;;  %v10602_v31 = vsub.f32 %v22206_v25, %v24327_v3  ;;  %v22258_v32 = vsub.f32 %v14810_v53, %v22238_v2  ;;  %v14807_v3 = vld [vmem:[%s24092_s2 + $0xae0] sm:$0xff]  ;;  %v22272_v53 = vsub.f32 %v14809_v36, %v22246_v50 }
 0xb08   : > { %10483 = vmatpush.msrb.mxu0 %v22021_v24  ;;  %10683 = vmatpush.msrb.mxu3 %v22055_v8 }
 0xb09   : > { %10574 = vmatpush.msrb.mxu1 %v10573_v29  ;;  %10642 = vmatpush.msrb.mxu2 %v22122_v48  ;;  %v14808_v29 = vld [vmem:[%s24092_s2 + $0xae8] sm:$0xff]  ;;  %v10603_v52 = vand.u32 4294901760, %v10602_v31  ;;  %v24335_v58 = vand.u32 4294901760, %v22258_v32  ;;  %v24339_v20 = vand.u32 4294901760, %v22272_v53 }
 0xb0a   : > { %10485 = vmatpush.msrb.mxu0 %v22041_v18  ;;  %10685 = vmatpush.msrb.mxu3 %v22066_v5  ;;  %v22265_v23 = vand.u32 4294901760, %v14808_v29 }
 0xb0b   : > { %10580 = vmatpush.msrb.mxu1 %v10579_v41  ;;  %10645 = vmatpush.msrb.mxu2 %v22137_v44  ;;  %v10608_v41 = vsub.f32 %v22216_v40, %v24329_v28  ;;  %v22276_v28 = vand.u32 4294901760, %v14807_v3 }
 0xb0c   : > { %10487 = vmatpush.msrb.mxu0 %v22055_v8  ;;  %10687 = vmatpush.msrb.mxu3 %v22092_v55  ;;  %v22288_v36 = vsub.f32 %v14808_v29, %v22265_v23  ;;  %v10859_v29 = vsub.f32 %v22258_v32, %v24335_v58 }
 0xb0d   : > { %10586 = vmatpush.msrb.mxu1 %v10585_v21  ;;  %10648 = vmatpush.msrb.mxu2 %v22152_v39  ;;  %v14806_v21 = vld [vmem:[%s24092_s2 + $0xad8] sm:$0xff]  ;;  %v22300_v54 = vsub.f32 %v14807_v3, %v22276_v28 }
 0xb0e   : > { %10489 = vmatpush.msrb.mxu0 %v22066_v5  ;;  %10689 = vmatpush.msrb.mxu3 %v22109_v47  ;;  %v22283_v31 = vand.u32 4294901760, %v14806_v21  ;;  %v24344_v3 = vand.u32 4294901760, %v22288_v36 }
 0xb0f   : > { %10592 = vmatpush.msrb.mxu1 %v10591_v6  ;;  %10651 = vmatpush.msrb.mxu2 %v22167_v35  ;;  %v10609_v6 = vand.u32 4294901760, %v10608_v41  ;;  %v14804_v41 = vld [vmem:[%s24092_s2 + $0xac8] sm:$0xff]  ;;  %v24346_v17 = vand.u32 4294901760, %v22300_v54 }
 0xb10   : > { %10491 = vmatpush.msrb.mxu0 %v22092_v55  ;;  %10691 = vmatpush.msrb.mxu3 %v22124_v60 }
 0xb11   : > { %10598 = vmatpush.msrb.mxu1 %v10597_v4  ;;  %10654 = vmatpush.msrb.mxu2 %v22182_v19  ;;  %v22292_v4 = vand.u32 4294901760, %v14805_v57 }
 0xb12   : > { %10493 = vmatpush.msrb.mxu0 %v22109_v47  ;;  %10693 = vmatpush.msrb.mxu3 %v22139_v16 }
 0xb13   : > { %10604 = vmatpush.msrb.mxu1 %v10603_v52  ;;  %10657 = vmatpush.msrb.mxu2 %v22194_v45  ;;  %v22307_v52 = vsub.f32 %v14806_v21, %v22283_v31  ;;  %v10865_v21 = vsub.f32 %v22272_v53, %v24339_v20  ;;  %v22323_v58 = vsub.f32 %v14805_v57, %v22292_v4  ;;  %v10860_v20 = vand.u32 4294901760, %v10859_v29 }
 0xb14   : > { %10495 = vmatpush.msrb.mxu0 %v22124_v60  ;;  %10695 = vmatpush.msrb.mxu3 %v22154_v11 }
 0xb15   : > { %10610 = vmatpush.msrb.mxu1 %v10609_v6  ;;  %10660 = vmatpush.msrb.mxu2 %v22206_v25  ;;  %24739 = vst [vmem:[#allocation12_spill] sm:$0xff] %v22307_v52  ;;  %v22315_v6 = vand.u32 4294901760, %v14804_v41  ;;  %v24348_v57 = vand.u32 4294901760, %v22307_v52  ;;  %v10866_v29 = vand.u32 4294901760, %v10865_v21 }
 0xb16   : > { %10497 = vmatpush.msrb.mxu0 %v22139_v16  ;;  %10697 = vmatpush.msrb.mxu3 %v22169_v13  ;;  %24740 = vst [vmem:[#allocation19_spill] sm:$0xff] %v22323_v58 }
 0xb17   : > { %10612 = vmatmul.f32.vlgmr.msrb.gmra.mxu1 %v20157_v1  ;;  %10663 = vmatpush.msrb.mxu2 %v22216_v40  ;;  %v22345_v63 = vsub.f32 %v14804_v41, %v22315_v6  ;;  %v10877_v41 = vsub.f32 %v22300_v54, %v24346_v17  ;;  %v10883_v21 = vsub.f32 %v22307_v52, %v24348_v57 }
 0xb18   : > { %10779 = vmatpush.msra.mxu1 %v21974_v34  ;;  %10499 = vmatpush.msrb.mxu0 %v22154_v11  ;;  %v10871_v34 = vsub.f32 %v22288_v36, %v24344_v3  ;;  %v22361_v3 = vsub.f32 %v14803_v49, %v22331_v56 }
 0xb19   : > { %10699 = vmatpush.msrb.mxu3 %v22184_v43  ;;  %10666 = vmatmul.f32.vlgmr.msrb.gmra.mxu2 %v24738_v10 }
 0xb1a   : > { %10781 = vmatpush.msra.mxu1 %v21984_v12  ;;  %10816 = vmatpush.msra.mxu2 %v22238_v2  ;;  %v14800_v12 = vld [vmem:[%s24092_s2 + $0xaa8] sm:$0xff]  ;;  %v10872_v17 = vand.u32 4294901760, %v10871_v34  ;;  %v22391_v34 = vsub.f32 %v14801_v51, %v22363_v22 }
 0xb1b   : > { %10501 = vmatpush.msrb.mxu0 %v22169_v13  ;;  %10701 = vmatpush.msrb.mxu3 %v22196_v7  ;;  %v22378_v10 = vand.u32 4294901760, %v14800_v12 }
 0xb1c   : > { %10705 = vmatmul.f32.vlgmr.msrb.gmra.mxu3 %v24737_v38  ;;  %10783 = vmatpush.msra.mxu1 %v21997_v14  ;;  %v14799_v14 = vld [vmem:[%s24092_s2 + $0xaa0] sm:$0xff]  ;;  %v14798_v38 = vld [vmem:[%s24092_s2 + $0xa98] sm:$0xff] }
 0xb1d   : > { %10818 = vmatpush.msra.mxu2 %v22246_v50  ;;  %10861 = vmatpush.msra.mxu3 %v10860_v20  ;;  %v24741_v20 = vand.u32 4294901760, %v22323_v58  ;;  %v22393_v49 = vand.u32 4294901760, %v14799_v14  ;;  %v22407_v26 = vsub.f32 %v14800_v12, %v22378_v10  ;;  %v22409_v52 = vand.u32 4294901760, %v14798_v38 }
 0xb1e   : > { %10503 = vmatpush.msrb.mxu0 %v22184_v43  ;;  %10785 = vmatpush.msra.mxu1 %v22010_v61  ;;  %v10878_v61 = vand.u32 4294901760, %v10877_v41 }
 0xb1f   : > { %10820 = vmatpush.msra.mxu2 %v22265_v23  ;;  %10867 = vmatpush.msra.mxu3 %v10866_v29  ;;  %v10889_v57 = vsub.f32 %v22323_v58, %v24741_v20  ;;  %v10884_v29 = vand.u32 4294901760, %v10883_v21  ;;  %v14797_v20 = vld [vmem:[%s24092_s2 + $0xa90] sm:$0xff]  ;;  %v24742_v58 = vand.u32 4294901760, %v21995_v30  ;;  %v24744_v30 = vand.u32 4294901760, %v22008_v27 }
 0xb20   : > { %10505 = vmatpush.msrb.mxu0 %v22196_v7  ;;  %10787 = vmatpush.msra.mxu1 %v22021_v24  ;;  %v24743_v24 = vand.u32 4294901760, %v22345_v63  ;;  %v22420_v12 = vsub.f32 %v14799_v14, %v22393_v49  ;;  %v22422_v41 = vand.u32 4294901760, %v14797_v20  ;;  %v24746_v27 = vand.u32 4294901760, %v22019_v0 }
 0xb21   : > { %10511 = vmatmul.f32.vlgmr.msrb.gmra.mxu0 %v20178_v33  ;;  %10822 = vmatpush.msra.mxu2 %v22276_v28  ;;  %v10890_v21 = vand.u32 4294901760, %v10889_v57 }
 0xb22   : > { %10712 = vmatpush.msra.mxu0 %v24742_v58  ;;  %10873 = vmatpush.msra.mxu3 %v10872_v17  ;;  %v10895_v51 = vsub.f32 %v22345_v63, %v24743_v24  ;;  %v24745_v17 = vand.u32 4294901760, %v22361_v3  ;;  %v10912_v24 = vand.u32 4294901760, %v22391_v34 }
 0xb23   : > { %10789 = vmatpush.msra.mxu1 %v22041_v18  ;;  %10824 = vmatpush.msra.mxu2 %v22283_v31  ;;  %v14796_v18 = vld [vmem:[%s24092_s2 + $0xa88] sm:$0xff] }
 0xb24   : > { %10716 = vmatpush.msra.mxu0 %v24744_v30  ;;  %10879 = vmatpush.msra.mxu3 %v10878_v61  ;;  %v10901_v58 = vsub.f32 %v22361_v3, %v24745_v17  ;;  %v10896_v57 = vand.u32 4294901760, %v10895_v51  ;;  %v24747_v61 = vand.u32 4294901760, %v22376_v9  ;;  %v10918_v30 = vand.u32 4294901760, %v22407_v26 }
 0xb25   : > { %10791 = vmatpush.msra.mxu1 %v22055_v8  ;;  %10826 = vmatpush.msra.mxu2 %v22292_v4  ;;  %v22436_v17 = vsub.f32 %v14798_v38, %v22409_v52  ;;  %v14795_v8 = vld [vmem:[%s24092_s2 + $0xa80] sm:$0xff]  ;;  %v22443_v0 = vand.u32 4294901760, %v14796_v18  ;;  %v10913_v38 = vsub.f32 %v22391_v34, %v10912_v24 }
 0xb26   : > { %10720 = vmatpush.msra.mxu0 %v24746_v27  ;;  %10885 = vmatpush.msra.mxu3 %v10884_v29  ;;  %v10907_v14 = vsub.f32 %v22376_v9, %v24747_v61  ;;  %v24748_v29 = vand.u32 4294901760, %v22036_v46  ;;  %v10902_v51 = vand.u32 4294901760, %v10901_v58  ;;  %v10924_v27 = vand.u32 4294901760, %v22420_v12 }
 0xb27   : > { %10793 = vmatpush.msra.mxu1 %v22066_v5  ;;  %10828 = vmatpush.msra.mxu2 %v22315_v6  ;;  %v22452_v61 = vsub.f32 %v14797_v20, %v22422_v41  ;;  %v22456_v5 = vand.u32 4294901760, %v14795_v8  ;;  %v24749_v46 = vand.u32 4294901760, %v22053_v59  ;;  %v10919_v58 = vsub.f32 %v22407_v26, %v10918_v30 }
 0xb28   : > { %10724 = vmatpush.msra.mxu0 %v24748_v29  ;;  %10891 = vmatpush.msra.mxu3 %v10890_v21  ;;  %v10908_v21 = vand.u32 4294901760, %v10907_v14  ;;  %v10930_v29 = vand.u32 4294901760, %v22436_v17  ;;  %v24750_v20 = vand.u32 4294901760, %v22075_v37  ;;  %v10914_v59 = vand.u32 4294901760, %v10913_v38 }
 0xb29   : > { %10795 = vmatpush.msra.mxu1 %v22092_v55  ;;  %10830 = vmatpush.msra.mxu2 %v22331_v56  ;;  %v22467_v55 = vsub.f32 %v14796_v18, %v22443_v0  ;;  %v10936_v14 = vand.u32 4294901760, %v22452_v61  ;;  %v24751_v18 = vand.u32 4294901760, %v22084_v42  ;;  %v10920_v37 = vand.u32 4294901760, %v10919_v58 }
 0xb2a   : > { %10728 = vmatpush.msra.mxu0 %v24749_v46  ;;  %10897 = vmatpush.msra.mxu3 %v10896_v57  ;;  %v10925_v57 = vsub.f32 %v22420_v12, %v10924_v27  ;;  %v24752_v38 = vand.u32 4294901760, %v22100_v15  ;;  %v24754_v58 = vand.u32 4294901760, %v22137_v44 }
 0xb2b   : > { %10797 = vmatpush.msra.mxu1 %v22109_v47  ;;  %10832 = vmatpush.msra.mxu2 %v22347_v62  ;;  %v22478_v47 = vsub.f32 %v14795_v8, %v22456_v5  ;;  %v10937_v42 = vsub.f32 %v22452_v61, %v10936_v14 }
 0xb2c   : > { %10732 = vmatpush.msra.mxu0 %v24750_v20  ;;  %10903 = vmatpush.msra.mxu3 %v10902_v51  ;;  %v10931_v51 = vsub.f32 %v22436_v17, %v10930_v29  ;;  %v10926_v8 = vand.u32 4294901760, %v10925_v57  ;;  %v24756_v20 = vand.u32 4294901760, %v22167_v35  ;;  %v24759_v35 = vand.u32 4294901760, %v22194_v45 }
 0xb2d   : > { %10799 = vmatpush.msra.mxu1 %v22124_v60  ;;  %10834 = vmatpush.msra.mxu2 %v22363_v22  ;;  %v10942_v60 = vand.u32 4294901760, %v22467_v55  ;;  %v10948_v46 = vand.u32 4294901760, %v22478_v47  ;;  %v24762_v57 = vand.u32 4294901760, %v22288_v36  ;;  %v24763_v45 = vand.u32 4294901760, %v22216_v40  ;;  %v14826_v40 = vld [vmem:[%s24092_s2 + $0xb78] sm:$0xff] }
 0xb2e   : > { %10736 = vmatpush.msra.mxu0 %v24751_v18  ;;  %10909 = vmatpush.msra.mxu3 %v10908_v21  ;;  %v10932_v21 = vand.u32 4294901760, %v10931_v51  ;;  %v24764_v18 = vand.u32 4294901760, %v22300_v54 }
 0xb2f   : > { %10801 = vmatpush.msra.mxu1 %v22139_v16  ;;  %10836 = vmatpush.msra.mxu2 %v22378_v10  ;;  %v24753_v16 = vand.u32 4294901760, %v22122_v48  ;;  %v10943_v15 = vsub.f32 %v22467_v55, %v10942_v60  ;;  %v10949_v48 = vsub.f32 %v22478_v47, %v10948_v46 }
 0xb30   : > { %10740 = vmatpush.msra.mxu0 %v24752_v38  ;;  %10915 = vmatpush.msra.mxu3 %v10914_v59  ;;  %v24760_v59 = vand.u32 4294901760, %v22272_v53 }
 0xb31   : > { %10803 = vmatpush.msra.mxu1 %v22154_v11  ;;  %10838 = vmatpush.msra.mxu2 %v22393_v49  ;;  %v10938_v11 = vand.u32 4294901760, %v10937_v42  ;;  %v10944_v44 = vand.u32 4294901760, %v10943_v15  ;;  %v14821_v15 = vld [vmem:[%s24092_s2 + $0xb50] sm:$0xff] }
 0xb32   : > { %10744 = vmatpush.msra.mxu0 %v24753_v16  ;;  %10921 = vmatpush.msra.mxu3 %v10920_v37 }
 0xb33   : > { %10805 = vmatpush.msra.mxu1 %v22169_v13  ;;  %10840 = vmatpush.msra.mxu2 %v22409_v52  ;;  %v24755_v13 = vand.u32 4294901760, %v22152_v39  ;;  %v24757_v39 = vand.u32 4294901760, %v22182_v19  ;;  %v24761_v19 = vand.u32 4294901760, %v22206_v25  ;;  %v24765_v25 = vld [vmem:[#allocation12_spill] sm:$0xff] }
 0xb34   : > { %10748 = vmatpush.msra.mxu0 %v24754_v58  ;;  %10927 = vmatpush.msra.mxu3 %v10926_v8  ;;  %v14822_v8 = vld [vmem:[%s24092_s2 + $0xb58] sm:$0xff]  ;;  %v22629_v58 = vand.u32 4294901760, %v14821_v15 }
 0xb35   : > { %10807 = vmatpush.msra.mxu1 %v22184_v43  ;;  %10842 = vmatpush.msra.mxu2 %v22422_v41  ;;  %v10950_v43 = vand.u32 4294901760, %v10949_v48 }
 0xb36   : > { %10752 = vmatpush.msra.mxu0 %v24755_v13  ;;  %10933 = vmatpush.msra.mxu3 %v10932_v21  ;;  %v14818_v13 = vld [vmem:[%s24092_s2 + $0xb38] sm:$0xff] }
 0xb37   : > { %10809 = vmatpush.msra.mxu1 %v22196_v7  ;;  %10844 = vmatpush.msra.mxu2 %v22443_v0  ;;  %v24758_v7 = vand.u32 4294901760, %v22258_v32 }
 0xb38   : > { %10756 = vmatpush.msra.mxu0 %v24756_v20  ;;  %10939 = vmatpush.msra.mxu3 %v10938_v11 }
 0xb39   : > { %10811 = vmatmul.f32.vlgmr.msra.gmra.mxu1 %v20157_v1  ;;  %10846 = vmatpush.msra.mxu2 %v22456_v5 }
 0xb3a   : > { %11012 = vmatpush.msrb.mxu1 %v22238_v2  ;;  %10760 = vmatpush.msra.mxu0 %v24757_v39 }
 0xb3b   : > { %10945 = vmatpush.msra.mxu3 %v10944_v44  ;;  %10852 = vmatmul.f32.vlgmr.msra.gmra.mxu2 %v20178_v33 }
 0xb3c   : > { %11014 = vmatpush.msrb.mxu1 %v22246_v50  ;;  %11053 = vmatpush.msrb.mxu2 %v24758_v7 }
 0xb3d   : > { %10764 = vmatpush.msra.mxu0 %v24759_v35  ;;  %10951 = vmatpush.msra.mxu3 %v10950_v43  ;;  %v24772_v35 = vld [vmem:[#allocation24_spill] sm:$0xff] }
 0xb3e   : > { %10953 = vmatmul.f32.vlgmr.msra.gmra.mxu3 %v20157_v1  ;;  %11016 = vmatpush.msrb.mxu1 %v22265_v23 }
 0xb3f   : > { %11057 = vmatpush.msrb.mxu2 %v24760_v59  ;;  %11120 = vmatpush.msrb.mxu3 %v22238_v2  ;;  %v24766_v2 = vand.u32 4294901760, %v24765_v25 }
 0xb40   : > { %10768 = vmatpush.msra.mxu0 %v24761_v19  ;;  %11018 = vmatpush.msrb.mxu1 %v22276_v28 }
 0xb41   : > { %11061 = vmatpush.msrb.mxu2 %v24762_v57  ;;  %11122 = vmatpush.msrb.mxu3 %v22246_v50  ;;  %v24767_v50 = vld [vmem:[#allocation19_spill] sm:$0xff] }
 0xb42   : > { %10772 = vmatpush.msra.mxu0 %v24763_v45  ;;  %11020 = vmatpush.msrb.mxu1 %v22283_v31  ;;  %v24768_v37 = vand.u32 4294901760, %v24767_v50  ;;  %v14815_v45 = vld [vmem:[%s24092_s2 + $0xb20] sm:$0xff] }
 0xb43   : > { %10774 = vmatmul.f32.vlgmr.msra.gmra.mxu0 %v20157_v1  ;;  %11065 = vmatpush.msrb.mxu2 %v24764_v18 }
 0xb44   : > { %10959 = vmatpush.msrb.mxu0 %v22258_v32  ;;  %11124 = vmatpush.msrb.mxu3 %v22265_v23  ;;  %v14825_v23 = vld [vmem:[%s24092_s2 + $0xb70] sm:$0xff]  ;;  %v22562_v32 = vand.u32 4294901760, %v14826_v40 }
 0xb45   : > { %11022 = vmatpush.msrb.mxu1 %v22292_v4  ;;  %11069 = vmatpush.msrb.mxu2 %v24766_v2  ;;  %v22572_v51 = vand.u32 4294901760, %v14825_v23  ;;  %v14814_v2 = vld [vmem:[%s24092_s2 + $0xb18] sm:$0xff] }
 0xb46   : > { %10962 = vmatpush.msrb.mxu0 %v22272_v53  ;;  %11126 = vmatpush.msrb.mxu3 %v22276_v28  ;;  %v24769_v53 = vand.u32 4294901760, %v22345_v63  ;;  %v14824_v28 = vld [vmem:[%s24092_s2 + $0xb68] sm:$0xff]  ;;  %v22583_v38 = vsub.f32 %v14826_v40, %v22562_v32  ;;  %v22721_v40 = vpop.f32.mrf.mxu2 }
 0xb47   : > { %11024 = vmatpush.msrb.mxu1 %v22315_v6  ;;  %11073 = vmatpush.msrb.mxu2 %v24768_v37  ;;  %24773 = vst [vmem:[#allocation13_spill] sm:$0xff] %v22721_v40  ;;  %v22731_v37 = vand.u32 4294901760, %v14815_v45 }
 0xb48   : > { %10965 = vmatpush.msrb.mxu0 %v22288_v36  ;;  %11128 = vmatpush.msrb.mxu3 %v22283_v31  ;;  %v24770_v31 = vand.u32 4294901760, %v22361_v3  ;;  %v14823_v36 = vld [vmem:[%s24092_s2 + $0xb60] sm:$0xff]  ;;  %v24369_v16 = vand.u32 4294901760, %v22583_v38 }
 0xb49   : > { %11026 = vmatpush.msrb.mxu1 %v22331_v56  ;;  %11077 = vmatpush.msrb.mxu2 %v24769_v53  ;;  %v22598_v42 = vand.u32 4294901760, %v14823_v36 }
 0xb4a   : > { %10968 = vmatpush.msrb.mxu0 %v22300_v54  ;;  %11130 = vmatpush.msrb.mxu3 %v22292_v4  ;;  %v22585_v54 = vand.u32 4294901760, %v14824_v28  ;;  %v24771_v4 = vand.u32 4294901760, %v22376_v9 }
 0xb4b   : > { %11028 = vmatpush.msrb.mxu1 %v22347_v62  ;;  %11081 = vmatpush.msrb.mxu2 %v24770_v31 }
 0xb4c   : > { %10971 = vmatpush.msrb.mxu0 %v24765_v25  ;;  %11132 = vmatpush.msrb.mxu3 %v22315_v6  ;;  %v22596_v6 = vsub.f32 %v14825_v23, %v22572_v51  ;;  %v22607_v21 = vsub.f32 %v14824_v28, %v22585_v54  ;;  %v22733_v23 = vpop.f32.mrf.mxu1 }
 0xb4d   : > { %11030 = vmatpush.msrb.mxu1 %v22363_v22  ;;  %11085 = vmatpush.msrb.mxu2 %v24771_v4  ;;  %24774 = vst [vmem:[#allocation18_spill] sm:$0xff] %v22733_v23 }
 0xb4e   : > { %10974 = vmatpush.msrb.mxu0 %v24767_v50  ;;  %11134 = vmatpush.msrb.mxu3 %v22331_v56  ;;  %v22609_v56 = vand.u32 4294901760, %v14822_v8 }
 0xb4f   : > { %11032 = vmatpush.msrb.mxu1 %v22378_v10  ;;  %11089 = vmatpush.msrb.mxu2 %v10912_v24  ;;  %v22624_v24 = vsub.f32 %v14823_v36, %v22598_v42  ;;  %v22748_v36 = vand.u32 4294901760, %v14814_v2 }
 0xb50   : > { %10977 = vmatpush.msrb.mxu0 %v22345_v63  ;;  %11136 = vmatpush.msrb.mxu3 %v22347_v62  ;;  %v14820_v62 = vld [vmem:[%s24092_s2 + $0xb48] sm:$0xff]  ;;  %v24368_v63 = vand.u32 4294901760, %v22596_v6  ;;  %v22641_v11 = vsub.f32 %v14822_v8, %v22609_v56 }
 0xb51   : > { %11034 = vmatpush.msrb.mxu1 %v22393_v49  ;;  %11093 = vmatpush.msrb.mxu2 %v10918_v30  ;;  %v14819_v30 = vld [vmem:[%s24092_s2 + $0xb40] sm:$0xff]  ;;  %v14812_v8 = vld [vmem:[%s24092_s2 + $0xb08] sm:$0xff] }
 0xb52   : > { %10980 = vmatpush.msrb.mxu0 %v22361_v3  ;;  %11138 = vmatpush.msrb.mxu3 %v22363_v22  ;;  %v11200_v22 = vsub.f32 %v22583_v38, %v24369_v16  ;;  %v24366_v3 = vand.u32 4294901760, %v22607_v21  ;;  %v22654_v48 = vand.u32 4294901760, %v14819_v30  ;;  %v24363_v44 = vand.u32 4294901760, %v22641_v11 }
 0xb53   : > { %11036 = vmatpush.msrb.mxu1 %v22409_v52  ;;  %11097 = vmatpush.msrb.mxu2 %v10924_v27  ;;  %v22643_v27 = vand.u32 4294901760, %v14820_v62 }
 0xb54   : > { %10983 = vmatpush.msrb.mxu0 %v22376_v9  ;;  %11140 = vmatpush.msrb.mxu3 %v22378_v10  ;;  %v11206_v9 = vsub.f32 %v22596_v6, %v24368_v63  ;;  %v24365_v10 = vand.u32 4294901760, %v22624_v24  ;;  %v22690_v7 = vsub.f32 %v14819_v30, %v22654_v48  ;;  %v11224_v19 = vsub.f32 %v22641_v11, %v24363_v44 }
 0xb55   : > { %11038 = vmatpush.msrb.mxu1 %v22422_v41  ;;  %11101 = vmatpush.msrb.mxu2 %v10930_v29  ;;  %v11212_v29 = vsub.f32 %v22607_v21, %v24366_v3  ;;  %v22672_v20 = vsub.f32 %v14820_v62, %v22643_v27 }
 0xb56   : > { %10986 = vmatpush.msrb.mxu0 %v22391_v34  ;;  %11142 = vmatpush.msrb.mxu3 %v22393_v49  ;;  %v22663_v34 = vsub.f32 %v14821_v15, %v22629_v58  ;;  %v11201_v49 = vand.u32 4294901760, %v11200_v22  ;;  %v11207_v43 = vand.u32 4294901760, %v11206_v9  ;;  %v11218_v39 = vsub.f32 %v22624_v24, %v24365_v10  ;;  %v22757_v15 = vpop.f32.mrf.mxu3  ;;  %v14839_v10 = vld [vmem:[%s24092_s2 + $0xbe0] sm:$0xff] }
 0xb57   : > { %11040 = vmatpush.msrb.mxu1 %v22443_v0  ;;  %11105 = vmatpush.msrb.mxu2 %v10936_v14  ;;  %v14817_v14 = vld [vmem:[%s24092_s2 + $0xb30] sm:$0xff]  ;;  %v11213_v59 = vand.u32 4294901760, %v11212_v29  ;;  %v24360_v57 = vand.u32 4294901760, %v22672_v20  ;;  %v24359_v25 = vand.u32 4294901760, %v22690_v7  ;;  %v11225_v53 = vand.u32 4294901760, %v11224_v19  ;;  %24775 = vst [vmem:[#allocation15_spill] sm:$0xff] %v22757_v15 }
 0xb58   : > { %10989 = vmatpush.msrb.mxu0 %v22407_v26  ;;  %11144 = vmatpush.msrb.mxu3 %v22409_v52  ;;  %v22680_v52 = vand.u32 4294901760, %v14818_v13  ;;  %v22682_v26 = vpop.f32.mrf.mxu0  ;;  %v24777_v29 = vld [vmem:[#allocation14_spill] sm:$0xff]  ;;  %v22890_v16 = vand.u32 4294901760, %v14839_v10  ;;  %v14834_v15 = vld [vmem:[%s24092_s2 + $0xbb8] sm:$0xff] }
 0xb59   : > { %11042 = vmatpush.msrb.mxu1 %v22456_v5  ;;  %11109 = vmatpush.msrb.mxu2 %v10942_v60  ;;  %v14816_v60 = vld [vmem:[%s24092_s2 + $0xb28] sm:$0xff]  ;;  %v11242_v4 = vsub.f32 %v22690_v7, %v24359_v25  ;;  %v22969_v40 = vand.u32 4294901760, %v14834_v15 }
 0xb5a   : > { %10992 = vmatpush.msrb.mxu0 %v22420_v12  ;;  %11146 = vmatpush.msrb.mxu3 %v22422_v41  ;;  %v24361_v12 = vand.u32 4294901760, %v22663_v34  ;;  %v22699_v41 = vand.u32 4294901760, %v14817_v14  ;;  %v22714_v18 = vand.u32 4294901760, %v14816_v60 }
 0xb5b   : > { %11046 = vmatmul.f32.vlgmr.msrb.gmra.mxu1 %v24772_v35  ;;  %11113 = vmatpush.msrb.mxu2 %v10948_v46  ;;  %v22712_v46 = vsub.f32 %v14818_v13, %v22680_v52 }
 0xb5c   : > { %11202 = vmatpush.msra.mxu1 %v11201_v49  ;;  %10995 = vmatpush.msrb.mxu0 %v22436_v17  ;;  %v11219_v17 = vand.u32 4294901760, %v11218_v39  ;;  %v22729_v50 = vsub.f32 %v14817_v14, %v22699_v41  ;;  %v22746_v31 = vsub.f32 %v14816_v60, %v22714_v18  ;;  %v14811_v49 = vld [vmem:[%s24092_s2 + $0xb00] sm:$0xff]  ;;  %v22780_v39 = vsub.f32 %v14814_v2, %v22748_v36  ;;  %v22798_v2 = vpop.f32.mrf.mxu2 }
 0xb5d   : > { %11148 = vmatpush.msrb.mxu3 %v22443_v0  ;;  %11115 = vmatmul.f32.vlgmr.msrb.gmra.mxu2 %v20157_v1  ;;  %v11230_v0 = vsub.f32 %v22663_v34, %v24361_v12  ;;  %v24357_v28 = vand.u32 4294901760, %v22712_v46  ;;  %v11243_v60 = vand.u32 4294901760, %v11242_v4  ;;  %24778 = vst [vmem:[#allocation20_spill] sm:$0xff] %v22798_v2  ;;  %v22808_v4 = vpop.f32.mrf.mxu1 }
 0xb5e   : > { %11208 = vmatpush.msra.mxu1 %v11207_v43  ;;  %11300 = vmatpush.msra.mxu2 %v22583_v38  ;;  %v24356_v30 = vand.u32 4294901760, %v22729_v50  ;;  %v24354_v43 = vand.u32 4294901760, %v22746_v31  ;;  %24779 = vst [vmem:[#allocation30_spill] sm:$0xff] %v22808_v4 }
 0xb5f   : > { %10998 = vmatpush.msrb.mxu0 %v22452_v61  ;;  %11150 = vmatpush.msrb.mxu3 %v22456_v5  ;;  %v11236_v61 = vsub.f32 %v22672_v20, %v24360_v57  ;;  %v14813_v5 = vld [vmem:[%s24092_s2 + $0xb10] sm:$0xff]  ;;  %v11231_v62 = vand.u32 4294901760, %v11230_v0  ;;  %v11248_v14 = vsub.f32 %v22712_v46, %v24357_v28 }
 0xb60   : > { %11152 = vmatmul.f32.vlgmr.msrb.gmra.mxu3 %v20157_v1  ;;  %11214 = vmatpush.msra.mxu1 %v11213_v59  ;;  %v22765_v22 = vand.u32 4294901760, %v14813_v5  ;;  %v22767_v9 = vpop.f32.mrf.mxu0  ;;  %v11254_v59 = vsub.f32 %v22729_v50, %v24356_v30  ;;  %v14841_v28 = vld [vmem:[%s24092_s2 + $0xbf0] sm:$0xff] }
 0xb61   : > { %11303 = vmatpush.msra.mxu2 %v22596_v6  ;;  %11353 = vmatpush.msra.mxu3 %v22562_v32  ;;  %24776 = vst [vmem:[#allocation21_spill] sm:$0xff] %v22767_v9  ;;  %v11237_v13 = vand.u32 4294901760, %v11236_v61  ;;  %v11249_v0 = vand.u32 4294901760, %v11248_v14  ;;  %v24358_v61 = vand.u32 4294901760, %v22780_v39  ;;  %v22854_v12 = vand.u32 4294901760, %v14841_v28 }
 0xb62   : > { %11001 = vmatpush.msrb.mxu0 %v22467_v55  ;;  %11220 = vmatpush.msra.mxu1 %v11219_v17  ;;  %v22763_v55 = vsub.f32 %v14815_v45, %v22731_v37  ;;  %v22792_v45 = vsub.f32 %v14813_v5, %v22765_v22  ;;  %v22794_v17 = vand.u32 4294901760, %v14811_v49 }
 0xb63   : > { %11306 = vmatpush.msra.mxu2 %v22607_v21  ;;  %11355 = vmatpush.msra.mxu3 %v22572_v51  ;;  %v22886_v63 = vsub.f32 %v14841_v28, %v22854_v12 }
 0xb64   : > { %11004 = vmatpush.msrb.mxu0 %v22478_v47  ;;  %11226 = vmatpush.msra.mxu1 %v11225_v53  ;;  %v22782_v47 = vand.u32 4294901760, %v14812_v8  ;;  %v24355_v19 = vand.u32 4294901760, %v22763_v55  ;;  %v11260_v53 = vsub.f32 %v22746_v31, %v24354_v43  ;;  %v24362_v14 = vand.u32 4294901760, %v22792_v45  ;;  %v22848_v57 = vpop.f32.mrf.mxu2 }
 0xb65   : > { %11007 = vmatmul.f32.vlgmr.msrb.gmra.mxu0 %v24777_v29  ;;  %11309 = vmatpush.msra.mxu2 %v22624_v24  ;;  %v22818_v43 = vsub.f32 %v14811_v49, %v22794_v17  ;;  %v11272_v49 = vsub.f32 %v22780_v39, %v24358_v61  ;;  %24782 = vst [vmem:[#allocation33_spill] sm:$0xff] %v22848_v57  ;;  %v22859_v44 = vpop.f32.mrf.mxu1 }
 0xb66   : > { %11157 = vmatpush.msra.mxu0 %v22562_v32  ;;  %11357 = vmatpush.msra.mxu3 %v22585_v54  ;;  %v22806_v5 = vsub.f32 %v14812_v8, %v22782_v47  ;;  %24783 = vst [vmem:[#allocation22_spill] sm:$0xff] %v22859_v44 }
 0xb67   : > { %11232 = vmatpush.msra.mxu1 %v11231_v62  ;;  %11312 = vmatpush.msra.mxu2 %v22641_v11  ;;  %v11255_v62 = vand.u32 4294901760, %v11254_v59  ;;  %v22827_v59 = vpop.f32.mrf.mxu3  ;;  %v24367_v61 = vand.u32 4294901760, %v22818_v43 }
 0xb68   : > { %11159 = vmatpush.msra.mxu0 %v22572_v51  ;;  %11359 = vmatpush.msra.mxu3 %v22598_v42  ;;  %v22820_v8 = vpop.f32.mrf.mxu0  ;;  %24781 = vst [vmem:[#allocation23_spill] sm:$0xff] %v22827_v59  ;;  %v24364_v30 = vand.u32 4294901760, %v22806_v5 }
 0xb69   : > { %11238 = vmatpush.msra.mxu1 %v11237_v13  ;;  %11315 = vmatpush.msra.mxu2 %v22663_v34  ;;  %v11266_v13 = vsub.f32 %v22763_v55, %v24355_v19  ;;  %24780 = vst [vmem:[#allocation9_spill] sm:$0xff] %v22820_v8  ;;  %v11261_v19 = vand.u32 4294901760, %v11260_v53  ;;  %v11278_v53 = vsub.f32 %v22792_v45, %v24362_v14  ;;  %v14840_v14 = vld [vmem:[%s24092_s2 + $0xbe8] sm:$0xff]  ;;  %v14833_v8 = vld [vmem:[%s24092_s2 + $0xbb0] sm:$0xff] }
 0xb6a   : > { %11161 = vmatpush.msra.mxu0 %v22585_v54  ;;  %11361 = vmatpush.msra.mxu3 %v22609_v56 }
 0xb6b   : > { %11244 = vmatpush.msra.mxu1 %v11243_v60  ;;  %11318 = vmatpush.msra.mxu2 %v22672_v20  ;;  %v14842_v60 = vld [vmem:[%s24092_s2 + $0xbf8] sm:$0xff] }
 0xb6c   : > { %11163 = vmatpush.msra.mxu0 %v22598_v42  ;;  %11363 = vmatpush.msra.mxu3 %v22629_v58  ;;  %v22844_v25 = vand.u32 4294901760, %v14842_v60  ;;  %v22904_v4 = vpop.f32.mrf.mxu2 }
 0xb6d   : > { %11250 = vmatpush.msra.mxu1 %v11249_v0  ;;  %11321 = vmatpush.msra.mxu2 %v22690_v7  ;;  %v11267_v0 = vand.u32 4294901760, %v11266_v13  ;;  %v11284_v13 = vsub.f32 %v22806_v5, %v24364_v30  ;;  %24786 = vst [vmem:[#allocation27_spill] sm:$0xff] %v22904_v4 }
 0xb6e   : > { %11165 = vmatpush.msra.mxu0 %v22609_v56  ;;  %11365 = vmatpush.msra.mxu3 %v22643_v27  ;;  %v22868_v30 = vsub.f32 %v14842_v60, %v22844_v25 }
 0xb6f   : > { %11256 = vmatpush.msra.mxu1 %v11255_v62  ;;  %11324 = vmatpush.msra.mxu2 %v22712_v46  ;;  %v11273_v62 = vand.u32 4294901760, %v11272_v49  ;;  %v11290_v49 = vsub.f32 %v22818_v43, %v24367_v61  ;;  %v22882_v61 = vpop.f32.mrf.mxu3  ;;  %v11285_v60 = vand.u32 4294901760, %v11284_v13 }
 0xb70   : > { %11167 = vmatpush.msra.mxu0 %v22629_v58  ;;  %11367 = vmatpush.msra.mxu3 %v22654_v48  ;;  %v22873_v3 = vpop.f32.mrf.mxu0  ;;  %24785 = vst [vmem:[#allocation8_spill] sm:$0xff] %v22882_v61  ;;  %v22913_v61 = vpop.f32.mrf.mxu1 }
 0xb71   : > { %11262 = vmatpush.msra.mxu1 %v11261_v19  ;;  %11327 = vmatpush.msra.mxu2 %v22729_v50  ;;  %v11279_v19 = vand.u32 4294901760, %v11278_v53  ;;  %24784 = vst [vmem:[#allocation32_spill] sm:$0xff] %v22873_v3  ;;  %v14838_v53 = vld [vmem:[%s24092_s2 + $0xbd8] sm:$0xff]  ;;  %v14837_v3 = vld [vmem:[%s24092_s2 + $0xbd0] sm:$0xff] }
 0xb72   : > { %11169 = vmatpush.msra.mxu0 %v22643_v27  ;;  %11369 = vmatpush.msra.mxu3 %v22680_v52  ;;  %v22897_v13 = vand.u32 4294901760, %v14838_v53  ;;  %v22908_v57 = vand.u32 4294901760, %v14837_v3  ;;  %24787 = vst [vmem:[#allocation35_spill] sm:$0xff] %v22913_v61  ;;  %v14835_v61 = vld [vmem:[%s24092_s2 + $0xbc0] sm:$0xff] }
 0xb73   : > { %11268 = vmatpush.msra.mxu1 %v11267_v0  ;;  %11330 = vmatpush.msra.mxu2 %v22746_v31  ;;  %v22877_v0 = vand.u32 4294901760, %v14840_v14 }
 0xb74   : > { %11171 = vmatpush.msra.mxu0 %v22654_v48  ;;  %11371 = vmatpush.msra.mxu3 %v22699_v41  ;;  %v22925_v4 = vsub.f32 %v14838_v53, %v22897_v13  ;;  %v24793_v53 = vand.u32 4294901760, %v22886_v63 }
 0xb75   : > { %11274 = vmatpush.msra.mxu1 %v11273_v62  ;;  %11333 = vmatpush.msra.mxu2 %v22763_v55  ;;  %v11291_v62 = vand.u32 4294901760, %v11290_v49  ;;  %v22902_v28 = vsub.f32 %v14840_v14, %v22877_v0  ;;  %v14836_v49 = vld [vmem:[%s24092_s2 + $0xbc8] sm:$0xff]  ;;  %v22918_v14 = vsub.f32 %v14839_v10, %v22890_v16 }
 0xb76   : > { %11173 = vmatpush.msra.mxu0 %v22680_v52  ;;  %11373 = vmatpush.msra.mxu3 %v22714_v18  ;;  %24790 = vst [vmem:[#allocation34_spill] sm:$0xff] %v22925_v4 }
 0xb77   : > { %11280 = vmatpush.msra.mxu1 %v11279_v19  ;;  %11336 = vmatpush.msra.mxu2 %v22780_v39  ;;  %24788 = vst [vmem:[#allocation26_spill] sm:$0xff] %v22918_v14  ;;  %v22937_v44 = vpop.f32.mrf.mxu3 }
 0xb78   : > { %11175 = vmatpush.msra.mxu0 %v22699_v41  ;;  %11375 = vmatpush.msra.mxu3 %v22731_v37  ;;  %v22930_v9 = vpop.f32.mrf.mxu0  ;;  %24792 = vst [vmem:[#allocation25_spill] sm:$0xff] %v22937_v44  ;;  %v22953_v44 = vand.u32 4294901760, %v14835_v61  ;;  %v22979_v2 = vpop.f32.mrf.mxu1 }
 0xb79   : > { %11286 = vmatpush.msra.mxu1 %v11285_v60  ;;  %11339 = vmatpush.msra.mxu2 %v22792_v45  ;;  %v24789_v60 = vand.u32 4294901760, %v22868_v30  ;;  %24791 = vst [vmem:[#allocation31_spill] sm:$0xff] %v22930_v9  ;;  %v22945_v9 = vsub.f32 %v14837_v3, %v22908_v57 }
 0xb7a   : > { %11177 = vmatpush.msra.mxu0 %v22714_v18  ;;  %11377 = vmatpush.msra.mxu3 %v22748_v36  ;;  %24798 = vst [vmem:[#allocation16_spill] sm:$0xff] %v22979_v2 }
 0xb7b   : > { %11292 = vmatpush.msra.mxu1 %v11291_v62  ;;  %11342 = vmatpush.msra.mxu2 %v22806_v5  ;;  %v11541_v19 = vsub.f32 %v22868_v30, %v24789_v60  ;;  %v22935_v62 = vand.u32 4294901760, %v14836_v49  ;;  %v11547_v60 = vsub.f32 %v22886_v63, %v24793_v53  ;;  %24794 = vst [vmem:[#allocation10_spill] sm:$0xff] %v22945_v9 }
 0xb7c   : > { %11179 = vmatpush.msra.mxu0 %v22731_v37  ;;  %11379 = vmatpush.msra.mxu3 %v22765_v22 }
 0xb7d   : > { %11294 = vmatmul.f32.vlgmr.msra.gmra.mxu1 %v20157_v1  ;;  %11345 = vmatpush.msra.mxu2 %v22818_v43  ;;  %v11542_v53 = vand.u32 4294901760, %v11541_v19  ;;  %v22967_v59 = vsub.f32 %v14836_v49, %v22935_v62  ;;  %v22971_v19 = vpop.f32.mrf.mxu2  ;;  %v11548_v3 = vand.u32 4294901760, %v11547_v60  ;;  %v24799_v49 = vand.u32 4294901760, %v22918_v14 }
 0xb7e   : > { %11461 = vmatpush.msrb.mxu1 %v22562_v32  ;;  %11181 = vmatpush.msra.mxu0 %v22748_v36  ;;  %v24795_v32 = vand.u32 4294901760, %v22902_v28  ;;  %24797 = vst [vmem:[#allocation28_spill] sm:$0xff] %v22971_v19  ;;  %v22987_v19 = vsub.f32 %v14835_v61, %v22953_v44  ;;  %v22989_v60 = vand.u32 4294901760, %v14833_v8 }
 0xb7f   : > { %11381 = vmatpush.msra.mxu3 %v22782_v47  ;;  %11348 = vmatmul.f32.vlgmr.msra.gmra.mxu2 %v24777_v29  ;;  %24796 = vst [vmem:[#allocation17_spill] sm:$0xff] %v22967_v59  ;;  %v14832_v29 = vld [vmem:[%s24092_s2 + $0xba8] sm:$0xff]  ;;  %v23008_v23 = vpop.f32.mrf.mxu3 }
 0xb80   : > { %11463 = vmatpush.msrb.mxu1 %v22572_v51  ;;  %11498 = vmatpush.msrb.mxu2 %v22844_v25  ;;  %v11553_v10 = vsub.f32 %v22902_v28, %v24795_v32  ;;  %v11559_v32 = vsub.f32 %v22918_v14, %v24799_v49  ;;  %v24800_v51 = vand.u32 4294901760, %v22925_v4  ;;  %v23004_v14 = vsub.f32 %v14834_v15, %v22969_v40 }
 0xb81   : > { %11183 = vmatpush.msra.mxu0 %v22765_v22  ;;  %11383 = vmatpush.msra.mxu3 %v22794_v17  ;;  %24802 = vst [vmem:[#allocation12_spill] sm:$0xff] %v23008_v23  ;;  %v23021_v49 = vsub.f32 %v14833_v8, %v22989_v60 }
 0xb82   : > { %11387 = vmatmul.f32.vlgmr.msra.gmra.mxu3 %v24772_v35  ;;  %11465 = vmatpush.msrb.mxu1 %v22585_v54  ;;  %v11565_v2 = vsub.f32 %v22925_v4, %v24800_v51  ;;  %v14831_v54 = vld [vmem:[%s24092_s2 + $0xba0] sm:$0xff]  ;;  %v22998_v35 = vpop.f32.mrf.mxu0  ;;  %v11554_v61 = vand.u32 4294901760, %v11553_v10  ;;  %v24803_v51 = vand.u32 4294901760, %v22945_v9  ;;  %v11560_v15 = vand.u32 4294901760, %v11559_v32 }
 0xb83   : > { %11500 = vmatpush.msrb.mxu2 %v22854_v12  ;;  %11543 = vmatpush.msrb.mxu3 %v11542_v53  ;;  %24801 = vst [vmem:[#allocation29_spill] sm:$0xff] %v22998_v35  ;;  %v23006_v53 = vand.u32 4294901760, %v14832_v29  ;;  %v23023_v23 = vand.u32 4294901760, %v14831_v54 }
 0xb84   : > { %11185 = vmatpush.msra.mxu0 %v22782_v47  ;;  %11467 = vmatpush.msrb.mxu1 %v22598_v42  ;;  %v11571_v35 = vsub.f32 %v22945_v9, %v24803_v51  ;;  %v14830_v42 = vld [vmem:[%s24092_s2 + $0xb98] sm:$0xff]  ;;  %v14829_v51 = vld [vmem:[%s24092_s2 + $0xb90] sm:$0xff]  ;;  %v24804_v9 = vand.u32 4294901760, %v22583_v38 }
 0xb85   : > { %11502 = vmatpush.msrb.mxu2 %v22877_v0  ;;  %11549 = vmatpush.msrb.mxu3 %v11548_v3  ;;  %v11566_v3 = vand.u32 4294901760, %v11565_v2  ;;  %v23037_v10 = vsub.f32 %v14832_v29, %v23006_v53  ;;  %v23039_v4 = vand.u32 4294901760, %v14830_v42  ;;  %v23041_v2 = vpop.f32.mrf.mxu2 }
 0xb86   : > { %11187 = vmatpush.msra.mxu0 %v22794_v17  ;;  %11469 = vmatpush.msrb.mxu1 %v22609_v56  ;;  %v24805_v56 = vand.u32 4294901760, %v22967_v59  ;;  %24806 = vst [vmem:[#allocation19_spill] sm:$0xff] %v23041_v2  ;;  %v11572_v38 = vand.u32 4294901760, %v11571_v35  ;;  %v23056_v2 = vand.u32 4294901760, %v14829_v51  ;;  %v24810_v35 = vand.u32 4294901760, %v22607_v21 }
 0xb87   : > { %11193 = vmatmul.f32.vlgmr.msra.gmra.mxu0 %v20178_v33  ;;  %11504 = vmatpush.msrb.mxu2 %v22890_v16  ;;  %v23070_v32 = vsub.f32 %v14830_v42, %v23039_v4  ;;  %v24813_v42 = vand.u32 4294901760, %v23021_v49 }
 0xb88   : > { %11394 = vmatpush.msrb.mxu0 %v24804_v9  ;;  %11555 = vmatpush.msrb.mxu3 %v11554_v61  ;;  %v11577_v8 = vsub.f32 %v22967_v59, %v24805_v56  ;;  %v23045_v9 = vpop.f32.mrf.mxu1  ;;  %v24808_v61 = vand.u32 4294901760, %v22596_v6  ;;  %v24809_v56 = vand.u32 4294901760, %v22987_v19  ;;  %v23054_v59 = vsub.f32 %v14831_v54, %v23023_v23 }
 0xb89   : > { %11471 = vmatpush.msrb.mxu1 %v22629_v58  ;;  %11506 = vmatpush.msrb.mxu2 %v22897_v13  ;;  %24807 = vst [vmem:[#allocation36_spill] sm:$0xff] %v23045_v9  ;;  %v14828_v58 = vld [vmem:[%s24092_s2 + $0xb88] sm:$0xff]  ;;  %v23075_v9 = vpop.f32.mrf.mxu3 }
 0xb8a   : > { %11398 = vmatpush.msrb.mxu0 %v24808_v61  ;;  %11561 = vmatpush.msrb.mxu3 %v11560_v15  ;;  %v11583_v29 = vsub.f32 %v22987_v19, %v24809_v56  ;;  %v9148_v6 = vpop.f32.mrf.mxu0  ;;  %v11578_v15 = vand.u32 4294901760, %v11577_v8  ;;  %v24811_v61 = vand.u32 4294901760, %v23004_v14  ;;  %v23079_v21 = vand.u32 4294901760, %v14828_v58 }
 0xb8b   : > { %11473 = vmatpush.msrb.mxu1 %v22643_v27  ;;  %11508 = vmatpush.msrb.mxu2 %v22908_v57  ;;  %v14827_v27 = vld [vmem:[%s24092_s2 + $0xb80] sm:$0xff]  ;;  %v23088_v56 = vsub.f32 %v14829_v51, %v23056_v2 }
 0xb8c   : > { %11402 = vmatpush.msrb.mxu0 %v24810_v35  ;;  %11567 = vmatpush.msrb.mxu3 %v11566_v3  ;;  %v11589_v54 = vsub.f32 %v23004_v14, %v24811_v61  ;;  %v24812_v3 = vand.u32 4294901760, %v22624_v24  ;;  %v11584_v8 = vand.u32 4294901760, %v11583_v29  ;;  %v11595_v35 = vsub.f32 %v23021_v49, %v24813_v42 }
 0xb8d   : > { %11475 = vmatpush.msrb.mxu1 %v22654_v48  ;;  %11510 = vmatpush.msrb.mxu2 %v22935_v62  ;;  %v23092_v48 = vand.u32 4294901760, %v14827_v27  ;;  %v24814_v24 = vand.u32 4294901760, %v22641_v11  ;;  %v24815_v29 = vand.u32 4294901760, %v23037_v10  ;;  %v24380_v42 = vand.u32 4294901760, %v23070_v32  ;;  %v9303_v61 = vpop.f32.mrf.mxu2 }
 0xb8e   : > { %11406 = vmatpush.msrb.mxu0 %v24812_v3  ;;  %11573 = vmatpush.msrb.mxu3 %v11572_v38  ;;  %v11590_v38 = vand.u32 4294901760, %v11589_v54  ;;  %v24816_v11 = vand.u32 4294901760, %v22663_v34  ;;  %v24817_v54 = vand.u32 4294901760, %v23054_v59 }
 0xb8f   : > { %11477 = vmatpush.msrb.mxu1 %v22680_v52  ;;  %11512 = vmatpush.msrb.mxu2 %v22953_v44  ;;  %v11601_v3 = vsub.f32 %v23037_v10, %v24815_v29  ;;  %v23103_v52 = vsub.f32 %v14828_v58, %v23079_v21  ;;  %v23117_v58 = vsub.f32 %v14827_v27, %v23092_v48  ;;  %v24819_v27 = vand.u32 4294901760, %v22690_v7  ;;  %v14968_v7 = vld [vmem:[%s24093_s3 + $0x11] ss:$0 sm:$0xff] }
 0xb90   : > { %11410 = vmatpush.msrb.mxu0 %v24814_v24  ;;  %11579 = vmatpush.msrb.mxu3 %v11578_v15  ;;  %v9249_v51 = vpop.f32.mrf.mxu1  ;;  %v11596_v15 = vand.u32 4294901760, %v11595_v35  ;;  %v11607_v24 = vsub.f32 %v23054_v59, %v24817_v54 }
 0xb91   : > { %11479 = vmatpush.msrb.mxu1 %v22699_v41  ;;  %11514 = vmatpush.msrb.mxu2 %v22969_v40  ;;  %v14967_v41 = vld [vmem:[%s24093_s3 + $0x10] ss:$0 sm:$0xff]  ;;  %v11602_v35 = vand.u32 4294901760, %v11601_v3  ;;  %v9342_v54 = vpop.f32.mrf.mxu3 }
 0xb92   : > { %11414 = vmatpush.msrb.mxu0 %v24816_v11  ;;  %11585 = vmatpush.msrb.mxu3 %v11584_v8  ;;  %v23119_v34 = vpop.f32.mrf.mxu0  ;;  %v24818_v8 = vand.u32 4294901760, %v22672_v20  ;;  %v11613_v11 = vsub.f32 %v23070_v32, %v24380_v42  ;;  %v11608_v29 = vand.u32 4294901760, %v11607_v24  ;;  %v24820_v20 = vand.u32 4294901760, %v23088_v56 }
 0xb93   : > { %11481 = vmatpush.msrb.mxu1 %v22714_v18  ;;  %11516 = vmatpush.msrb.mxu2 %v22989_v60  ;;  %v11624_v18 = vand.u32 4294901760, %v23103_v52  ;;  %v9149_v3 = vadd.f32 %v14967_v41, %v9148_v6  ;;  %v24822_v24 = vand.u32 4294901760, %v22729_v50 }
 0xb94   : > { %11418 = vmatpush.msrb.mxu0 %v24818_v8  ;;  %11591 = vmatpush.msrb.mxu3 %v11590_v38  ;;  %v11619_v38 = vsub.f32 %v23088_v56, %v24820_v20  ;;  %v24821_v8 = vand.u32 4294901760, %v22712_v46  ;;  %v11614_v42 = vand.u32 4294901760, %v11613_v11  ;;  %v24823_v11 = vand.u32 4294901760, %v22746_v31 }
 0xb95   : > { %11483 = vmatpush.msrb.mxu1 %v22731_v37  ;;  %11518 = vmatpush.msrb.mxu2 %v23006_v53  ;;  %v11630_v37 = vand.u32 4294901760, %v23117_v58  ;;  %v9250_v41 = vadd.f32 %v9249_v51, %v9149_v3  ;;  %v24825_v31 = vand.u32 4294901760, %v22780_v39  ;;  %v14969_v39 = vld [vmem:[%s24093_s3 + $0x12] ss:$0 sm:$0xff] }
 0xb96   : > { %11422 = vmatpush.msrb.mxu0 %v24819_v27  ;;  %11597 = vmatpush.msrb.mxu3 %v11596_v15  ;;  %v9489_v15 = vpop.f32.mrf.mxu2  ;;  %v11620_v46 = vand.u32 4294901760, %v11619_v38 }
 0xb97   : > { %11485 = vmatpush.msrb.mxu1 %v22748_v36  ;;  %11520 = vmatpush.msrb.mxu2 %v23023_v23  ;;  %v11625_v36 = vsub.f32 %v23103_v52, %v11624_v18  ;;  %v9490_v27 = vadd.f32 %v14968_v7, %v9489_v15  ;;  %v9304_v51 = vadd.f32 %v9303_v61, %v9250_v41  ;;  %v24826_v61 = vand.u32 4294901760, %v22868_v30 }
 0xb98   : > { %11426 = vmatpush.msrb.mxu0 %v24821_v8  ;;  %11603 = vmatpush.msrb.mxu3 %v11602_v35  ;;  %v9448_v6 = vpop.f32.mrf.mxu1  ;;  %v24827_v7 = vand.u32 4294901760, %v22792_v45  ;;  %v24829_v45 = vand.u32 4294901760, %v22806_v5 }
 0xb99   : > { %11487 = vmatpush.msrb.mxu1 %v22765_v22  ;;  %11522 = vmatpush.msrb.mxu2 %v23039_v4  ;;  %v11631_v22 = vsub.f32 %v23117_v58, %v11630_v37  ;;  %v9590_v20 = vpop.f32.mrf.mxu3  ;;  %v11626_v50 = vand.u32 4294901760, %v11625_v36  ;;  %v9343_v3 = vadd.f32 %v9342_v54, %v9304_v51  ;;  %v14964_v54 = vld [vmem:[%s24093_s3 + $0xd] ss:$0 sm:$0xff] }
 0xb9a   : > { %11430 = vmatpush.msrb.mxu0 %v24822_v24  ;;  %11609 = vmatpush.msrb.mxu3 %v11608_v29  ;;  %v9644_v35 = vpop.f32.mrf.mxu0 }
 0xb9b   : > { %11489 = vmatpush.msrb.mxu1 %v22782_v47  ;;  %11524 = vmatpush.msrb.mxu2 %v23056_v2  ;;  %v24824_v47 = vand.u32 4294901760, %v22763_v55  ;;  %v11632_v29 = vand.u32 4294901760, %v11631_v22  ;;  %v9412_v36 = vadd.f32 %v23119_v34, %v9343_v3  ;;  %v24831_v34 = vand.u32 4294901760, %v22818_v43  ;;  %v24842_v3 = vld [vmem:[#allocation9_spill] sm:$0xff] }
 0xb9c   : > { %11434 = vmatpush.msrb.mxu0 %v24823_v11  ;;  %11615 = vmatpush.msrb.mxu3 %v11614_v42  ;;  %v9591_v42 = vadd.f32 %v9590_v20, %v9490_v27 }
 0xb9d   : > { %11491 = vmatpush.msrb.mxu1 %v22794_v17  ;;  %11526 = vmatpush.msrb.mxu2 %v23079_v21  ;;  %v14963_v17 = vld [vmem:[%s24093_s3 + $0xc] ss:$0 sm:$0xff]  ;;  %v9449_v5 = vadd.f32 %v9448_v6, %v9412_v36  ;;  %v24838_v6 = vld [vmem:[#allocation13_spill] sm:$0xff] }
 0xb9e   : > { %11438 = vmatpush.msrb.mxu0 %v24824_v47  ;;  %11621 = vmatpush.msrb.mxu3 %v11620_v46  ;;  %v9752_v38 = vpop.f32.mrf.mxu2  ;;  %v9645_v8 = vadd.f32 %v9644_v35, %v9591_v42  ;;  %v24828_v46 = vand.u32 4294901760, %v22886_v63  ;;  %v24832_v35 = vld [vmem:[#allocation18_spill] sm:$0xff]  ;;  %v24839_v42 = vld [vmem:[#allocation23_spill] sm:$0xff] }
 0xb9f   : > { %11493 = vmatmul.f32.vlgmr.msrb.gmra.mxu1 %v20157_v1  ;;  %11528 = vmatpush.msrb.mxu2 %v23092_v48 }
 0xba0   : > { %11694 = vmatpush.msra.mxu1 %v22844_v25  ;;  %11442 = vmatpush.msrb.mxu0 %v24825_v31  ;;  %v9683_v55 = vpop.f32.mrf.mxu1 }
 0xba1   : > { %11627 = vmatpush.msrb.mxu3 %v11626_v50  ;;  %11534 = vmatmul.f32.vlgmr.msrb.gmra.mxu2 %v20178_v33  ;;  %v7785_v33 = vadd.f32 %v14963_v17, %v22682_v26  ;;  %v9789_v24 = vpop.f32.mrf.mxu3  ;;  %v9684_v41 = vadd.f32 %v9683_v55, %v9645_v8  ;;  %v24830_v26 = vand.u32 4294901760, %v22902_v28  ;;  %v24834_v50 = vld [vmem:[#allocation26_spill] sm:$0xff] }
 0xba2   : > { %11696 = vmatpush.msra.mxu1 %v22854_v12  ;;  %11735 = vmatpush.msra.mxu2 %v24826_v61  ;;  %v9830_v15 = vpop.f32.mrf.mxu0  ;;  %v24835_v47 = vand.u32 4294901760, %v24834_v50  ;;  %v11842_v61 = vsel %vm4796_vm4, %v9449_v5, 0  ;;  %v24850_v5 = vand.u32 4294901760, %v23021_v49 }
 0xba3   : > { %11446 = vmatpush.msrb.mxu0 %v24827_v7  ;;  %11633 = vmatpush.msrb.mxu3 %v11632_v29  ;;  %v9831_v22 = vadd.f32 %v14969_v39, %v9830_v15  ;;  %v7886_v11 = vadd.f32 %v24832_v35, %v7785_v33  ;;  %v24836_v29 = vld [vmem:[#allocation34_spill] sm:$0xff]  ;;  %v24843_v7 = vld [vmem:[#allocation17_spill] sm:$0xff]  ;;  %v23220_v33 = vand.u32 4294901760, %v11842_v61 }
 0xba4   : > { %11635 = vmatmul.f32.vlgmr.msrb.gmra.mxu3 %v20157_v1  ;;  %11698 = vmatpush.msra.mxu1 %v22877_v0  ;;  %v24837_v31 = vand.u32 4294901760, %v24836_v29  ;;  %v24844_v15 = vand.u32 4294901760, %v24843_v7  ;;  %v24849_v35 = vld [vmem:[#allocation21_spill] sm:$0xff] }
 0xba5   : > { %11739 = vmatpush.msra.mxu2 %v24828_v46  ;;  %11802 = vmatpush.msra.mxu3 %v22844_v25  ;;  %v24833_v25 = vld [vmem:[#allocation20_spill] sm:$0xff]  ;;  %v7940_v17 = vadd.f32 %v24838_v6, %v7886_v11  ;;  %v24847_v46 = vld [vmem:[#allocation22_spill] sm:$0xff] }
 0xba6   : > { %11450 = vmatpush.msrb.mxu0 %v24829_v45  ;;  %11700 = vmatpush.msra.mxu1 %v22890_v16  ;;  %v8126_v27 = vadd.f32 %v14964_v54, %v24833_v25  ;;  %v9985_v20 = vpop.f32.mrf.mxu2  ;;  %v14970_v54 = vld [vmem:[%s24093_s3 + $0x13] ss:$0 sm:$0xff] }
 0xba7   : > { %11743 = vmatpush.msra.mxu2 %v24830_v26  ;;  %11804 = vmatpush.msra.mxu3 %v22854_v12  ;;  %v9753_v12 = vadd.f32 %v9752_v38, %v9684_v41  ;;  %v23239_v26 = vsub.f32 %v11842_v61, %v23220_v33  ;;  %v24856_v61 = vand.u32 4294901760, %v23070_v32 }
 0xba8   : > { %11454 = vmatpush.msrb.mxu0 %v24831_v34  ;;  %11702 = vmatpush.msra.mxu1 %v22897_v13  ;;  %v9931_v51 = vpop.f32.mrf.mxu1  ;;  %v8227_v55 = vadd.f32 %v24839_v42, %v8126_v27 }
 0xba9   : > { %11456 = vmatmul.f32.vlgmr.msrb.gmra.mxu0 %v20157_v1  ;;  %11747 = vmatpush.msra.mxu2 %v24835_v47  ;;  %v9932_v43 = vadd.f32 %v9931_v51, %v9831_v22  ;;  %v9790_v8 = vadd.f32 %v9789_v24, %v9753_v12  ;;  %v24846_v24 = vand.u32 4294901760, %v22987_v19 }
 0xbaa   : > { %11641 = vmatpush.msra.mxu0 %v22868_v30  ;;  %11806 = vmatpush.msra.mxu3 %v22877_v0  ;;  %v10024_v30 = vpop.f32.mrf.mxu3  ;;  %v24840_v0 = vld [vmem:[#allocation10_spill] sm:$0xff]  ;;  %v10093_v39 = vpop.f32.mrf.mxu0 }
 0xbab   : > { %11704 = vmatpush.msra.mxu1 %v22908_v57  ;;  %11751 = vmatpush.msra.mxu2 %v24837_v31  ;;  %v24841_v38 = vand.u32 4294901760, %v24840_v0  ;;  %v11994_v41 = vsel %vm4796_vm4, %v9790_v8, 0 }
 0xbac   : > { %11644 = vmatpush.msra.mxu0 %v22886_v63  ;;  %11808 = vmatpush.msra.mxu3 %v22890_v16  ;;  %v8281_v63 = vadd.f32 %v24842_v3, %v8227_v55  ;;  %v9986_v16 = vadd.f32 %v9985_v20, %v9932_v43  ;;  %v23247_v20 = vand.u32 4294901760, %v11994_v41  ;;  %v11887_v43 = vand.u32 4294901760, %v23239_v26  ;;  %v14965_v55 = vld [vmem:[%s24093_s3 + $0xe] ss:$0 sm:$0xff] }
 0xbad   : > { %11706 = vmatpush.msra.mxu1 %v22935_v62  ;;  %11755 = vmatpush.msra.mxu2 %v24841_v38  ;;  %v24857_v3 = vand.u32 4294901760, %v23088_v56 }
 0xbae   : > { %11647 = vmatpush.msra.mxu0 %v22902_v28  ;;  %11810 = vmatpush.msra.mxu3 %v22897_v13  ;;  %v24845_v13 = vld [vmem:[#allocation15_spill] sm:$0xff]  ;;  %v10171_v36 = vpop.f32.mrf.mxu2  ;;  %v8320_v45 = vadd.f32 %v24847_v46, %v8281_v63  ;;  %v10025_v22 = vadd.f32 %v10024_v30, %v9986_v16  ;;  %v14966_v30 = vld [vmem:[%s24093_s3 + $0xf] ss:$0 sm:$0xff]  ;;  %v24858_v16 = vld [vmem:[#allocation32_spill] sm:$0xff] }
 0xbaf   : > { %11708 = vmatpush.msra.mxu1 %v22953_v44  ;;  %11759 = vmatpush.msra.mxu2 %v24844_v15  ;;  %v7979_v28 = vadd.f32 %v24845_v13, %v7940_v17  ;;  %v10172_v34 = vadd.f32 %v14970_v54, %v10171_v36  ;;  %v23263_v17 = vsub.f32 %v11994_v41, %v23247_v20  ;;  %v14971_v63 = vld [vmem:[%s24093_s3 + $0x14] ss:$0 sm:$0xff]  ;;  %v24860_v36 = vld [vmem:[#allocation24_spill] sm:$0xff] }
 0xbb0   : > { %11650 = vmatpush.msra.mxu0 %v24834_v50  ;;  %11812 = vmatpush.msra.mxu3 %v22908_v57  ;;  %v24848_v57 = vand.u32 4294901760, %v23004_v14  ;;  %v10130_v11 = vpop.f32.mrf.mxu1  ;;  %v10094_v25 = vadd.f32 %v10093_v39, %v10025_v22  ;;  %v24851_v50 = vld [vmem:[#allocation33_spill] sm:$0xff]  ;;  %v8467_v39 = vadd.f32 %v14965_v55, %v24858_v16 }
 0xbb1   : > { %11710 = vmatpush.msra.mxu1 %v22969_v40  ;;  %11763 = vmatpush.msra.mxu2 %v24846_v24  ;;  %v8389_v47 = vadd.f32 %v24851_v50, %v8320_v45 }
 0xbb2   : > { %11653 = vmatpush.msra.mxu0 %v24836_v29  ;;  %11814 = vmatpush.msra.mxu3 %v22935_v62  ;;  %v8048_v62 = vadd.f32 %v24849_v35, %v7979_v28  ;;  %v10272_v27 = vpop.f32.mrf.mxu3  ;;  %v10326_v51 = vpop.f32.mrf.mxu0  ;;  %v24853_v29 = vld [vmem:[#allocation30_spill] sm:$0xff]  ;;  %v10131_v6 = vadd.f32 %v10130_v11, %v10094_v25  ;;  %v24863_v25 = vld [vmem:[#allocation27_spill] sm:$0xff] }
 0xbb3   : > { %11712 = vmatpush.msra.mxu1 %v22989_v60  ;;  %11767 = vmatpush.msra.mxu2 %v24848_v57  ;;  %v10273_v12 = vadd.f32 %v10272_v27, %v10172_v34  ;;  %v24864_v27 = vld [vmem:[#allocation29_spill] sm:$0xff] }
 0xbb4   : > { %11656 = vmatpush.msra.mxu0 %v24840_v0  ;;  %11816 = vmatpush.msra.mxu3 %v22953_v44  ;;  %v24852_v44 = vand.u32 4294901760, %v23037_v10  ;;  %v8085_v31 = vadd.f32 %v24853_v29, %v8048_v62  ;;  %v12146_v0 = vsel %vm4796_vm4, %v10131_v6, 0  ;;  %v24866_v29 = vld [vmem:[#allocation25_spill] sm:$0xff] }
 0xbb5   : > { %11714 = vmatpush.msra.mxu1 %v23006_v53  ;;  %11771 = vmatpush.msra.mxu2 %v24850_v5  ;;  %v10327_v42 = vadd.f32 %v10326_v51, %v10273_v12  ;;  %v23300_v54 = vand.u32 4294901760, %v12146_v0  ;;  %v24865_v12 = vld [vmem:[#allocation14_spill] sm:$0xff] }
 0xbb6   : > { %11659 = vmatpush.msra.mxu0 %v24843_v7  ;;  %11818 = vmatpush.msra.mxu3 %v22969_v40  ;;  %v24854_v40 = vand.u32 4294901760, %v23054_v59  ;;  %v10434_v28 = vpop.f32.mrf.mxu2 }
 0xbb7   : > { %11716 = vmatpush.msra.mxu1 %v23023_v23  ;;  %11775 = vmatpush.msra.mxu2 %v24852_v44 }
 0xbb8   : > { %11662 = vmatpush.msra.mxu0 %v22987_v19  ;;  %11820 = vmatpush.msra.mxu3 %v22989_v60  ;;  %v24855_v19 = vld [vmem:[#allocation8_spill] sm:$0xff]  ;;  %v10365_v38 = vpop.f32.mrf.mxu1 }
 0xbb9   : > { %11718 = vmatpush.msra.mxu1 %v23039_v4  ;;  %11779 = vmatpush.msra.mxu2 %v24854_v40  ;;  %v8426_v60 = vadd.f32 %v24855_v19, %v8389_v47 }
 0xbba   : > { %11665 = vmatpush.msra.mxu0 %v23004_v14  ;;  %11822 = vmatpush.msra.mxu3 %v23006_v53  ;;  %v11888_v14 = vsub.f32 %v23239_v26, %v11887_v43  ;;  %v11839_v53 = vsel %vm4796_vm4, %v8085_v31, 0  ;;  %v10512_v7 = vpop.f32.mrf.mxu0  ;;  %v10471_v57 = vpop.f32.mrf.mxu3  ;;  %v24867_v31 = vld [vmem:[#allocation36_spill] sm:$0xff] }
 0xbbb   : > { %11720 = vmatpush.msra.mxu1 %v23056_v2  ;;  %11783 = vmatpush.msra.mxu2 %v24856_v61  ;;  %v11991_v8 = vsel %vm4796_vm4, %v8426_v60, 0  ;;  %v23298_v15 = vand.u32 4294901760, %v11839_v53  ;;  %v10513_v46 = vadd.f32 %v14971_v63, %v10512_v7 }
 0xbbc   : > { %11668 = vmatpush.msra.mxu0 %v23021_v49  ;;  %11824 = vmatpush.msra.mxu3 %v23023_v23  ;;  %v12039_v23 = vand.u32 4294901760, %v23263_v17  ;;  %v10366_v49 = vadd.f32 %v10365_v38, %v10327_v42  ;;  %v23308_v24 = vand.u32 4294901760, %v11991_v8  ;;  %v24868_v42 = vld [vmem:[#allocation31_spill] sm:$0xff]  ;;  %v24870_v38 = vld [vmem:[#allocation16_spill] sm:$0xff] }
 0xbbd   : > { %11722 = vmatpush.msra.mxu1 %v23079_v21  ;;  %11787 = vmatpush.msra.mxu2 %v24857_v3  ;;  %v11862_v41 = vsub.f32 %v11839_v53, %v23298_v15 }
 0xbbe   : > { %11671 = vmatpush.msra.mxu0 %v23037_v10  ;;  %11826 = vmatpush.msra.mxu3 %v23039_v4  ;;  %v11889_v10 = vand.u32 4294901760, %v11888_v14  ;;  %v24859_v4 = vld [vmem:[#allocation28_spill] sm:$0xff]  ;;  %v10667_v47 = vpop.f32.mrf.mxu2 }
 0xbbf   : > { %11724 = vmatpush.msra.mxu1 %v23092_v48  ;;  %11791 = vmatpush.msra.mxu2 %v11624_v18  ;;  %v8808_v13 = vadd.f32 %v14966_v30, %v24859_v4  ;;  %v10435_v18 = vadd.f32 %v10434_v28, %v10366_v49  ;;  %v11863_v50 = vand.u32 4294901760, %v11862_v41 }
 0xbc0   : > { %11674 = vmatpush.msra.mxu0 %v23054_v59  ;;  %11828 = vmatpush.msra.mxu3 %v23056_v2  ;;  %v12040_v59 = vsub.f32 %v23263_v17, %v12039_v23  ;;  %v24861_v2 = vld [vmem:[#allocation35_spill] sm:$0xff]  ;;  %v10613_v34 = vpop.f32.mrf.mxu1 }
 0xbc1   : > { %11728 = vmatmul.f32.vlgmr.msra.gmra.mxu1 %v24860_v36  ;;  %11795 = vmatpush.msra.mxu2 %v11630_v37  ;;  %v8568_v45 = vadd.f32 %v24861_v2, %v8467_v39  ;;  %v23319_v37 = vsub.f32 %v12146_v0, %v23300_v54  ;;  %v10472_v35 = vadd.f32 %v10471_v57, %v10435_v18 }
 0xbc2   : > { %11890 = vmatpush.xpose.msrb.mxu1 %v11889_v10  ;;  %11677 = vmatpush.msra.mxu0 %v23070_v32  ;;  %v24862_v32 = vld [vmem:[#allocation12_spill] sm:$0xff]  ;;  %v10614_v62 = vadd.f32 %v10613_v34, %v10513_v46  ;;  %v12041_v11 = vand.u32 4294901760, %v12040_v59  ;;  %v11864_v40 = vsub.f32 %v11862_v41, %v11863_v50  ;;  %v10706_v55 = vpop.f32.mrf.mxu3  ;;  %v10775_v61 = vpop.f32.mrf.mxu0 }
 0xbc3   : > { %11830 = vmatpush.msra.mxu3 %v23079_v21  ;;  %11797 = vmatmul.f32.vlgmr.msra.gmra.mxu2 %v20157_v1  ;;  %v8909_v22 = vadd.f32 %v24862_v32, %v8808_v13  ;;  %v23327_v21 = vsub.f32 %v11991_v8, %v23308_v24  ;;  %v12298_v51 = vsel %vm4796_vm4, %v10472_v35, 0 }
 0xbc4   : > { %11680 = vmatpush.msra.mxu0 %v23088_v56  ;;  %11913 = vmatpush.xpose.msrb.mxu2 %v23239_v26  ;;  %v8622_v56 = vadd.f32 %v24863_v25, %v8568_v45  ;;  %v10668_v44 = vadd.f32 %v10667_v47, %v10614_v62  ;;  %v23351_v60 = vand.u32 4294901760, %v12298_v51  ;;  %v24869_v26 = vld [vmem:[#allocation19_spill] sm:$0xff]  ;;  %v11865_v53 = vand.u32 4294901760, %v11864_v40 }
 0xbc5   : > { %11832 = vmatpush.msra.mxu3 %v23092_v48  ;;  %v8963_v5 = vadd.f32 %v24864_v27, %v8909_v22  ;;  %v12191_v48 = vand.u32 4294901760, %v23319_v37 }
 0xbc6   : > { %11984 = vmatpush.xpose.msra.mxu1 %v23220_v33  ;;  %11834 = vmatmul.f32.vlgmr.msra.gmra.mxu3 %v20157_v1  ;;  %v12015_v1 = vand.u32 4294901760, %v23327_v21  ;;  %v10707_v14 = vadd.f32 %v10706_v55, %v10668_v44  ;;  %v23360_v49 = vsub.f32 %v12298_v51, %v23351_v60  ;;  %v10853_v28 = vpop.f32.mrf.mxu2 }
 0xbc7   : > { %11936 = vmatpush.xpose.msrb.mxu3 %v23220_v33  ;;  %11683 = vmatpush.msra.mxu0 %v23103_v52  ;;  %v8661_v52 = vadd.f32 %v24866_v29, %v8622_v56  ;;  %v9002_v6 = vadd.f32 %v24867_v31, %v8963_v5 }
 0xbc8   : > { %12012 = vmatpush.xpose.msra.mxu2 %v23247_v20  ;;  %v10776_v30 = vadd.f32 %v10775_v61, %v10707_v14  ;;  %v10812_v8 = vpop.f32.mrf.mxu1  ;;  %v12343_v39 = vand.u32 4294901760, %v23360_v49 }
 0xbc9   : > { %11686 = vmatpush.msra.mxu0 %v23117_v58  ;;  %11892 = vmatmul.f32.vlgmr.msrb.gmra.mxu1 %v23298_v15  ;;  %v12192_v58 = vsub.f32 %v23319_v37, %v12191_v48  ;;  %v8730_v19 = vadd.f32 %v24868_v42, %v8661_v52 }
 0xbca   : > { %11689 = vmatmul.f32.vlgmr.msra.gmra.mxu0 %v24865_v12  ;;  %12088 = vmatpush.xpose.msrb.mxu1 %v23247_v20  ;;  %v10813_v16 = vadd.f32 %v10812_v8, %v10776_v30  ;;  %v10954_v45 = vpop.f32.mrf.mxu3  ;;  %v14973_v12 = vld [vmem:[%s24093_s3 + $0x16] ss:$0 sm:$0xff] }
 0xbcb   : > { %12042 = vmatpush.xpose.msra.mxu3 %v12041_v11  ;;  %11860 = vmatpush.xpose.msrb.mxu0 %v23220_v33  ;;  %v12016_v33 = vsub.f32 %v23327_v21, %v12015_v1  ;;  %v12193_v0 = vand.u32 4294901760, %v12192_v58  ;;  %v8767_v3 = vadd.f32 %v24870_v38, %v8730_v19 }
 0xbcc   : > { %11916 = vmatmul.f32.vlgmr.msrb.gmra.mxu2 %v11862_v41  ;;  %v12568_v4 = vand.u32 4294901760, %v10813_v16 }
 0xbcd   : > { %12114 = vmatpush.xpose.msrb.mxu2 %v12039_v23  ;;  %v12017_v63 = vand.u32 4294901760, %v12016_v33 }
 0xbce   : > { %11940 = vmatmul.f32.vlgmr.msrb.gmra.mxu3 %v11863_v50  ;;  %v12595_v18 = vsub.f32 %v10813_v16, %v12568_v4 }
 0xbcf   : > { %11962 = vmatpush.xpose.msra.mxu0 %v11887_v43  ;;  %v9071_v43 = vadd.f32 %v24869_v26, %v9002_v6  ;;  %12136 = vmatpush.xpose.msrb.mxu3 %v23247_v20  ;;  %v12143_v20 = vsel %vm4796_vm4, %v8767_v3, 0 }
 0xbd0   : > { %v12165_v10 = vand.u32 4294901760, %v12143_v20  ;;  %v12596_v32 = vand.u32 4294901760, %v12595_v18 }
 0xbd1   : > { %11986 = vmatmul.f32.vlgmr.msra.gmra.mxu1 %v23298_v15  ;;  %v9108_v23 = vadd.f32 %v23075_v9, %v9071_v43  ;;  %v14972_v9 = vld [vmem:[%s24093_s3 + $0x15] ss:$0 sm:$0xff] }
 0xbd2   : > { %11866 = vmatmul.f32.vlgmr.msrb.gmra.mxu0 %v11865_v53  ;;  %12194 = vmatpush.xpose.msra.mxu1 %v12193_v0  ;;  %v12166_v36 = vsub.f32 %v12143_v20, %v12165_v10  ;;  %v10854_v46 = vadd.f32 %v14972_v9, %v10853_v28  ;;  %v12597_v62 = vsub.f32 %v12595_v18, %v12596_v32 }
 0xbd3   : > { %12065 = vmatpush.xpose.msrb.mxu0 %v23263_v17  ;;  %v12295_v7 = vsel %vm4796_vm4, %v9108_v23, 0  ;;  %v12344_v17 = vsub.f32 %v23360_v49, %v12343_v39 }
 0xbd4   : > { %12018 = vmatmul.f32.vlgmr.msra.gmra.mxu2 %v12017_v63  ;;  %v12317_v13 = vand.u32 4294901760, %v12295_v7  ;;  %v12167_v41 = vand.u32 4294901760, %v12166_v36  ;;  %v12598_v27 = vand.u32 4294901760, %v12597_v62 }
 0xbd5   : > { %12217 = vmatpush.xpose.msra.mxu2 %v23319_v37  ;;  %v12345_v59 = vand.u32 4294901760, %v12344_v17 }
 0xbd6   : > { %12044 = vmatmul.f32.vlgmr.msra.gmra.mxu3 %v23308_v24  ;;  %v12318_v2 = vsub.f32 %v12295_v7, %v12317_v13  ;;  %v12168_v34 = vsub.f32 %v12166_v36, %v12167_v41 }
 0xbd7   : > { %12240 = vmatpush.xpose.msra.mxu3 %v23300_v54 }
 0xbd8   : > { %v12319_v22 = vand.u32 4294901760, %v12318_v2  ;;  %v11047_v35 = vpop.f32.mrf.mxu1 }
 0xbd9   : > { %12092 = vmatmul.f32.vlgmr.msrb.gmra.mxu1 %v12015_v1 }
 0xbda   : > { %11964 = vmatmul.f32.vlgmr.msra.gmra.mxu0 %v23298_v15  ;;  %12288 = vmatpush.xpose.msrb.mxu1 %v23300_v54  ;;  %v10955_v15 = vadd.f32 %v10954_v45, %v10854_v46  ;;  %v12320_v11 = vsub.f32 %v12318_v2, %v12319_v22 }
 0xbdb   : > { %12164 = vmatpush.xpose.msra.mxu0 %v23300_v54 }
 0xbdc   : > { %12116 = vmatmul.f32.vlgmr.msrb.gmra.mxu2 %v23308_v24  ;;  %v12321_v37 = vand.u32 4294901760, %v12320_v11 }
 0xbdd   : > { %12316 = vmatpush.xpose.msrb.mxu2 %v23351_v60 }
 0xbde   : > { %12138 = vmatmul.f32.vlgmr.msrb.gmra.mxu3 %v23308_v24 }
 0xbdf   : > { %12346 = vmatpush.xpose.msrb.mxu3 %v12345_v59 }
 0xbe0   : > { %v11116_v25 = vpop.f32.mrf.mxu2 }
 0xbe1   : > { %12196 = vmatmul.f32.vlgmr.msra.gmra.mxu1 %v12165_v10 }
 0xbe2   : > { %12068 = vmatmul.f32.vlgmr.msrb.gmra.mxu0 %v23327_v21  ;;  %12392 = vmatpush.xpose.msra.mxu1 %v23351_v60  ;;  %v11008_v54 = vpop.f32.mrf.mxu0  ;;  %v12169_v21 = vand.u32 4294901760, %v12168_v34 }
 0xbe3   : > { %12266 = vmatpush.xpose.msrb.mxu0 %v12191_v48  ;;  %v11009_v57 = vadd.f32 %v11008_v54, %v10955_v15  ;;  %v11153_v5 = vpop.f32.mrf.mxu3 }
 0xbe4   : > { %12220 = vmatmul.f32.vlgmr.msra.gmra.mxu2 %v12166_v36 }
 0xbe5   : > { %12418 = vmatpush.xpose.msra.mxu2 %v12343_v39  ;;  %v11048_v24 = vadd.f32 %v11047_v35, %v11009_v57 }
 0xbe6   : > { %12244 = vmatmul.f32.vlgmr.msra.gmra.mxu3 %v12167_v41 }
 0xbe7   : > { %12440 = vmatpush.xpose.msra.mxu3 %v23351_v60  ;;  %v11117_v56 = vadd.f32 %v11116_v25, %v11048_v24  ;;  %v14974_v60 = vld [vmem:[%s24093_s3 + $0x17] ss:$0 sm:$0xff] }
 0xbe9   : > { %12290 = vmatmul.f32.vlgmr.msrb.gmra.mxu1 %v12165_v10  ;;  %v11154_v50 = vadd.f32 %v11153_v5, %v11117_v56 }
 0xbea   : > { %12170 = vmatmul.f32.vlgmr.msra.gmra.mxu0 %v12169_v21  ;;  %12599 = vmatpush.msrb.mxu1 %v12598_v27 }
 0xbeb   : > { %12369 = vmatpush.xpose.msra.mxu0 %v23360_v49  ;;  %v23387_v48 = vand.u32 4294901760, %v11154_v50 }
 0xbec   : > { %12322 = vmatmul.f32.vlgmr.msrb.gmra.mxu2 %v12321_v37 }
 0xbed   : > { %v23390_v47 = vsub.f32 %v11154_v50, %v23387_v48  ;;  %12622 = vmatpush.msrb.mxu2 %v12595_v18 }
 0xbee   : > { %12348 = vmatmul.f32.vlgmr.msrb.gmra.mxu3 %v12317_v13 }
 0xbef   : > { %v12745_v1 = vand.u32 4294901760, %v23390_v47  ;;  %12645 = vmatpush.msrb.mxu3 %v12568_v4 }
 0xbf1   : > { %12396 = vmatmul.f32.vlgmr.msra.gmra.mxu1 %v12319_v22  ;;  %v12746_v51 = vsub.f32 %v23390_v47, %v12745_v1 }
 0xbf2   : > { %12268 = vmatmul.f32.vlgmr.msrb.gmra.mxu0 %v12165_v10  ;;  %12693 = vmatpush.msra.mxu1 %v12568_v4 }
 0xbf3   : > { %12569 = vmatpush.msrb.mxu0 %v12568_v4  ;;  %v12747_v44 = vand.u32 4294901760, %v12746_v51 }
 0xbf4   : > { %12420 = vmatmul.f32.vlgmr.msra.gmra.mxu2 %v12317_v13 }
 0xbf5   : > { %12718 = vmatpush.msra.mxu2 %v23387_v48 }
 0xbf6   : > { %12442 = vmatmul.f32.vlgmr.msra.gmra.mxu3 %v12317_v13 }
 0xbf7   : > { %12748 = vmatpush.msra.mxu3 %v12747_v44 }
 0xbfa   : > { %12372 = vmatmul.f32.vlgmr.msra.gmra.mxu0 %v12318_v2  ;;  %v11295_v31 = vpop.f32.mrf.mxu1 }
 0xbfb   : > { %12671 = vmatpush.msra.mxu0 %v12596_v32  ;;  %v15025_v32 = vld [vmem:[%s18993_s28] sm:$0xff] }
 0xc02   : > { %v11349_v40 = vpop.f32.mrf.mxu2 }
 0xc04   : > { %v11194_v29 = vpop.f32.mrf.mxu0 }
 0xc05   : > { %v11195_v52 = vadd.f32 %v14973_v12, %v11194_v29  ;;  %v11388_v42 = vpop.f32.mrf.mxu3 }
 0xc07   : > { %v11296_v6 = vadd.f32 %v11295_v31, %v11195_v52 }
 0xc09   : > { %v11350_v58 = vadd.f32 %v11349_v40, %v11296_v6 }
 0xc0b   : > { %v11389_v19 = vadd.f32 %v11388_v42, %v11350_v58 }
 0xc1c   : > { %v11494_v43 = vpop.f32.mrf.mxu1 }
 0xc24   : > { %v11535_v55 = vpop.f32.mrf.mxu2 }
 0xc25   : > { %v11536_v61 = vadd.f32 %v14974_v60, %v11535_v55 }
 0xc26   : > { %v11457_v33 = vpop.f32.mrf.mxu0 }
 0xc27   : > { %v11458_v14 = vadd.f32 %v11457_v33, %v11389_v19  ;;  %v11636_v26 = vpop.f32.mrf.mxu3 }
 0xc28   : > { %v11637_v53 = vadd.f32 %v11636_v26, %v11536_v61 }
 0xc29   : > { %v23403_v30 = vadd.f32 %v11494_v43, %v11458_v14 }
 0xc3e   : > { %v11729_v0 = vpop.f32.mrf.mxu1 }
 0xc46   : > { %v11893_v38 = vpop.f32.mrf.mxu1  ;;  %v11798_v49 = vpop.f32.mrf.mxu2 }
 0xc47   : > { %v11690_v3 = vpop.f32.mrf.mxu0 }
 0xc48   : > { %v11691_v63 = vadd.f32 %v11690_v3, %v11637_v53 }
 0xc49   : > { %v11835_v23 = vpop.f32.mrf.mxu3 }
 0xc4a   : > { %v11730_v8 = vadd.f32 %v11729_v0, %v11691_v63 }
 0xc4c   : > { %v11799_v16 = vadd.f32 %v11798_v49, %v11730_v8 }
 0xc4e   : > { %v23405_v20 = vadd.f32 %v11835_v23, %v11799_v16  ;;  %v11987_v4 = vpop.f32.mrf.mxu1 }
 0xc4f   : > { %v11867_v39 = vpop.f32.mrf.mxu0  ;;  %v11917_v7 = vpop.f32.mrf.mxu2 }
 0xc50   : > { %v11894_v10 = vadd.f32 %v11893_v38, %v11867_v39 }
 0xc51   : > { %v11941_v9 = vpop.f32.mrf.mxu3 }
 0xc52   : > { %v11918_v17 = vadd.f32 %v11917_v7, %v11894_v10 }
 0xc54   : > { %v11942_v13 = vadd.f32 %v11941_v9, %v11918_v17 }
 0xc56   : > { %v12093_v2 = vpop.f32.mrf.mxu1 }
 0xc57   : > { %v11965_v28 = vpop.f32.mrf.mxu0  ;;  %v12019_v36 = vpop.f32.mrf.mxu2 }
 0xc58   : > { %v11966_v18 = vadd.f32 %v11965_v28, %v11942_v13 }
 0xc59   : > { %v12045_v46 = vpop.f32.mrf.mxu3 }
 0xc5a   : > { %v11988_v59 = vadd.f32 %v11987_v4, %v11966_v18  ;;  %v12046_v41 = vadd.f32 %v12045_v46, %v12019_v36 }
 0xc5c   : > { %v12446_v45 = vmul.f32 0.35355338, %v11988_v59 }
 0xc5e   : > { %v12450_v15 = vadd.f32 %v15025_v32, %v12446_v45  ;;  %v12197_v11 = vpop.f32.mrf.mxu1 }
 0xc5f   : > { %v12069_v22 = vpop.f32.mrf.mxu0  ;;  %v12117_v54 = vpop.f32.mrf.mxu2 }
 0xc60   : > { %v12070_v57 = vadd.f32 %v12069_v22, %v12046_v41  ;;  %v12454_v34 = vsel %vm4796_vm4, %v12450_v15, -inf }
 0xc61   : > { %v12139_v35 = vpop.f32.mrf.mxu3  ;;  %12455 = vmax.xlane.f32.xlu2 %v12454_v34 }
 0xc62   : > { %v12094_v62 = vadd.f32 %v12093_v2, %v12070_v57 }
 0xc64   : > { %v12118_v24 = vadd.f32 %v12117_v54, %v12094_v62 }
 0xc66   : > { %v12140_v25 = vadd.f32 %v12139_v35, %v12118_v24  ;;  %v12291_v29 = vpop.f32.mrf.mxu1 }
 0xc67   : > { %v12171_v56 = vpop.f32.mrf.mxu0  ;;  %v12221_v21 = vpop.f32.mrf.mxu2 }
 0xc68   : > { %v12447_v27 = vmul.f32 0.35355338, %v12140_v25  ;;  %v12198_v5 = vadd.f32 %v12197_v11, %v12171_v56  ;;  %v23426_v25 = vand.u32 4294901760, %v23403_v30 }
 0xc69   : > { %v12245_v50 = vpop.f32.mrf.mxu3 }
 0xc6a   : > { %v12222_v37 = vadd.f32 %v12221_v21, %v12198_v5  ;;  %v12451_v51 = vadd.f32 %v15025_v32, %v12447_v27 }
 0xc6c   : > { %v12457_v44 = vsel %vm4796_vm4, %v12451_v51, -inf  ;;  %v12246_v12 = vadd.f32 %v12245_v50, %v12222_v37  ;;  %v23430_v50 = vsub.f32 %v23403_v30, %v23426_v25 }
 0xc6d   : > { %12458 = vmax.xlane.f32.xlu0 %v12457_v44 }
 0xc6e   : > { %v12397_v14 = vpop.f32.mrf.mxu1 }
 0xc6f   : > { %v12269_v52 = vpop.f32.mrf.mxu0  ;;  %v12323_v6 = vpop.f32.mrf.mxu2 }
 0xc70   : > { %v12270_v31 = vadd.f32 %v12269_v52, %v12246_v12  ;;  %v12894_v52 = vand.u32 4294901760, %v23430_v50 }
 0xc71   : > { %v12349_v58 = vpop.f32.mrf.mxu3 }
 0xc72   : > { %v12292_v40 = vadd.f32 %v12291_v29, %v12270_v31  ;;  %v12350_v19 = vadd.f32 %v12349_v58, %v12323_v6 }
 0xc74   : > { %v12448_v42 = vmul.f32 0.35355338, %v12292_v40 }
 0xc76   : > { %v12452_v60 = vadd.f32 %v15025_v32, %v12448_v42 }
 0xc77   : > { %v12373_v55 = vpop.f32.mrf.mxu0  ;;  %v12421_v43 = vpop.f32.mrf.mxu2 }
 0xc78   : > { %v12374_v61 = vadd.f32 %v12373_v55, %v12350_v19  ;;  %v12460_v33 = vsel %vm4796_vm4, %v12452_v60, -inf  ;;  %v12895_v55 = vsub.f32 %v23430_v50, %v12894_v52 }
 0xc79   : > { %12461 = vmax.xlane.f32.xlu1 %v12460_v33  ;;  %v12443_v0 = vpop.f32.mrf.mxu3 }
 0xc7a   : > { %v12398_v26 = vadd.f32 %v12397_v14, %v12374_v61  ;;  %v23441_v61 = vand.u32 4294901760, %v23405_v20 }
 0xc7c   : > { %v12422_v53 = vadd.f32 %v12421_v43, %v12398_v26 }
 0xc7e   : > { %v12444_v38 = vadd.f32 %v12443_v0, %v12422_v53  ;;  %v12896_v0 = vand.u32 4294901760, %v12895_v55 }
 0xc80   : > { %v12449_v3 = vmul.f32 0.35355338, %v12444_v38 }
 0xc82   : > { %v12453_v49 = vadd.f32 %v15025_v32, %v12449_v3  ;;  %v23447_v3 = vsub.f32 %v23405_v20, %v23441_v61 }
 0xc84   : > { %v12463_v63 = vsel %vm4796_vm4, %v12453_v49, -inf }
 0xc85   : > { %12464 = vmax.xlane.f32.xlu2 %v12463_v63 }
 0xcd4   : > { %v12456_v23 = vpop.xlane.xlu2 %12455 }
 0xcd5   : > { %v12466_v8 = vsub.f32 %v12450_v15, %v12456_v23 }
 0xcd7   : > { %v12470_v16 = vmul.f32 1.442695, %v12466_v8 }
 0xcd9   : > { %15004 = vpow2.f32 %v12470_v16 }
 0xcdf   : > { %v15005_v39 = vpop.eup %15004 }
 0xce0   : > { %v12459_v7 = vpop.xlane.xlu0 %12458  ;;  %v12478_v10 = vsel %vm4796_vm4, %v15005_v39, 0.0 }
 0xce1   : > { %v12467_v4 = vsub.f32 %v12451_v51, %v12459_v7  ;;  %12479 = vadd.xlane.f32.xlu0 %v12478_v10 }
 0xce3   : > { %v12472_v9 = vmul.f32 1.442695, %v12467_v4 }
 0xce5   : > { %15006 = vpow2.f32 %v12472_v9 }
 0xceb   : > { %v23413_v17 = vpop.eup %15006 }
 0xcec   : > { %v12462_v13 = vpop.xlane.xlu1 %12461  ;;  %v12481_v28 = vsel %vm4796_vm4, %v23413_v17, 0.0 }
 0xced   : > { %v12468_v36 = vsub.f32 %v12452_v60, %v12462_v13  ;;  %12482 = vadd.xlane.f32.xlu1 %v12481_v28 }
 0xcef   : > { %v12474_v18 = vmul.f32 1.442695, %v12468_v36 }
 0xcf1   : > { %15008 = vpow2.f32 %v12474_v18 }
 0xcf7   : > { %v23417_v46 = vpop.eup %15008 }
 0xcf8   : > { %v12465_v59 = vpop.xlane.xlu2 %12464  ;;  %v12484_v2 = vsel %vm4796_vm4, %v23417_v46, 0.0 }
 0xcf9   : > { %v12469_v45 = vsub.f32 %v12453_v49, %v12465_v59  ;;  %12485 = vadd.xlane.f32.xlu2 %v12484_v2 }
 0xcfb   : > { %v12476_v41 = vmul.f32 1.442695, %v12469_v45 }
 0xcfd   : > { %15010 = vpow2.f32 %v12476_v41 }
 0xd03   : > { %v23421_v32 = vpop.eup %15010 }
 0xd04   : > { %v12487_v15 = vsel %vm4796_vm4, %v23421_v32, 0.0 }
 0xd05   : > { %12488 = vadd.xlane.f32.xlu0 %v12487_v15 }
 0xd54   : > { %v12480_v22 = vpop.xlane.xlu0 %12479 }
 0xd55   : > { %15012 = vrcp.f32 %v12480_v22  ;;  %v12501_v35 = vand.u32 2147483648, %v12480_v22  ;;  %v12499_v24 = vand.u32 2147483647, %v12480_v22  ;;  %vm12495_vm13 = vweird.f32 %v12480_v22 }
 0xd57   : > { %v12502_v21 = vor.u32 1.1754944e-38, %v12501_v35  ;;  %vm12500_vm15 = vcmp.eq.f32.partialorder %v12499_v24, 8.507059e+37 }
 0xd5b   : > { %v15013_v54 = vpop.eup %15012 }
 0xd5c   : > { %v12491_v57 = vmul.f32 %v15013_v54, %v12480_v22  ;;  %vm12496_vm12 = vweird.f32 %v15013_v54 }
 0xd5d   : > { %vm12497_vm14 = vmor %vm12495_vm13, %vm12496_vm12 }
 0xd5e   : > { %v12492_v34 = vsub.f32 1.0, %v12491_v57 }
 0xd60   : > { %v12493_v62 = vmul.f32 %v15013_v54, %v12492_v34  ;;  %v12483_v11 = vpop.xlane.xlu1 %12482 }
 0xd61   : > { %15014 = vrcp.f32 %v12483_v11  ;;  %v12516_v6 = vand.u32 2147483648, %v12483_v11  ;;  %v12514_v42 = vand.u32 2147483647, %v12483_v11  ;;  %vm12510_vm1 = vweird.f32 %v12483_v11 }
 0xd62   : > { %v12494_v56 = vadd.f32 %v15013_v54, %v12493_v62 }
 0xd63   : > { %v12517_v33 = vor.u32 1.1754944e-38, %v12516_v6  ;;  %vm12515_vm3 = vcmp.eq.f32.partialorder %v12514_v42, 8.507059e+37  ;;  %v14856_v42 = vld [vmem:[%s24094_s4 + $0x28] sm:$0xff] }
 0xd64   : > { %v12498_v27 = vsel %vm12497_vm14, %v15013_v54, %v12494_v56 }
 0xd65   : > { %v12503_v5 = vsel %vm12500_vm15, %v12502_v21, %v12498_v27 }
 0xd66   : > { %v12504_v37 = vmul.f32 %v15005_v39, %v12503_v5 }
 0xd67   : > { %v15015_v51 = vpop.eup %15014 }
 0xd68   : > { %v12506_v44 = vmul.f32 %v15015_v51, %v12483_v11  ;;  %v12551_v12 = vsel %vm4796_vm4, %v12504_v37, 0  ;;  %vm12511_vm0 = vweird.f32 %v15015_v51 }
 0xd69   : > { %v12570_v29 = vand.u32 4294901760, %v12551_v12  ;;  %vm12512_vm2 = vmor %vm12510_vm1, %vm12511_vm0 }
 0xd6a   : > { %v12507_v31 = vsub.f32 1.0, %v12506_v44 }
 0xd6b   : > { %12601 = vmatmul.f32.vlgmr.msrb.gmra.mxu1 %v12570_v29  ;;  %v12571_v40 = vsub.f32 %v12551_v12, %v12570_v29 }
 0xd6c   : > { %v12508_v58 = vmul.f32 %v15015_v51, %v12507_v31  ;;  %12794 = vmatpush.msrb.mxu1 %v23387_v48  ;;  %v12486_v19 = vpop.xlane.xlu2 %12485 }
 0xd6d   : > { %15016 = vrcp.f32 %v12486_v19  ;;  %12625 = vmatmul.f32.vlgmr.msrb.gmra.mxu2 %v12571_v40  ;;  %v12572_v60 = vand.u32 4294901760, %v12571_v40  ;;  %v12531_v16 = vand.u32 2147483648, %v12486_v19  ;;  %v12529_v10 = vand.u32 2147483647, %v12486_v19 }
 0xd6e   : > { %v12509_v30 = vadd.f32 %v15015_v51, %v12508_v58  ;;  %12820 = vmatpush.msrb.mxu2 %v12745_v1  ;;  %vm12525_vm6 = vweird.f32 %v12486_v19 }
 0xd6f   : > { %12649 = vmatmul.f32.vlgmr.msrb.gmra.mxu3 %v12572_v60  ;;  %v12573_v26 = vsub.f32 %v12571_v40, %v12572_v60  ;;  %vm12530_vm8 = vcmp.eq.f32.partialorder %v12529_v10, 8.507059e+37 }
 0xd70   : > { %v12513_v14 = vsel %vm12512_vm2, %v15015_v51, %v12509_v30  ;;  %12842 = vmatpush.msrb.mxu3 %v23387_v48  ;;  %v13043_v48 = vand.u32 4294901760, %v23447_v3 }
 0xd71   : > { %v12518_v43 = vsel %vm12515_vm3, %v12517_v33, %v12513_v14  ;;  %v12574_v1 = vand.u32 4294901760, %v12573_v26 }
 0xd72   : > { %v12519_v53 = vmul.f32 %v23413_v17, %v12518_v43  ;;  %v12532_v17 = vor.u32 1.1754944e-38, %v12531_v16 }
 0xd73   : > { %v15017_v38 = vpop.eup %15016  ;;  %12695 = vmatmul.f32.vlgmr.msra.gmra.mxu1 %v12570_v29  ;;  %12575 = vmatmul.f32.vlgmr.msrb.gmra.mxu0 %v12574_v1 }
 0xd74   : > { %v12521_v49 = vmul.f32 %v15017_v38, %v12486_v19  ;;  %12897 = vmatpush.msra.mxu1 %v12896_v0  ;;  %v12700_v63 = vsel %vm4796_vm4, %v12519_v53, 0  ;;  %12771 = vmatpush.msrb.mxu0 %v23390_v47  ;;  %vm12526_vm5 = vweird.f32 %v15017_v38  ;;  %v13044_v47 = vsub.f32 %v23447_v3, %v13043_v48  ;;  %v14857_v0 = vld [vmem:[%s24094_s4 + $0x30] sm:$0xff] }
 0xd75   : > { %v12719_v23 = vand.u32 4294901760, %v12700_v63  ;;  %vm12527_vm7 = vmor %vm12525_vm6, %vm12526_vm5  ;;  %v13318_v19 = vand.u32 4294901760, %v14856_v42 }
 0xd76   : > { %v12522_v8 = vsub.f32 1.0, %v12521_v49  ;;  %v13045_v45 = vand.u32 4294901760, %v13044_v47 }
 0xd77   : > { %v12720_v39 = vsub.f32 %v12700_v63, %v12719_v23  ;;  %12750 = vmatmul.f32.vlgmr.msra.gmra.mxu3 %v12719_v23  ;;  %v13345_v30 = vsub.f32 %v14856_v42, %v13318_v19 }
 0xd78   : > { %v12523_v7 = vmul.f32 %v15017_v38, %v12522_v8  ;;  %v12489_v20 = vpop.xlane.xlu0 %12488  ;;  %12943 = vmatpush.msra.mxu3 %v23426_v25 }
 0xd79   : > { %15018 = vrcp.f32 %v12489_v20  ;;  %v12721_v9 = vand.u32 4294901760, %v12720_v39  ;;  %v12546_v57 = vand.u32 2147483648, %v12489_v20  ;;  %v12544_v62 = vand.u32 2147483647, %v12489_v20 }
 0xd7a   : > { %v12524_v4 = vadd.f32 %v15017_v38, %v12523_v7  ;;  %vm12540_vm10 = vweird.f32 %v12489_v20  ;;  %v13346_v60 = vand.u32 4294901760, %v13345_v30 }
 0xd7b   : > { %12673 = vmatmul.f32.vlgmr.msra.gmra.mxu0 %v12570_v29  ;;  %12798 = vmatmul.f32.vlgmr.msrb.gmra.mxu1 %v12721_v9  ;;  %v12722_v28 = vsub.f32 %v12720_v39, %v12721_v9  ;;  %v12547_v11 = vor.u32 1.1754944e-38, %v12546_v57  ;;  %vm12545_vm12 = vcmp.eq.f32.partialorder %v12544_v62, 8.507059e+37 }
 0xd7c   : > { %v12528_v13 = vsel %vm12527_vm7, %v15017_v38, %v12524_v4  ;;  %12867 = vmatpush.msra.mxu0 %v23426_v25  ;;  %12991 = vmatpush.msrb.mxu1 %v23426_v25  ;;  %v13467_v38 = vand.u32 4294901760, %v14857_v0 }
 0xd7d   : > { %v12533_v36 = vsel %vm12530_vm8, %v12532_v17, %v12528_v13  ;;  %v12723_v59 = vand.u32 4294901760, %v12722_v28 }
 0xd7e   : > { %v12534_v18 = vmul.f32 %v23417_v46, %v12533_v36  ;;  %v23480_v8 = vsub.f32 %v14857_v0, %v13467_v38 }
 0xd7f   : > { %v15019_v2 = vpop.eup %15018  ;;  %12724 = vmatmul.f32.vlgmr.msra.gmra.mxu2 %v12723_v59  ;;  %12844 = vmatmul.f32.vlgmr.msrb.gmra.mxu3 %v12719_v23 }
 0xd80   : > { %v12536_v41 = vmul.f32 %v15019_v2, %v12489_v20  ;;  %v12849_v15 = vsel %vm4796_vm4, %v12534_v18, 0  ;;  %12920 = vmatpush.msra.mxu2 %v23430_v50  ;;  %13046 = vmatpush.msrb.mxu3 %v13045_v45  ;;  %vm12541_vm9 = vweird.f32 %v15019_v2  ;;  %v13495_v7 = vand.u32 4294901760, %v23480_v8  ;;  %v14858_v18 = vld [vmem:[%s24094_s4 + $0x38] sm:$0xff] }
 0xd81   : > { %v12868_v22 = vand.u32 4294901760, %v12849_v15  ;;  %vm12542_vm11 = vmor %vm12540_vm10, %vm12541_vm9 }
 0xd82   : > { %v12537_v54 = vsub.f32 1.0, %v12536_v41  ;;  %v13496_v9 = vsub.f32 %v23480_v8, %v13495_v7 }
 0xd83   : > { %v12869_v34 = vsub.f32 %v12849_v15, %v12868_v22  ;;  %12774 = vmatmul.f32.vlgmr.msrb.gmra.mxu0 %v12720_v39  ;;  %12899 = vmatmul.f32.vlgmr.msra.gmra.mxu1 %v12868_v22  ;;  %v13616_v15 = vand.u32 4294901760, %v14858_v18 }
 0xd84   : > { %v12538_v35 = vmul.f32 %v15019_v2, %v12537_v54  ;;  %12969 = vmatpush.msrb.mxu0 %v12894_v52  ;;  %13092 = vmatpush.msra.mxu1 %v23441_v61 }
 0xd85   : > { %v12870_v46 = vand.u32 4294901760, %v12869_v34 }
 0xd86   : > { %v12539_v24 = vadd.f32 %v15019_v2, %v12538_v35  ;;  %v23488_v35 = vsub.f32 %v14858_v18, %v13616_v15 }
 0xd87   : > { %v12871_v25 = vsub.f32 %v12869_v34, %v12870_v46  ;;  %12822 = vmatmul.f32.vlgmr.msrb.gmra.mxu2 %v12719_v23  ;;  %12947 = vmatmul.f32.vlgmr.msra.gmra.mxu3 %v12870_v46 }
 0xd88   : > { %v12543_v56 = vsel %vm12542_vm11, %v15019_v2, %v12539_v24  ;;  %13016 = vmatpush.msrb.mxu2 %v23441_v61  ;;  %13140 = vmatpush.msra.mxu3 %v23441_v61  ;;  %v13347_v61 = vsub.f32 %v13345_v30, %v13346_v60  ;;  %v13497_v2 = vand.u32 4294901760, %v13496_v9 }
 0xd89   : > { %v12548_v21 = vsel %vm12545_vm12, %v12547_v11, %v12543_v56  ;;  %v12872_v27 = vand.u32 4294901760, %v12871_v25  ;;  %v13644_v11 = vand.u32 4294901760, %v23488_v35 }
 0xd8a   : > { %v12549_v5 = vmul.f32 %v23421_v32, %v12548_v21  ;;  %v14855_v32 = vld [vmem:[%s24094_s4 + $0x20] sm:$0xff]  ;;  %v13348_v14 = vand.u32 4294901760, %v13347_v61 }
 0xd8b   : > { %12873 = vmatmul.f32.vlgmr.msra.gmra.mxu0 %v12872_v27  ;;  %12993 = vmatmul.f32.vlgmr.msrb.gmra.mxu1 %v12868_v22  ;;  %v13169_v52 = vand.u32 4294901760, %v14855_v32 }
 0xd8c   : > { %v12998_v50 = vsel %vm4796_vm4, %v12549_v5, 0  ;;  %13069 = vmatpush.msra.mxu0 %v23447_v3 }
 0xd8d   : > { %v13017_v37 = vand.u32 4294901760, %v12998_v50  ;;  %v13196_v31 = vsub.f32 %v14855_v32, %v13169_v52 }
 0xd8f   : > { %v13018_v51 = vsub.f32 %v12998_v50, %v13017_v37  ;;  %12923 = vmatmul.f32.vlgmr.msra.gmra.mxu2 %v12869_v34  ;;  %13048 = vmatmul.f32.vlgmr.msrb.gmra.mxu3 %v13017_v37  ;;  %v13197_v6 = vand.u32 4294901760, %v13196_v31 }
 0xd90   : > { %13118 = vmatpush.msra.mxu2 %v13043_v48  ;;  %13246 = vmatpush.msrb.mxu3 %v13169_v52 }
 0xd91   : > { %v13019_v44 = vand.u32 4294901760, %v13018_v51  ;;  %v13198_v40 = vsub.f32 %v13196_v31, %v13197_v6 }
 0xd93   : > { %v13020_v12 = vsub.f32 %v13018_v51, %v13019_v44  ;;  %12971 = vmatmul.f32.vlgmr.msrb.gmra.mxu0 %v12868_v22  ;;  %13096 = vmatmul.f32.vlgmr.msra.gmra.mxu1 %v13019_v44  ;;  %v13199_v58 = vand.u32 4294901760, %v13198_v40 }
 0xd94   : > { %13170 = vmatpush.msrb.mxu0 %v13169_v52 }
 0xd95   : > { %v13021_v29 = vand.u32 4294901760, %v13020_v12  ;;  %13200 = vmatpush.msrb.mxu1 %v13199_v58 }
 0xd97   : > { %13022 = vmatmul.f32.vlgmr.msrb.gmra.mxu2 %v13021_v29  ;;  %13142 = vmatmul.f32.vlgmr.msra.gmra.mxu3 %v13017_v37 }
 0xd98   : > { %13223 = vmatpush.msrb.mxu2 %v13196_v31  ;;  %13294 = vmatpush.msra.mxu1 %v13169_v52 }
 0xd99   : > { %13349 = vmatpush.msra.mxu3 %v13348_v14 }
 0xd9b   : > { %13072 = vmatmul.f32.vlgmr.msra.gmra.mxu0 %v13018_v51  ;;  %v13645_v51 = vsub.f32 %v23488_v35, %v13644_v11 }
 0xd9c   : > { %13272 = vmatpush.msra.mxu0 %v13197_v6 }
 0xd9d   : > { %v13646_v31 = vand.u32 4294901760, %v13645_v51 }
 0xd9f   : > { %13120 = vmatmul.f32.vlgmr.msra.gmra.mxu2 %v13017_v37 }
 0xda0   : > { %13319 = vmatpush.msra.mxu2 %v13318_v19 }
 0xde8   : > { %v12602_v55 = vpop.f32.mrf.mxu1 }
 0xdf0   : > { %v12576_v33 = vpop.f32.mrf.mxu0  ;;  %v12626_v43 = vpop.f32.mrf.mxu2 }
 0xdf1   : > { %v12603_v26 = vadd.f32 %v12602_v55, %v12576_v33  ;;  %v12696_v49 = vpop.f32.mrf.mxu1 }
 0xdf2   : > { %v12650_v53 = vpop.f32.mrf.mxu3 }
 0xdf3   : > { %v12627_v1 = vadd.f32 %v12626_v43, %v12603_v26 }
 0xdf5   : > { %v12651_v3 = vadd.f32 %v12650_v53, %v12627_v1 }
 0xdf8   : > { %v12674_v63 = vpop.f32.mrf.mxu0 }
 0xdf9   : > { %v12675_v23 = vadd.f32 %v12674_v63, %v12651_v3  ;;  %v12799_v17 = vpop.f32.mrf.mxu1 }
 0xdfa   : > { %v12751_v16 = vpop.f32.mrf.mxu3 }
 0xdfb   : > { %v12697_v48 = vadd.f32 %v12696_v49, %v12675_v23 }
 0xdfd   : > { %v13152_v39 = vsel %vm4796_vm4, %v12697_v48, 0 }
 0xdfe   : > { %v13171_v10 = vand.u32 4294901760, %v13152_v39 }
 0xe00   : > { %v13172_v20 = vsub.f32 %v13152_v39, %v13171_v10  ;;  %v12775_v4 = vpop.f32.mrf.mxu0  ;;  %13202 = vmatmul.f32.vlgmr.msrb.gmra.mxu1 %v13171_v10 }
 0xe01   : > { %13395 = vmatpush.msrb.mxu1 %v13318_v19  ;;  %v12900_v62 = vpop.f32.mrf.mxu1 }
 0xe02   : > { %v13173_v47 = vand.u32 4294901760, %v13172_v20  ;;  %v12725_v13 = vpop.f32.mrf.mxu2  ;;  %13226 = vmatmul.f32.vlgmr.msrb.gmra.mxu2 %v13172_v20  ;;  %v12845_v41 = vpop.f32.mrf.mxu3 }
 0xe03   : > { %v12752_v28 = vadd.f32 %v12751_v16, %v12725_v13  ;;  %13421 = vmatpush.msrb.mxu2 %v13346_v60 }
 0xe04   : > { %v13174_v36 = vsub.f32 %v13172_v20, %v13173_v47  ;;  %13250 = vmatmul.f32.vlgmr.msrb.gmra.mxu3 %v13173_v47 }
 0xe05   : > { %v12776_v59 = vadd.f32 %v12775_v4, %v12752_v28  ;;  %13443 = vmatpush.msrb.mxu3 %v13318_v19 }
 0xe06   : > { %v13175_v45 = vand.u32 4294901760, %v13174_v36 }
 0xe07   : > { %v12800_v54 = vadd.f32 %v12799_v17, %v12776_v59 }
 0xe08   : > { %v12874_v22 = vpop.f32.mrf.mxu0  ;;  %13176 = vmatmul.f32.vlgmr.msrb.gmra.mxu0 %v13175_v45  ;;  %13296 = vmatmul.f32.vlgmr.msra.gmra.mxu1 %v13171_v10 }
 0xe09   : > { %13372 = vmatpush.msrb.mxu0 %v13345_v30  ;;  %13498 = vmatpush.msra.mxu1 %v13497_v2  ;;  %v12901_v21 = vadd.f32 %v12900_v62, %v12874_v22  ;;  %v12994_v29 = vpop.f32.mrf.mxu1 }
 0xe0a   : > { %v12823_v57 = vpop.f32.mrf.mxu2  ;;  %v12948_v56 = vpop.f32.mrf.mxu3 }
 0xe0b   : > { %v12824_v34 = vadd.f32 %v12823_v57, %v12800_v54 }
 0xe0d   : > { %v12846_v46 = vadd.f32 %v12845_v41, %v12824_v34 }
 0xe0f   : > { %v13301_v24 = vsel %vm4796_vm4, %v12846_v46, 0 }
 0xe10   : > { %v13320_v25 = vand.u32 4294901760, %v13301_v24  ;;  %13274 = vmatmul.f32.vlgmr.msra.gmra.mxu0 %v13171_v10  ;;  %v12972_v5 = vpop.f32.mrf.mxu0 }
 0xe11   : > { %13468 = vmatpush.msra.mxu0 %v13467_v38  ;;  %v13097_v14 = vpop.f32.mrf.mxu1 }
 0xe12   : > { %v13321_v27 = vsub.f32 %v13301_v24, %v13320_v25  ;;  %v12924_v50 = vpop.f32.mrf.mxu2  ;;  %13351 = vmatmul.f32.vlgmr.msra.gmra.mxu3 %v13320_v25  ;;  %v13049_v58 = vpop.f32.mrf.mxu3 }
 0xe13   : > { %v12925_v37 = vadd.f32 %v12924_v50, %v12901_v21  ;;  %13544 = vmatpush.msra.mxu3 %v13467_v38 }
 0xe14   : > { %v13322_v44 = vand.u32 4294901760, %v13321_v27 }
 0xe15   : > { %v12949_v12 = vadd.f32 %v12948_v56, %v12925_v37 }
 0xe16   : > { %v13323_v32 = vsub.f32 %v13321_v27, %v13322_v44  ;;  %13399 = vmatmul.f32.vlgmr.msrb.gmra.mxu1 %v13322_v44 }
 0xe17   : > { %v12973_v52 = vadd.f32 %v12972_v5, %v12949_v12  ;;  %13592 = vmatpush.msrb.mxu1 %v13467_v38 }
 0xe18   : > { %v13324_v6 = vand.u32 4294901760, %v13323_v32  ;;  %13375 = vmatmul.f32.vlgmr.msrb.gmra.mxu0 %v13321_v27  ;;  %v13073_v55 = vpop.f32.mrf.mxu0 }
 0xe19   : > { %v12995_v40 = vadd.f32 %v12994_v29, %v12973_v52  ;;  %13570 = vmatpush.msrb.mxu0 %v13495_v7 }
 0xe1a   : > { %v13023_v42 = vpop.f32.mrf.mxu2  ;;  %13325 = vmatmul.f32.vlgmr.msra.gmra.mxu2 %v13324_v6  ;;  %13445 = vmatmul.f32.vlgmr.msrb.gmra.mxu3 %v13320_v25  ;;  %v13143_v38 = vpop.f32.mrf.mxu3 }
 0xe1b   : > { %v13450_v19 = vsel %vm4796_vm4, %v12995_v40, 0  ;;  %v13050_v30 = vadd.f32 %v13049_v58, %v13023_v42  ;;  %13521 = vmatpush.msra.mxu2 %v23480_v8  ;;  %13647 = vmatpush.msrb.mxu3 %v13646_v31 }
 0xe1c   : > { %v13469_v60 = vand.u32 4294901760, %v13450_v19 }
 0xe1d   : > { %v13074_v61 = vadd.f32 %v13073_v55, %v13050_v30  ;;  %v14975_v55 = vld [vmem:[%s24095_s5 + $0x1] ss:$0 sm:$0xff] }
 0xe1e   : > { %v13470_v33 = vsub.f32 %v13450_v19, %v13469_v60  ;;  %13500 = vmatmul.f32.vlgmr.msra.gmra.mxu1 %v13469_v60 }
 0xe1f   : > { %13693 = vmatpush.msra.mxu1 %v13616_v15  ;;  %v13098_v43 = vadd.f32 %v13097_v14, %v13074_v61  ;;  %v24871_v14 = vld [vmem:[#allocation11_spill] sm:$0xff] }
 0xe20   : > { %v13471_v26 = vand.u32 4294901760, %v13470_v33 }
 0xe22   : > { %v13121_v53 = vpop.f32.mrf.mxu2  ;;  %13423 = vmatmul.f32.vlgmr.msrb.gmra.mxu2 %v13320_v25  ;;  %13548 = vmatmul.f32.vlgmr.msra.gmra.mxu3 %v13471_v26  ;;  %v13472_v1 = vsub.f32 %v13470_v33, %v13471_v26 }
 0xe23   : > { %v13122_v0 = vadd.f32 %v13121_v53, %v13098_v43  ;;  %13617 = vmatpush.msrb.mxu2 %v13616_v15  ;;  %13741 = vmatpush.msra.mxu3 %v13616_v15  ;;  %v14877_v43 = vld [vmem:[%s24098_s8 + $0xf8] sm:$0xff]  ;;  %v14876_v53 = vld [vmem:[%s24098_s8 + $0xf0] sm:$0xff] }
 0xe24   : > { %v13473_v3 = vand.u32 4294901760, %v13472_v1  ;;  %v14875_v1 = vld [vmem:[%s24098_s8 + $0xe8] sm:$0xff] }
 0xe25   : > { %v13144_v49 = vadd.f32 %v13143_v38, %v13122_v0  ;;  %v23513_v0 = vand.u32 4294901760, %v14877_v43  ;;  %v23515_v38 = vand.u32 4294901760, %v14876_v53 }
 0xe26   : > { %13474 = vmatmul.f32.vlgmr.msra.gmra.mxu0 %v13473_v3  ;;  %13594 = vmatmul.f32.vlgmr.msrb.gmra.mxu1 %v13469_v60  ;;  %v23517_v3 = vand.u32 4294901760, %v14875_v1 }
 0xe27   : > { %v13599_v63 = vsel %vm4796_vm4, %v13144_v49, 0  ;;  %13670 = vmatpush.msra.mxu0 %v23488_v35  ;;  %v14874_v49 = vld [vmem:[%s24098_s8 + $0xe0] sm:$0xff] }
 0xe28   : > { %v13618_v23 = vand.u32 4294901760, %v13599_v63 }
 0xe2a   : > { %v13619_v8 = vsub.f32 %v13599_v63, %v13618_v23  ;;  %13524 = vmatmul.f32.vlgmr.msra.gmra.mxu2 %v13470_v33  ;;  %13649 = vmatmul.f32.vlgmr.msrb.gmra.mxu3 %v13618_v23  ;;  %v14873_v63 = vld [vmem:[%s24098_s8 + $0xd8] sm:$0xff] }
 0xe2b   : > { %13719 = vmatpush.msra.mxu2 %v13644_v11  ;;  %14009 = vmatpush.msrb.mxu3 %v23513_v0 }
 0xe2c   : > { %v13620_v48 = vand.u32 4294901760, %v13619_v8 }
 0xe2d   : > { %14011 = vmatpush.msrb.mxu3 %v23515_v38 }
 0xe2e   : > { %v13621_v16 = vsub.f32 %v13619_v8, %v13620_v48  ;;  %13572 = vmatmul.f32.vlgmr.msrb.gmra.mxu0 %v13469_v60  ;;  %13697 = vmatmul.f32.vlgmr.msra.gmra.mxu1 %v13620_v48  ;;  %v23530_v48 = vand.u32 4294901760, %v14873_v63 }
 0xe2f   : > { %13813 = vmatpush.msrb.mxu0 %v23513_v0  ;;  %14013 = vmatpush.msrb.mxu3 %v23517_v3 }
 0xe30   : > { %v13622_v39 = vand.u32 4294901760, %v13621_v16 }
 0xe31   : > { %13815 = vmatpush.msrb.mxu0 %v23515_v38 }
 0xe32   : > { %13623 = vmatmul.f32.vlgmr.msrb.gmra.mxu2 %v13622_v39  ;;  %13743 = vmatmul.f32.vlgmr.msra.gmra.mxu3 %v13618_v23  ;;  %v14871_v39 = vld [vmem:[%s24098_s8 + $0xc8] sm:$0xff] }
 0xe33   : > { %13817 = vmatpush.msrb.mxu0 %v23517_v3 }
 0xe36   : > { %13673 = vmatmul.f32.vlgmr.msra.gmra.mxu0 %v13619_v8  ;;  %v23528_v8 = vand.u32 4294901760, %v14874_v49 }
 0xe38   : > { %13819 = vmatpush.msrb.mxu0 %v23528_v8  ;;  %14015 = vmatpush.msrb.mxu3 %v23528_v8 }
 0xe3a   : > { %13721 = vmatmul.f32.vlgmr.msra.gmra.mxu2 %v13618_v23  ;;  %v14872_v23 = vld [vmem:[%s24098_s8 + $0xd0] sm:$0xff]  ;;  %13821 = vmatpush.msrb.mxu0 %v23530_v48 }
 0xe3b   : > { %v23532_v16 = vand.u32 4294901760, %v14872_v23  ;;  %14017 = vmatpush.msrb.mxu3 %v23530_v48 }
 0xe3d   : > { %13823 = vmatpush.msrb.mxu0 %v23532_v16  ;;  %14019 = vmatpush.msrb.mxu3 %v23532_v16 }
 0xe7d   : > { %v13203_v10 = vpop.f32.mrf.mxu1 }
 0xe85   : > { %v13177_v7 = vpop.f32.mrf.mxu0  ;;  %v13227_v9 = vpop.f32.mrf.mxu2 }
 0xe86   : > { %v13297_v47 = vpop.f32.mrf.mxu1  ;;  %v13204_v57 = vadd.f32 %v13203_v10, %v13177_v7  ;;  %v14870_v7 = vld [vmem:[%s24098_s8 + $0xc0] sm:$0xff]  ;;  %v23541_v10 = vsub.f32 %v14877_v43, %v23513_v0 }
 0xe87   : > { %v13251_v20 = vpop.f32.mrf.mxu3 }
 0xe88   : > { %v13228_v24 = vadd.f32 %v13227_v9, %v13204_v57  ;;  %v23550_v9 = vand.u32 4294901760, %v14871_v39  ;;  %13956 = vmatpush.msrb.mxu2 %v23541_v10 }
 0xe8a   : > { %v13252_v27 = vadd.f32 %v13251_v20, %v13228_v24  ;;  %v23544_v20 = vsub.f32 %v14876_v53, %v23515_v38  ;;  %13825 = vmatpush.msrb.mxu0 %v23550_v9  ;;  %14021 = vmatpush.msrb.mxu3 %v23550_v9 }
 0xe8c   : > { %13959 = vmatpush.msrb.mxu2 %v23544_v20 }
 0xe8d   : > { %v13275_v4 = vpop.f32.mrf.mxu0 }
 0xe8e   : > { %v13276_v51 = vadd.f32 %v13275_v4, %v13252_v27  ;;  %v23547_v4 = vsub.f32 %v14875_v1, %v23517_v3  ;;  %v14866_v27 = vld [vmem:[%s24098_s8 + $0xa0] sm:$0xff] }
 0xe90   : > { %v13298_v52 = vadd.f32 %v13297_v47, %v13276_v51  ;;  %v23554_v47 = vsub.f32 %v14874_v49, %v23528_v8  ;;  %13962 = vmatpush.msrb.mxu2 %v23547_v4 }
 0xe92   : > { %13965 = vmatpush.msrb.mxu2 %v23554_v47 }
 0xe93   : > { %v13400_v28 = vpop.f32.mrf.mxu1 }
 0xe95   : > { %v13352_v17 = vpop.f32.mrf.mxu3  ;;  %v13376_v13 = vpop.f32.mrf.mxu0 }
 0xe9b   : > { %v13501_v45 = vpop.f32.mrf.mxu1 }
 0xe9d   : > { %v13326_v36 = vpop.f32.mrf.mxu2  ;;  %v13446_v18 = vpop.f32.mrf.mxu3 }
 0xe9e   : > { %v13353_v15 = vadd.f32 %v13352_v17, %v13326_v36  ;;  %v23557_v17 = vsub.f32 %v14873_v63, %v23530_v48  ;;  %v13855_v36 = vand.u32 4294901760, %v23541_v10 }
 0xea0   : > { %v13377_v35 = vadd.f32 %v13376_v13, %v13353_v15  ;;  %v23560_v13 = vsub.f32 %v14872_v23, %v23532_v16  ;;  %v13856_v15 = vsub.f32 %v23541_v10, %v13855_v36  ;;  %13968 = vmatpush.msrb.mxu2 %v23557_v17  ;;  %v14894_v10 = vld [vmem:[%s24100_s10 + $0xf8] sm:$0xff] }
 0xea2   : > { %v13401_v11 = vadd.f32 %v13400_v28, %v13377_v35  ;;  %v23562_v28 = vand.u32 4294901760, %v14870_v7  ;;  %v13885_v57 = vand.u32 4294901760, %v23560_v13  ;;  %v14869_v35 = vld [vmem:[%s24098_s8 + $0xb8] sm:$0xff]  ;;  %v13857_v24 = vand.u32 4294901760, %v13856_v15  ;;  %13971 = vmatpush.msrb.mxu2 %v23560_v13 }
 0xea3   : > { %v13475_v59 = vpop.f32.mrf.mxu0  ;;  %v13595_v46 = vpop.f32.mrf.mxu1 }
 0xea4   : > { %v13502_v34 = vadd.f32 %v13501_v45, %v13475_v59  ;;  %v13867_v59 = vand.u32 4294901760, %v23547_v4  ;;  %v13879_v45 = vand.u32 4294901760, %v23557_v17  ;;  %13858 = vmatpush.msrb.mxu1 %v13857_v24  ;;  %13827 = vmatpush.msrb.mxu0 %v23562_v28 }
 0xea5   : > { %v13424_v2 = vpop.f32.mrf.mxu2  ;;  %v13549_v41 = vpop.f32.mrf.mxu3  ;;  %14023 = vmatpush.msrb.mxu3 %v23562_v28 }
 0xea6   : > { %v13425_v5 = vadd.f32 %v13424_v2, %v13401_v11  ;;  %v13873_v2 = vand.u32 4294901760, %v23554_v47 }
 0xea8   : > { %v13447_v29 = vadd.f32 %v13446_v18, %v13425_v5  ;;  %v13861_v18 = vand.u32 4294901760, %v23544_v20 }
 0xeaa   : > { %v13747_v58 = vadd.f32 %v13447_v29, %v13298_v52 }
 0xeab   : > { %v13573_v22 = vpop.f32.mrf.mxu0  ;;  %v13698_v32 = vpop.f32.mrf.mxu1 }
 0xead   : > { %v13525_v54 = vpop.f32.mrf.mxu2  ;;  %v13650_v56 = vpop.f32.mrf.mxu3 }
 0xeae   : > { %v13526_v62 = vadd.f32 %v13525_v54, %v13502_v34  ;;  %v13868_v54 = vsub.f32 %v23547_v4, %v13867_v59  ;;  %v23588_v34 = vsub.f32 %v14870_v7, %v23562_v28  ;;  %v14892_v4 = vld [vmem:[%s24100_s10 + $0xe8] sm:$0xff] }
 0xeb0   : > { %v13550_v25 = vadd.f32 %v13549_v41, %v13526_v62  ;;  %v23572_v41 = vsub.f32 %v14871_v39, %v23550_v9  ;;  %v14868_v62 = vld [vmem:[%s24098_s8 + $0xb0] sm:$0xff]  ;;  %v13869_v5 = vand.u32 4294901760, %v13868_v54 }
 0xeb2   : > { %v13574_v44 = vadd.f32 %v13573_v22, %v13550_v25  ;;  %v13862_v22 = vsub.f32 %v23544_v20, %v13861_v18  ;;  %v13874_v25 = vsub.f32 %v23554_v47, %v13873_v2  ;;  %13974 = vmatpush.msrb.mxu2 %v23572_v41  ;;  %v14893_v20 = vld [vmem:[%s24100_s10 + $0xf0] sm:$0xff]  ;;  %v23765_v47 = vand.u32 4294901760, %v14894_v10 }
 0xeb3   : > { %v13674_v37 = vpop.f32.mrf.mxu0 }
 0xeb4   : > { %v13596_v31 = vadd.f32 %v13595_v46, %v13574_v44  ;;  %v14867_v46 = vld [vmem:[%s24098_s8 + $0xa8] sm:$0xff]  ;;  %v13863_v11 = vand.u32 4294901760, %v13862_v22  ;;  %v13886_v44 = vsub.f32 %v23560_v13, %v13885_v57  ;;  %v13875_v29 = vand.u32 4294901760, %v13874_v25  ;;  %13977 = vmatpush.msrb.mxu2 %v23588_v34 }
 0xeb5   : > { %v13624_v21 = vpop.f32.mrf.mxu2  ;;  %v13744_v19 = vpop.f32.mrf.mxu3  ;;  %v23618_v51 = vand.u32 4294901760, %v14867_v46  ;;  %v23769_v13 = vand.u32 4294901760, %v14892_v4 }
 0xeb6   : > { %v13651_v50 = vadd.f32 %v13650_v56, %v13624_v21  ;;  %v13748_v60 = vadd.f32 %v13747_v58, %v13596_v31  ;;  %v13880_v56 = vsub.f32 %v23557_v17, %v13879_v45  ;;  %v13891_v21 = vand.u32 4294901760, %v23572_v41  ;;  %13864 = vmatpush.msrb.mxu1 %v13863_v11  ;;  %v14865_v11 = vld [vmem:[%s24098_s8 + $0x98] sm:$0xff] }
 0xeb7   : > { %v23633_v31 = vand.u32 4294901760, %v14866_v27  ;;  %v23693_v25 = vand.u32 4294901760, %v14865_v11  ;;  %v23767_v17 = vand.u32 4294901760, %v14893_v20 }
 0xeb8   : > { %v13675_v12 = vadd.f32 %v13674_v37, %v13651_v50  ;;  %v23614_v50 = vand.u32 4294901760, %v14869_v35  ;;  %v23616_v37 = vand.u32 4294901760, %v14868_v62  ;;  %13870 = vmatpush.msrb.mxu1 %v13869_v5 }
 0xeba   : > { %v13699_v6 = vadd.f32 %v13698_v32, %v13675_v12  ;;  %v13897_v12 = vand.u32 4294901760, %v23588_v34  ;;  %v23627_v32 = vsub.f32 %v14869_v35, %v23614_v50  ;;  %v23631_v52 = vsub.f32 %v14868_v62, %v23616_v37  ;;  %13876 = vmatpush.msrb.mxu1 %v13875_v29  ;;  %13829 = vmatpush.msrb.mxu0 %v23614_v50  ;;  %v24872_v35 = vld [vmem:[#allocation7_spill] sm:$0xff] }
 0xebb   : > { %14025 = vmatpush.msrb.mxu3 %v23614_v50 }
 0xebc   : > { %v13903_v58 = vand.u32 4294901760, %v23627_v32  ;;  %13831 = vmatpush.msrb.mxu0 %v23616_v37  ;;  %13980 = vmatpush.msrb.mxu2 %v23627_v32 }
 0xebd   : > { %v13722_v40 = vpop.f32.mrf.mxu2  ;;  %14027 = vmatpush.msrb.mxu3 %v23616_v37 }
 0xebe   : > { %v13723_v42 = vadd.f32 %v13722_v40, %v13699_v6  ;;  %v13881_v6 = vand.u32 4294901760, %v13880_v56  ;;  %v13892_v40 = vsub.f32 %v23572_v41, %v13891_v21  ;;  %13833 = vmatpush.msrb.mxu0 %v23618_v51  ;;  %13983 = vmatpush.msrb.mxu2 %v23631_v52  ;;  %v14864_v56 = vld [vmem:[%s24098_s8 + $0x90] sm:$0xff] }
 0xebf   : > { %14029 = vmatpush.msrb.mxu3 %v23618_v51  ;;  %v23699_v5 = vand.u32 4294901760, %v14864_v56 }
 0xec0   : > { %v13745_v30 = vadd.f32 %v13744_v19, %v13723_v42  ;;  %v23643_v42 = vsub.f32 %v14867_v46, %v23618_v51  ;;  %v13887_v19 = vand.u32 4294901760, %v13886_v44  ;;  %13882 = vmatpush.msrb.mxu1 %v13881_v6  ;;  %13835 = vmatpush.msrb.mxu0 %v23633_v31  ;;  %v14863_v44 = vld [vmem:[%s24098_s8 + $0x88] sm:$0xff] }
 0xec1   : > { %14031 = vmatpush.msrb.mxu3 %v23633_v31  ;;  %v13932_v6 = vsub.f32 %v14864_v56, %v23699_v5 }
 0xec2   : > { %v13749_v61 = vadd.f32 %v13748_v60, %v13745_v30  ;;  %v13898_v30 = vsub.f32 %v23588_v34, %v13897_v12  ;;  %v13909_v60 = vand.u32 4294901760, %v23631_v52  ;;  %13888 = vmatpush.msrb.mxu1 %v13887_v19  ;;  %13986 = vmatpush.msrb.mxu2 %v23643_v42  ;;  %v14862_v19 = vld [vmem:[%s24098_s8 + $0x80] sm:$0xff]  ;;  %v23791_v34 = vsub.f32 %v14893_v20, %v23767_v17 }
 0xec3   : > { %13837 = vmatpush.msrb.mxu0 %v23693_v25  ;;  %14033 = vmatpush.msrb.mxu3 %v23693_v25 }
 0xec4   : > { %v13755_v33 = vadd.f32 %v14975_v55, %v13749_v61  ;;  %v23653_v55 = vsub.f32 %v14866_v27, %v23633_v31  ;;  %v13893_v61 = vand.u32 4294901760, %v13892_v40  ;;  %v13899_v43 = vand.u32 4294901760, %v13898_v30 }
 0xec5   : > { %v13910_v53 = vsub.f32 %v23631_v52, %v13909_v60  ;;  %v13926_v27 = vsub.f32 %v14865_v11, %v23693_v25  ;;  %v23707_v40 = vand.u32 4294901760, %v14863_v44  ;;  %13839 = vmatpush.msrb.mxu0 %v23699_v5  ;;  %14035 = vmatpush.msrb.mxu3 %v23699_v5 }
 0xec6   : > { %v23501_v26 = vadd.f32 %v13755_v33, %v24871_v14  ;;  %v13904_v33 = vsub.f32 %v23627_v32, %v13903_v58  ;;  %v13915_v14 = vand.u32 4294901760, %v23643_v42  ;;  %v13921_v1 = vand.u32 4294901760, %v23653_v55  ;;  %13894 = vmatpush.msrb.mxu1 %v13893_v61  ;;  %13989 = vmatpush.msrb.mxu2 %v23653_v55 }
 0xec7   : > { %v13911_v7 = vand.u32 4294901760, %v13910_v53  ;;  %v13927_v29 = vand.u32 4294901760, %v13926_v27  ;;  %v13933_v61 = vand.u32 4294901760, %v13932_v6  ;;  %13841 = vmatpush.msrb.mxu0 %v23707_v40  ;;  %14037 = vmatpush.msrb.mxu3 %v23707_v40 }
 0xec8   : > { %13757 = vadd.xlane.f32.xlu1 %v23501_v26  ;;  %v13905_v63 = vand.u32 4294901760, %v13904_v33  ;;  %v13916_v23 = vsub.f32 %v23643_v42, %v13915_v14  ;;  %13900 = vmatpush.msrb.mxu1 %v13899_v43  ;;  %v13922_v15 = vsub.f32 %v23653_v55, %v13921_v1  ;;  %v13938_v33 = vsub.f32 %v14863_v44, %v23707_v40  ;;  %v14976_v42 = vld [vmem:[%s24096_s6 + $0x3] ss:$0 sm:$0xff] }
 0xec9   : > { %13992 = vmatpush.msrb.mxu2 %v13926_v27  ;;  %v13928_v30 = vsub.f32 %v13926_v27, %v13927_v29  ;;  %v13842_v43 = vand.u32 4294901760, %v14862_v19 }
 0xeca   : > { %13906 = vmatpush.msrb.mxu1 %v13905_v63  ;;  %v13917_v54 = vand.u32 4294901760, %v13916_v23  ;;  %v13923_v46 = vand.u32 4294901760, %v13922_v15  ;;  %v13939_v63 = vand.u32 4294901760, %v13938_v33 }
 0xecb   : > { %13995 = vmatpush.msrb.mxu2 %v13932_v6  ;;  %v13929_v53 = vand.u32 4294901760, %v13928_v30  ;;  %v13944_v23 = vsub.f32 %v14862_v19, %v13842_v43  ;;  %13843 = vmatpush.msrb.mxu0 %v13842_v43  ;;  %v14885_v19 = vld [vmem:[%s24100_s10 + $0xb0] sm:$0xff] }
 0xecc   : > { %13912 = vmatpush.msrb.mxu1 %v13911_v7  ;;  %14039 = vmatpush.msrb.mxu3 %v13842_v43  ;;  %v13940_v7 = vsub.f32 %v13938_v33, %v13939_v63 }
 0xecd   : > { %13998 = vmatpush.msrb.mxu2 %v13938_v33  ;;  %14050 = vmatpush.msra.mxu0 %v13855_v36  ;;  %v13945_v15 = vand.u32 4294901760, %v13944_v23  ;;  %v14890_v36 = vld [vmem:[%s24100_s10 + $0xd8] sm:$0xff] }
 0xece   : > { %13918 = vmatpush.msrb.mxu1 %v13917_v54 }
 0xecf   : > { %14001 = vmatpush.msrb.mxu2 %v13944_v23  ;;  %14054 = vmatpush.msra.mxu0 %v13861_v18  ;;  %v13946_v54 = vsub.f32 %v13944_v23, %v13945_v15 }
 0xed0   : > { %13924 = vmatpush.msrb.mxu1 %v13923_v46 }
 0xed1   : > { %14058 = vmatpush.msra.mxu0 %v13867_v59  ;;  %v13947_v46 = vand.u32 4294901760, %v13946_v54  ;;  %v23779_v59 = vand.u32 4294901760, %v14890_v36  ;;  %14177 = vmatpush.msra.mxu2 %v23765_v47 }
 0xed2   : > { %13930 = vmatpush.msrb.mxu1 %v13929_v53 }
 0xed3   : > { %14062 = vmatpush.msra.mxu0 %v13873_v2  ;;  %v14889_v2 = vld [vmem:[%s24100_s10 + $0xd0] sm:$0xff]  ;;  %14179 = vmatpush.msra.mxu2 %v23767_v17 }
 0xed5   : > { %14066 = vmatpush.msra.mxu0 %v13879_v45  ;;  %v14888_v45 = vld [vmem:[%s24100_s10 + $0xc8] sm:$0xff]  ;;  %14181 = vmatpush.msra.mxu2 %v23769_v13 }
 0xed7   : > { %14070 = vmatpush.msra.mxu0 %v13885_v57  ;;  %v23788_v57 = vsub.f32 %v14894_v10, %v23765_v47 }
 0xed9   : > { %14074 = vmatpush.msra.mxu0 %v13891_v21  ;;  %v23794_v21 = vsub.f32 %v14892_v4, %v23769_v13  ;;  %v14219_v52 = vand.u32 4294901760, %v23788_v57  ;;  %v14881_v4 = vld [vmem:[%s24100_s10 + $0x90] sm:$0xff] }
 0xedb   : > { %14078 = vmatpush.msra.mxu0 %v13897_v12  ;;  %v23805_v12 = vand.u32 4294901760, %v14888_v45 }
 0xedd   : > { %14082 = vmatpush.msra.mxu0 %v13903_v58  ;;  %v14231_v58 = vand.u32 4294901760, %v23794_v21 }
 0xedf   : > { %14086 = vmatpush.msra.mxu0 %v13909_v60  ;;  %v14232_v27 = vsub.f32 %v23794_v21, %v14231_v58 }
 0xee1   : > { %14090 = vmatpush.msra.mxu0 %v13915_v14 }
 0xee3   : > { %14094 = vmatpush.msra.mxu0 %v13921_v1  ;;  %v23822_v1 = vsub.f32 %v14888_v45, %v23805_v12 }
 0xee5   : > { %14098 = vmatpush.msra.mxu0 %v13927_v29  ;;  %v14255_v53 = vand.u32 4294901760, %v23822_v1 }
 0xee7   : > { %14102 = vmatpush.msra.mxu0 %v13933_v61  ;;  %v14256_v20 = vsub.f32 %v23822_v1, %v14255_v53 }
 0xee9   : > { %14106 = vmatpush.msra.mxu0 %v13939_v63  ;;  %v14233_v63 = vand.u32 4294901760, %v14232_v27  ;;  %v14257_v27 = vand.u32 4294901760, %v14256_v20 }
 0xeeb   : > { %14110 = vmatpush.msra.mxu0 %v13945_v15 }
 0xf3b   : > { %v13758_v49 = vpop.xlane.xlu1 %13757 }
 0xf3c   : > { %v13759_v39 = vmul.f32 0.03125, %v13758_v49  ;;  %v13934_v49 = vsub.f32 %v13932_v6, %v13933_v61  ;;  %v14887_v6 = vld [vmem:[%s24100_s10 + $0xc0] sm:$0xff]  ;;  %v14884_v61 = vld [vmem:[%s24100_s10 + $0xa8] sm:$0xff] }
 0xf3d   : > { %v23862_v23 = vand.u32 4294901760, %v14887_v6 }
 0xf3e   : > { %v13760_v22 = vsub.f32 %v23501_v26, %v13759_v39  ;;  %v13935_v39 = vand.u32 4294901760, %v13934_v49  ;;  %v14883_v49 = vld [vmem:[%s24100_s10 + $0xa0] sm:$0xff] }
 0xf40   : > { %v23685_v62 = vmul.f32 %v24872_v35, %v13760_v22  ;;  %13936 = vmatpush.msrb.mxu1 %v13935_v39  ;;  %v13941_v22 = vand.u32 4294901760, %v13940_v7  ;;  %v23867_v7 = vand.u32 4294901760, %v14885_v19 }
 0xf42   : > { %v13762_v24 = vmul.f32 %v23685_v62, %v23685_v62  ;;  %13942 = vmatpush.msrb.mxu1 %v13941_v22 }
 0xf44   : > { %13763 = vadd.xlane.f32.xlu2 %v13762_v24  ;;  %13948 = vmatpush.msrb.mxu1 %v13947_v46  ;;  %v14977_v24 = vld [vmem:[%s24097_s7 + $0x3] ss:$0 sm:$0xff]  ;;  %v23872_v46 = vand.u32 4294901760, %v14884_v61 }
 0xf46   : > { %14117 = vmatpush.msra.mxu1 %v23513_v0 }
 0xf48   : > { %14119 = vmatpush.msra.mxu1 %v23515_v38 }
 0xf4a   : > { %14121 = vmatpush.msra.mxu1 %v23517_v3 }
 0xf4c   : > { %14123 = vmatpush.msra.mxu1 %v23528_v8 }
 0xf4e   : > { %14125 = vmatpush.msra.mxu1 %v23530_v48 }
 0xf50   : > { %14127 = vmatpush.msra.mxu1 %v23532_v16 }
 0xf52   : > { %14129 = vmatpush.msra.mxu1 %v23550_v9 }
 0xf54   : > { %14131 = vmatpush.msra.mxu1 %v23562_v28  ;;  %v14891_v28 = vld [vmem:[%s24100_s10 + $0xe0] sm:$0xff] }
 0xf55   : > { %v23777_v18 = vand.u32 4294901760, %v14891_v28 }
 0xf56   : > { %14133 = vmatpush.msra.mxu1 %v23614_v50 }
 0xf57   : > { %v23798_v50 = vsub.f32 %v14891_v28, %v23777_v18  ;;  %14183 = vmatpush.msra.mxu2 %v23777_v18 }
 0xf58   : > { %14135 = vmatpush.msra.mxu1 %v23616_v37  ;;  %v23801_v37 = vsub.f32 %v14890_v36, %v23779_v59  ;;  %v23901_v36 = vsub.f32 %v14884_v61, %v23872_v46 }
 0xf59   : > { %v14237_v60 = vand.u32 4294901760, %v23798_v50  ;;  %14185 = vmatpush.msra.mxu2 %v23779_v59 }
 0xf5a   : > { %14137 = vmatpush.msra.mxu1 %v23618_v51  ;;  %v23803_v51 = vand.u32 4294901760, %v14889_v2  ;;  %v14243_v55 = vand.u32 4294901760, %v23801_v37 }
 0xf5b   : > { %v14238_v44 = vsub.f32 %v23798_v50, %v14237_v60 }
 0xf5c   : > { %14139 = vmatpush.msra.mxu1 %v23633_v31  ;;  %v14225_v31 = vand.u32 4294901760, %v23791_v34  ;;  %v23819_v14 = vsub.f32 %v14889_v2, %v23803_v51  ;;  %14187 = vmatpush.msra.mxu2 %v23803_v51 }
 0xf5d   : > { %v14239_v22 = vand.u32 4294901760, %v14238_v44  ;;  %v14279_v44 = vand.u32 4294901760, %v23901_v36 }
 0xf5e   : > { %14141 = vmatpush.msra.mxu1 %v23693_v25  ;;  %v14220_v25 = vsub.f32 %v23788_v57, %v14219_v52  ;;  %v14226_v56 = vsub.f32 %v23791_v34, %v14225_v31  ;;  %v14249_v29 = vand.u32 4294901760, %v23819_v14  ;;  %14189 = vmatpush.msra.mxu2 %v23805_v12 }
 0xf60   : > { %14143 = vmatpush.msra.mxu1 %v23699_v5  ;;  %v14221_v30 = vand.u32 4294901760, %v14220_v25  ;;  %v14250_v54 = vsub.f32 %v23819_v14, %v14249_v29  ;;  %14191 = vmatpush.msra.mxu2 %v23862_v23  ;;  %v23918_v25 = vand.u32 4294901760, %v14881_v4 }
 0xf62   : > { %14145 = vmatpush.msra.mxu1 %v23707_v40  ;;  %v14886_v40 = vld [vmem:[%s24100_s10 + $0xb8] sm:$0xff]  ;;  %14222 = vmatpush.msra.mxu3 %v14221_v30 }
 0xf63   : > { %v23865_v39 = vand.u32 4294901760, %v14886_v40 }
 0xf64   : > { %14147 = vmatpush.msra.mxu1 %v13842_v43  ;;  %v14244_v43 = vsub.f32 %v23801_v37, %v14243_v55 }
 0xf65   : > { %14193 = vmatpush.msra.mxu2 %v23865_v39 }
 0xf66   : > { %v14245_v10 = vand.u32 4294901760, %v14244_v43 }
 0xf67   : > { %14195 = vmatpush.msra.mxu2 %v23867_v7 }
 0xf69   : > { %14197 = vmatpush.msra.mxu2 %v23872_v46 }
 0xfb7   : > { %v13764_v0 = vpop.xlane.xlu2 %13763 }
 0xfb8   : > { %v13765_v38 = vmul.f32 0.032258064, %v13764_v0  ;;  %v14882_v0 = vld [vmem:[%s24100_s10 + $0x98] sm:$0xff] }
 0xfb9   : > { %v23903_v2 = vand.u32 4294901760, %v14882_v0 }
 0xfba   : > { %v13768_v3 = vadd.f32 1e-06, %v13765_v38  ;;  %v23878_v38 = vsub.f32 %v14887_v6, %v23862_v23 }
 0xfbb   : > { %v23927_v6 = vsub.f32 %v14882_v0, %v23903_v2 }
 0xfbc   : > { %15020 = vrsqrt.f32 %v13768_v3  ;;  %vm13775_vm4 = vweird.f32 %v13768_v3 }
 0xfc2   : > { %v15021_v8 = vpop.eup %15020 }
 0xfc3   : > { %v13770_v48 = vmul.f32 %v15021_v8, %v13768_v3  ;;  %vm13776_vm13 = vweird.f32 %v15021_v8  ;;  %v23881_v3 = vsub.f32 %v14886_v40, %v23865_v39 }
 0xfc4   : > { %vm13777_vm14 = vmor %vm13775_vm4, %vm13776_vm13 }
 0xfc5   : > { %v13771_v16 = vmul.f32 %v15021_v8, %v13770_v48  ;;  %v23887_v48 = vand.u32 4294901760, %v14883_v49  ;;  %v14267_v28 = vand.u32 4294901760, %v23881_v3 }
 0xfc7   : > { %v13772_v9 = vmul.f32 0.5, %v13771_v16  ;;  %14199 = vmatpush.msra.mxu2 %v23887_v48 }
 0xfc9   : > { %v13773_v41 = vsub.f32 1.5, %v13772_v9  ;;  %v14261_v9 = vand.u32 4294901760, %v23878_v38  ;;  %14201 = vmatpush.msra.mxu2 %v23903_v2 }
 0xfcb   : > { %v13774_v32 = vmul.f32 %v15021_v8, %v13773_v41  ;;  %v14251_v41 = vand.u32 4294901760, %v14250_v54  ;;  %14203 = vmatpush.msra.mxu2 %v23918_v25 }
 0xfcd   : > { %v13778_v11 = vsel %vm13777_vm14, %v15021_v8, %v13774_v32  ;;  %v23885_v8 = vsub.f32 %v14885_v19, %v23867_v7  ;;  %v14880_v32 = vld [vmem:[%s24100_s10 + $0x88] sm:$0xff] }
 0xfce   : > { %v13779_v5 = vmul.f32 %v13778_v11, %v23685_v62  ;;  %v14227_v62 = vand.u32 4294901760, %v14226_v56  ;;  %v23916_v11 = vsub.f32 %v14883_v49, %v23887_v48  ;;  %v23929_v40 = vand.u32 4294901760, %v14880_v32 }
 0xfd0   : > { %v13783_v33 = vmul.f32 %v14976_v42, %v13779_v5  ;;  %14228 = vmatpush.msra.mxu3 %v14227_v62  ;;  %v14262_v42 = vsub.f32 %v23878_v38, %v14261_v9  ;;  %v14268_v5 = vsub.f32 %v23881_v3, %v14267_v28  ;;  %v14285_v61 = vand.u32 4294901760, %v23916_v11  ;;  %14205 = vmatpush.msra.mxu2 %v23929_v40 }
 0xfd2   : > { %v13789_v15 = vadd.f32 %v14977_v24, %v13783_v33  ;;  %14234 = vmatpush.msra.mxu3 %v14233_v63  ;;  %v14273_v24 = vand.u32 4294901760, %v23885_v8  ;;  %v14263_v30 = vand.u32 4294901760, %v14262_v42  ;;  %v23938_v33 = vsub.f32 %v14881_v4, %v23918_v25 }
 0xfd3   : > { %v14269_v49 = vand.u32 4294901760, %v14268_v5  ;;  %v14280_v63 = vsub.f32 %v23901_v36, %v14279_v44  ;;  %v14286_v0 = vsub.f32 %v23916_v11, %v14285_v61 }
 0xfd4   : > { %v23889_v16 = vand.u32 4294901760, %v13789_v15  ;;  %14240 = vmatpush.msra.mxu3 %v14239_v22  ;;  %v14274_v62 = vsub.f32 %v23885_v8, %v14273_v24  ;;  %v23947_v22 = vsub.f32 %v14880_v32, %v23929_v40 }
 0xfd5   : > { %v14281_v20 = vand.u32 4294901760, %v14280_v63 }
 0xfd6   : > { %13950 = vmatmul.f32.vlgmr.msrb.gmra.mxu1 %v23889_v16  ;;  %v13845_v45 = vsub.f32 %v13789_v15, %v23889_v16  ;;  %14246 = vmatpush.msra.mxu3 %v14245_v10  ;;  %v14291_v15 = vand.u32 4294901760, %v23927_v6  ;;  %v14275_v54 = vand.u32 4294901760, %v14274_v62  ;;  %v14297_v10 = vand.u32 4294901760, %v23938_v33 }
 0xfd7   : > { %14373 = vmatpush.msrb.mxu1 %v23765_v47 }
 0xfd8   : > { %14004 = vmatmul.f32.vlgmr.msrb.gmra.mxu2 %v13845_v45  ;;  %v13846_v56 = vand.u32 4294901760, %v13845_v45  ;;  %14252 = vmatpush.msra.mxu3 %v14251_v41  ;;  %v14292_v4 = vsub.f32 %v23927_v6, %v14291_v15  ;;  %v14287_v41 = vand.u32 4294901760, %v14286_v0  ;;  %v14298_v32 = vsub.f32 %v23938_v33, %v14297_v10 }
 0xfd9   : > { %14375 = vmatpush.msrb.mxu1 %v23767_v17 }
 0xfda   : > { %14043 = vmatmul.f32.vlgmr.msrb.gmra.mxu3 %v13846_v56  ;;  %v13847_v19 = vsub.f32 %v13845_v45, %v13846_v56  ;;  %v14303_v45 = vand.u32 4294901760, %v23947_v22  ;;  %v14293_v42 = vand.u32 4294901760, %v14292_v4  ;;  %v14981_v4 = vld [vmem:[%s24097_s7 + $0x4] ss:$0 sm:$0xff] }
 0xfdb   : > { %14377 = vmatpush.msrb.mxu1 %v23769_v13  ;;  %14258 = vmatpush.msra.mxu3 %v14257_v27  ;;  %v14299_v27 = vand.u32 4294901760, %v14298_v32 }
 0xfdc   : > { %v13848_v43 = vand.u32 4294901760, %v13847_v19  ;;  %v14304_v56 = vsub.f32 %v23947_v22, %v14303_v45 }
 0xfdd   : > { %14264 = vmatpush.msra.mxu3 %v14263_v30  ;;  %14379 = vmatpush.msrb.mxu1 %v23777_v18 }
 0xfde   : > { %13849 = vmatmul.f32.vlgmr.msrb.gmra.mxu0 %v13848_v43  ;;  %14149 = vmatmul.f32.vlgmr.msra.gmra.mxu1 %v23889_v16  ;;  %v14305_v5 = vand.u32 4294901760, %v14304_v56 }
 0xfdf   : > { %14320 = vmatpush.msrb.mxu0 %v23788_v57  ;;  %14270 = vmatpush.msra.mxu3 %v14269_v49 }
 0xfe0   : > { %14381 = vmatpush.msrb.mxu1 %v23779_v59 }
 0xfe1   : > { %14323 = vmatpush.msrb.mxu0 %v23791_v34  ;;  %14276 = vmatpush.msra.mxu3 %v14275_v54 }
 0xfe2   : > { %14383 = vmatpush.msrb.mxu1 %v23803_v51 }
 0xfe3   : > { %14326 = vmatpush.msrb.mxu0 %v23794_v21  ;;  %14282 = vmatpush.msra.mxu3 %v14281_v20 }
 0xfe4   : > { %14385 = vmatpush.msrb.mxu1 %v23805_v12 }
 0xfe5   : > { %14329 = vmatpush.msrb.mxu0 %v23798_v50  ;;  %14288 = vmatpush.msra.mxu3 %v14287_v41 }
 0xfe6   : > { %14112 = vmatmul.f32.vlgmr.msra.gmra.mxu0 %v23889_v16  ;;  %14387 = vmatpush.msrb.mxu1 %v23862_v23  ;;  %v14879_v16 = vld [vmem:[%s24100_s10 + $0x80] sm:$0xff] }
 0xfe7   : > { %14332 = vmatpush.msrb.mxu0 %v23801_v37  ;;  %14294 = vmatpush.msra.mxu3 %v14293_v42  ;;  %v14206_v19 = vand.u32 4294901760, %v14879_v16 }
 0xfe8   : > { %14389 = vmatpush.msrb.mxu1 %v23865_v39 }
 0xfe9   : > { %14335 = vmatpush.msrb.mxu0 %v23819_v14  ;;  %14300 = vmatpush.msra.mxu3 %v14299_v27  ;;  %v14308_v30 = vsub.f32 %v14879_v16, %v14206_v19 }
 0xfea   : > { %14391 = vmatpush.msrb.mxu1 %v23867_v7  ;;  %14207 = vmatpush.msra.mxu2 %v14206_v19 }
 0xfeb   : > { %14338 = vmatpush.msrb.mxu0 %v23822_v1  ;;  %14306 = vmatpush.msra.mxu3 %v14305_v5  ;;  %v14309_v62 = vand.u32 4294901760, %v14308_v30 }
 0xfec   : > { %14393 = vmatpush.msrb.mxu1 %v23872_v46  ;;  %14414 = vmatpush.msrb.mxu2 %v14219_v52 }
 0xfed   : > { %14341 = vmatpush.msrb.mxu0 %v23878_v38  ;;  %v14310_v43 = vsub.f32 %v14308_v30, %v14309_v62 }
 0xfee   : > { %14395 = vmatpush.msrb.mxu1 %v23887_v48  ;;  %14418 = vmatpush.msrb.mxu2 %v14225_v31 }
 0xfef   : > { %14344 = vmatpush.msrb.mxu0 %v23881_v3  ;;  %v14311_v49 = vand.u32 4294901760, %v14310_v43 }
 0xff0   : > { %14397 = vmatpush.msrb.mxu1 %v23903_v2  ;;  %14422 = vmatpush.msrb.mxu2 %v14231_v58 }
 0xff1   : > { %14347 = vmatpush.msrb.mxu0 %v23885_v8  ;;  %14312 = vmatpush.msra.mxu3 %v14311_v49 }
 0xff2   : > { %14399 = vmatpush.msrb.mxu1 %v23918_v25  ;;  %14426 = vmatpush.msrb.mxu2 %v14237_v60 }
 0xff3   : > { %14350 = vmatpush.msrb.mxu0 %v23901_v36  ;;  %14481 = vmatpush.msrb.mxu3 %v23765_v47  ;;  %v14978_v47 = vld [vmem:[%s24099_s9 + $0x1] ss:$0 sm:$0xff] }
 0xff4   : > { %14401 = vmatpush.msrb.mxu1 %v23929_v40  ;;  %14430 = vmatpush.msrb.mxu2 %v14243_v55 }
 0xff5   : > { %14353 = vmatpush.msrb.mxu0 %v23916_v11  ;;  %14483 = vmatpush.msrb.mxu3 %v23767_v17 }
 0xff6   : > { %14403 = vmatpush.msrb.mxu1 %v14206_v19  ;;  %14434 = vmatpush.msrb.mxu2 %v14249_v29  ;;  %v14979_v29 = vld [vmem:[%s24101_s11 + $0x1] ss:$0 sm:$0xff] }
 0xff7   : > { %14356 = vmatpush.msrb.mxu0 %v23927_v6  ;;  %14485 = vmatpush.msrb.mxu3 %v23769_v13 }
 0xff8   : > { %14438 = vmatpush.msrb.mxu2 %v14255_v53 }
 0xff9   : > { %14359 = vmatpush.msrb.mxu0 %v23938_v33  ;;  %14487 = vmatpush.msrb.mxu3 %v23777_v18 }
 0xffa   : > { %14442 = vmatpush.msrb.mxu2 %v14261_v9 }
 0xffb   : > { %14362 = vmatpush.msrb.mxu0 %v23947_v22  ;;  %14489 = vmatpush.msrb.mxu3 %v23779_v59 }
 0xffc   : > { %14446 = vmatpush.msrb.mxu2 %v14267_v28 }
 0xffd   : > { %14365 = vmatpush.msrb.mxu0 %v14308_v30  ;;  %14491 = vmatpush.msrb.mxu3 %v23803_v51 }
 0xffe   : > { %14450 = vmatpush.msrb.mxu2 %v14273_v24 }
 0xfff   : > { %14493 = vmatpush.msrb.mxu3 %v23805_v12 }
0x1000   : > { %14454 = vmatpush.msrb.mxu2 %v14279_v44 }
0x1001   : > { %14495 = vmatpush.msrb.mxu3 %v23862_v23 }
0x1002   : > { %14458 = vmatpush.msrb.mxu2 %v14285_v61 }
0x1003   : > { %14497 = vmatpush.msrb.mxu3 %v23865_v39 }
0x1004   : > { %14462 = vmatpush.msrb.mxu2 %v14291_v15 }
0x1005   : > { %14499 = vmatpush.msrb.mxu3 %v23867_v7 }
0x1006   : > { %14466 = vmatpush.msrb.mxu2 %v14297_v10 }
0x1007   : > { %14501 = vmatpush.msrb.mxu3 %v23872_v46 }
0x1008   : > { %14470 = vmatpush.msrb.mxu2 %v14303_v45 }
0x1009   : > { %14503 = vmatpush.msrb.mxu3 %v23887_v48 }
0x100a   : > { %14474 = vmatpush.msrb.mxu2 %v14309_v62 }
0x100b   : > { %14505 = vmatpush.msrb.mxu3 %v23903_v2 }
0x100d   : > { %14507 = vmatpush.msrb.mxu3 %v23918_v25 }
0x100f   : > { %14509 = vmatpush.msrb.mxu3 %v23929_v40 }
0x1011   : > { %14511 = vmatpush.msrb.mxu3 %v14206_v19 }
0x1053   : > { %v13951_v17 = vpop.f32.mrf.mxu1 }
0x105b   : > { %v13850_v13 = vpop.f32.mrf.mxu0  ;;  %v14005_v57 = vpop.f32.mrf.mxu2 }
0x105c   : > { %v13851_v18 = vadd.f32 %v14978_v47, %v13850_v13  ;;  %v14150_v12 = vpop.f32.mrf.mxu1 }
0x105d   : > { %v14044_v21 = vpop.f32.mrf.mxu3 }
0x105e   : > { %v13952_v59 = vadd.f32 %v13951_v17, %v13851_v18 }
0x1060   : > { %v14006_v34 = vadd.f32 %v14005_v57, %v13952_v59 }
0x1062   : > { %v14045_v50 = vadd.f32 %v14044_v21, %v14006_v34 }
0x1063   : > { %v14113_v37 = vpop.f32.mrf.mxu0 }
0x1064   : > { %v14114_v51 = vadd.f32 %v14113_v37, %v14045_v50 }
0x1066   : > { %v14151_v52 = vadd.f32 %v14150_v12, %v14114_v51 }
0x1068   : > { %v14153_v31 = vmax.f32 %v14151_v52, 0.0 }
0x106a   : > { %v14208_v58 = vand.u32 4294901760, %v14153_v31 }
0x106c   : > { %v14209_v60 = vsub.f32 %v14153_v31, %v14208_v58  ;;  %14314 = vmatmul.f32.vlgmr.msra.gmra.mxu3 %v14208_v58 }
0x106e   : > { %v14210_v55 = vand.u32 4294901760, %v14209_v60  ;;  %14368 = vmatmul.f32.vlgmr.msrb.gmra.mxu0 %v14209_v60 }
0x1070   : > { %v14211_v14 = vsub.f32 %v14209_v60, %v14210_v55  ;;  %14407 = vmatmul.f32.vlgmr.msrb.gmra.mxu1 %v14210_v55 }
0x1072   : > { %v14212_v1 = vand.u32 4294901760, %v14211_v14 }
0x1074   : > { %14213 = vmatmul.f32.vlgmr.msra.gmra.mxu2 %v14212_v1  ;;  %14513 = vmatmul.f32.vlgmr.msrb.gmra.mxu3 %v14208_v58 }
0x107c   : > { %14476 = vmatmul.f32.vlgmr.msrb.gmra.mxu2 %v14208_v58 }
0x10eb   : > { %v14369_v46 = vpop.f32.mrf.mxu0 }
0x10ed   : > { %v14408_v3 = vpop.f32.mrf.mxu1 }
0x10ef   : > { %v14315_v53 = vpop.f32.mrf.mxu3 }
0x10f7   : > { %v14214_v23 = vpop.f32.mrf.mxu2  ;;  %v14514_v28 = vpop.f32.mrf.mxu3 }
0x10f8   : > { %v14215_v39 = vadd.f32 %v14979_v29, %v14214_v23 }
0x10fa   : > { %v14316_v7 = vadd.f32 %v14315_v53, %v14215_v39 }
0x10fc   : > { %v14370_v38 = vadd.f32 %v14369_v46, %v14316_v7 }
0x10fe   : > { %v14409_v8 = vadd.f32 %v14408_v3, %v14370_v38 }
0x10ff   : > { %v14477_v48 = vpop.f32.mrf.mxu2 }
0x1100   : > { %v14478_v9 = vadd.f32 %v14477_v48, %v14409_v8 }
0x1102   : > { %v14515_v36 = vadd.f32 %v14514_v28, %v14478_v9 }
0x1104   : > { %v14517_v2 = vadd.f32 %v14515_v36, %v23501_v26 }
0x1106   : > { %14518 = vadd.xlane.f32.xlu0 %v14517_v2 }
0x1179   : > { %v14519_v24 = vpop.xlane.xlu0 %14518 }
0x117a   : > { %v14520_v11 = vmul.f32 0.03125, %v14519_v24 }
0x117c   : > { %v14521_v25 = vsub.f32 %v14517_v2, %v14520_v11 }
0x117e   : > { %v14522_v44 = vmul.f32 %v24872_v35, %v14521_v25  ;;  %v14980_v35 = vld [vmem:[%s24096_s6 + $0x4] ss:$0 sm:$0xff] }
0x1180   : > { %v14523_v6 = vmul.f32 %v14522_v44, %v14522_v44 }
0x1182   : > { %14524 = vadd.xlane.f32.xlu1 %v14523_v6 }
0x11f5   : > { %v14525_v40 = vpop.xlane.xlu1 %14524 }
0x11f6   : > { %v14526_v61 = vmul.f32 0.032258064, %v14525_v40 }
0x11f8   : > { %v14529_v33 = vadd.f32 1e-06, %v14526_v61 }
0x11fa   : > { %15022 = vrsqrt.f32 %v14529_v33  ;;  %vm14536_vm0 = vweird.f32 %v14529_v33 }
0x1200   : > { %v15023_v63 = vpop.eup %15022 }
0x1201   : > { %v14531_v15 = vmul.f32 %v15023_v63, %v14529_v33  ;;  %vm14537_vm15 = vweird.f32 %v15023_v63 }
0x1202   : > { %vm14538_vm1 = vmor %vm14536_vm0, %vm14537_vm15 }
0x1203   : > { %v14532_v22 = vmul.f32 %v15023_v63, %v14531_v15 }
0x1205   : > { %v14533_v54 = vmul.f32 0.5, %v14532_v22 }
0x1207   : > { %v14534_v0 = vsub.f32 1.5, %v14533_v54 }
0x1209   : > { %v14535_v26 = vmul.f32 %v15023_v63, %v14534_v0 }
0x120b   : > { %v14539_v10 = vsel %vm14538_vm1, %v15023_v63, %v14535_v26 }
0x120c   : > { %v14540_v20 = vmul.f32 %v14539_v10, %v14522_v44 }
0x120e   : > { %v14544_v45 = vmul.f32 %v14980_v35, %v14540_v20 }
0x1210   : > { %v14550_v41 = vadd.f32 %v14981_v4, %v14544_v45 }
0x1212   : > { %14551 = vst [vmem:[%s417_s29] sm:$0xff] %v14550_v41 }
0x1213   : > { %15053 = shalt.err (!%p15050_p3)
}
0x1214   : > { %14902 = dma.vmem_to_hbm [thread:$0]  (%p15194_p5), %s14566_s25, 128, %s14568_s0, %s14553_s18  }
0x1215 PF: > { %p14908_p4 = scmp.ge.s32.totalorder %s15088_s24, 2  ;;  %s14579_s23 = sand.u32 1, %s15076_s21  }
0x1216   : > { %s14580_s15 = scalar_lea.sflag [#allocation3], %s14579_s23 }
0x1217   : > { %p14905_p7 = pnand %p14908_p4, %p15198_p6 }
0x1219   : > { %p14906_p8 = pneg %p14905_p7 }
0x121b   : > { %15071 = dma.done.wait (%p14906_p8), %s14580_s15, 128  }
0x121c   : > { %15073 = vsyncadd (%p14906_p8), %s14580_s15, 4294967168  ;;  %s24873_s29 = sld [smem:[#allocation5_spill]]  ;;  %p22_p9 = scmp.ge.s32.totalorder %s15181_s27, 4  }
0x121d   : > { %s24874_s23 = sld [smem:[#allocation6_spill]]  ;;  %s24875_s21 = smov %s15080_s22 }
0x121e   : > { %s24877_s24 = smov %s15181_s27  ;;  %24 = sbr.rel (!%p22_p9) target bundleno = 5 (0x5), region = 122 }
0x1222   : > { %s24876_s22 = smov %s24873_s29 }
0x1223   :  { %14586 = vsyncpa [#allocation3], 1 }
0x1224   :  { %14588 = vsyncpa [#allocation3 + $0x1], 1 }

</bundles_post_ra>
